<compile_context>
chip_gen: v7x
topology: tpu7x:2x2x1
jax: 0.10.0
libtpu: 0.0.40
codegen_flags: <defaults>
</compile_context>

<pallas_src>
import jax
import jax.numpy as jnp
from jax.experimental import pallas as pl

# ----------------------------- model config ---------------------------------
IN_DIM = 11
EDGE_DIM = 9
GLOBAL_DIM = 107
HIDDEN = 32
HEADS = 4
N_CONV = 5
DGN_GROUPS = 10
GAT_LAYERS = 2      # hidden layers in Global_Attention (hard-coded in kernel)
N_LINEAR = 1        # hidden layers in the MLP head (hard-coded in kernel)
S2S_STEPS = 3
NUM_GRAPHS = 2
NODES_PER_GRAPH = 6

F32 = jnp.float32
NEG_BIG = 1e30

_HAS_RECIP = hasattr(pl, "reciprocal")


# ----------------------------- in-kernel helpers -----------------------------
def _recip(x):
    """Reciprocal on the EUP slot (approx) when available, VPU divide otherwise."""
    if _HAS_RECIP:
        return pl.reciprocal(x, approx=True)
    return 1.0 / x


def _softplus(y):
    # numerically-stable softplus (matches F.softplus)
    return jnp.maximum(y, 0.0) + jnp.log(1.0 + jnp.exp(-jnp.abs(y)))


def _leaky_relu(y, slope=0.2):
    return jnp.where(y > 0, y, slope * y)


def _sigmoid(y):
    return _recip(1.0 + jnp.exp(-y))


def _dot(a, b):
    """f32 matmul with explicit f32 accumulation (MXU)."""
    return jnp.dot(a, b, preferred_element_type=F32)


def _seg_softmax(vals, gather_oh, scatter_oh, neg_mask):
    """Segment softmax over rows of `vals` (torch_geometric.utils.softmax).

    vals:       (M, C) per-row values
    gather_oh:  (M, S) one-hot row->segment (segment->row gather via matmul)
    scatter_oh: (S, M) transposed one-hot   (row->segment sum via matmul)
    neg_mask:   (S, M) additive mask: 0 inside the segment, -1e30 outside.

    The per-segment max keeps the row dimension (M) in lanes: the broadcast is
    (C, S, M) with C <= 4, so no lane-1 / lane-C padded tensors are created.
    """
    vt = jnp.transpose(vals)                                            # (C, M)
    seg_max = jnp.max(vt[:, None, :] + neg_mask[None, :, :], axis=-1)   # (C, S)
    gmax = _dot(gather_oh, jnp.transpose(seg_max))                      # (M, C)
    ex = jnp.exp(vals - gmax)
    den = _dot(scatter_oh, ex) + 1e-16                                  # (S, C)
    gden = _dot(gather_oh, den)                                         # (M, C)
    return ex * _recip(gden)


# --------------------------------- kernel ------------------------------------
def _skip_kernel(
        # node / edge embeddings
        x_ref, wx_ref, bx_ref, e_ref, we_ref, be_ref,
        # graph structure (shared across all stages, DMA'd once)
        src_oh_ref, dst_oh_ref, src_oh_t_ref, b_oh_ref, b_oh_t_ref,
        # conv stack, per-layer weights stacked on a leading axis
        wtop_ref, wbot_ref, atti_ref, attj_ref, bns_ref, bnb_ref, cbias_ref,
        # shared head bookkeeping + DiffGroupNorm (eval, folded)
        mean_m_ref, brd_ref, brd_t_ref, dgn_w_ref, dgn_b_ref, dgn_a_ref, dgn_c_ref,
        # global attention
        g_ref, wix_ref, wig_ref, bi_ref, w1_ref, b1_ref, w2_ref, b2_ref,
        wo_ref, bo_ref,
        # Set2Set LSTM
        wq_ref, wr_ref, wh_ref, bl_ref,
        # MLP head
        w1q_ref, w1r_ref, b1m_ref, wo1_ref, bo1_ref, wo2_ref, bo2_ref,
        # output
        o_ref):
    """Whole SKIP forward fused into one VMEM-resident kernel."""
    # ---- 1. node / edge embeddings (softplus node, leaky_relu(0.2) edge) ----
    x = _softplus(_dot(x_ref[...], wx_ref[...]) + bx_ref[...])           # (N, H)
    e = _leaky_relu(_dot(e_ref[...], we_ref[...]) + be_ref[...], 0.2)    # (E, H)

    # graph structure, loaded once and resident for the whole forward
    src_oh = src_oh_ref[...]                     # (E, N)
    dst_oh = dst_oh_ref[...]                     # (E, N)
    src_oh_t = src_oh_t_ref[...]                 # (N, E)
    src_neg = (src_oh_t - 1.0) * NEG_BIG         # (N, E) additive softmax mask
    b_oh = b_oh_ref[...]                         # (N, B)
    b_oh_t = b_oh_t_ref[...]                     # (B, N)
    b_neg = (b_oh_t - 1.0) * NEG_BIG             # (B, N)

    mean_m = mean_m_ref[...]                     # (heads*H, H) mean over heads
    brd = brd_ref[...]                           # (heads, heads*H) head broadcast
    brd_t = brd_t_ref[...]                       # (heads*H, heads) per-head block sum
    dgn_w = dgn_w_ref[...]; dgn_b = dgn_b_ref[...]
    dgn_a = dgn_a_ref[...]; dgn_c = dgn_c_ref[...]

    # ---- 2. conv stack: 5 x (AGAT + DiffGroupNorm(eval) + skip), unrolled ----
    for l in range(N_CONV):
        # cat([x_gather, edge_attr]) @ W == one_hot @ (x @ W_top) + edge_attr @ W_bot
        xw = _dot(x, wtop_ref[l])                                      # (N, heads*H)
        ew = _dot(e, wbot_ref[l])                                      # (E, heads*H)
        out_i = _softplus(_dot(src_oh, xw) + ew)                       # (E, heads*H)
        out_j = _softplus(_dot(dst_oh, xw) + ew)                       # (E, heads*H)

        # attention logits per head: (out_i*att_i + out_j*att_j) summed per head
        prod = out_i * atti_ref[l] + out_j * attj_ref[l]               # (E, heads*H)
        alpha = _dot(prod, brd_t)                                      # (E, heads)
        alpha = _softplus(alpha)
        alpha = alpha * bns_ref[l] + bnb_ref[l]     # BatchNorm1d(heads), eval, folded
        alpha = _softplus(alpha)
        alpha = _seg_softmax(alpha, src_oh, src_oh_t, src_neg)
        # TODO(synk): dropout on alpha is identity in eval mode (training=False).

        # out_j weighted per head, scatter-add over src, mean over heads, + bias
        weighted = out_j * _dot(alpha, brd)                            # (E, heads*H)
        aggr = _dot(src_oh_t, weighted)                                # (N, heads*H)
        x_conv = _dot(aggr, mean_m) + cbias_ref[l]                     # (N, H)

        # DiffGroupNorm (eval) folded: x_conv + lamda*out == x_conv*(1+s@A') + C'
        logits = _dot(x_conv, dgn_w) + dgn_b                           # (N, G)
        z = logits - jnp.max(logits, axis=-1, keepdims=True)
        ez = jnp.exp(z)
        s = ez * _recip(jnp.sum(ez, axis=-1, keepdims=True))
        # skip connection: + x (the block input is `prev`)
        x = x_conv * (1.0 + _dot(s, dgn_a)) + dgn_c + x
        # TODO(synk): Dropout(p=0.2) after each block is identity in eval mode.

    # ---- 3. global attention + node weighting ----
    h = _softplus(_dot(x, wix_ref[...]) + _dot(g_ref[...], wig_ref[...]) + bi_ref[...])
    h = _softplus(_dot(h, w1_ref[...]) + b1_ref[...])
    h = _softplus(_dot(h, w2_ref[...]) + b2_ref[...])
    # out_layer (H -> 1) as a lane dot-reduction (no lane-sparse matmul/store)
    logit = jnp.sum(h * wo_ref[...], axis=-1, keepdims=True) + bo_ref[...]   # (N, 1)
    x = x * _seg_softmax(logit, b_oh, b_oh_t, b_neg)

    # ---- 4. Set2Set: 3 LSTM steps + attention readout ----
    nb = b_oh_t.shape[0]
    hdim = x.shape[1]
    h_l = jnp.zeros((nb, hdim), F32)
    c_l = jnp.zeros((nb, hdim), F32)
    q = jnp.zeros((nb, hdim), F32)                 # q_star = [q, r], both start at 0
    r = jnp.zeros((nb, hdim), F32)
    wq = wq_ref[...]; wr = wr_ref[...]; wh = wh_ref[...]; bl = bl_ref[...]
    for _ in range(S2S_STEPS):
        gates = _dot(q, wq) + _dot(r, wr) + _dot(h_l, wh) + bl          # (B, 4H) i,f,g,o
        g_i = _sigmoid(gates[:, 0:hdim])
        g_f = _sigmoid(gates[:, hdim:2 * hdim])
        g_g = jnp.tanh(gates[:, 2 * hdim:3 * hdim])
        g_o = _sigmoid(gates[:, 3 * hdim:4 * hdim])
        c_l = g_f * c_l + g_i * g_g
        h_l = g_o * jnp.tanh(c_l)
        q = h_l
        qg = _dot(b_oh, q)                                              # (N, H)  q[batch]
        e_att = jnp.sum(x * qg, axis=-1, keepdims=True)                 # (N, 1)
        a = _seg_softmax(e_att, b_oh, b_oh_t, b_neg)                    # (N, 1)
        r = _dot(b_oh_t, a * x)                                         # (B, H)

    # ---- 5. MLP head on q_star = [q, r] (first-layer weights pre-split) ----
    y = _softplus(_dot(q, w1q_ref[...]) + _dot(r, w1r_ref[...]) + b1m_ref[...])
    y = _softplus(_dot(y, wo1_ref[...]) + bo1_ref[...])
    o_ref[...] = jnp.sum(y * wo2_ref[...], axis=-1, keepdims=True) + bo2_ref[...]  # (B, 1)


# --------------------------- one-time host-side prep --------------------------
def prepare_inputs(params, data, num_graphs):
    """Hoist all static graph/BN/weight prep out of the jit hot path.

    Returns a flat tuple of arrays in the exact positional order expected by
    _skip_kernel.  Call once per (graph, params); the jitted forward then runs
    a single pallas_call with no extra XLA ops.
    """
    x_in = data["x"].astype(F32)
    edge_index = data["edge_index"]
    edge_attr_in = data["edge_attr"].astype(F32)
    g_info = data["global_info"].astype(F32)
    batch = data["batch"]
    num_nodes = x_in.shape[0]
    H, G = HIDDEN, DGN_GROUPS
    src, dst = edge_index[0], edge_index[1]

    # structural matrices: gathers/scatters become matmuls inside the kernel
    src_oh = jax.nn.one_hot(src, num_nodes, dtype=F32)        # (E, N)
    dst_oh = jax.nn.one_hot(dst, num_nodes, dtype=F32)        # (E, N)
    src_oh_t = src_oh.T                                       # (N, E)
    b_oh = jax.nn.one_hot(batch, num_graphs, dtype=F32)       # (N, B)
    b_oh_t = b_oh.T                                           # (B, N)

    # head bookkeeping (shared across conv layers)
    mean_m = jnp.tile(jnp.eye(H, dtype=F32), (HEADS, 1)) / HEADS   # (heads*H, H)
    brd = jnp.repeat(jnp.eye(HEADS, dtype=F32), H, axis=1)         # (heads, heads*H)
    brd_t = brd.T                                                  # (heads*H, heads)

    # conv-layer weights stacked along a leading axis
    wtop, wbot, attis, attjs, bns, bnb, cbias = [], [], [], [], [], [], []
    for cp in params["convs"]:
        att_i, att_j = cp["att"][:, :H], cp["att"][:, H:]          # (heads, H) each
        attis.append(att_i.reshape(1, HEADS * H))
        attjs.append(att_j.reshape(1, HEADS * H))
        scale = cp["bn_g"] / jnp.sqrt(cp["bn_rv"] + 1e-5)
        shift = cp["bn_b"] - cp["bn_rm"] * scale
        bns.append(scale.reshape(1, HEADS))
        bnb.append(shift.reshape(1, HEADS))
        wtop.append(cp["W"][:H])
        wbot.append(cp["W"][H:])
        cbias.append(cp["bias"].reshape(1, H))
    wtop = jnp.stack(wtop); wbot = jnp.stack(wbot)
    attis = jnp.stack(attis); attjs = jnp.stack(attjs)
    bns = jnp.stack(bns); bnb = jnp.stack(bnb); cbias = jnp.stack(cbias)

    # DiffGroupNorm (eval) folded into an affine form shared by all conv layers
    dp = params["dgn"]
    inv = 1.0 / jnp.sqrt(dp["bn_rv"] + 1e-5)
    a_flat = dp["bn_g"] * inv                                       # (G*H,)
    dgn_a = (dp["lamda"] * a_flat).reshape(G, H)                    # (G, H), lamda folded
    dgn_c = (dp["lamda"] * (dp["bn_b"] - dp["bn_rm"] * a_flat).reshape(G, H).sum(0)
             ).reshape(1, H)
    dgn_w = dp["lin_w"]
    dgn_b = dp["lin_b"].reshape(1, -1)

    gp = params["gat"]
    (w1, b1), (w2, b2) = gp["lins"]

    sp, mp = params["s2s"], params["mlp"]
    w_cat = sp["w_cat"]                                             # (3H, 4H): [q | r | h]
    l1_w, l1_b = mp["lins"][0]

    pn, pe = params["lin_node"], params["edge_node"]
    return (
        # embeddings
        x_in, pn["w"], pn["b"].reshape(1, -1),
        edge_attr_in, pe["w"], pe["b"].reshape(1, -1),
        # structure
        src_oh, dst_oh, src_oh_t, b_oh, b_oh_t,
        # conv stacked
        wtop, wbot, attis, attjs, bns, bnb, cbias,
        # shared + DGN
        mean_m, brd, brd_t, dgn_w, dgn_b, dgn_a, dgn_c,
        # global attention
        g_info, gp["in_w"][:H], gp["in_w"][H:], gp["in_b"].reshape(1, -1),
        w1, b1.reshape(1, -1), w2, b2.reshape(1, -1),
        gp["out_w"].T, gp["out_b"].reshape(1, 1),
        # Set2Set
        w_cat[:H], w_cat[H:2 * H], w_cat[2 * H:], sp["b_cat"].reshape(1, -1),
        # MLP head
        l1_w[:H], l1_w[H:], l1_b.reshape(1, -1),
        mp["o1_w"], mp["o1_b"].reshape(1, -1),
        mp["o2_w"].T, mp["o2_b"].reshape(1, 1),
    )


# --------------------------------- forward -----------------------------------
def skip_forward(*args):
    """Whole SKIP forward = one gridless pallas_call (all operands VMEM-resident)."""
    num_graphs = args[10].shape[0]              # b_oh_t is (B, N)
    out = pl.pallas_call(
        _skip_kernel,
        out_shape=jax.ShapeDtypeStruct((num_graphs, 1), F32),
    )(*args)
    return out.reshape(1, -1)


# ------------------------------ parameter init --------------------------------
def glorot(key, shape):
    fan_in, fan_out = shape[0], shape[1]
    limit = (6.0 / (fan_in + fan_out)) ** 0.5
    return jax.random.uniform(key, shape, F32, -limit, limit)


def linear_params(key, in_dim, out_dim):
    kw, kb = jax.random.split(key)
    w = glorot(kw, (in_dim, out_dim))
    b = jax.random.uniform(kb, (out_dim,), F32, -0.1, 0.1)
    return w, b


def init_params(key):
    keys = iter(jax.random.split(key, 64))
    p = {}
    w, b = linear_params(next(keys), IN_DIM, HIDDEN)
    p["lin_node"] = {"w": w, "b": b}
    w, b = linear_params(next(keys), EDGE_DIM, HIDDEN)
    p["edge_node"] = {"w": w, "b": b}

    convs = []
    for _ in range(N_CONV):
        convs.append({
            "W": glorot(next(keys), (2 * HIDDEN, HEADS * HIDDEN)),
            "att": glorot(next(keys), (HEADS, 2 * HIDDEN)),
            "bias": jnp.zeros((HIDDEN,), F32),
            "bn_g": jnp.ones((HEADS,), F32),
            "bn_b": jnp.zeros((HEADS,), F32),
            "bn_rm": jnp.zeros((HEADS,), F32),
            "bn_rv": jnp.ones((HEADS,), F32),
        })
    p["convs"] = convs

    lw, lb = linear_params(next(keys), HIDDEN, DGN_GROUPS)
    p["dgn"] = {
        "lin_w": lw, "lin_b": lb, "lamda": 0.01,
        "bn_g": jnp.ones((DGN_GROUPS * HIDDEN,), F32),
        "bn_b": jnp.zeros((DGN_GROUPS * HIDDEN,), F32),
        "bn_rm": jnp.zeros((DGN_GROUPS * HIDDEN,), F32),
        "bn_rv": jnp.ones((DGN_GROUPS * HIDDEN,), F32),
    }

    gi_w, gi_b = linear_params(next(keys), HIDDEN + GLOBAL_DIM, HIDDEN)
    lins = [linear_params(next(keys), HIDDEN, HIDDEN) for _ in range(GAT_LAYERS)]
    go_w, go_b = linear_params(next(keys), HIDDEN, 1)
    p["gat"] = {"in_w": gi_w, "in_b": gi_b, "lins": lins, "out_w": go_w, "out_b": go_b}

    # Set2Set LSTM(input=2H, hidden=H): fuse W_ih / W_hh into one row-stacked matrix.
    w_ih = glorot(next(keys), (2 * HIDDEN, 4 * HIDDEN))
    w_hh = glorot(next(keys), (HIDDEN, 4 * HIDDEN))
    b_ih = jax.random.uniform(next(keys), (4 * HIDDEN,), F32, -0.1, 0.1)
    b_hh = jax.random.uniform(next(keys), (4 * HIDDEN,), F32, -0.1, 0.1)
    p["s2s"] = {"w_cat": jnp.concatenate([w_ih, w_hh], axis=0), "b_cat": b_ih + b_hh}

    mlp_lins = [linear_params(next(keys), 2 * HIDDEN, 2 * HIDDEN) for _ in range(N_LINEAR)]
    o1 = linear_params(next(keys), 2 * HIDDEN, 32)
    o2 = linear_params(next(keys), 32, 1)
    p["mlp"] = {"lins": mlp_lins, "o1_w": o1[0], "o1_b": o1[1], "o2_w": o2[0], "o2_b": o2[1]}
    return p


# ------------------------------------ main ------------------------------------
if __name__ == "__main__":
    key = jax.random.PRNGKey(0)
    k_param, kx, ke, kg = jax.random.split(key, 4)

    num_nodes = NUM_GRAPHS * NODES_PER_GRAPH
    # fully-connected (no self loops) edges inside each graph
    srcs, dsts = [], []
    for g in range(NUM_GRAPHS):
        for a in range(NODES_PER_GRAPH):
            for b in range(NODES_PER_GRAPH):
                if a != b:
                    srcs.append(g * NODES_PER_GRAPH + a)
                    dsts.append(g * NODES_PER_GRAPH + b)
    edge_index = jnp.array([srcs, dsts], dtype=jnp.int32)
    num_edges = edge_index.shape[1]

    data = {
        "x": jax.random.normal(kx, (num_nodes, IN_DIM), F32),
        "edge_index": edge_index,
        "edge_attr": jax.random.normal(ke, (num_edges, EDGE_DIM), F32),
        "global_info": jax.random.normal(kg, (num_nodes, GLOBAL_DIM), F32),
        "batch": jnp.repeat(jnp.arange(NUM_GRAPHS, dtype=jnp.int32), NODES_PER_GRAPH),
    }

    params = init_params(k_param)
    # one-time prep outside the hot path (static graph topology + eval BN stats)
    args = prepare_inputs(params, data, NUM_GRAPHS)
    fwd = jax.jit(skip_forward)
    out = fwd(*args)
    out = jax.block_until_ready(out)
    assert out.shape == (1, NUM_GRAPHS)
    assert bool(jnp.all(jnp.isfinite(out)))
    print("KERNEL_OK")
</pallas_src>

<mosaic_0001>
module attributes {stable_mosaic.version = 11 : i64} {
  func.func @_skip_kernel(%arg0: memref<12x11xf32, #tpu.memory_space<vmem>>, %arg1: memref<11x32xf32, #tpu.memory_space<vmem>>, %arg2: memref<1x32xf32, #tpu.memory_space<vmem>>, %arg3: memref<60x9xf32, #tpu.memory_space<vmem>>, %arg4: memref<9x32xf32, #tpu.memory_space<vmem>>, %arg5: memref<1x32xf32, #tpu.memory_space<vmem>>, %arg6: memref<60x12xf32, #tpu.memory_space<vmem>>, %arg7: memref<60x12xf32, #tpu.memory_space<vmem>>, %arg8: memref<12x60xf32, #tpu.memory_space<vmem>>, %arg9: memref<12x2xf32, #tpu.memory_space<vmem>>, %arg10: memref<2x12xf32, #tpu.memory_space<vmem>>, %arg11: memref<5x32x128xf32, #tpu.memory_space<vmem>>, %arg12: memref<5x32x128xf32, #tpu.memory_space<vmem>>, %arg13: memref<5x1x128xf32, #tpu.memory_space<vmem>>, %arg14: memref<5x1x128xf32, #tpu.memory_space<vmem>>, %arg15: memref<5x1x4xf32, #tpu.memory_space<vmem>>, %arg16: memref<5x1x4xf32, #tpu.memory_space<vmem>>, %arg17: memref<5x1x32xf32, #tpu.memory_space<vmem>>, %arg18: memref<128x32xf32, #tpu.memory_space<vmem>>, %arg19: memref<4x128xf32, #tpu.memory_space<vmem>>, %arg20: memref<128x4xf32, #tpu.memory_space<vmem>>, %arg21: memref<32x10xf32, #tpu.memory_space<vmem>>, %arg22: memref<1x10xf32, #tpu.memory_space<vmem>>, %arg23: memref<10x32xf32, #tpu.memory_space<vmem>>, %arg24: memref<1x32xf32, #tpu.memory_space<vmem>>, %arg25: memref<12x107xf32, #tpu.memory_space<vmem>>, %arg26: memref<32x32xf32, #tpu.memory_space<vmem>>, %arg27: memref<107x32xf32, #tpu.memory_space<vmem>>, %arg28: memref<1x32xf32, #tpu.memory_space<vmem>>, %arg29: memref<32x32xf32, #tpu.memory_space<vmem>>, %arg30: memref<1x32xf32, #tpu.memory_space<vmem>>, %arg31: memref<32x32xf32, #tpu.memory_space<vmem>>, %arg32: memref<1x32xf32, #tpu.memory_space<vmem>>, %arg33: memref<1x32xf32, #tpu.memory_space<vmem>>, %arg34: memref<1x1xf32, #tpu.memory_space<vmem>>, %arg35: memref<32x128xf32, #tpu.memory_space<vmem>>, %arg36: memref<32x128xf32, #tpu.memory_space<vmem>>, %arg37: memref<32x128xf32, #tpu.memory_space<vmem>>, %arg38: memref<1x128xf32, #tpu.memory_space<vmem>>, %arg39: memref<32x64xf32, #tpu.memory_space<vmem>>, %arg40: memref<32x64xf32, #tpu.memory_space<vmem>>, %arg41: memref<1x64xf32, #tpu.memory_space<vmem>>, %arg42: memref<64x32xf32, #tpu.memory_space<vmem>>, %arg43: memref<1x32xf32, #tpu.memory_space<vmem>>, %arg44: memref<1x32xf32, #tpu.memory_space<vmem>>, %arg45: memref<1x1xf32, #tpu.memory_space<vmem>>, %arg46: memref<2x1xf32, #tpu.memory_space<vmem>>) attributes {dimension_semantics = [], scalar_prefetch = 0 : i64, scratch_operands = 0 : i64, tpu.core_type = #tpu.core_type<tc>} {
    %c0 = arith.constant 0 : index
    %c0_0 = arith.constant 0 : index
    %0 = vector.load %arg0[%c0, %c0_0] : memref<12x11xf32, #tpu.memory_space<vmem>>, vector<12x11xf32>
    %c0_1 = arith.constant 0 : index
    %c0_2 = arith.constant 0 : index
    %1 = vector.load %arg1[%c0_1, %c0_2] : memref<11x32xf32, #tpu.memory_space<vmem>>, vector<11x32xf32>
    %cst = arith.constant dense<0.000000e+00> : vector<12x32xf32>
    %2 = tpu.matmul %0, %1, %cst {dimension_numbers = #tpu.dot_dimension_numbers<[1], [0], [0], [1], [0, 0, 1, 1], [], []>} : vector<12x11xf32>, vector<11x32xf32>, vector<12x32xf32> -> vector<12x32xf32>
    %c0_3 = arith.constant 0 : index
    %c0_4 = arith.constant 0 : index
    %3 = vector.load %arg2[%c0_3, %c0_4] : memref<1x32xf32, #tpu.memory_space<vmem>>, vector<1x32xf32>
    %4 = vector.broadcast %3 : vector<1x32xf32> to vector<12x32xf32>
    %5 = arith.addf %2, %4 : vector<12x32xf32>
    %cst_5 = arith.constant 0.000000e+00 : f32
    %6 = vector.broadcast %cst_5 : f32 to vector<12x32xf32>
    %7 = arith.maximumf %5, %6 : vector<12x32xf32>
    %8 = math.absf %5 : vector<12x32xf32>
    %cst_6 = arith.constant 0.000000e+00 : f32
    %9 = vector.broadcast %cst_6 : f32 to vector<12x32xf32>
    %10 = arith.subf %9, %8 : vector<12x32xf32>
    %11 = math.exp %10 : vector<12x32xf32>
    %cst_7 = arith.constant 1.000000e+00 : f32
    %12 = vector.broadcast %cst_7 : f32 to vector<12x32xf32>
    %13 = arith.addf %12, %11 : vector<12x32xf32>
    %14 = math.log %13 : vector<12x32xf32>
    %15 = arith.addf %7, %14 : vector<12x32xf32>
    %c0_8 = arith.constant 0 : index
    %c0_9 = arith.constant 0 : index
    %16 = vector.load %arg3[%c0_8, %c0_9] : memref<60x9xf32, #tpu.memory_space<vmem>>, vector<60x9xf32>
    %c0_10 = arith.constant 0 : index
    %c0_11 = arith.constant 0 : index
    %17 = vector.load %arg4[%c0_10, %c0_11] : memref<9x32xf32, #tpu.memory_space<vmem>>, vector<9x32xf32>
    %cst_12 = arith.constant dense<0.000000e+00> : vector<60x32xf32>
    %18 = tpu.matmul %16, %17, %cst_12 {dimension_numbers = #tpu.dot_dimension_numbers<[1], [0], [0], [1], [0, 0, 1, 1], [], []>} : vector<60x9xf32>, vector<9x32xf32>, vector<60x32xf32> -> vector<60x32xf32>
    %c0_13 = arith.constant 0 : index
    %c0_14 = arith.constant 0 : index
    %19 = vector.load %arg5[%c0_13, %c0_14] : memref<1x32xf32, #tpu.memory_space<vmem>>, vector<1x32xf32>
    %20 = vector.broadcast %19 : vector<1x32xf32> to vector<60x32xf32>
    %21 = arith.addf %18, %20 : vector<60x32xf32>
    %cst_15 = arith.constant 0.000000e+00 : f32
    %22 = vector.broadcast %cst_15 : f32 to vector<60x32xf32>
    %23 = arith.cmpf ogt, %21, %22 : vector<60x32xf32>
    %cst_16 = arith.constant 2.000000e-01 : f32
    %24 = vector.broadcast %cst_16 : f32 to vector<60x32xf32>
    %25 = arith.mulf %24, %21 : vector<60x32xf32>
    %26 = arith.select %23, %21, %25 : vector<60x32xi1>, vector<60x32xf32>
    %c0_17 = arith.constant 0 : index
    %c0_18 = arith.constant 0 : index
    %27 = vector.load %arg6[%c0_17, %c0_18] : memref<60x12xf32, #tpu.memory_space<vmem>>, vector<60x12xf32>
    %c0_19 = arith.constant 0 : index
    %c0_20 = arith.constant 0 : index
    %28 = vector.load %arg7[%c0_19, %c0_20] : memref<60x12xf32, #tpu.memory_space<vmem>>, vector<60x12xf32>
    %c0_21 = arith.constant 0 : index
    %c0_22 = arith.constant 0 : index
    %29 = vector.load %arg8[%c0_21, %c0_22] : memref<12x60xf32, #tpu.memory_space<vmem>>, vector<12x60xf32>
    %cst_23 = arith.constant 1.000000e+00 : f32
    %30 = vector.broadcast %cst_23 : f32 to vector<12x60xf32>
    %31 = arith.subf %29, %30 : vector<12x60xf32>
    %cst_24 = arith.constant 1.000000e+30 : f32
    %32 = vector.broadcast %cst_24 : f32 to vector<12x60xf32>
    %33 = arith.mulf %31, %32 : vector<12x60xf32>
    %c0_25 = arith.constant 0 : index
    %c0_26 = arith.constant 0 : index
    %34 = vector.load %arg9[%c0_25, %c0_26] : memref<12x2xf32, #tpu.memory_space<vmem>>, vector<12x2xf32>
    %c0_27 = arith.constant 0 : index
    %c0_28 = arith.constant 0 : index
    %35 = vector.load %arg10[%c0_27, %c0_28] : memref<2x12xf32, #tpu.memory_space<vmem>>, vector<2x12xf32>
    %cst_29 = arith.constant 1.000000e+00 : f32
    %36 = vector.broadcast %cst_29 : f32 to vector<2x12xf32>
    %37 = arith.subf %35, %36 : vector<2x12xf32>
    %cst_30 = arith.constant 1.000000e+30 : f32
    %38 = vector.broadcast %cst_30 : f32 to vector<2x12xf32>
    %39 = arith.mulf %37, %38 : vector<2x12xf32>
    %c0_31 = arith.constant 0 : index
    %c0_32 = arith.constant 0 : index
    %40 = vector.load %arg18[%c0_31, %c0_32] : memref<128x32xf32, #tpu.memory_space<vmem>>, vector<128x32xf32>
    %c0_33 = arith.constant 0 : index
    %c0_34 = arith.constant 0 : index
    %41 = vector.load %arg19[%c0_33, %c0_34] : memref<4x128xf32, #tpu.memory_space<vmem>>, vector<4x128xf32>
    %c0_35 = arith.constant 0 : index
    %c0_36 = arith.constant 0 : index
    %42 = vector.load %arg20[%c0_35, %c0_36] : memref<128x4xf32, #tpu.memory_space<vmem>>, vector<128x4xf32>
    %c0_37 = arith.constant 0 : index
    %c0_38 = arith.constant 0 : index
    %43 = vector.load %arg21[%c0_37, %c0_38] : memref<32x10xf32, #tpu.memory_space<vmem>>, vector<32x10xf32>
    %c0_39 = arith.constant 0 : index
    %c0_40 = arith.constant 0 : index
    %44 = vector.load %arg22[%c0_39, %c0_40] : memref<1x10xf32, #tpu.memory_space<vmem>>, vector<1x10xf32>
    %c0_41 = arith.constant 0 : index
    %c0_42 = arith.constant 0 : index
    %45 = vector.load %arg23[%c0_41, %c0_42] : memref<10x32xf32, #tpu.memory_space<vmem>>, vector<10x32xf32>
    %c0_43 = arith.constant 0 : index
    %c0_44 = arith.constant 0 : index
    %46 = vector.load %arg24[%c0_43, %c0_44] : memref<1x32xf32, #tpu.memory_space<vmem>>, vector<1x32xf32>
    %c0_45 = arith.constant 0 : index
    %c0_46 = arith.constant 0 : index
    %c0_47 = arith.constant 0 : index
    %47 = vector.load %arg11[%c0_45, %c0_46, %c0_47] : memref<5x32x128xf32, #tpu.memory_space<vmem>>, vector<1x32x128xf32>
    %48 = vector.shape_cast %47 : vector<1x32x128xf32> to vector<32x128xf32>
    %cst_48 = arith.constant dense<0.000000e+00> : vector<12x128xf32>
    %49 = tpu.matmul %15, %48, %cst_48 {dimension_numbers = #tpu.dot_dimension_numbers<[1], [0], [0], [1], [0, 0, 1, 1], [], []>} : vector<12x32xf32>, vector<32x128xf32>, vector<12x128xf32> -> vector<12x128xf32>
    %c0_49 = arith.constant 0 : index
    %c0_50 = arith.constant 0 : index
    %c0_51 = arith.constant 0 : index
    %50 = vector.load %arg12[%c0_49, %c0_50, %c0_51] : memref<5x32x128xf32, #tpu.memory_space<vmem>>, vector<1x32x128xf32>
    %51 = vector.shape_cast %50 : vector<1x32x128xf32> to vector<32x128xf32>
    %cst_52 = arith.constant dense<0.000000e+00> : vector<60x128xf32>
    %52 = tpu.matmul %26, %51, %cst_52 {dimension_numbers = #tpu.dot_dimension_numbers<[1], [0], [0], [1], [0, 0, 1, 1], [], []>} : vector<60x32xf32>, vector<32x128xf32>, vector<60x128xf32> -> vector<60x128xf32>
    %cst_53 = arith.constant dense<0.000000e+00> : vector<60x128xf32>
    %53 = tpu.matmul %27, %49, %cst_53 {dimension_numbers = #tpu.dot_dimension_numbers<[1], [0], [0], [1], [0, 0, 1, 1], [], []>} : vector<60x12xf32>, vector<12x128xf32>, vector<60x128xf32> -> vector<60x128xf32>
    %54 = arith.addf %53, %52 : vector<60x128xf32>
    %cst_54 = arith.constant 0.000000e+00 : f32
    %55 = vector.broadcast %cst_54 : f32 to vector<60x128xf32>
    %56 = arith.maximumf %54, %55 : vector<60x128xf32>
    %57 = math.absf %54 : vector<60x128xf32>
    %cst_55 = arith.constant 0.000000e+00 : f32
    %58 = vector.broadcast %cst_55 : f32 to vector<60x128xf32>
    %59 = arith.subf %58, %57 : vector<60x128xf32>
    %60 = math.exp %59 : vector<60x128xf32>
    %cst_56 = arith.constant 1.000000e+00 : f32
    %61 = vector.broadcast %cst_56 : f32 to vector<60x128xf32>
    %62 = arith.addf %61, %60 : vector<60x128xf32>
    %63 = math.log %62 : vector<60x128xf32>
    %64 = arith.addf %56, %63 : vector<60x128xf32>
    %cst_57 = arith.constant dense<0.000000e+00> : vector<60x128xf32>
    %65 = tpu.matmul %28, %49, %cst_57 {dimension_numbers = #tpu.dot_dimension_numbers<[1], [0], [0], [1], [0, 0, 1, 1], [], []>} : vector<60x12xf32>, vector<12x128xf32>, vector<60x128xf32> -> vector<60x128xf32>
    %66 = arith.addf %65, %52 : vector<60x128xf32>
    %cst_58 = arith.constant 0.000000e+00 : f32
    %67 = vector.broadcast %cst_58 : f32 to vector<60x128xf32>
    %68 = arith.maximumf %66, %67 : vector<60x128xf32>
    %69 = math.absf %66 : vector<60x128xf32>
    %cst_59 = arith.constant 0.000000e+00 : f32
    %70 = vector.broadcast %cst_59 : f32 to vector<60x128xf32>
    %71 = arith.subf %70, %69 : vector<60x128xf32>
    %72 = math.exp %71 : vector<60x128xf32>
    %cst_60 = arith.constant 1.000000e+00 : f32
    %73 = vector.broadcast %cst_60 : f32 to vector<60x128xf32>
    %74 = arith.addf %73, %72 : vector<60x128xf32>
    %75 = math.log %74 : vector<60x128xf32>
    %76 = arith.addf %68, %75 : vector<60x128xf32>
    %c0_61 = arith.constant 0 : index
    %c0_62 = arith.constant 0 : index
    %c0_63 = arith.constant 0 : index
    %77 = vector.load %arg13[%c0_61, %c0_62, %c0_63] : memref<5x1x128xf32, #tpu.memory_space<vmem>>, vector<1x1x128xf32>
    %78 = vector.shape_cast %77 : vector<1x1x128xf32> to vector<1x128xf32>
    %79 = vector.broadcast %78 : vector<1x128xf32> to vector<60x128xf32>
    %80 = arith.mulf %64, %79 : vector<60x128xf32>
    %c0_64 = arith.constant 0 : index
    %c0_65 = arith.constant 0 : index
    %c0_66 = arith.constant 0 : index
    %81 = vector.load %arg14[%c0_64, %c0_65, %c0_66] : memref<5x1x128xf32, #tpu.memory_space<vmem>>, vector<1x1x128xf32>
    %82 = vector.shape_cast %81 : vector<1x1x128xf32> to vector<1x128xf32>
    %83 = vector.broadcast %82 : vector<1x128xf32> to vector<60x128xf32>
    %84 = arith.mulf %76, %83 : vector<60x128xf32>
    %85 = arith.addf %80, %84 : vector<60x128xf32>
    %cst_67 = arith.constant dense<0.000000e+00> : vector<60x4xf32>
    %86 = tpu.matmul %85, %42, %cst_67 {dimension_numbers = #tpu.dot_dimension_numbers<[1], [0], [0], [1], [0, 0, 1, 1], [], []>} : vector<60x128xf32>, vector<128x4xf32>, vector<60x4xf32> -> vector<60x4xf32>
    %cst_68 = arith.constant 0.000000e+00 : f32
    %87 = vector.broadcast %cst_68 : f32 to vector<60x4xf32>
    %88 = arith.maximumf %86, %87 : vector<60x4xf32>
    %89 = math.absf %86 : vector<60x4xf32>
    %cst_69 = arith.constant 0.000000e+00 : f32
    %90 = vector.broadcast %cst_69 : f32 to vector<60x4xf32>
    %91 = arith.subf %90, %89 : vector<60x4xf32>
    %92 = math.exp %91 : vector<60x4xf32>
    %cst_70 = arith.constant 1.000000e+00 : f32
    %93 = vector.broadcast %cst_70 : f32 to vector<60x4xf32>
    %94 = arith.addf %93, %92 : vector<60x4xf32>
    %95 = math.log %94 : vector<60x4xf32>
    %96 = arith.addf %88, %95 : vector<60x4xf32>
    %c0_71 = arith.constant 0 : index
    %c0_72 = arith.constant 0 : index
    %c0_73 = arith.constant 0 : index
    %97 = vector.load %arg15[%c0_71, %c0_72, %c0_73] : memref<5x1x4xf32, #tpu.memory_space<vmem>>, vector<1x1x4xf32>
    %98 = vector.shape_cast %97 : vector<1x1x4xf32> to vector<1x4xf32>
    %99 = vector.broadcast %98 : vector<1x4xf32> to vector<60x4xf32>
    %100 = arith.mulf %96, %99 : vector<60x4xf32>
    %c0_74 = arith.constant 0 : index
    %c0_75 = arith.constant 0 : index
    %c0_76 = arith.constant 0 : index
    %101 = vector.load %arg16[%c0_74, %c0_75, %c0_76] : memref<5x1x4xf32, #tpu.memory_space<vmem>>, vector<1x1x4xf32>
    %102 = vector.shape_cast %101 : vector<1x1x4xf32> to vector<1x4xf32>
    %103 = vector.broadcast %102 : vector<1x4xf32> to vector<60x4xf32>
    %104 = arith.addf %100, %103 : vector<60x4xf32>
    %cst_77 = arith.constant 0.000000e+00 : f32
    %105 = vector.broadcast %cst_77 : f32 to vector<60x4xf32>
    %106 = arith.maximumf %104, %105 : vector<60x4xf32>
    %107 = math.absf %104 : vector<60x4xf32>
    %cst_78 = arith.constant 0.000000e+00 : f32
    %108 = vector.broadcast %cst_78 : f32 to vector<60x4xf32>
    %109 = arith.subf %108, %107 : vector<60x4xf32>
    %110 = math.exp %109 : vector<60x4xf32>
    %cst_79 = arith.constant 1.000000e+00 : f32
    %111 = vector.broadcast %cst_79 : f32 to vector<60x4xf32>
    %112 = arith.addf %111, %110 : vector<60x4xf32>
    %113 = math.log %112 : vector<60x4xf32>
    %114 = arith.addf %106, %113 : vector<60x4xf32>
    %115 = tpu.transpose %114, [1, 0] : vector<60x4xf32> -> vector<4x60xf32>
    %116 = vector.shape_cast %115 : vector<4x60xf32> to vector<4x1x60xf32>
    %117 = vector.shape_cast %33 : vector<12x60xf32> to vector<1x12x60xf32>
    %118 = vector.broadcast %116 : vector<4x1x60xf32> to vector<4x12x60xf32>
    %119 = vector.broadcast %117 : vector<1x12x60xf32> to vector<4x12x60xf32>
    %120 = arith.addf %118, %119 : vector<4x12x60xf32>
    %cst_80 = arith.constant dense<0xFF800000> : vector<4x12xf32>
    %121 = vector.multi_reduction <maximumf>, %120, %cst_80 [2] : vector<4x12x60xf32> to vector<4x12xf32>
    %122 = tpu.transpose %121, [1, 0] : vector<4x12xf32> -> vector<12x4xf32>
    %cst_81 = arith.constant dense<0.000000e+00> : vector<60x4xf32>
    %123 = tpu.matmul %27, %122, %cst_81 {dimension_numbers = #tpu.dot_dimension_numbers<[1], [0], [0], [1], [0, 0, 1, 1], [], []>} : vector<60x12xf32>, vector<12x4xf32>, vector<60x4xf32> -> vector<60x4xf32>
    %124 = arith.subf %114, %123 : vector<60x4xf32>
    %125 = math.exp %124 : vector<60x4xf32>
    %cst_82 = arith.constant dense<0.000000e+00> : vector<12x4xf32>
    %126 = tpu.matmul %29, %125, %cst_82 {dimension_numbers = #tpu.dot_dimension_numbers<[1], [0], [0], [1], [0, 0, 1, 1], [], []>} : vector<12x60xf32>, vector<60x4xf32>, vector<12x4xf32> -> vector<12x4xf32>
    %cst_83 = arith.constant 1.000000e-16 : f32
    %127 = vector.broadcast %cst_83 : f32 to vector<12x4xf32>
    %128 = arith.addf %126, %127 : vector<12x4xf32>
    %cst_84 = arith.constant dense<0.000000e+00> : vector<60x4xf32>
    %129 = tpu.matmul %27, %128, %cst_84 {dimension_numbers = #tpu.dot_dimension_numbers<[1], [0], [0], [1], [0, 0, 1, 1], [], []>} : vector<60x12xf32>, vector<12x4xf32>, vector<60x4xf32> -> vector<60x4xf32>
    %130 = tpu.reciprocal %129 {approx = true} : vector<60x4xf32> -> vector<60x4xf32>
    %131 = arith.mulf %125, %130 : vector<60x4xf32>
    %cst_85 = arith.constant dense<0.000000e+00> : vector<60x128xf32>
    %132 = tpu.matmul %131, %41, %cst_85 {dimension_numbers = #tpu.dot_dimension_numbers<[1], [0], [0], [1], [0, 0, 1, 1], [], []>} : vector<60x4xf32>, vector<4x128xf32>, vector<60x128xf32> -> vector<60x128xf32>
    %133 = arith.mulf %76, %132 : vector<60x128xf32>
    %cst_86 = arith.constant dense<0.000000e+00> : vector<12x128xf32>
    %134 = tpu.matmul %29, %133, %cst_86 {dimension_numbers = #tpu.dot_dimension_numbers<[1], [0], [0], [1], [0, 0, 1, 1], [], []>} : vector<12x60xf32>, vector<60x128xf32>, vector<12x128xf32> -> vector<12x128xf32>
    %cst_87 = arith.constant dense<0.000000e+00> : vector<12x32xf32>
    %135 = tpu.matmul %134, %40, %cst_87 {dimension_numbers = #tpu.dot_dimension_numbers<[1], [0], [0], [1], [0, 0, 1, 1], [], []>} : vector<12x128xf32>, vector<128x32xf32>, vector<12x32xf32> -> vector<12x32xf32>
    %c0_88 = arith.constant 0 : index
    %c0_89 = arith.constant 0 : index
    %c0_90 = arith.constant 0 : index
    %136 = vector.load %arg17[%c0_88, %c0_89, %c0_90] : memref<5x1x32xf32, #tpu.memory_space<vmem>>, vector<1x1x32xf32>
    %137 = vector.shape_cast %136 : vector<1x1x32xf32> to vector<1x32xf32>
    %138 = vector.broadcast %137 : vector<1x32xf32> to vector<12x32xf32>
    %139 = arith.addf %135, %138 : vector<12x32xf32>
    %cst_91 = arith.constant dense<0.000000e+00> : vector<12x10xf32>
    %140 = tpu.matmul %139, %43, %cst_91 {dimension_numbers = #tpu.dot_dimension_numbers<[1], [0], [0], [1], [0, 0, 1, 1], [], []>} : vector<12x32xf32>, vector<32x10xf32>, vector<12x10xf32> -> vector<12x10xf32>
    %141 = vector.broadcast %44 : vector<1x10xf32> to vector<12x10xf32>
    %142 = arith.addf %140, %141 : vector<12x10xf32>
    %cst_92 = arith.constant dense<0xFF800000> : vector<12xf32>
    %143 = vector.multi_reduction <maximumf>, %142, %cst_92 [1] : vector<12x10xf32> to vector<12xf32>
    %144 = vector.shape_cast %143 : vector<12xf32> to vector<12x1xf32>
    %145 = vector.broadcast %144 : vector<12x1xf32> to vector<12x10xf32>
    %146 = arith.subf %142, %145 : vector<12x10xf32>
    %147 = math.exp %146 : vector<12x10xf32>
    %cst_93 = arith.constant dense<0.000000e+00> : vector<12xf32>
    %148 = vector.multi_reduction <add>, %147, %cst_93 [1] : vector<12x10xf32> to vector<12xf32>
    %149 = vector.shape_cast %148 : vector<12xf32> to vector<12x1xf32>
    %150 = tpu.reciprocal %149 {approx = true} : vector<12x1xf32> -> vector<12x1xf32>
    %151 = vector.broadcast %150 : vector<12x1xf32> to vector<12x10xf32>
    %152 = arith.mulf %147, %151 : vector<12x10xf32>
    %cst_94 = arith.constant dense<0.000000e+00> : vector<12x32xf32>
    %153 = tpu.matmul %152, %45, %cst_94 {dimension_numbers = #tpu.dot_dimension_numbers<[1], [0], [0], [1], [0, 0, 1, 1], [], []>} : vector<12x10xf32>, vector<10x32xf32>, vector<12x32xf32> -> vector<12x32xf32>
    %cst_95 = arith.constant 1.000000e+00 : f32
    %154 = vector.broadcast %cst_95 : f32 to vector<12x32xf32>
    %155 = arith.addf %154, %153 : vector<12x32xf32>
    %156 = arith.mulf %139, %155 : vector<12x32xf32>
    %157 = vector.broadcast %46 : vector<1x32xf32> to vector<12x32xf32>
    %158 = arith.addf %156, %157 : vector<12x32xf32>
    %159 = arith.addf %158, %15 : vector<12x32xf32>
    %c1 = arith.constant 1 : index
    %c0_96 = arith.constant 0 : index
    %c0_97 = arith.constant 0 : index
    %160 = vector.load %arg11[%c1, %c0_96, %c0_97] : memref<5x32x128xf32, #tpu.memory_space<vmem>>, vector<1x32x128xf32>
    %161 = vector.shape_cast %160 : vector<1x32x128xf32> to vector<32x128xf32>
    %cst_98 = arith.constant dense<0.000000e+00> : vector<12x128xf32>
    %162 = tpu.matmul %159, %161, %cst_98 {dimension_numbers = #tpu.dot_dimension_numbers<[1], [0], [0], [1], [0, 0, 1, 1], [], []>} : vector<12x32xf32>, vector<32x128xf32>, vector<12x128xf32> -> vector<12x128xf32>
    %c1_99 = arith.constant 1 : index
    %c0_100 = arith.constant 0 : index
    %c0_101 = arith.constant 0 : index
    %163 = vector.load %arg12[%c1_99, %c0_100, %c0_101] : memref<5x32x128xf32, #tpu.memory_space<vmem>>, vector<1x32x128xf32>
    %164 = vector.shape_cast %163 : vector<1x32x128xf32> to vector<32x128xf32>
    %cst_102 = arith.constant dense<0.000000e+00> : vector<60x128xf32>
    %165 = tpu.matmul %26, %164, %cst_102 {dimension_numbers = #tpu.dot_dimension_numbers<[1], [0], [0], [1], [0, 0, 1, 1], [], []>} : vector<60x32xf32>, vector<32x128xf32>, vector<60x128xf32> -> vector<60x128xf32>
    %cst_103 = arith.constant dense<0.000000e+00> : vector<60x128xf32>
    %166 = tpu.matmul %27, %162, %cst_103 {dimension_numbers = #tpu.dot_dimension_numbers<[1], [0], [0], [1], [0, 0, 1, 1], [], []>} : vector<60x12xf32>, vector<12x128xf32>, vector<60x128xf32> -> vector<60x128xf32>
    %167 = arith.addf %166, %165 : vector<60x128xf32>
    %cst_104 = arith.constant 0.000000e+00 : f32
    %168 = vector.broadcast %cst_104 : f32 to vector<60x128xf32>
    %169 = arith.maximumf %167, %168 : vector<60x128xf32>
    %170 = math.absf %167 : vector<60x128xf32>
    %cst_105 = arith.constant 0.000000e+00 : f32
    %171 = vector.broadcast %cst_105 : f32 to vector<60x128xf32>
    %172 = arith.subf %171, %170 : vector<60x128xf32>
    %173 = math.exp %172 : vector<60x128xf32>
    %cst_106 = arith.constant 1.000000e+00 : f32
    %174 = vector.broadcast %cst_106 : f32 to vector<60x128xf32>
    %175 = arith.addf %174, %173 : vector<60x128xf32>
    %176 = math.log %175 : vector<60x128xf32>
    %177 = arith.addf %169, %176 : vector<60x128xf32>
    %cst_107 = arith.constant dense<0.000000e+00> : vector<60x128xf32>
    %178 = tpu.matmul %28, %162, %cst_107 {dimension_numbers = #tpu.dot_dimension_numbers<[1], [0], [0], [1], [0, 0, 1, 1], [], []>} : vector<60x12xf32>, vector<12x128xf32>, vector<60x128xf32> -> vector<60x128xf32>
    %179 = arith.addf %178, %165 : vector<60x128xf32>
    %cst_108 = arith.constant 0.000000e+00 : f32
    %180 = vector.broadcast %cst_108 : f32 to vector<60x128xf32>
    %181 = arith.maximumf %179, %180 : vector<60x128xf32>
    %182 = math.absf %179 : vector<60x128xf32>
    %cst_109 = arith.constant 0.000000e+00 : f32
    %183 = vector.broadcast %cst_109 : f32 to vector<60x128xf32>
    %184 = arith.subf %183, %182 : vector<60x128xf32>
    %185 = math.exp %184 : vector<60x128xf32>
    %cst_110 = arith.constant 1.000000e+00 : f32
    %186 = vector.broadcast %cst_110 : f32 to vector<60x128xf32>
    %187 = arith.addf %186, %185 : vector<60x128xf32>
    %188 = math.log %187 : vector<60x128xf32>
    %189 = arith.addf %181, %188 : vector<60x128xf32>
    %c1_111 = arith.constant 1 : index
    %c0_112 = arith.constant 0 : index
    %c0_113 = arith.constant 0 : index
    %190 = vector.load %arg13[%c1_111, %c0_112, %c0_113] : memref<5x1x128xf32, #tpu.memory_space<vmem>>, vector<1x1x128xf32>
    %191 = vector.shape_cast %190 : vector<1x1x128xf32> to vector<1x128xf32>
    %192 = vector.broadcast %191 : vector<1x128xf32> to vector<60x128xf32>
    %193 = arith.mulf %177, %192 : vector<60x128xf32>
    %c1_114 = arith.constant 1 : index
    %c0_115 = arith.constant 0 : index
    %c0_116 = arith.constant 0 : index
    %194 = vector.load %arg14[%c1_114, %c0_115, %c0_116] : memref<5x1x128xf32, #tpu.memory_space<vmem>>, vector<1x1x128xf32>
    %195 = vector.shape_cast %194 : vector<1x1x128xf32> to vector<1x128xf32>
    %196 = vector.broadcast %195 : vector<1x128xf32> to vector<60x128xf32>
    %197 = arith.mulf %189, %196 : vector<60x128xf32>
    %198 = arith.addf %193, %197 : vector<60x128xf32>
    %cst_117 = arith.constant dense<0.000000e+00> : vector<60x4xf32>
    %199 = tpu.matmul %198, %42, %cst_117 {dimension_numbers = #tpu.dot_dimension_numbers<[1], [0], [0], [1], [0, 0, 1, 1], [], []>} : vector<60x128xf32>, vector<128x4xf32>, vector<60x4xf32> -> vector<60x4xf32>
    %cst_118 = arith.constant 0.000000e+00 : f32
    %200 = vector.broadcast %cst_118 : f32 to vector<60x4xf32>
    %201 = arith.maximumf %199, %200 : vector<60x4xf32>
    %202 = math.absf %199 : vector<60x4xf32>
    %cst_119 = arith.constant 0.000000e+00 : f32
    %203 = vector.broadcast %cst_119 : f32 to vector<60x4xf32>
    %204 = arith.subf %203, %202 : vector<60x4xf32>
    %205 = math.exp %204 : vector<60x4xf32>
    %cst_120 = arith.constant 1.000000e+00 : f32
    %206 = vector.broadcast %cst_120 : f32 to vector<60x4xf32>
    %207 = arith.addf %206, %205 : vector<60x4xf32>
    %208 = math.log %207 : vector<60x4xf32>
    %209 = arith.addf %201, %208 : vector<60x4xf32>
    %c1_121 = arith.constant 1 : index
    %c0_122 = arith.constant 0 : index
    %c0_123 = arith.constant 0 : index
    %210 = vector.load %arg15[%c1_121, %c0_122, %c0_123] : memref<5x1x4xf32, #tpu.memory_space<vmem>>, vector<1x1x4xf32>
    %211 = vector.shape_cast %210 : vector<1x1x4xf32> to vector<1x4xf32>
    %212 = vector.broadcast %211 : vector<1x4xf32> to vector<60x4xf32>
    %213 = arith.mulf %209, %212 : vector<60x4xf32>
    %c1_124 = arith.constant 1 : index
    %c0_125 = arith.constant 0 : index
    %c0_126 = arith.constant 0 : index
    %214 = vector.load %arg16[%c1_124, %c0_125, %c0_126] : memref<5x1x4xf32, #tpu.memory_space<vmem>>, vector<1x1x4xf32>
    %215 = vector.shape_cast %214 : vector<1x1x4xf32> to vector<1x4xf32>
    %216 = vector.broadcast %215 : vector<1x4xf32> to vector<60x4xf32>
    %217 = arith.addf %213, %216 : vector<60x4xf32>
    %cst_127 = arith.constant 0.000000e+00 : f32
    %218 = vector.broadcast %cst_127 : f32 to vector<60x4xf32>
    %219 = arith.maximumf %217, %218 : vector<60x4xf32>
    %220 = math.absf %217 : vector<60x4xf32>
    %cst_128 = arith.constant 0.000000e+00 : f32
    %221 = vector.broadcast %cst_128 : f32 to vector<60x4xf32>
    %222 = arith.subf %221, %220 : vector<60x4xf32>
    %223 = math.exp %222 : vector<60x4xf32>
    %cst_129 = arith.constant 1.000000e+00 : f32
    %224 = vector.broadcast %cst_129 : f32 to vector<60x4xf32>
    %225 = arith.addf %224, %223 : vector<60x4xf32>
    %226 = math.log %225 : vector<60x4xf32>
    %227 = arith.addf %219, %226 : vector<60x4xf32>
    %228 = tpu.transpose %227, [1, 0] : vector<60x4xf32> -> vector<4x60xf32>
    %229 = vector.shape_cast %228 : vector<4x60xf32> to vector<4x1x60xf32>
    %230 = vector.shape_cast %33 : vector<12x60xf32> to vector<1x12x60xf32>
    %231 = vector.broadcast %229 : vector<4x1x60xf32> to vector<4x12x60xf32>
    %232 = vector.broadcast %230 : vector<1x12x60xf32> to vector<4x12x60xf32>
    %233 = arith.addf %231, %232 : vector<4x12x60xf32>
    %cst_130 = arith.constant dense<0xFF800000> : vector<4x12xf32>
    %234 = vector.multi_reduction <maximumf>, %233, %cst_130 [2] : vector<4x12x60xf32> to vector<4x12xf32>
    %235 = tpu.transpose %234, [1, 0] : vector<4x12xf32> -> vector<12x4xf32>
    %cst_131 = arith.constant dense<0.000000e+00> : vector<60x4xf32>
    %236 = tpu.matmul %27, %235, %cst_131 {dimension_numbers = #tpu.dot_dimension_numbers<[1], [0], [0], [1], [0, 0, 1, 1], [], []>} : vector<60x12xf32>, vector<12x4xf32>, vector<60x4xf32> -> vector<60x4xf32>
    %237 = arith.subf %227, %236 : vector<60x4xf32>
    %238 = math.exp %237 : vector<60x4xf32>
    %cst_132 = arith.constant dense<0.000000e+00> : vector<12x4xf32>
    %239 = tpu.matmul %29, %238, %cst_132 {dimension_numbers = #tpu.dot_dimension_numbers<[1], [0], [0], [1], [0, 0, 1, 1], [], []>} : vector<12x60xf32>, vector<60x4xf32>, vector<12x4xf32> -> vector<12x4xf32>
    %cst_133 = arith.constant 1.000000e-16 : f32
    %240 = vector.broadcast %cst_133 : f32 to vector<12x4xf32>
    %241 = arith.addf %239, %240 : vector<12x4xf32>
    %cst_134 = arith.constant dense<0.000000e+00> : vector<60x4xf32>
    %242 = tpu.matmul %27, %241, %cst_134 {dimension_numbers = #tpu.dot_dimension_numbers<[1], [0], [0], [1], [0, 0, 1, 1], [], []>} : vector<60x12xf32>, vector<12x4xf32>, vector<60x4xf32> -> vector<60x4xf32>
    %243 = tpu.reciprocal %242 {approx = true} : vector<60x4xf32> -> vector<60x4xf32>
    %244 = arith.mulf %238, %243 : vector<60x4xf32>
    %cst_135 = arith.constant dense<0.000000e+00> : vector<60x128xf32>
    %245 = tpu.matmul %244, %41, %cst_135 {dimension_numbers = #tpu.dot_dimension_numbers<[1], [0], [0], [1], [0, 0, 1, 1], [], []>} : vector<60x4xf32>, vector<4x128xf32>, vector<60x128xf32> -> vector<60x128xf32>
    %246 = arith.mulf %189, %245 : vector<60x128xf32>
    %cst_136 = arith.constant dense<0.000000e+00> : vector<12x128xf32>
    %247 = tpu.matmul %29, %246, %cst_136 {dimension_numbers = #tpu.dot_dimension_numbers<[1], [0], [0], [1], [0, 0, 1, 1], [], []>} : vector<12x60xf32>, vector<60x128xf32>, vector<12x128xf32> -> vector<12x128xf32>
    %cst_137 = arith.constant dense<0.000000e+00> : vector<12x32xf32>
    %248 = tpu.matmul %247, %40, %cst_137 {dimension_numbers = #tpu.dot_dimension_numbers<[1], [0], [0], [1], [0, 0, 1, 1], [], []>} : vector<12x128xf32>, vector<128x32xf32>, vector<12x32xf32> -> vector<12x32xf32>
    %c1_138 = arith.constant 1 : index
    %c0_139 = arith.constant 0 : index
    %c0_140 = arith.constant 0 : index
    %249 = vector.load %arg17[%c1_138, %c0_139, %c0_140] : memref<5x1x32xf32, #tpu.memory_space<vmem>>, vector<1x1x32xf32>
    %250 = vector.shape_cast %249 : vector<1x1x32xf32> to vector<1x32xf32>
    %251 = vector.broadcast %250 : vector<1x32xf32> to vector<12x32xf32>
    %252 = arith.addf %248, %251 : vector<12x32xf32>
    %cst_141 = arith.constant dense<0.000000e+00> : vector<12x10xf32>
    %253 = tpu.matmul %252, %43, %cst_141 {dimension_numbers = #tpu.dot_dimension_numbers<[1], [0], [0], [1], [0, 0, 1, 1], [], []>} : vector<12x32xf32>, vector<32x10xf32>, vector<12x10xf32> -> vector<12x10xf32>
    %254 = vector.broadcast %44 : vector<1x10xf32> to vector<12x10xf32>
    %255 = arith.addf %253, %254 : vector<12x10xf32>
    %cst_142 = arith.constant dense<0xFF800000> : vector<12xf32>
    %256 = vector.multi_reduction <maximumf>, %255, %cst_142 [1] : vector<12x10xf32> to vector<12xf32>
    %257 = vector.shape_cast %256 : vector<12xf32> to vector<12x1xf32>
    %258 = vector.broadcast %257 : vector<12x1xf32> to vector<12x10xf32>
    %259 = arith.subf %255, %258 : vector<12x10xf32>
    %260 = math.exp %259 : vector<12x10xf32>
    %cst_143 = arith.constant dense<0.000000e+00> : vector<12xf32>
    %261 = vector.multi_reduction <add>, %260, %cst_143 [1] : vector<12x10xf32> to vector<12xf32>
    %262 = vector.shape_cast %261 : vector<12xf32> to vector<12x1xf32>
    %263 = tpu.reciprocal %262 {approx = true} : vector<12x1xf32> -> vector<12x1xf32>
    %264 = vector.broadcast %263 : vector<12x1xf32> to vector<12x10xf32>
    %265 = arith.mulf %260, %264 : vector<12x10xf32>
    %cst_144 = arith.constant dense<0.000000e+00> : vector<12x32xf32>
    %266 = tpu.matmul %265, %45, %cst_144 {dimension_numbers = #tpu.dot_dimension_numbers<[1], [0], [0], [1], [0, 0, 1, 1], [], []>} : vector<12x10xf32>, vector<10x32xf32>, vector<12x32xf32> -> vector<12x32xf32>
    %cst_145 = arith.constant 1.000000e+00 : f32
    %267 = vector.broadcast %cst_145 : f32 to vector<12x32xf32>
    %268 = arith.addf %267, %266 : vector<12x32xf32>
    %269 = arith.mulf %252, %268 : vector<12x32xf32>
    %270 = vector.broadcast %46 : vector<1x32xf32> to vector<12x32xf32>
    %271 = arith.addf %269, %270 : vector<12x32xf32>
    %272 = arith.addf %271, %159 : vector<12x32xf32>
    %c2 = arith.constant 2 : index
    %c0_146 = arith.constant 0 : index
    %c0_147 = arith.constant 0 : index
    %273 = vector.load %arg11[%c2, %c0_146, %c0_147] : memref<5x32x128xf32, #tpu.memory_space<vmem>>, vector<1x32x128xf32>
    %274 = vector.shape_cast %273 : vector<1x32x128xf32> to vector<32x128xf32>
    %cst_148 = arith.constant dense<0.000000e+00> : vector<12x128xf32>
    %275 = tpu.matmul %272, %274, %cst_148 {dimension_numbers = #tpu.dot_dimension_numbers<[1], [0], [0], [1], [0, 0, 1, 1], [], []>} : vector<12x32xf32>, vector<32x128xf32>, vector<12x128xf32> -> vector<12x128xf32>
    %c2_149 = arith.constant 2 : index
    %c0_150 = arith.constant 0 : index
    %c0_151 = arith.constant 0 : index
    %276 = vector.load %arg12[%c2_149, %c0_150, %c0_151] : memref<5x32x128xf32, #tpu.memory_space<vmem>>, vector<1x32x128xf32>
    %277 = vector.shape_cast %276 : vector<1x32x128xf32> to vector<32x128xf32>
    %cst_152 = arith.constant dense<0.000000e+00> : vector<60x128xf32>
    %278 = tpu.matmul %26, %277, %cst_152 {dimension_numbers = #tpu.dot_dimension_numbers<[1], [0], [0], [1], [0, 0, 1, 1], [], []>} : vector<60x32xf32>, vector<32x128xf32>, vector<60x128xf32> -> vector<60x128xf32>
    %cst_153 = arith.constant dense<0.000000e+00> : vector<60x128xf32>
    %279 = tpu.matmul %27, %275, %cst_153 {dimension_numbers = #tpu.dot_dimension_numbers<[1], [0], [0], [1], [0, 0, 1, 1], [], []>} : vector<60x12xf32>, vector<12x128xf32>, vector<60x128xf32> -> vector<60x128xf32>
    %280 = arith.addf %279, %278 : vector<60x128xf32>
    %cst_154 = arith.constant 0.000000e+00 : f32
    %281 = vector.broadcast %cst_154 : f32 to vector<60x128xf32>
    %282 = arith.maximumf %280, %281 : vector<60x128xf32>
    %283 = math.absf %280 : vector<60x128xf32>
    %cst_155 = arith.constant 0.000000e+00 : f32
    %284 = vector.broadcast %cst_155 : f32 to vector<60x128xf32>
    %285 = arith.subf %284, %283 : vector<60x128xf32>
    %286 = math.exp %285 : vector<60x128xf32>
    %cst_156 = arith.constant 1.000000e+00 : f32
    %287 = vector.broadcast %cst_156 : f32 to vector<60x128xf32>
    %288 = arith.addf %287, %286 : vector<60x128xf32>
    %289 = math.log %288 : vector<60x128xf32>
    %290 = arith.addf %282, %289 : vector<60x128xf32>
    %cst_157 = arith.constant dense<0.000000e+00> : vector<60x128xf32>
    %291 = tpu.matmul %28, %275, %cst_157 {dimension_numbers = #tpu.dot_dimension_numbers<[1], [0], [0], [1], [0, 0, 1, 1], [], []>} : vector<60x12xf32>, vector<12x128xf32>, vector<60x128xf32> -> vector<60x128xf32>
    %292 = arith.addf %291, %278 : vector<60x128xf32>
    %cst_158 = arith.constant 0.000000e+00 : f32
    %293 = vector.broadcast %cst_158 : f32 to vector<60x128xf32>
    %294 = arith.maximumf %292, %293 : vector<60x128xf32>
    %295 = math.absf %292 : vector<60x128xf32>
    %cst_159 = arith.constant 0.000000e+00 : f32
    %296 = vector.broadcast %cst_159 : f32 to vector<60x128xf32>
    %297 = arith.subf %296, %295 : vector<60x128xf32>
    %298 = math.exp %297 : vector<60x128xf32>
    %cst_160 = arith.constant 1.000000e+00 : f32
    %299 = vector.broadcast %cst_160 : f32 to vector<60x128xf32>
    %300 = arith.addf %299, %298 : vector<60x128xf32>
    %301 = math.log %300 : vector<60x128xf32>
    %302 = arith.addf %294, %301 : vector<60x128xf32>
    %c2_161 = arith.constant 2 : index
    %c0_162 = arith.constant 0 : index
    %c0_163 = arith.constant 0 : index
    %303 = vector.load %arg13[%c2_161, %c0_162, %c0_163] : memref<5x1x128xf32, #tpu.memory_space<vmem>>, vector<1x1x128xf32>
    %304 = vector.shape_cast %303 : vector<1x1x128xf32> to vector<1x128xf32>
    %305 = vector.broadcast %304 : vector<1x128xf32> to vector<60x128xf32>
    %306 = arith.mulf %290, %305 : vector<60x128xf32>
    %c2_164 = arith.constant 2 : index
    %c0_165 = arith.constant 0 : index
    %c0_166 = arith.constant 0 : index
    %307 = vector.load %arg14[%c2_164, %c0_165, %c0_166] : memref<5x1x128xf32, #tpu.memory_space<vmem>>, vector<1x1x128xf32>
    %308 = vector.shape_cast %307 : vector<1x1x128xf32> to vector<1x128xf32>
    %309 = vector.broadcast %308 : vector<1x128xf32> to vector<60x128xf32>
    %310 = arith.mulf %302, %309 : vector<60x128xf32>
    %311 = arith.addf %306, %310 : vector<60x128xf32>
    %cst_167 = arith.constant dense<0.000000e+00> : vector<60x4xf32>
    %312 = tpu.matmul %311, %42, %cst_167 {dimension_numbers = #tpu.dot_dimension_numbers<[1], [0], [0], [1], [0, 0, 1, 1], [], []>} : vector<60x128xf32>, vector<128x4xf32>, vector<60x4xf32> -> vector<60x4xf32>
    %cst_168 = arith.constant 0.000000e+00 : f32
    %313 = vector.broadcast %cst_168 : f32 to vector<60x4xf32>
    %314 = arith.maximumf %312, %313 : vector<60x4xf32>
    %315 = math.absf %312 : vector<60x4xf32>
    %cst_169 = arith.constant 0.000000e+00 : f32
    %316 = vector.broadcast %cst_169 : f32 to vector<60x4xf32>
    %317 = arith.subf %316, %315 : vector<60x4xf32>
    %318 = math.exp %317 : vector<60x4xf32>
    %cst_170 = arith.constant 1.000000e+00 : f32
    %319 = vector.broadcast %cst_170 : f32 to vector<60x4xf32>
    %320 = arith.addf %319, %318 : vector<60x4xf32>
    %321 = math.log %320 : vector<60x4xf32>
    %322 = arith.addf %314, %321 : vector<60x4xf32>
    %c2_171 = arith.constant 2 : index
    %c0_172 = arith.constant 0 : index
    %c0_173 = arith.constant 0 : index
    %323 = vector.load %arg15[%c2_171, %c0_172, %c0_173] : memref<5x1x4xf32, #tpu.memory_space<vmem>>, vector<1x1x4xf32>
    %324 = vector.shape_cast %323 : vector<1x1x4xf32> to vector<1x4xf32>
    %325 = vector.broadcast %324 : vector<1x4xf32> to vector<60x4xf32>
    %326 = arith.mulf %322, %325 : vector<60x4xf32>
    %c2_174 = arith.constant 2 : index
    %c0_175 = arith.constant 0 : index
    %c0_176 = arith.constant 0 : index
    %327 = vector.load %arg16[%c2_174, %c0_175, %c0_176] : memref<5x1x4xf32, #tpu.memory_space<vmem>>, vector<1x1x4xf32>
    %328 = vector.shape_cast %327 : vector<1x1x4xf32> to vector<1x4xf32>
    %329 = vector.broadcast %328 : vector<1x4xf32> to vector<60x4xf32>
    %330 = arith.addf %326, %329 : vector<60x4xf32>
    %cst_177 = arith.constant 0.000000e+00 : f32
    %331 = vector.broadcast %cst_177 : f32 to vector<60x4xf32>
    %332 = arith.maximumf %330, %331 : vector<60x4xf32>
    %333 = math.absf %330 : vector<60x4xf32>
    %cst_178 = arith.constant 0.000000e+00 : f32
    %334 = vector.broadcast %cst_178 : f32 to vector<60x4xf32>
    %335 = arith.subf %334, %333 : vector<60x4xf32>
    %336 = math.exp %335 : vector<60x4xf32>
    %cst_179 = arith.constant 1.000000e+00 : f32
    %337 = vector.broadcast %cst_179 : f32 to vector<60x4xf32>
    %338 = arith.addf %337, %336 : vector<60x4xf32>
    %339 = math.log %338 : vector<60x4xf32>
    %340 = arith.addf %332, %339 : vector<60x4xf32>
    %341 = tpu.transpose %340, [1, 0] : vector<60x4xf32> -> vector<4x60xf32>
    %342 = vector.shape_cast %341 : vector<4x60xf32> to vector<4x1x60xf32>
    %343 = vector.shape_cast %33 : vector<12x60xf32> to vector<1x12x60xf32>
    %344 = vector.broadcast %342 : vector<4x1x60xf32> to vector<4x12x60xf32>
    %345 = vector.broadcast %343 : vector<1x12x60xf32> to vector<4x12x60xf32>
    %346 = arith.addf %344, %345 : vector<4x12x60xf32>
    %cst_180 = arith.constant dense<0xFF800000> : vector<4x12xf32>
    %347 = vector.multi_reduction <maximumf>, %346, %cst_180 [2] : vector<4x12x60xf32> to vector<4x12xf32>
    %348 = tpu.transpose %347, [1, 0] : vector<4x12xf32> -> vector<12x4xf32>
    %cst_181 = arith.constant dense<0.000000e+00> : vector<60x4xf32>
    %349 = tpu.matmul %27, %348, %cst_181 {dimension_numbers = #tpu.dot_dimension_numbers<[1], [0], [0], [1], [0, 0, 1, 1], [], []>} : vector<60x12xf32>, vector<12x4xf32>, vector<60x4xf32> -> vector<60x4xf32>
    %350 = arith.subf %340, %349 : vector<60x4xf32>
    %351 = math.exp %350 : vector<60x4xf32>
    %cst_182 = arith.constant dense<0.000000e+00> : vector<12x4xf32>
    %352 = tpu.matmul %29, %351, %cst_182 {dimension_numbers = #tpu.dot_dimension_numbers<[1], [0], [0], [1], [0, 0, 1, 1], [], []>} : vector<12x60xf32>, vector<60x4xf32>, vector<12x4xf32> -> vector<12x4xf32>
    %cst_183 = arith.constant 1.000000e-16 : f32
    %353 = vector.broadcast %cst_183 : f32 to vector<12x4xf32>
    %354 = arith.addf %352, %353 : vector<12x4xf32>
    %cst_184 = arith.constant dense<0.000000e+00> : vector<60x4xf32>
    %355 = tpu.matmul %27, %354, %cst_184 {dimension_numbers = #tpu.dot_dimension_numbers<[1], [0], [0], [1], [0, 0, 1, 1], [], []>} : vector<60x12xf32>, vector<12x4xf32>, vector<60x4xf32> -> vector<60x4xf32>
    %356 = tpu.reciprocal %355 {approx = true} : vector<60x4xf32> -> vector<60x4xf32>
    %357 = arith.mulf %351, %356 : vector<60x4xf32>
    %cst_185 = arith.constant dense<0.000000e+00> : vector<60x128xf32>
    %358 = tpu.matmul %357, %41, %cst_185 {dimension_numbers = #tpu.dot_dimension_numbers<[1], [0], [0], [1], [0, 0, 1, 1], [], []>} : vector<60x4xf32>, vector<4x128xf32>, vector<60x128xf32> -> vector<60x128xf32>
    %359 = arith.mulf %302, %358 : vector<60x128xf32>
    %cst_186 = arith.constant dense<0.000000e+00> : vector<12x128xf32>
    %360 = tpu.matmul %29, %359, %cst_186 {dimension_numbers = #tpu.dot_dimension_numbers<[1], [0], [0], [1], [0, 0, 1, 1], [], []>} : vector<12x60xf32>, vector<60x128xf32>, vector<12x128xf32> -> vector<12x128xf32>
    %cst_187 = arith.constant dense<0.000000e+00> : vector<12x32xf32>
    %361 = tpu.matmul %360, %40, %cst_187 {dimension_numbers = #tpu.dot_dimension_numbers<[1], [0], [0], [1], [0, 0, 1, 1], [], []>} : vector<12x128xf32>, vector<128x32xf32>, vector<12x32xf32> -> vector<12x32xf32>
    %c2_188 = arith.constant 2 : index
    %c0_189 = arith.constant 0 : index
    %c0_190 = arith.constant 0 : index
    %362 = vector.load %arg17[%c2_188, %c0_189, %c0_190] : memref<5x1x32xf32, #tpu.memory_space<vmem>>, vector<1x1x32xf32>
    %363 = vector.shape_cast %362 : vector<1x1x32xf32> to vector<1x32xf32>
    %364 = vector.broadcast %363 : vector<1x32xf32> to vector<12x32xf32>
    %365 = arith.addf %361, %364 : vector<12x32xf32>
    %cst_191 = arith.constant dense<0.000000e+00> : vector<12x10xf32>
    %366 = tpu.matmul %365, %43, %cst_191 {dimension_numbers = #tpu.dot_dimension_numbers<[1], [0], [0], [1], [0, 0, 1, 1], [], []>} : vector<12x32xf32>, vector<32x10xf32>, vector<12x10xf32> -> vector<12x10xf32>
    %367 = vector.broadcast %44 : vector<1x10xf32> to vector<12x10xf32>
    %368 = arith.addf %366, %367 : vector<12x10xf32>
    %cst_192 = arith.constant dense<0xFF800000> : vector<12xf32>
    %369 = vector.multi_reduction <maximumf>, %368, %cst_192 [1] : vector<12x10xf32> to vector<12xf32>
    %370 = vector.shape_cast %369 : vector<12xf32> to vector<12x1xf32>
    %371 = vector.broadcast %370 : vector<12x1xf32> to vector<12x10xf32>
    %372 = arith.subf %368, %371 : vector<12x10xf32>
    %373 = math.exp %372 : vector<12x10xf32>
    %cst_193 = arith.constant dense<0.000000e+00> : vector<12xf32>
    %374 = vector.multi_reduction <add>, %373, %cst_193 [1] : vector<12x10xf32> to vector<12xf32>
    %375 = vector.shape_cast %374 : vector<12xf32> to vector<12x1xf32>
    %376 = tpu.reciprocal %375 {approx = true} : vector<12x1xf32> -> vector<12x1xf32>
    %377 = vector.broadcast %376 : vector<12x1xf32> to vector<12x10xf32>
    %378 = arith.mulf %373, %377 : vector<12x10xf32>
    %cst_194 = arith.constant dense<0.000000e+00> : vector<12x32xf32>
    %379 = tpu.matmul %378, %45, %cst_194 {dimension_numbers = #tpu.dot_dimension_numbers<[1], [0], [0], [1], [0, 0, 1, 1], [], []>} : vector<12x10xf32>, vector<10x32xf32>, vector<12x32xf32> -> vector<12x32xf32>
    %cst_195 = arith.constant 1.000000e+00 : f32
    %380 = vector.broadcast %cst_195 : f32 to vector<12x32xf32>
    %381 = arith.addf %380, %379 : vector<12x32xf32>
    %382 = arith.mulf %365, %381 : vector<12x32xf32>
    %383 = vector.broadcast %46 : vector<1x32xf32> to vector<12x32xf32>
    %384 = arith.addf %382, %383 : vector<12x32xf32>
    %385 = arith.addf %384, %272 : vector<12x32xf32>
    %c3 = arith.constant 3 : index
    %c0_196 = arith.constant 0 : index
    %c0_197 = arith.constant 0 : index
    %386 = vector.load %arg11[%c3, %c0_196, %c0_197] : memref<5x32x128xf32, #tpu.memory_space<vmem>>, vector<1x32x128xf32>
    %387 = vector.shape_cast %386 : vector<1x32x128xf32> to vector<32x128xf32>
    %cst_198 = arith.constant dense<0.000000e+00> : vector<12x128xf32>
    %388 = tpu.matmul %385, %387, %cst_198 {dimension_numbers = #tpu.dot_dimension_numbers<[1], [0], [0], [1], [0, 0, 1, 1], [], []>} : vector<12x32xf32>, vector<32x128xf32>, vector<12x128xf32> -> vector<12x128xf32>
    %c3_199 = arith.constant 3 : index
    %c0_200 = arith.constant 0 : index
    %c0_201 = arith.constant 0 : index
    %389 = vector.load %arg12[%c3_199, %c0_200, %c0_201] : memref<5x32x128xf32, #tpu.memory_space<vmem>>, vector<1x32x128xf32>
    %390 = vector.shape_cast %389 : vector<1x32x128xf32> to vector<32x128xf32>
    %cst_202 = arith.constant dense<0.000000e+00> : vector<60x128xf32>
    %391 = tpu.matmul %26, %390, %cst_202 {dimension_numbers = #tpu.dot_dimension_numbers<[1], [0], [0], [1], [0, 0, 1, 1], [], []>} : vector<60x32xf32>, vector<32x128xf32>, vector<60x128xf32> -> vector<60x128xf32>
    %cst_203 = arith.constant dense<0.000000e+00> : vector<60x128xf32>
    %392 = tpu.matmul %27, %388, %cst_203 {dimension_numbers = #tpu.dot_dimension_numbers<[1], [0], [0], [1], [0, 0, 1, 1], [], []>} : vector<60x12xf32>, vector<12x128xf32>, vector<60x128xf32> -> vector<60x128xf32>
    %393 = arith.addf %392, %391 : vector<60x128xf32>
    %cst_204 = arith.constant 0.000000e+00 : f32
    %394 = vector.broadcast %cst_204 : f32 to vector<60x128xf32>
    %395 = arith.maximumf %393, %394 : vector<60x128xf32>
    %396 = math.absf %393 : vector<60x128xf32>
    %cst_205 = arith.constant 0.000000e+00 : f32
    %397 = vector.broadcast %cst_205 : f32 to vector<60x128xf32>
    %398 = arith.subf %397, %396 : vector<60x128xf32>
    %399 = math.exp %398 : vector<60x128xf32>
    %cst_206 = arith.constant 1.000000e+00 : f32
    %400 = vector.broadcast %cst_206 : f32 to vector<60x128xf32>
    %401 = arith.addf %400, %399 : vector<60x128xf32>
    %402 = math.log %401 : vector<60x128xf32>
    %403 = arith.addf %395, %402 : vector<60x128xf32>
    %cst_207 = arith.constant dense<0.000000e+00> : vector<60x128xf32>
    %404 = tpu.matmul %28, %388, %cst_207 {dimension_numbers = #tpu.dot_dimension_numbers<[1], [0], [0], [1], [0, 0, 1, 1], [], []>} : vector<60x12xf32>, vector<12x128xf32>, vector<60x128xf32> -> vector<60x128xf32>
    %405 = arith.addf %404, %391 : vector<60x128xf32>
    %cst_208 = arith.constant 0.000000e+00 : f32
    %406 = vector.broadcast %cst_208 : f32 to vector<60x128xf32>
    %407 = arith.maximumf %405, %406 : vector<60x128xf32>
    %408 = math.absf %405 : vector<60x128xf32>
    %cst_209 = arith.constant 0.000000e+00 : f32
    %409 = vector.broadcast %cst_209 : f32 to vector<60x128xf32>
    %410 = arith.subf %409, %408 : vector<60x128xf32>
    %411 = math.exp %410 : vector<60x128xf32>
    %cst_210 = arith.constant 1.000000e+00 : f32
    %412 = vector.broadcast %cst_210 : f32 to vector<60x128xf32>
    %413 = arith.addf %412, %411 : vector<60x128xf32>
    %414 = math.log %413 : vector<60x128xf32>
    %415 = arith.addf %407, %414 : vector<60x128xf32>
    %c3_211 = arith.constant 3 : index
    %c0_212 = arith.constant 0 : index
    %c0_213 = arith.constant 0 : index
    %416 = vector.load %arg13[%c3_211, %c0_212, %c0_213] : memref<5x1x128xf32, #tpu.memory_space<vmem>>, vector<1x1x128xf32>
    %417 = vector.shape_cast %416 : vector<1x1x128xf32> to vector<1x128xf32>
    %418 = vector.broadcast %417 : vector<1x128xf32> to vector<60x128xf32>
    %419 = arith.mulf %403, %418 : vector<60x128xf32>
    %c3_214 = arith.constant 3 : index
    %c0_215 = arith.constant 0 : index
    %c0_216 = arith.constant 0 : index
    %420 = vector.load %arg14[%c3_214, %c0_215, %c0_216] : memref<5x1x128xf32, #tpu.memory_space<vmem>>, vector<1x1x128xf32>
    %421 = vector.shape_cast %420 : vector<1x1x128xf32> to vector<1x128xf32>
    %422 = vector.broadcast %421 : vector<1x128xf32> to vector<60x128xf32>
    %423 = arith.mulf %415, %422 : vector<60x128xf32>
    %424 = arith.addf %419, %423 : vector<60x128xf32>
    %cst_217 = arith.constant dense<0.000000e+00> : vector<60x4xf32>
    %425 = tpu.matmul %424, %42, %cst_217 {dimension_numbers = #tpu.dot_dimension_numbers<[1], [0], [0], [1], [0, 0, 1, 1], [], []>} : vector<60x128xf32>, vector<128x4xf32>, vector<60x4xf32> -> vector<60x4xf32>
    %cst_218 = arith.constant 0.000000e+00 : f32
    %426 = vector.broadcast %cst_218 : f32 to vector<60x4xf32>
    %427 = arith.maximumf %425, %426 : vector<60x4xf32>
    %428 = math.absf %425 : vector<60x4xf32>
    %cst_219 = arith.constant 0.000000e+00 : f32
    %429 = vector.broadcast %cst_219 : f32 to vector<60x4xf32>
    %430 = arith.subf %429, %428 : vector<60x4xf32>
    %431 = math.exp %430 : vector<60x4xf32>
    %cst_220 = arith.constant 1.000000e+00 : f32
    %432 = vector.broadcast %cst_220 : f32 to vector<60x4xf32>
    %433 = arith.addf %432, %431 : vector<60x4xf32>
    %434 = math.log %433 : vector<60x4xf32>
    %435 = arith.addf %427, %434 : vector<60x4xf32>
    %c3_221 = arith.constant 3 : index
    %c0_222 = arith.constant 0 : index
    %c0_223 = arith.constant 0 : index
    %436 = vector.load %arg15[%c3_221, %c0_222, %c0_223] : memref<5x1x4xf32, #tpu.memory_space<vmem>>, vector<1x1x4xf32>
    %437 = vector.shape_cast %436 : vector<1x1x4xf32> to vector<1x4xf32>
    %438 = vector.broadcast %437 : vector<1x4xf32> to vector<60x4xf32>
    %439 = arith.mulf %435, %438 : vector<60x4xf32>
    %c3_224 = arith.constant 3 : index
    %c0_225 = arith.constant 0 : index
    %c0_226 = arith.constant 0 : index
    %440 = vector.load %arg16[%c3_224, %c0_225, %c0_226] : memref<5x1x4xf32, #tpu.memory_space<vmem>>, vector<1x1x4xf32>
    %441 = vector.shape_cast %440 : vector<1x1x4xf32> to vector<1x4xf32>
    %442 = vector.broadcast %441 : vector<1x4xf32> to vector<60x4xf32>
    %443 = arith.addf %439, %442 : vector<60x4xf32>
    %cst_227 = arith.constant 0.000000e+00 : f32
    %444 = vector.broadcast %cst_227 : f32 to vector<60x4xf32>
    %445 = arith.maximumf %443, %444 : vector<60x4xf32>
    %446 = math.absf %443 : vector<60x4xf32>
    %cst_228 = arith.constant 0.000000e+00 : f32
    %447 = vector.broadcast %cst_228 : f32 to vector<60x4xf32>
    %448 = arith.subf %447, %446 : vector<60x4xf32>
    %449 = math.exp %448 : vector<60x4xf32>
    %cst_229 = arith.constant 1.000000e+00 : f32
    %450 = vector.broadcast %cst_229 : f32 to vector<60x4xf32>
    %451 = arith.addf %450, %449 : vector<60x4xf32>
    %452 = math.log %451 : vector<60x4xf32>
    %453 = arith.addf %445, %452 : vector<60x4xf32>
    %454 = tpu.transpose %453, [1, 0] : vector<60x4xf32> -> vector<4x60xf32>
    %455 = vector.shape_cast %454 : vector<4x60xf32> to vector<4x1x60xf32>
    %456 = vector.shape_cast %33 : vector<12x60xf32> to vector<1x12x60xf32>
    %457 = vector.broadcast %455 : vector<4x1x60xf32> to vector<4x12x60xf32>
    %458 = vector.broadcast %456 : vector<1x12x60xf32> to vector<4x12x60xf32>
    %459 = arith.addf %457, %458 : vector<4x12x60xf32>
    %cst_230 = arith.constant dense<0xFF800000> : vector<4x12xf32>
    %460 = vector.multi_reduction <maximumf>, %459, %cst_230 [2] : vector<4x12x60xf32> to vector<4x12xf32>
    %461 = tpu.transpose %460, [1, 0] : vector<4x12xf32> -> vector<12x4xf32>
    %cst_231 = arith.constant dense<0.000000e+00> : vector<60x4xf32>
    %462 = tpu.matmul %27, %461, %cst_231 {dimension_numbers = #tpu.dot_dimension_numbers<[1], [0], [0], [1], [0, 0, 1, 1], [], []>} : vector<60x12xf32>, vector<12x4xf32>, vector<60x4xf32> -> vector<60x4xf32>
    %463 = arith.subf %453, %462 : vector<60x4xf32>
    %464 = math.exp %463 : vector<60x4xf32>
    %cst_232 = arith.constant dense<0.000000e+00> : vector<12x4xf32>
    %465 = tpu.matmul %29, %464, %cst_232 {dimension_numbers = #tpu.dot_dimension_numbers<[1], [0], [0], [1], [0, 0, 1, 1], [], []>} : vector<12x60xf32>, vector<60x4xf32>, vector<12x4xf32> -> vector<12x4xf32>
    %cst_233 = arith.constant 1.000000e-16 : f32
    %466 = vector.broadcast %cst_233 : f32 to vector<12x4xf32>
    %467 = arith.addf %465, %466 : vector<12x4xf32>
    %cst_234 = arith.constant dense<0.000000e+00> : vector<60x4xf32>
    %468 = tpu.matmul %27, %467, %cst_234 {dimension_numbers = #tpu.dot_dimension_numbers<[1], [0], [0], [1], [0, 0, 1, 1], [], []>} : vector<60x12xf32>, vector<12x4xf32>, vector<60x4xf32> -> vector<60x4xf32>
    %469 = tpu.reciprocal %468 {approx = true} : vector<60x4xf32> -> vector<60x4xf32>
    %470 = arith.mulf %464, %469 : vector<60x4xf32>
    %cst_235 = arith.constant dense<0.000000e+00> : vector<60x128xf32>
    %471 = tpu.matmul %470, %41, %cst_235 {dimension_numbers = #tpu.dot_dimension_numbers<[1], [0], [0], [1], [0, 0, 1, 1], [], []>} : vector<60x4xf32>, vector<4x128xf32>, vector<60x128xf32> -> vector<60x128xf32>
    %472 = arith.mulf %415, %471 : vector<60x128xf32>
    %cst_236 = arith.constant dense<0.000000e+00> : vector<12x128xf32>
    %473 = tpu.matmul %29, %472, %cst_236 {dimension_numbers = #tpu.dot_dimension_numbers<[1], [0], [0], [1], [0, 0, 1, 1], [], []>} : vector<12x60xf32>, vector<60x128xf32>, vector<12x128xf32> -> vector<12x128xf32>
    %cst_237 = arith.constant dense<0.000000e+00> : vector<12x32xf32>
    %474 = tpu.matmul %473, %40, %cst_237 {dimension_numbers = #tpu.dot_dimension_numbers<[1], [0], [0], [1], [0, 0, 1, 1], [], []>} : vector<12x128xf32>, vector<128x32xf32>, vector<12x32xf32> -> vector<12x32xf32>
    %c3_238 = arith.constant 3 : index
    %c0_239 = arith.constant 0 : index
    %c0_240 = arith.constant 0 : index
    %475 = vector.load %arg17[%c3_238, %c0_239, %c0_240] : memref<5x1x32xf32, #tpu.memory_space<vmem>>, vector<1x1x32xf32>
    %476 = vector.shape_cast %475 : vector<1x1x32xf32> to vector<1x32xf32>
    %477 = vector.broadcast %476 : vector<1x32xf32> to vector<12x32xf32>
    %478 = arith.addf %474, %477 : vector<12x32xf32>
    %cst_241 = arith.constant dense<0.000000e+00> : vector<12x10xf32>
    %479 = tpu.matmul %478, %43, %cst_241 {dimension_numbers = #tpu.dot_dimension_numbers<[1], [0], [0], [1], [0, 0, 1, 1], [], []>} : vector<12x32xf32>, vector<32x10xf32>, vector<12x10xf32> -> vector<12x10xf32>
    %480 = vector.broadcast %44 : vector<1x10xf32> to vector<12x10xf32>
    %481 = arith.addf %479, %480 : vector<12x10xf32>
    %cst_242 = arith.constant dense<0xFF800000> : vector<12xf32>
    %482 = vector.multi_reduction <maximumf>, %481, %cst_242 [1] : vector<12x10xf32> to vector<12xf32>
    %483 = vector.shape_cast %482 : vector<12xf32> to vector<12x1xf32>
    %484 = vector.broadcast %483 : vector<12x1xf32> to vector<12x10xf32>
    %485 = arith.subf %481, %484 : vector<12x10xf32>
    %486 = math.exp %485 : vector<12x10xf32>
    %cst_243 = arith.constant dense<0.000000e+00> : vector<12xf32>
    %487 = vector.multi_reduction <add>, %486, %cst_243 [1] : vector<12x10xf32> to vector<12xf32>
    %488 = vector.shape_cast %487 : vector<12xf32> to vector<12x1xf32>
    %489 = tpu.reciprocal %488 {approx = true} : vector<12x1xf32> -> vector<12x1xf32>
    %490 = vector.broadcast %489 : vector<12x1xf32> to vector<12x10xf32>
    %491 = arith.mulf %486, %490 : vector<12x10xf32>
    %cst_244 = arith.constant dense<0.000000e+00> : vector<12x32xf32>
    %492 = tpu.matmul %491, %45, %cst_244 {dimension_numbers = #tpu.dot_dimension_numbers<[1], [0], [0], [1], [0, 0, 1, 1], [], []>} : vector<12x10xf32>, vector<10x32xf32>, vector<12x32xf32> -> vector<12x32xf32>
    %cst_245 = arith.constant 1.000000e+00 : f32
    %493 = vector.broadcast %cst_245 : f32 to vector<12x32xf32>
    %494 = arith.addf %493, %492 : vector<12x32xf32>
    %495 = arith.mulf %478, %494 : vector<12x32xf32>
    %496 = vector.broadcast %46 : vector<1x32xf32> to vector<12x32xf32>
    %497 = arith.addf %495, %496 : vector<12x32xf32>
    %498 = arith.addf %497, %385 : vector<12x32xf32>
    %c4 = arith.constant 4 : index
    %c0_246 = arith.constant 0 : index
    %c0_247 = arith.constant 0 : index
    %499 = vector.load %arg11[%c4, %c0_246, %c0_247] : memref<5x32x128xf32, #tpu.memory_space<vmem>>, vector<1x32x128xf32>
    %500 = vector.shape_cast %499 : vector<1x32x128xf32> to vector<32x128xf32>
    %cst_248 = arith.constant dense<0.000000e+00> : vector<12x128xf32>
    %501 = tpu.matmul %498, %500, %cst_248 {dimension_numbers = #tpu.dot_dimension_numbers<[1], [0], [0], [1], [0, 0, 1, 1], [], []>} : vector<12x32xf32>, vector<32x128xf32>, vector<12x128xf32> -> vector<12x128xf32>
    %c4_249 = arith.constant 4 : index
    %c0_250 = arith.constant 0 : index
    %c0_251 = arith.constant 0 : index
    %502 = vector.load %arg12[%c4_249, %c0_250, %c0_251] : memref<5x32x128xf32, #tpu.memory_space<vmem>>, vector<1x32x128xf32>
    %503 = vector.shape_cast %502 : vector<1x32x128xf32> to vector<32x128xf32>
    %cst_252 = arith.constant dense<0.000000e+00> : vector<60x128xf32>
    %504 = tpu.matmul %26, %503, %cst_252 {dimension_numbers = #tpu.dot_dimension_numbers<[1], [0], [0], [1], [0, 0, 1, 1], [], []>} : vector<60x32xf32>, vector<32x128xf32>, vector<60x128xf32> -> vector<60x128xf32>
    %cst_253 = arith.constant dense<0.000000e+00> : vector<60x128xf32>
    %505 = tpu.matmul %27, %501, %cst_253 {dimension_numbers = #tpu.dot_dimension_numbers<[1], [0], [0], [1], [0, 0, 1, 1], [], []>} : vector<60x12xf32>, vector<12x128xf32>, vector<60x128xf32> -> vector<60x128xf32>
    %506 = arith.addf %505, %504 : vector<60x128xf32>
    %cst_254 = arith.constant 0.000000e+00 : f32
    %507 = vector.broadcast %cst_254 : f32 to vector<60x128xf32>
    %508 = arith.maximumf %506, %507 : vector<60x128xf32>
    %509 = math.absf %506 : vector<60x128xf32>
    %cst_255 = arith.constant 0.000000e+00 : f32
    %510 = vector.broadcast %cst_255 : f32 to vector<60x128xf32>
    %511 = arith.subf %510, %509 : vector<60x128xf32>
    %512 = math.exp %511 : vector<60x128xf32>
    %cst_256 = arith.constant 1.000000e+00 : f32
    %513 = vector.broadcast %cst_256 : f32 to vector<60x128xf32>
    %514 = arith.addf %513, %512 : vector<60x128xf32>
    %515 = math.log %514 : vector<60x128xf32>
    %516 = arith.addf %508, %515 : vector<60x128xf32>
    %cst_257 = arith.constant dense<0.000000e+00> : vector<60x128xf32>
    %517 = tpu.matmul %28, %501, %cst_257 {dimension_numbers = #tpu.dot_dimension_numbers<[1], [0], [0], [1], [0, 0, 1, 1], [], []>} : vector<60x12xf32>, vector<12x128xf32>, vector<60x128xf32> -> vector<60x128xf32>
    %518 = arith.addf %517, %504 : vector<60x128xf32>
    %cst_258 = arith.constant 0.000000e+00 : f32
    %519 = vector.broadcast %cst_258 : f32 to vector<60x128xf32>
    %520 = arith.maximumf %518, %519 : vector<60x128xf32>
    %521 = math.absf %518 : vector<60x128xf32>
    %cst_259 = arith.constant 0.000000e+00 : f32
    %522 = vector.broadcast %cst_259 : f32 to vector<60x128xf32>
    %523 = arith.subf %522, %521 : vector<60x128xf32>
    %524 = math.exp %523 : vector<60x128xf32>
    %cst_260 = arith.constant 1.000000e+00 : f32
    %525 = vector.broadcast %cst_260 : f32 to vector<60x128xf32>
    %526 = arith.addf %525, %524 : vector<60x128xf32>
    %527 = math.log %526 : vector<60x128xf32>
    %528 = arith.addf %520, %527 : vector<60x128xf32>
    %c4_261 = arith.constant 4 : index
    %c0_262 = arith.constant 0 : index
    %c0_263 = arith.constant 0 : index
    %529 = vector.load %arg13[%c4_261, %c0_262, %c0_263] : memref<5x1x128xf32, #tpu.memory_space<vmem>>, vector<1x1x128xf32>
    %530 = vector.shape_cast %529 : vector<1x1x128xf32> to vector<1x128xf32>
    %531 = vector.broadcast %530 : vector<1x128xf32> to vector<60x128xf32>
    %532 = arith.mulf %516, %531 : vector<60x128xf32>
    %c4_264 = arith.constant 4 : index
    %c0_265 = arith.constant 0 : index
    %c0_266 = arith.constant 0 : index
    %533 = vector.load %arg14[%c4_264, %c0_265, %c0_266] : memref<5x1x128xf32, #tpu.memory_space<vmem>>, vector<1x1x128xf32>
    %534 = vector.shape_cast %533 : vector<1x1x128xf32> to vector<1x128xf32>
    %535 = vector.broadcast %534 : vector<1x128xf32> to vector<60x128xf32>
    %536 = arith.mulf %528, %535 : vector<60x128xf32>
    %537 = arith.addf %532, %536 : vector<60x128xf32>
    %cst_267 = arith.constant dense<0.000000e+00> : vector<60x4xf32>
    %538 = tpu.matmul %537, %42, %cst_267 {dimension_numbers = #tpu.dot_dimension_numbers<[1], [0], [0], [1], [0, 0, 1, 1], [], []>} : vector<60x128xf32>, vector<128x4xf32>, vector<60x4xf32> -> vector<60x4xf32>
    %cst_268 = arith.constant 0.000000e+00 : f32
    %539 = vector.broadcast %cst_268 : f32 to vector<60x4xf32>
    %540 = arith.maximumf %538, %539 : vector<60x4xf32>
    %541 = math.absf %538 : vector<60x4xf32>
    %cst_269 = arith.constant 0.000000e+00 : f32
    %542 = vector.broadcast %cst_269 : f32 to vector<60x4xf32>
    %543 = arith.subf %542, %541 : vector<60x4xf32>
    %544 = math.exp %543 : vector<60x4xf32>
    %cst_270 = arith.constant 1.000000e+00 : f32
    %545 = vector.broadcast %cst_270 : f32 to vector<60x4xf32>
    %546 = arith.addf %545, %544 : vector<60x4xf32>
    %547 = math.log %546 : vector<60x4xf32>
    %548 = arith.addf %540, %547 : vector<60x4xf32>
    %c4_271 = arith.constant 4 : index
    %c0_272 = arith.constant 0 : index
    %c0_273 = arith.constant 0 : index
    %549 = vector.load %arg15[%c4_271, %c0_272, %c0_273] : memref<5x1x4xf32, #tpu.memory_space<vmem>>, vector<1x1x4xf32>
    %550 = vector.shape_cast %549 : vector<1x1x4xf32> to vector<1x4xf32>
    %551 = vector.broadcast %550 : vector<1x4xf32> to vector<60x4xf32>
    %552 = arith.mulf %548, %551 : vector<60x4xf32>
    %c4_274 = arith.constant 4 : index
    %c0_275 = arith.constant 0 : index
    %c0_276 = arith.constant 0 : index
    %553 = vector.load %arg16[%c4_274, %c0_275, %c0_276] : memref<5x1x4xf32, #tpu.memory_space<vmem>>, vector<1x1x4xf32>
    %554 = vector.shape_cast %553 : vector<1x1x4xf32> to vector<1x4xf32>
    %555 = vector.broadcast %554 : vector<1x4xf32> to vector<60x4xf32>
    %556 = arith.addf %552, %555 : vector<60x4xf32>
    %cst_277 = arith.constant 0.000000e+00 : f32
    %557 = vector.broadcast %cst_277 : f32 to vector<60x4xf32>
    %558 = arith.maximumf %556, %557 : vector<60x4xf32>
    %559 = math.absf %556 : vector<60x4xf32>
    %cst_278 = arith.constant 0.000000e+00 : f32
    %560 = vector.broadcast %cst_278 : f32 to vector<60x4xf32>
    %561 = arith.subf %560, %559 : vector<60x4xf32>
    %562 = math.exp %561 : vector<60x4xf32>
    %cst_279 = arith.constant 1.000000e+00 : f32
    %563 = vector.broadcast %cst_279 : f32 to vector<60x4xf32>
    %564 = arith.addf %563, %562 : vector<60x4xf32>
    %565 = math.log %564 : vector<60x4xf32>
    %566 = arith.addf %558, %565 : vector<60x4xf32>
    %567 = tpu.transpose %566, [1, 0] : vector<60x4xf32> -> vector<4x60xf32>
    %568 = vector.shape_cast %567 : vector<4x60xf32> to vector<4x1x60xf32>
    %569 = vector.shape_cast %33 : vector<12x60xf32> to vector<1x12x60xf32>
    %570 = vector.broadcast %568 : vector<4x1x60xf32> to vector<4x12x60xf32>
    %571 = vector.broadcast %569 : vector<1x12x60xf32> to vector<4x12x60xf32>
    %572 = arith.addf %570, %571 : vector<4x12x60xf32>
    %cst_280 = arith.constant dense<0xFF800000> : vector<4x12xf32>
    %573 = vector.multi_reduction <maximumf>, %572, %cst_280 [2] : vector<4x12x60xf32> to vector<4x12xf32>
    %574 = tpu.transpose %573, [1, 0] : vector<4x12xf32> -> vector<12x4xf32>
    %cst_281 = arith.constant dense<0.000000e+00> : vector<60x4xf32>
    %575 = tpu.matmul %27, %574, %cst_281 {dimension_numbers = #tpu.dot_dimension_numbers<[1], [0], [0], [1], [0, 0, 1, 1], [], []>} : vector<60x12xf32>, vector<12x4xf32>, vector<60x4xf32> -> vector<60x4xf32>
    %576 = arith.subf %566, %575 : vector<60x4xf32>
    %577 = math.exp %576 : vector<60x4xf32>
    %cst_282 = arith.constant dense<0.000000e+00> : vector<12x4xf32>
    %578 = tpu.matmul %29, %577, %cst_282 {dimension_numbers = #tpu.dot_dimension_numbers<[1], [0], [0], [1], [0, 0, 1, 1], [], []>} : vector<12x60xf32>, vector<60x4xf32>, vector<12x4xf32> -> vector<12x4xf32>
    %cst_283 = arith.constant 1.000000e-16 : f32
    %579 = vector.broadcast %cst_283 : f32 to vector<12x4xf32>
    %580 = arith.addf %578, %579 : vector<12x4xf32>
    %cst_284 = arith.constant dense<0.000000e+00> : vector<60x4xf32>
    %581 = tpu.matmul %27, %580, %cst_284 {dimension_numbers = #tpu.dot_dimension_numbers<[1], [0], [0], [1], [0, 0, 1, 1], [], []>} : vector<60x12xf32>, vector<12x4xf32>, vector<60x4xf32> -> vector<60x4xf32>
    %582 = tpu.reciprocal %581 {approx = true} : vector<60x4xf32> -> vector<60x4xf32>
    %583 = arith.mulf %577, %582 : vector<60x4xf32>
    %cst_285 = arith.constant dense<0.000000e+00> : vector<60x128xf32>
    %584 = tpu.matmul %583, %41, %cst_285 {dimension_numbers = #tpu.dot_dimension_numbers<[1], [0], [0], [1], [0, 0, 1, 1], [], []>} : vector<60x4xf32>, vector<4x128xf32>, vector<60x128xf32> -> vector<60x128xf32>
    %585 = arith.mulf %528, %584 : vector<60x128xf32>
    %cst_286 = arith.constant dense<0.000000e+00> : vector<12x128xf32>
    %586 = tpu.matmul %29, %585, %cst_286 {dimension_numbers = #tpu.dot_dimension_numbers<[1], [0], [0], [1], [0, 0, 1, 1], [], []>} : vector<12x60xf32>, vector<60x128xf32>, vector<12x128xf32> -> vector<12x128xf32>
    %cst_287 = arith.constant dense<0.000000e+00> : vector<12x32xf32>
    %587 = tpu.matmul %586, %40, %cst_287 {dimension_numbers = #tpu.dot_dimension_numbers<[1], [0], [0], [1], [0, 0, 1, 1], [], []>} : vector<12x128xf32>, vector<128x32xf32>, vector<12x32xf32> -> vector<12x32xf32>
    %c4_288 = arith.constant 4 : index
    %c0_289 = arith.constant 0 : index
    %c0_290 = arith.constant 0 : index
    %588 = vector.load %arg17[%c4_288, %c0_289, %c0_290] : memref<5x1x32xf32, #tpu.memory_space<vmem>>, vector<1x1x32xf32>
    %589 = vector.shape_cast %588 : vector<1x1x32xf32> to vector<1x32xf32>
    %590 = vector.broadcast %589 : vector<1x32xf32> to vector<12x32xf32>
    %591 = arith.addf %587, %590 : vector<12x32xf32>
    %cst_291 = arith.constant dense<0.000000e+00> : vector<12x10xf32>
    %592 = tpu.matmul %591, %43, %cst_291 {dimension_numbers = #tpu.dot_dimension_numbers<[1], [0], [0], [1], [0, 0, 1, 1], [], []>} : vector<12x32xf32>, vector<32x10xf32>, vector<12x10xf32> -> vector<12x10xf32>
    %593 = vector.broadcast %44 : vector<1x10xf32> to vector<12x10xf32>
    %594 = arith.addf %592, %593 : vector<12x10xf32>
    %cst_292 = arith.constant dense<0xFF800000> : vector<12xf32>
    %595 = vector.multi_reduction <maximumf>, %594, %cst_292 [1] : vector<12x10xf32> to vector<12xf32>
    %596 = vector.shape_cast %595 : vector<12xf32> to vector<12x1xf32>
    %597 = vector.broadcast %596 : vector<12x1xf32> to vector<12x10xf32>
    %598 = arith.subf %594, %597 : vector<12x10xf32>
    %599 = math.exp %598 : vector<12x10xf32>
    %cst_293 = arith.constant dense<0.000000e+00> : vector<12xf32>
    %600 = vector.multi_reduction <add>, %599, %cst_293 [1] : vector<12x10xf32> to vector<12xf32>
    %601 = vector.shape_cast %600 : vector<12xf32> to vector<12x1xf32>
    %602 = tpu.reciprocal %601 {approx = true} : vector<12x1xf32> -> vector<12x1xf32>
    %603 = vector.broadcast %602 : vector<12x1xf32> to vector<12x10xf32>
    %604 = arith.mulf %599, %603 : vector<12x10xf32>
    %cst_294 = arith.constant dense<0.000000e+00> : vector<12x32xf32>
    %605 = tpu.matmul %604, %45, %cst_294 {dimension_numbers = #tpu.dot_dimension_numbers<[1], [0], [0], [1], [0, 0, 1, 1], [], []>} : vector<12x10xf32>, vector<10x32xf32>, vector<12x32xf32> -> vector<12x32xf32>
    %cst_295 = arith.constant 1.000000e+00 : f32
    %606 = vector.broadcast %cst_295 : f32 to vector<12x32xf32>
    %607 = arith.addf %606, %605 : vector<12x32xf32>
    %608 = arith.mulf %591, %607 : vector<12x32xf32>
    %609 = vector.broadcast %46 : vector<1x32xf32> to vector<12x32xf32>
    %610 = arith.addf %608, %609 : vector<12x32xf32>
    %611 = arith.addf %610, %498 : vector<12x32xf32>
    %c0_296 = arith.constant 0 : index
    %c0_297 = arith.constant 0 : index
    %612 = vector.load %arg26[%c0_296, %c0_297] : memref<32x32xf32, #tpu.memory_space<vmem>>, vector<32x32xf32>
    %cst_298 = arith.constant dense<0.000000e+00> : vector<12x32xf32>
    %613 = tpu.matmul %611, %612, %cst_298 {dimension_numbers = #tpu.dot_dimension_numbers<[1], [0], [0], [1], [0, 0, 1, 1], [], []>} : vector<12x32xf32>, vector<32x32xf32>, vector<12x32xf32> -> vector<12x32xf32>
    %c0_299 = arith.constant 0 : index
    %c0_300 = arith.constant 0 : index
    %614 = vector.load %arg25[%c0_299, %c0_300] : memref<12x107xf32, #tpu.memory_space<vmem>>, vector<12x107xf32>
    %c0_301 = arith.constant 0 : index
    %c0_302 = arith.constant 0 : index
    %615 = vector.load %arg27[%c0_301, %c0_302] : memref<107x32xf32, #tpu.memory_space<vmem>>, vector<107x32xf32>
    %cst_303 = arith.constant dense<0.000000e+00> : vector<12x32xf32>
    %616 = tpu.matmul %614, %615, %cst_303 {dimension_numbers = #tpu.dot_dimension_numbers<[1], [0], [0], [1], [0, 0, 1, 1], [], []>} : vector<12x107xf32>, vector<107x32xf32>, vector<12x32xf32> -> vector<12x32xf32>
    %617 = arith.addf %613, %616 : vector<12x32xf32>
    %c0_304 = arith.constant 0 : index
    %c0_305 = arith.constant 0 : index
    %618 = vector.load %arg28[%c0_304, %c0_305] : memref<1x32xf32, #tpu.memory_space<vmem>>, vector<1x32xf32>
    %619 = vector.broadcast %618 : vector<1x32xf32> to vector<12x32xf32>
    %620 = arith.addf %617, %619 : vector<12x32xf32>
    %cst_306 = arith.constant 0.000000e+00 : f32
    %621 = vector.broadcast %cst_306 : f32 to vector<12x32xf32>
    %622 = arith.maximumf %620, %621 : vector<12x32xf32>
    %623 = math.absf %620 : vector<12x32xf32>
    %cst_307 = arith.constant 0.000000e+00 : f32
    %624 = vector.broadcast %cst_307 : f32 to vector<12x32xf32>
    %625 = arith.subf %624, %623 : vector<12x32xf32>
    %626 = math.exp %625 : vector<12x32xf32>
    %cst_308 = arith.constant 1.000000e+00 : f32
    %627 = vector.broadcast %cst_308 : f32 to vector<12x32xf32>
    %628 = arith.addf %627, %626 : vector<12x32xf32>
    %629 = math.log %628 : vector<12x32xf32>
    %630 = arith.addf %622, %629 : vector<12x32xf32>
    %c0_309 = arith.constant 0 : index
    %c0_310 = arith.constant 0 : index
    %631 = vector.load %arg29[%c0_309, %c0_310] : memref<32x32xf32, #tpu.memory_space<vmem>>, vector<32x32xf32>
    %cst_311 = arith.constant dense<0.000000e+00> : vector<12x32xf32>
    %632 = tpu.matmul %630, %631, %cst_311 {dimension_numbers = #tpu.dot_dimension_numbers<[1], [0], [0], [1], [0, 0, 1, 1], [], []>} : vector<12x32xf32>, vector<32x32xf32>, vector<12x32xf32> -> vector<12x32xf32>
    %c0_312 = arith.constant 0 : index
    %c0_313 = arith.constant 0 : index
    %633 = vector.load %arg30[%c0_312, %c0_313] : memref<1x32xf32, #tpu.memory_space<vmem>>, vector<1x32xf32>
    %634 = vector.broadcast %633 : vector<1x32xf32> to vector<12x32xf32>
    %635 = arith.addf %632, %634 : vector<12x32xf32>
    %cst_314 = arith.constant 0.000000e+00 : f32
    %636 = vector.broadcast %cst_314 : f32 to vector<12x32xf32>
    %637 = arith.maximumf %635, %636 : vector<12x32xf32>
    %638 = math.absf %635 : vector<12x32xf32>
    %cst_315 = arith.constant 0.000000e+00 : f32
    %639 = vector.broadcast %cst_315 : f32 to vector<12x32xf32>
    %640 = arith.subf %639, %638 : vector<12x32xf32>
    %641 = math.exp %640 : vector<12x32xf32>
    %cst_316 = arith.constant 1.000000e+00 : f32
    %642 = vector.broadcast %cst_316 : f32 to vector<12x32xf32>
    %643 = arith.addf %642, %641 : vector<12x32xf32>
    %644 = math.log %643 : vector<12x32xf32>
    %645 = arith.addf %637, %644 : vector<12x32xf32>
    %c0_317 = arith.constant 0 : index
    %c0_318 = arith.constant 0 : index
    %646 = vector.load %arg31[%c0_317, %c0_318] : memref<32x32xf32, #tpu.memory_space<vmem>>, vector<32x32xf32>
    %cst_319 = arith.constant dense<0.000000e+00> : vector<12x32xf32>
    %647 = tpu.matmul %645, %646, %cst_319 {dimension_numbers = #tpu.dot_dimension_numbers<[1], [0], [0], [1], [0, 0, 1, 1], [], []>} : vector<12x32xf32>, vector<32x32xf32>, vector<12x32xf32> -> vector<12x32xf32>
    %c0_320 = arith.constant 0 : index
    %c0_321 = arith.constant 0 : index
    %648 = vector.load %arg32[%c0_320, %c0_321] : memref<1x32xf32, #tpu.memory_space<vmem>>, vector<1x32xf32>
    %649 = vector.broadcast %648 : vector<1x32xf32> to vector<12x32xf32>
    %650 = arith.addf %647, %649 : vector<12x32xf32>
    %cst_322 = arith.constant 0.000000e+00 : f32
    %651 = vector.broadcast %cst_322 : f32 to vector<12x32xf32>
    %652 = arith.maximumf %650, %651 : vector<12x32xf32>
    %653 = math.absf %650 : vector<12x32xf32>
    %cst_323 = arith.constant 0.000000e+00 : f32
    %654 = vector.broadcast %cst_323 : f32 to vector<12x32xf32>
    %655 = arith.subf %654, %653 : vector<12x32xf32>
    %656 = math.exp %655 : vector<12x32xf32>
    %cst_324 = arith.constant 1.000000e+00 : f32
    %657 = vector.broadcast %cst_324 : f32 to vector<12x32xf32>
    %658 = arith.addf %657, %656 : vector<12x32xf32>
    %659 = math.log %658 : vector<12x32xf32>
    %660 = arith.addf %652, %659 : vector<12x32xf32>
    %c0_325 = arith.constant 0 : index
    %c0_326 = arith.constant 0 : index
    %661 = vector.load %arg33[%c0_325, %c0_326] : memref<1x32xf32, #tpu.memory_space<vmem>>, vector<1x32xf32>
    %662 = vector.broadcast %661 : vector<1x32xf32> to vector<12x32xf32>
    %663 = arith.mulf %660, %662 : vector<12x32xf32>
    %cst_327 = arith.constant dense<0.000000e+00> : vector<12xf32>
    %664 = vector.multi_reduction <add>, %663, %cst_327 [1] : vector<12x32xf32> to vector<12xf32>
    %665 = vector.shape_cast %664 : vector<12xf32> to vector<12x1xf32>
    %c0_328 = arith.constant 0 : index
    %c0_329 = arith.constant 0 : index
    %666 = vector.load %arg34[%c0_328, %c0_329] : memref<1x1xf32, #tpu.memory_space<vmem>>, vector<1x1xf32>
    %667 = vector.broadcast %666 : vector<1x1xf32> to vector<12x1xf32>
    %668 = arith.addf %665, %667 : vector<12x1xf32>
    %669 = tpu.transpose %668, [1, 0] : vector<12x1xf32> -> vector<1x12xf32>
    %670 = vector.shape_cast %669 : vector<1x12xf32> to vector<1x1x12xf32>
    %671 = vector.shape_cast %39 : vector<2x12xf32> to vector<1x2x12xf32>
    %672 = vector.broadcast %670 : vector<1x1x12xf32> to vector<1x2x12xf32>
    %673 = arith.addf %672, %671 : vector<1x2x12xf32>
    %cst_330 = arith.constant dense<0xFF800000> : vector<1x2xf32>
    %674 = vector.multi_reduction <maximumf>, %673, %cst_330 [2] : vector<1x2x12xf32> to vector<1x2xf32>
    %675 = tpu.transpose %674, [1, 0] : vector<1x2xf32> -> vector<2x1xf32>
    %cst_331 = arith.constant dense<0.000000e+00> : vector<12x1xf32>
    %676 = tpu.matmul %34, %675, %cst_331 {dimension_numbers = #tpu.dot_dimension_numbers<[1], [0], [0], [1], [0, 0, 1, 1], [], []>} : vector<12x2xf32>, vector<2x1xf32>, vector<12x1xf32> -> vector<12x1xf32>
    %677 = arith.subf %668, %676 : vector<12x1xf32>
    %678 = math.exp %677 : vector<12x1xf32>
    %cst_332 = arith.constant dense<0.000000e+00> : vector<2x1xf32>
    %679 = tpu.matmul %35, %678, %cst_332 {dimension_numbers = #tpu.dot_dimension_numbers<[1], [0], [0], [1], [0, 0, 1, 1], [], []>} : vector<2x12xf32>, vector<12x1xf32>, vector<2x1xf32> -> vector<2x1xf32>
    %cst_333 = arith.constant 1.000000e-16 : f32
    %680 = vector.broadcast %cst_333 : f32 to vector<2x1xf32>
    %681 = arith.addf %679, %680 : vector<2x1xf32>
    %cst_334 = arith.constant dense<0.000000e+00> : vector<12x1xf32>
    %682 = tpu.matmul %34, %681, %cst_334 {dimension_numbers = #tpu.dot_dimension_numbers<[1], [0], [0], [1], [0, 0, 1, 1], [], []>} : vector<12x2xf32>, vector<2x1xf32>, vector<12x1xf32> -> vector<12x1xf32>
    %683 = tpu.reciprocal %682 {approx = true} : vector<12x1xf32> -> vector<12x1xf32>
    %684 = arith.mulf %678, %683 : vector<12x1xf32>
    %685 = vector.broadcast %684 : vector<12x1xf32> to vector<12x32xf32>
    %686 = arith.mulf %611, %685 : vector<12x32xf32>
    %cst_335 = arith.constant 0.000000e+00 : f32
    %687 = vector.broadcast %cst_335 : f32 to vector<2x32xf32>
    %cst_336 = arith.constant 0.000000e+00 : f32
    %688 = vector.broadcast %cst_336 : f32 to vector<2x32xf32>
    %cst_337 = arith.constant 0.000000e+00 : f32
    %689 = vector.broadcast %cst_337 : f32 to vector<2x32xf32>
    %cst_338 = arith.constant 0.000000e+00 : f32
    %690 = vector.broadcast %cst_338 : f32 to vector<2x32xf32>
    %c0_339 = arith.constant 0 : index
    %c0_340 = arith.constant 0 : index
    %691 = vector.load %arg35[%c0_339, %c0_340] : memref<32x128xf32, #tpu.memory_space<vmem>>, vector<32x128xf32>
    %c0_341 = arith.constant 0 : index
    %c0_342 = arith.constant 0 : index
    %692 = vector.load %arg36[%c0_341, %c0_342] : memref<32x128xf32, #tpu.memory_space<vmem>>, vector<32x128xf32>
    %c0_343 = arith.constant 0 : index
    %c0_344 = arith.constant 0 : index
    %693 = vector.load %arg37[%c0_343, %c0_344] : memref<32x128xf32, #tpu.memory_space<vmem>>, vector<32x128xf32>
    %c0_345 = arith.constant 0 : index
    %c0_346 = arith.constant 0 : index
    %694 = vector.load %arg38[%c0_345, %c0_346] : memref<1x128xf32, #tpu.memory_space<vmem>>, vector<1x128xf32>
    %cst_347 = arith.constant dense<0.000000e+00> : vector<2x128xf32>
    %695 = tpu.matmul %689, %691, %cst_347 {dimension_numbers = #tpu.dot_dimension_numbers<[1], [0], [0], [1], [0, 0, 1, 1], [], []>} : vector<2x32xf32>, vector<32x128xf32>, vector<2x128xf32> -> vector<2x128xf32>
    %cst_348 = arith.constant dense<0.000000e+00> : vector<2x128xf32>
    %696 = tpu.matmul %690, %692, %cst_348 {dimension_numbers = #tpu.dot_dimension_numbers<[1], [0], [0], [1], [0, 0, 1, 1], [], []>} : vector<2x32xf32>, vector<32x128xf32>, vector<2x128xf32> -> vector<2x128xf32>
    %697 = arith.addf %695, %696 : vector<2x128xf32>
    %cst_349 = arith.constant dense<0.000000e+00> : vector<2x128xf32>
    %698 = tpu.matmul %687, %693, %cst_349 {dimension_numbers = #tpu.dot_dimension_numbers<[1], [0], [0], [1], [0, 0, 1, 1], [], []>} : vector<2x32xf32>, vector<32x128xf32>, vector<2x128xf32> -> vector<2x128xf32>
    %699 = arith.addf %697, %698 : vector<2x128xf32>
    %700 = vector.broadcast %694 : vector<1x128xf32> to vector<2x128xf32>
    %701 = arith.addf %699, %700 : vector<2x128xf32>
    %702 = vector.extract_strided_slice %701 {offsets = [0, 0], sizes = [2, 32], strides = [1, 1]} : vector<2x128xf32> to vector<2x32xf32>
    %cst_350 = arith.constant 0.000000e+00 : f32
    %703 = vector.broadcast %cst_350 : f32 to vector<2x32xf32>
    %704 = arith.subf %703, %702 : vector<2x32xf32>
    %705 = math.exp %704 : vector<2x32xf32>
    %cst_351 = arith.constant 1.000000e+00 : f32
    %706 = vector.broadcast %cst_351 : f32 to vector<2x32xf32>
    %707 = arith.addf %706, %705 : vector<2x32xf32>
    %708 = tpu.reciprocal %707 {approx = true} : vector<2x32xf32> -> vector<2x32xf32>
    %709 = vector.extract_strided_slice %701 {offsets = [0, 32], sizes = [2, 32], strides = [1, 1]} : vector<2x128xf32> to vector<2x32xf32>
    %cst_352 = arith.constant 0.000000e+00 : f32
    %710 = vector.broadcast %cst_352 : f32 to vector<2x32xf32>
    %711 = arith.subf %710, %709 : vector<2x32xf32>
    %712 = math.exp %711 : vector<2x32xf32>
    %cst_353 = arith.constant 1.000000e+00 : f32
    %713 = vector.broadcast %cst_353 : f32 to vector<2x32xf32>
    %714 = arith.addf %713, %712 : vector<2x32xf32>
    %715 = tpu.reciprocal %714 {approx = true} : vector<2x32xf32> -> vector<2x32xf32>
    %716 = vector.extract_strided_slice %701 {offsets = [0, 64], sizes = [2, 32], strides = [1, 1]} : vector<2x128xf32> to vector<2x32xf32>
    %717 = math.tanh %716 : vector<2x32xf32>
    %718 = vector.extract_strided_slice %701 {offsets = [0, 96], sizes = [2, 32], strides = [1, 1]} : vector<2x128xf32> to vector<2x32xf32>
    %cst_354 = arith.constant 0.000000e+00 : f32
    %719 = vector.broadcast %cst_354 : f32 to vector<2x32xf32>
    %720 = arith.subf %719, %718 : vector<2x32xf32>
    %721 = math.exp %720 : vector<2x32xf32>
    %cst_355 = arith.constant 1.000000e+00 : f32
    %722 = vector.broadcast %cst_355 : f32 to vector<2x32xf32>
    %723 = arith.addf %722, %721 : vector<2x32xf32>
    %724 = tpu.reciprocal %723 {approx = true} : vector<2x32xf32> -> vector<2x32xf32>
    %725 = arith.mulf %715, %688 : vector<2x32xf32>
    %726 = arith.mulf %708, %717 : vector<2x32xf32>
    %727 = arith.addf %725, %726 : vector<2x32xf32>
    %728 = math.tanh %727 : vector<2x32xf32>
    %729 = arith.mulf %724, %728 : vector<2x32xf32>
    %cst_356 = arith.constant dense<0.000000e+00> : vector<12x32xf32>
    %730 = tpu.matmul %34, %729, %cst_356 {dimension_numbers = #tpu.dot_dimension_numbers<[1], [0], [0], [1], [0, 0, 1, 1], [], []>} : vector<12x2xf32>, vector<2x32xf32>, vector<12x32xf32> -> vector<12x32xf32>
    %731 = arith.mulf %686, %730 : vector<12x32xf32>
    %cst_357 = arith.constant dense<0.000000e+00> : vector<12xf32>
    %732 = vector.multi_reduction <add>, %731, %cst_357 [1] : vector<12x32xf32> to vector<12xf32>
    %733 = vector.shape_cast %732 : vector<12xf32> to vector<12x1xf32>
    %734 = tpu.transpose %733, [1, 0] : vector<12x1xf32> -> vector<1x12xf32>
    %735 = vector.shape_cast %734 : vector<1x12xf32> to vector<1x1x12xf32>
    %736 = vector.shape_cast %39 : vector<2x12xf32> to vector<1x2x12xf32>
    %737 = vector.broadcast %735 : vector<1x1x12xf32> to vector<1x2x12xf32>
    %738 = arith.addf %737, %736 : vector<1x2x12xf32>
    %cst_358 = arith.constant dense<0xFF800000> : vector<1x2xf32>
    %739 = vector.multi_reduction <maximumf>, %738, %cst_358 [2] : vector<1x2x12xf32> to vector<1x2xf32>
    %740 = tpu.transpose %739, [1, 0] : vector<1x2xf32> -> vector<2x1xf32>
    %cst_359 = arith.constant dense<0.000000e+00> : vector<12x1xf32>
    %741 = tpu.matmul %34, %740, %cst_359 {dimension_numbers = #tpu.dot_dimension_numbers<[1], [0], [0], [1], [0, 0, 1, 1], [], []>} : vector<12x2xf32>, vector<2x1xf32>, vector<12x1xf32> -> vector<12x1xf32>
    %742 = arith.subf %733, %741 : vector<12x1xf32>
    %743 = math.exp %742 : vector<12x1xf32>
    %cst_360 = arith.constant dense<0.000000e+00> : vector<2x1xf32>
    %744 = tpu.matmul %35, %743, %cst_360 {dimension_numbers = #tpu.dot_dimension_numbers<[1], [0], [0], [1], [0, 0, 1, 1], [], []>} : vector<2x12xf32>, vector<12x1xf32>, vector<2x1xf32> -> vector<2x1xf32>
    %cst_361 = arith.constant 1.000000e-16 : f32
    %745 = vector.broadcast %cst_361 : f32 to vector<2x1xf32>
    %746 = arith.addf %744, %745 : vector<2x1xf32>
    %cst_362 = arith.constant dense<0.000000e+00> : vector<12x1xf32>
    %747 = tpu.matmul %34, %746, %cst_362 {dimension_numbers = #tpu.dot_dimension_numbers<[1], [0], [0], [1], [0, 0, 1, 1], [], []>} : vector<12x2xf32>, vector<2x1xf32>, vector<12x1xf32> -> vector<12x1xf32>
    %748 = tpu.reciprocal %747 {approx = true} : vector<12x1xf32> -> vector<12x1xf32>
    %749 = arith.mulf %743, %748 : vector<12x1xf32>
    %750 = vector.broadcast %749 : vector<12x1xf32> to vector<12x32xf32>
    %751 = arith.mulf %750, %686 : vector<12x32xf32>
    %cst_363 = arith.constant dense<0.000000e+00> : vector<2x32xf32>
    %752 = tpu.matmul %35, %751, %cst_363 {dimension_numbers = #tpu.dot_dimension_numbers<[1], [0], [0], [1], [0, 0, 1, 1], [], []>} : vector<2x12xf32>, vector<12x32xf32>, vector<2x32xf32> -> vector<2x32xf32>
    %cst_364 = arith.constant dense<0.000000e+00> : vector<2x128xf32>
    %753 = tpu.matmul %729, %691, %cst_364 {dimension_numbers = #tpu.dot_dimension_numbers<[1], [0], [0], [1], [0, 0, 1, 1], [], []>} : vector<2x32xf32>, vector<32x128xf32>, vector<2x128xf32> -> vector<2x128xf32>
    %cst_365 = arith.constant dense<0.000000e+00> : vector<2x128xf32>
    %754 = tpu.matmul %752, %692, %cst_365 {dimension_numbers = #tpu.dot_dimension_numbers<[1], [0], [0], [1], [0, 0, 1, 1], [], []>} : vector<2x32xf32>, vector<32x128xf32>, vector<2x128xf32> -> vector<2x128xf32>
    %755 = arith.addf %753, %754 : vector<2x128xf32>
    %cst_366 = arith.constant dense<0.000000e+00> : vector<2x128xf32>
    %756 = tpu.matmul %729, %693, %cst_366 {dimension_numbers = #tpu.dot_dimension_numbers<[1], [0], [0], [1], [0, 0, 1, 1], [], []>} : vector<2x32xf32>, vector<32x128xf32>, vector<2x128xf32> -> vector<2x128xf32>
    %757 = arith.addf %755, %756 : vector<2x128xf32>
    %758 = vector.broadcast %694 : vector<1x128xf32> to vector<2x128xf32>
    %759 = arith.addf %757, %758 : vector<2x128xf32>
    %760 = vector.extract_strided_slice %759 {offsets = [0, 0], sizes = [2, 32], strides = [1, 1]} : vector<2x128xf32> to vector<2x32xf32>
    %cst_367 = arith.constant 0.000000e+00 : f32
    %761 = vector.broadcast %cst_367 : f32 to vector<2x32xf32>
    %762 = arith.subf %761, %760 : vector<2x32xf32>
    %763 = math.exp %762 : vector<2x32xf32>
    %cst_368 = arith.constant 1.000000e+00 : f32
    %764 = vector.broadcast %cst_368 : f32 to vector<2x32xf32>
    %765 = arith.addf %764, %763 : vector<2x32xf32>
    %766 = tpu.reciprocal %765 {approx = true} : vector<2x32xf32> -> vector<2x32xf32>
    %767 = vector.extract_strided_slice %759 {offsets = [0, 32], sizes = [2, 32], strides = [1, 1]} : vector<2x128xf32> to vector<2x32xf32>
    %cst_369 = arith.constant 0.000000e+00 : f32
    %768 = vector.broadcast %cst_369 : f32 to vector<2x32xf32>
    %769 = arith.subf %768, %767 : vector<2x32xf32>
    %770 = math.exp %769 : vector<2x32xf32>
    %cst_370 = arith.constant 1.000000e+00 : f32
    %771 = vector.broadcast %cst_370 : f32 to vector<2x32xf32>
    %772 = arith.addf %771, %770 : vector<2x32xf32>
    %773 = tpu.reciprocal %772 {approx = true} : vector<2x32xf32> -> vector<2x32xf32>
    %774 = vector.extract_strided_slice %759 {offsets = [0, 64], sizes = [2, 32], strides = [1, 1]} : vector<2x128xf32> to vector<2x32xf32>
    %775 = math.tanh %774 : vector<2x32xf32>
    %776 = vector.extract_strided_slice %759 {offsets = [0, 96], sizes = [2, 32], strides = [1, 1]} : vector<2x128xf32> to vector<2x32xf32>
    %cst_371 = arith.constant 0.000000e+00 : f32
    %777 = vector.broadcast %cst_371 : f32 to vector<2x32xf32>
    %778 = arith.subf %777, %776 : vector<2x32xf32>
    %779 = math.exp %778 : vector<2x32xf32>
    %cst_372 = arith.constant 1.000000e+00 : f32
    %780 = vector.broadcast %cst_372 : f32 to vector<2x32xf32>
    %781 = arith.addf %780, %779 : vector<2x32xf32>
    %782 = tpu.reciprocal %781 {approx = true} : vector<2x32xf32> -> vector<2x32xf32>
    %783 = arith.mulf %773, %727 : vector<2x32xf32>
    %784 = arith.mulf %766, %775 : vector<2x32xf32>
    %785 = arith.addf %783, %784 : vector<2x32xf32>
    %786 = math.tanh %785 : vector<2x32xf32>
    %787 = arith.mulf %782, %786 : vector<2x32xf32>
    %cst_373 = arith.constant dense<0.000000e+00> : vector<12x32xf32>
    %788 = tpu.matmul %34, %787, %cst_373 {dimension_numbers = #tpu.dot_dimension_numbers<[1], [0], [0], [1], [0, 0, 1, 1], [], []>} : vector<12x2xf32>, vector<2x32xf32>, vector<12x32xf32> -> vector<12x32xf32>
    %789 = arith.mulf %686, %788 : vector<12x32xf32>
    %cst_374 = arith.constant dense<0.000000e+00> : vector<12xf32>
    %790 = vector.multi_reduction <add>, %789, %cst_374 [1] : vector<12x32xf32> to vector<12xf32>
    %791 = vector.shape_cast %790 : vector<12xf32> to vector<12x1xf32>
    %792 = tpu.transpose %791, [1, 0] : vector<12x1xf32> -> vector<1x12xf32>
    %793 = vector.shape_cast %792 : vector<1x12xf32> to vector<1x1x12xf32>
    %794 = vector.shape_cast %39 : vector<2x12xf32> to vector<1x2x12xf32>
    %795 = vector.broadcast %793 : vector<1x1x12xf32> to vector<1x2x12xf32>
    %796 = arith.addf %795, %794 : vector<1x2x12xf32>
    %cst_375 = arith.constant dense<0xFF800000> : vector<1x2xf32>
    %797 = vector.multi_reduction <maximumf>, %796, %cst_375 [2] : vector<1x2x12xf32> to vector<1x2xf32>
    %798 = tpu.transpose %797, [1, 0] : vector<1x2xf32> -> vector<2x1xf32>
    %cst_376 = arith.constant dense<0.000000e+00> : vector<12x1xf32>
    %799 = tpu.matmul %34, %798, %cst_376 {dimension_numbers = #tpu.dot_dimension_numbers<[1], [0], [0], [1], [0, 0, 1, 1], [], []>} : vector<12x2xf32>, vector<2x1xf32>, vector<12x1xf32> -> vector<12x1xf32>
    %800 = arith.subf %791, %799 : vector<12x1xf32>
    %801 = math.exp %800 : vector<12x1xf32>
    %cst_377 = arith.constant dense<0.000000e+00> : vector<2x1xf32>
    %802 = tpu.matmul %35, %801, %cst_377 {dimension_numbers = #tpu.dot_dimension_numbers<[1], [0], [0], [1], [0, 0, 1, 1], [], []>} : vector<2x12xf32>, vector<12x1xf32>, vector<2x1xf32> -> vector<2x1xf32>
    %cst_378 = arith.constant 1.000000e-16 : f32
    %803 = vector.broadcast %cst_378 : f32 to vector<2x1xf32>
    %804 = arith.addf %802, %803 : vector<2x1xf32>
    %cst_379 = arith.constant dense<0.000000e+00> : vector<12x1xf32>
    %805 = tpu.matmul %34, %804, %cst_379 {dimension_numbers = #tpu.dot_dimension_numbers<[1], [0], [0], [1], [0, 0, 1, 1], [], []>} : vector<12x2xf32>, vector<2x1xf32>, vector<12x1xf32> -> vector<12x1xf32>
    %806 = tpu.reciprocal %805 {approx = true} : vector<12x1xf32> -> vector<12x1xf32>
    %807 = arith.mulf %801, %806 : vector<12x1xf32>
    %808 = vector.broadcast %807 : vector<12x1xf32> to vector<12x32xf32>
    %809 = arith.mulf %808, %686 : vector<12x32xf32>
    %cst_380 = arith.constant dense<0.000000e+00> : vector<2x32xf32>
    %810 = tpu.matmul %35, %809, %cst_380 {dimension_numbers = #tpu.dot_dimension_numbers<[1], [0], [0], [1], [0, 0, 1, 1], [], []>} : vector<2x12xf32>, vector<12x32xf32>, vector<2x32xf32> -> vector<2x32xf32>
    %cst_381 = arith.constant dense<0.000000e+00> : vector<2x128xf32>
    %811 = tpu.matmul %787, %691, %cst_381 {dimension_numbers = #tpu.dot_dimension_numbers<[1], [0], [0], [1], [0, 0, 1, 1], [], []>} : vector<2x32xf32>, vector<32x128xf32>, vector<2x128xf32> -> vector<2x128xf32>
    %cst_382 = arith.constant dense<0.000000e+00> : vector<2x128xf32>
    %812 = tpu.matmul %810, %692, %cst_382 {dimension_numbers = #tpu.dot_dimension_numbers<[1], [0], [0], [1], [0, 0, 1, 1], [], []>} : vector<2x32xf32>, vector<32x128xf32>, vector<2x128xf32> -> vector<2x128xf32>
    %813 = arith.addf %811, %812 : vector<2x128xf32>
    %cst_383 = arith.constant dense<0.000000e+00> : vector<2x128xf32>
    %814 = tpu.matmul %787, %693, %cst_383 {dimension_numbers = #tpu.dot_dimension_numbers<[1], [0], [0], [1], [0, 0, 1, 1], [], []>} : vector<2x32xf32>, vector<32x128xf32>, vector<2x128xf32> -> vector<2x128xf32>
    %815 = arith.addf %813, %814 : vector<2x128xf32>
    %816 = vector.broadcast %694 : vector<1x128xf32> to vector<2x128xf32>
    %817 = arith.addf %815, %816 : vector<2x128xf32>
    %818 = vector.extract_strided_slice %817 {offsets = [0, 0], sizes = [2, 32], strides = [1, 1]} : vector<2x128xf32> to vector<2x32xf32>
    %cst_384 = arith.constant 0.000000e+00 : f32
    %819 = vector.broadcast %cst_384 : f32 to vector<2x32xf32>
    %820 = arith.subf %819, %818 : vector<2x32xf32>
    %821 = math.exp %820 : vector<2x32xf32>
    %cst_385 = arith.constant 1.000000e+00 : f32
    %822 = vector.broadcast %cst_385 : f32 to vector<2x32xf32>
    %823 = arith.addf %822, %821 : vector<2x32xf32>
    %824 = tpu.reciprocal %823 {approx = true} : vector<2x32xf32> -> vector<2x32xf32>
    %825 = vector.extract_strided_slice %817 {offsets = [0, 32], sizes = [2, 32], strides = [1, 1]} : vector<2x128xf32> to vector<2x32xf32>
    %cst_386 = arith.constant 0.000000e+00 : f32
    %826 = vector.broadcast %cst_386 : f32 to vector<2x32xf32>
    %827 = arith.subf %826, %825 : vector<2x32xf32>
    %828 = math.exp %827 : vector<2x32xf32>
    %cst_387 = arith.constant 1.000000e+00 : f32
    %829 = vector.broadcast %cst_387 : f32 to vector<2x32xf32>
    %830 = arith.addf %829, %828 : vector<2x32xf32>
    %831 = tpu.reciprocal %830 {approx = true} : vector<2x32xf32> -> vector<2x32xf32>
    %832 = vector.extract_strided_slice %817 {offsets = [0, 64], sizes = [2, 32], strides = [1, 1]} : vector<2x128xf32> to vector<2x32xf32>
    %833 = math.tanh %832 : vector<2x32xf32>
    %834 = vector.extract_strided_slice %817 {offsets = [0, 96], sizes = [2, 32], strides = [1, 1]} : vector<2x128xf32> to vector<2x32xf32>
    %cst_388 = arith.constant 0.000000e+00 : f32
    %835 = vector.broadcast %cst_388 : f32 to vector<2x32xf32>
    %836 = arith.subf %835, %834 : vector<2x32xf32>
    %837 = math.exp %836 : vector<2x32xf32>
    %cst_389 = arith.constant 1.000000e+00 : f32
    %838 = vector.broadcast %cst_389 : f32 to vector<2x32xf32>
    %839 = arith.addf %838, %837 : vector<2x32xf32>
    %840 = tpu.reciprocal %839 {approx = true} : vector<2x32xf32> -> vector<2x32xf32>
    %841 = arith.mulf %831, %785 : vector<2x32xf32>
    %842 = arith.mulf %824, %833 : vector<2x32xf32>
    %843 = arith.addf %841, %842 : vector<2x32xf32>
    %844 = math.tanh %843 : vector<2x32xf32>
    %845 = arith.mulf %840, %844 : vector<2x32xf32>
    %cst_390 = arith.constant dense<0.000000e+00> : vector<12x32xf32>
    %846 = tpu.matmul %34, %845, %cst_390 {dimension_numbers = #tpu.dot_dimension_numbers<[1], [0], [0], [1], [0, 0, 1, 1], [], []>} : vector<12x2xf32>, vector<2x32xf32>, vector<12x32xf32> -> vector<12x32xf32>
    %847 = arith.mulf %686, %846 : vector<12x32xf32>
    %cst_391 = arith.constant dense<0.000000e+00> : vector<12xf32>
    %848 = vector.multi_reduction <add>, %847, %cst_391 [1] : vector<12x32xf32> to vector<12xf32>
    %849 = vector.shape_cast %848 : vector<12xf32> to vector<12x1xf32>
    %850 = tpu.transpose %849, [1, 0] : vector<12x1xf32> -> vector<1x12xf32>
    %851 = vector.shape_cast %850 : vector<1x12xf32> to vector<1x1x12xf32>
    %852 = vector.shape_cast %39 : vector<2x12xf32> to vector<1x2x12xf32>
    %853 = vector.broadcast %851 : vector<1x1x12xf32> to vector<1x2x12xf32>
    %854 = arith.addf %853, %852 : vector<1x2x12xf32>
    %cst_392 = arith.constant dense<0xFF800000> : vector<1x2xf32>
    %855 = vector.multi_reduction <maximumf>, %854, %cst_392 [2] : vector<1x2x12xf32> to vector<1x2xf32>
    %856 = tpu.transpose %855, [1, 0] : vector<1x2xf32> -> vector<2x1xf32>
    %cst_393 = arith.constant dense<0.000000e+00> : vector<12x1xf32>
    %857 = tpu.matmul %34, %856, %cst_393 {dimension_numbers = #tpu.dot_dimension_numbers<[1], [0], [0], [1], [0, 0, 1, 1], [], []>} : vector<12x2xf32>, vector<2x1xf32>, vector<12x1xf32> -> vector<12x1xf32>
    %858 = arith.subf %849, %857 : vector<12x1xf32>
    %859 = math.exp %858 : vector<12x1xf32>
    %cst_394 = arith.constant dense<0.000000e+00> : vector<2x1xf32>
    %860 = tpu.matmul %35, %859, %cst_394 {dimension_numbers = #tpu.dot_dimension_numbers<[1], [0], [0], [1], [0, 0, 1, 1], [], []>} : vector<2x12xf32>, vector<12x1xf32>, vector<2x1xf32> -> vector<2x1xf32>
    %cst_395 = arith.constant 1.000000e-16 : f32
    %861 = vector.broadcast %cst_395 : f32 to vector<2x1xf32>
    %862 = arith.addf %860, %861 : vector<2x1xf32>
    %cst_396 = arith.constant dense<0.000000e+00> : vector<12x1xf32>
    %863 = tpu.matmul %34, %862, %cst_396 {dimension_numbers = #tpu.dot_dimension_numbers<[1], [0], [0], [1], [0, 0, 1, 1], [], []>} : vector<12x2xf32>, vector<2x1xf32>, vector<12x1xf32> -> vector<12x1xf32>
    %864 = tpu.reciprocal %863 {approx = true} : vector<12x1xf32> -> vector<12x1xf32>
    %865 = arith.mulf %859, %864 : vector<12x1xf32>
    %866 = vector.broadcast %865 : vector<12x1xf32> to vector<12x32xf32>
    %867 = arith.mulf %866, %686 : vector<12x32xf32>
    %cst_397 = arith.constant dense<0.000000e+00> : vector<2x32xf32>
    %868 = tpu.matmul %35, %867, %cst_397 {dimension_numbers = #tpu.dot_dimension_numbers<[1], [0], [0], [1], [0, 0, 1, 1], [], []>} : vector<2x12xf32>, vector<12x32xf32>, vector<2x32xf32> -> vector<2x32xf32>
    %c0_398 = arith.constant 0 : index
    %c0_399 = arith.constant 0 : index
    %869 = vector.load %arg39[%c0_398, %c0_399] : memref<32x64xf32, #tpu.memory_space<vmem>>, vector<32x64xf32>
    %cst_400 = arith.constant dense<0.000000e+00> : vector<2x64xf32>
    %870 = tpu.matmul %845, %869, %cst_400 {dimension_numbers = #tpu.dot_dimension_numbers<[1], [0], [0], [1], [0, 0, 1, 1], [], []>} : vector<2x32xf32>, vector<32x64xf32>, vector<2x64xf32> -> vector<2x64xf32>
    %c0_401 = arith.constant 0 : index
    %c0_402 = arith.constant 0 : index
    %871 = vector.load %arg40[%c0_401, %c0_402] : memref<32x64xf32, #tpu.memory_space<vmem>>, vector<32x64xf32>
    %cst_403 = arith.constant dense<0.000000e+00> : vector<2x64xf32>
    %872 = tpu.matmul %868, %871, %cst_403 {dimension_numbers = #tpu.dot_dimension_numbers<[1], [0], [0], [1], [0, 0, 1, 1], [], []>} : vector<2x32xf32>, vector<32x64xf32>, vector<2x64xf32> -> vector<2x64xf32>
    %873 = arith.addf %870, %872 : vector<2x64xf32>
    %c0_404 = arith.constant 0 : index
    %c0_405 = arith.constant 0 : index
    %874 = vector.load %arg41[%c0_404, %c0_405] : memref<1x64xf32, #tpu.memory_space<vmem>>, vector<1x64xf32>
    %875 = vector.broadcast %874 : vector<1x64xf32> to vector<2x64xf32>
    %876 = arith.addf %873, %875 : vector<2x64xf32>
    %cst_406 = arith.constant 0.000000e+00 : f32
    %877 = vector.broadcast %cst_406 : f32 to vector<2x64xf32>
    %878 = arith.maximumf %876, %877 : vector<2x64xf32>
    %879 = math.absf %876 : vector<2x64xf32>
    %cst_407 = arith.constant 0.000000e+00 : f32
    %880 = vector.broadcast %cst_407 : f32 to vector<2x64xf32>
    %881 = arith.subf %880, %879 : vector<2x64xf32>
    %882 = math.exp %881 : vector<2x64xf32>
    %cst_408 = arith.constant 1.000000e+00 : f32
    %883 = vector.broadcast %cst_408 : f32 to vector<2x64xf32>
    %884 = arith.addf %883, %882 : vector<2x64xf32>
    %885 = math.log %884 : vector<2x64xf32>
    %886 = arith.addf %878, %885 : vector<2x64xf32>
    %c0_409 = arith.constant 0 : index
    %c0_410 = arith.constant 0 : index
    %887 = vector.load %arg42[%c0_409, %c0_410] : memref<64x32xf32, #tpu.memory_space<vmem>>, vector<64x32xf32>
    %cst_411 = arith.constant dense<0.000000e+00> : vector<2x32xf32>
    %888 = tpu.matmul %886, %887, %cst_411 {dimension_numbers = #tpu.dot_dimension_numbers<[1], [0], [0], [1], [0, 0, 1, 1], [], []>} : vector<2x64xf32>, vector<64x32xf32>, vector<2x32xf32> -> vector<2x32xf32>
    %c0_412 = arith.constant 0 : index
    %c0_413 = arith.constant 0 : index
    %889 = vector.load %arg43[%c0_412, %c0_413] : memref<1x32xf32, #tpu.memory_space<vmem>>, vector<1x32xf32>
    %890 = vector.broadcast %889 : vector<1x32xf32> to vector<2x32xf32>
    %891 = arith.addf %888, %890 : vector<2x32xf32>
    %cst_414 = arith.constant 0.000000e+00 : f32
    %892 = vector.broadcast %cst_414 : f32 to vector<2x32xf32>
    %893 = arith.maximumf %891, %892 : vector<2x32xf32>
    %894 = math.absf %891 : vector<2x32xf32>
    %cst_415 = arith.constant 0.000000e+00 : f32
    %895 = vector.broadcast %cst_415 : f32 to vector<2x32xf32>
    %896 = arith.subf %895, %894 : vector<2x32xf32>
    %897 = math.exp %896 : vector<2x32xf32>
    %cst_416 = arith.constant 1.000000e+00 : f32
    %898 = vector.broadcast %cst_416 : f32 to vector<2x32xf32>
    %899 = arith.addf %898, %897 : vector<2x32xf32>
    %900 = math.log %899 : vector<2x32xf32>
    %901 = arith.addf %893, %900 : vector<2x32xf32>
    %c0_417 = arith.constant 0 : index
    %c0_418 = arith.constant 0 : index
    %902 = vector.load %arg44[%c0_417, %c0_418] : memref<1x32xf32, #tpu.memory_space<vmem>>, vector<1x32xf32>
    %903 = vector.broadcast %902 : vector<1x32xf32> to vector<2x32xf32>
    %904 = arith.mulf %901, %903 : vector<2x32xf32>
    %cst_419 = arith.constant dense<0.000000e+00> : vector<2xf32>
    %905 = vector.multi_reduction <add>, %904, %cst_419 [1] : vector<2x32xf32> to vector<2xf32>
    %906 = vector.shape_cast %905 : vector<2xf32> to vector<2x1xf32>
    %c0_420 = arith.constant 0 : index
    %c0_421 = arith.constant 0 : index
    %907 = vector.load %arg45[%c0_420, %c0_421] : memref<1x1xf32, #tpu.memory_space<vmem>>, vector<1x1xf32>
    %908 = vector.broadcast %907 : vector<1x1xf32> to vector<2x1xf32>
    %909 = arith.addf %906, %908 : vector<2x1xf32>
    %c0_422 = arith.constant 0 : index
    %c0_423 = arith.constant 0 : index
    %910 = vector.load %arg46[%c0_422, %c0_423] : memref<2x1xf32, #tpu.memory_space<vmem>>, vector<2x1xf32>
    tpu.vector_store %arg46[%c0_422, %c0_423], %909 {strides = array<i32>} : memref<2x1xf32, #tpu.memory_space<vmem>>, vector<2x1xf32>,
    return
  }
}

</mosaic_0001>

<bundles_post_ra>
// kernel: skip_forward.1
= control target key start
LH: loop header
LB: loop body
LE: loop exit
PB: predicated region body
PF: predicated region fallthrough
CT: control target
= control target key end

     0   :  { %s17883_s6 = smov 1   ;;  %s17884_s10 = smov 2   ;;  %s21470_s0 = inlined_call_operand.smem [shape: u32[47], index: -1, kind: input, shape index: {}] }
   0x1   :  { %s17949_s5 = sld [smem:[%s21470_s0]]   ;;  %s17885_s14 = smov 3  }
   0x2   :  { %s17954_s9 = sld [smem:[%s21470_s0 + %s17883_s6]]   ;;  %s17886_s18 = smov 4  }
   0x3   :  { %s17959_s13 = sld [smem:[%s21470_s0 + %s17884_s10]]   ;;  %s17887_s22 = smov 5  }
   0x4   :  { %s17964_s17 = sld [smem:[%s21470_s0 + %s17885_s14]]   ;;  %s17888_s26 = smov 6  }
   0x5   :  { %s17969_s21 = sld [smem:[%s21470_s0 + %s17886_s18]]   ;;  %s17889_s30 = smov 7  }
   0x6   :  { %s17974_s25 = sld [smem:[%s21470_s0 + %s17887_s22]]   ;;  %s17890_s4 = smov 8  }
   0x7   :  { %s17979_s29 = sld [smem:[%s21470_s0 + %s17888_s26]]   ;;  %s17891_s10 = smov 9  }
   0x8   :  { %s17984_s3 = sld [smem:[%s21470_s0 + %s17889_s30]]   ;;  %s17892_s15 = smov 10  }
   0x9   :  { %s17989_s8 = sld [smem:[%s21470_s0 + %s17890_s4]]   ;;  %s17893_s20 = smov 11  }
   0xa   :  { %s17994_s14 = sld [smem:[%s21470_s0 + %s17891_s10]]   ;;  %s17894_s26 = smov 12  }
   0xb   :  { %s17999_s19 = sld [smem:[%s21470_s0 + %s17892_s15]]   ;;  %s17895_s1 = smov 13  }
   0xc   :  { %s18004_s24 = sld [smem:[%s21470_s0 + %s17893_s20]]   ;;  %s17896_s7 = smov 14  }
   0xd   :  { %s18009_s30 = sld [smem:[%s21470_s0 + %s17894_s26]]   ;;  %s17897_s15 = smov 15  }
   0xe   :  { %s18014_s6 = sld [smem:[%s21470_s0 + %s17895_s1]]   ;;  %s17898_s22 = smov 16  }
   0xf   :  { %21552 = sst [smem:[#allocation14_spill]] %s17989_s8  ;;  %s17899_s28 = smov 17  }
  0x10   :  { %21553 = sst [smem:[#allocation15_spill]] %s17994_s14  ;;  %s17917_s16 = smov 35  }
  0x11   :  { %21554 = sst [smem:[#allocation16_spill]] %s17999_s19  ;;  %s17918_s23 = smov 36  }
  0x12   :  { %s18019_s12 = sld [smem:[%s21470_s0 + %s17896_s7]]   ;;  %s17900_s7 = smov 18  }
  0x13   :  { %s18024_s20 = sld [smem:[%s21470_s0 + %s17897_s15]]   ;;  %s17901_s15 = smov 19  }
  0x14   :  { %s18029_s27 = sld [smem:[%s21470_s0 + %s17898_s22]]   ;;  %s17902_s22 = smov 20  }
  0x15   :  { %s18034_s4 = sld [smem:[%s21470_s0 + %s17899_s28]]   ;;  %s17903_s28 = smov 21  }
  0x16   :  { %s18039_s14 = sld [smem:[%s21470_s0 + %s17900_s7]]   ;;  %s17904_s7 = smov 22  }
  0x17   :  { %s18044_s19 = sld [smem:[%s21470_s0 + %s17901_s15]]   ;;  %s17905_s15 = smov 23  }
  0x18   :  { %s18049_s8 = sld [smem:[%s21470_s0 + %s17902_s22]]   ;;  %s17906_s22 = smov 24  }
  0x19   :  { %21555 = sst [smem:[#allocation17_spill]] %s18024_s20  ;;  %s17919_s1 = smov 37  }
  0x1a   :  { %21556 = sst [smem:[#allocation18_spill]] %s18029_s27  ;;  %s17920_s10 = smov 38  }
  0x1b   :  { %21557 = sst [smem:[#allocation19_spill]] %s18034_s4 }
  0x1c   :  { %21558 = sst [smem:[#allocation20_spill]] %s18039_s14 }
  0x1d   :  { %21559 = sst [smem:[#allocation21_spill]] %s18044_s19 }
  0x1e   :  { %s18054_s4 = sld [smem:[%s21470_s0 + %s17903_s28]]   ;;  %s17907_s28 = smov 25  }
  0x1f   :  { %s18059_s14 = sld [smem:[%s21470_s0 + %s17904_s7]]   ;;  %s17908_s7 = smov 26  }
  0x20   :  { %s18064_s19 = sld [smem:[%s21470_s0 + %s17905_s15]]   ;;  %s17909_s15 = smov 27  }
  0x21   :  { %s18069_s27 = sld [smem:[%s21470_s0 + %s17906_s22]]   ;;  %s17910_s22 = smov 28  }
  0x22   :  { %s18137_s20 = sld [smem:[%s21470_s0 + %s17920_s10]]   ;;  %s17924_s10 = smov 42  }
  0x24   :  { %21560 = sst [smem:[#allocation22_spill]] %s18054_s4 }
  0x25   :  { %21561 = sst [smem:[#allocation23_spill]] %s18059_s14 }
  0x26   :  { %21562 = sst [smem:[#allocation24_spill]] %s18064_s19 }
  0x27   :  { %21563 = sst [smem:[#allocation25_spill]] %s18069_s27 }
  0x28   :  { %s18074_s4 = sld [smem:[%s21470_s0 + %s17907_s28]]   ;;  %s17911_s28 = smov 29  }
  0x29   :  { %s18079_s14 = sld [smem:[%s21470_s0 + %s17908_s7]]   ;;  %s17912_s7 = smov 30  }
  0x2a   :  { %s18084_s19 = sld [smem:[%s21470_s0 + %s17909_s15]]   ;;  %s17913_s15 = smov 31  }
  0x2b   :  { %s18089_s27 = sld [smem:[%s21470_s0 + %s17910_s22]]   ;;  %s17914_s22 = smov 32  }
  0x2c   :  { %21576 = sst [smem:[#allocation38_spill]] %s18137_s20  ;;  %s17928_s20 = smov 45  }
  0x2e   :  { %21564 = sst [smem:[#allocation26_spill]] %s18074_s4 }
  0x2f   :  { %21565 = sst [smem:[#allocation27_spill]] %s18079_s14 }
  0x30   :  { %21566 = sst [smem:[#allocation28_spill]] %s18084_s19 }
  0x31   :  { %21567 = sst [smem:[#allocation29_spill]] %s18089_s27 }
  0x32   :  { %s18094_s4 = sld [smem:[%s21470_s0 + %s17911_s28]]   ;;  %s17915_s28 = smov 33  }
  0x33   :  { %s18099_s14 = sld [smem:[%s21470_s0 + %s17912_s7]]   ;;  %s17916_s7 = smov 34  }
  0x34   :  { %s18104_s19 = sld [smem:[%s21470_s0 + %s17913_s15]]   ;;  %s17925_s15 = smov 43  }
  0x35   :  { %s18109_s27 = sld [smem:[%s21470_s0 + %s17914_s22]]  }
  0x38   :  { %21568 = sst [smem:[#allocation30_spill]] %s18094_s4 }
  0x39   :  { %21569 = sst [smem:[#allocation31_spill]] %s18099_s14 }
  0x3a   :  { %21570 = sst [smem:[#allocation32_spill]] %s18104_s19 }
  0x3b   :  { %21571 = sst [smem:[#allocation33_spill]] %s18109_s27 }
  0x3c   :  { %s18114_s4 = sld [smem:[%s21470_s0 + %s17915_s28]]  }
  0x3d   :  { %s12919_s14 = sld [smem:[%s21470_s0 + %s17916_s7]]  }
  0x3e   :  { %s18122_s19 = sld [smem:[%s21470_s0 + %s17917_s16]]   ;;  %s17921_s16 = smov 39  }
  0x3f   :  { %s18127_s27 = sld [smem:[%s21470_s0 + %s17918_s23]]   ;;  %s17922_s23 = smov 40  }
  0x42   :  { %21572 = sst [smem:[#allocation34_spill]] %s18114_s4 }
  0x43   :  { %s18132_s4 = sld [smem:[%s21470_s0 + %s17919_s1]]   ;;  %v98_v0 = vstv %s12919_s14  ;;  %s17923_s1 = smov 41  }
  0x44   :  { %21573 = sst [smem:[#allocation35_spill]] %s18122_s19  ;;  %99 = vst [vmem:[#allocation2] sm:$0x1] %v98_v0  ;;  %s17926_s14 = smov 44  }
  0x45   :  { %21574 = sst [smem:[#allocation36_spill]] %s18127_s27 }
  0x46   :  { %s18142_s19 = sld [smem:[%s21470_s0 + %s17921_s16]]  }
  0x47   :  { %s18147_s27 = sld [smem:[%s21470_s0 + %s17922_s23]]  }
  0x48   :  { %s18152_s7 = sld [smem:[%s21470_s0 + %s17923_s1]]   ;;  %s17927_s1 = smov 46  }
  0x49   :  { %21575 = sst [smem:[#allocation37_spill]] %s18132_s4 }
  0x4a   :  { %s18157_s16 = sld [smem:[%s21470_s0 + %s17924_s10]]  }
  0x4b   :  { %s18162_s23 = sld [smem:[%s21470_s0 + %s17925_s15]]  }
  0x4c   :  { %21577 = sst [smem:[#allocation39_spill]] %s18142_s19 }
  0x4d   :  { %21578 = sst [smem:[#allocation40_spill]] %s18147_s27 }
  0x4e   :  { %s18167_s28 = sld [smem:[%s21470_s0 + %s17926_s14]]  }
  0x4f   :  { %s18172_s4 = sld [smem:[%s21470_s0 + %s17927_s1]]  }
  0x50   :  { %21579 = sst [smem:[#allocation41_spill]] %s18157_s16 }
  0x51   :  { %s12930_s16 = sld [smem:[%s21470_s0 + %s17928_s20]]  }
  0x57   :  { %v100_v1 = vstv %s12930_s16 }
  0x58   :  { %101 = vst [vmem:[#allocation3] sm:$0x1] %v100_v1 }
  0x59   :  { %102 = vsyncpa [#allocation5], 0 }
  0x5a   :  { %103 = vsyncpa [#allocation7], 0 }
  0x5b   :  { %104 = vsyncpa [#allocation10], 0  ;;  %s17929_s19 = smov [#allocation6]   ;;  %s17930_s18 = smov [#allocation4]  }
  0x5c   :  { %s201_s15 = sshll.u32 %s17929_s19, 4  ;;  %s115_s14 = sshll.u32 %s17930_s18, 4  ;;  %s202_s15 = int_to_ptr.vmem [resolvable:$true] %s201_s15  ;;  %s116_s14 = int_to_ptr.vmem [resolvable:$true] %s115_s14 }
  0x5d   :  { %s17789_s27 = scalar_lea.hbm %s18152_s7, 16 }
  0x5e   :  { %p17790_p0 = scmp.ne.s32.totalorder %s18152_s7, %s17789_s27  ;;  %p17793_p1 = scmp.lt.u32.totalorder %s17789_s27, %s18152_s7 }
  0x60   :  { %p17795_p2 = pnand %p17793_p1, %p17790_p0 }
  0x62   :  { %17798 = shalt.err (!%p17795_p2)
}
  0x63   :  { %s17799_s0 = scalar_lea.vmem %s202_s15, 16  ;;  %s17803_s16 = scalar_lea.vmem %s202_s15, 32 }
  0x64   :  { %p17800_p3 = scmp.ne.s32.totalorder %s202_s15, %s17799_s0  ;;  %p17804_p4 = scmp.lt.s32.totalorder %s202_s15, %s202_s15 }
  0x65   :  { %p17805_p5 = scmp.lt.s32.totalorder %s17803_s16, %s17799_s0 }
  0x67   :  { %p17806_p6 = por %p17805_p5, %p17804_p4 }
  0x69   :  { %p17807_p7 = pnand %p17806_p6, %p17800_p3 }
  0x6b   :  { %17810 = shalt.err (!%p17807_p7)
}
  0x6c   :  { %204 = dma.hbm_to_vmem [thread:$0]  %s18152_s7, 16, %s202_s15, [#allocation7]  }
  0x6d   :  { %s17811_s22 = scalar_lea.hbm %s17959_s13, 16 }
  0x6e   :  { %p17812_p8 = scmp.ne.s32.totalorder %s17959_s13, %s17811_s22  ;;  %p17815_p9 = scmp.lt.u32.totalorder %s17811_s22, %s17959_s13 }
  0x70   :  { %p17817_p10 = pnand %p17815_p9, %p17812_p8 }
  0x72   :  { %17820 = shalt.err (!%p17817_p10)
}
  0x73   :  { %s17821_s26 = scalar_lea.vmem %s116_s14, 16  ;;  %s17825_s1 = scalar_lea.vmem %s116_s14, 32 }
  0x74   :  { %p17822_p11 = scmp.ne.s32.totalorder %s116_s14, %s17821_s26  ;;  %p17826_p12 = scmp.lt.s32.totalorder %s116_s14, %s116_s14 }
  0x75   :  { %p17827_p13 = scmp.lt.s32.totalorder %s17825_s1, %s17821_s26 }
  0x77   :  { %p17828_p0 = por %p17827_p13, %p17826_p12 }
  0x79   :  { %p17829_p1 = pnand %p17828_p0, %p17822_p11 }
  0x7b   :  { %17832 = shalt.err (!%p17829_p1)
}
  0x7c   :  { %118 = dma.hbm_to_vmem [thread:$0]  %s17959_s13, 16, %s116_s14, [#allocation5]  }
  0x7d   :  { %s17931_s2 = smov [#allocation8]   ;;  %s17932_s20 = smov [#allocation9]  }
  0x7e   :  { %s213_s7 = sshll.u32 %s17931_s2, 4  ;;  %s223_s10 = sshll.u32 %s17932_s20, 4  ;;  %s214_s7 = int_to_ptr.vmem [resolvable:$true] %s213_s7  ;;  %s224_s10 = int_to_ptr.vmem [resolvable:$true] %s223_s10 }
  0x7f   :  { %s17833_s11 = scalar_lea.hbm %s18162_s23, 16 }
  0x80   :  { %p17834_p2 = scmp.ne.s32.totalorder %s18162_s23, %s17833_s11  ;;  %p17837_p3 = scmp.lt.u32.totalorder %s17833_s11, %s18162_s23 }
  0x82   :  { %p17839_p4 = pnand %p17837_p3, %p17834_p2 }
  0x84   :  { %17842 = shalt.err (!%p17839_p4)
}
  0x85   :  { %s17843_s19 = scalar_lea.vmem %s214_s7, 16  ;;  %s17847_s15 = scalar_lea.vmem %s214_s7, 32 }
  0x86   :  { %p17844_p5 = scmp.ne.s32.totalorder %s214_s7, %s17843_s19  ;;  %p17848_p6 = scmp.lt.s32.totalorder %s214_s7, %s214_s7 }
  0x87   :  { %p17849_p7 = scmp.lt.s32.totalorder %s17847_s15, %s17843_s19 }
  0x89   :  { %p17850_p8 = por %p17849_p7, %p17848_p6 }
  0x8b   :  { %p17851_p9 = pnand %p17850_p8, %p17844_p5 }
  0x8d   :  { %17854 = shalt.err (!%p17851_p9)
}
  0x8e   :  { %216 = dma.hbm_to_vmem [thread:$0]  %s18162_s23, 16, %s214_s7, [#allocation7]  }
  0x8f   :  { %s17855_s13 = scalar_lea.hbm %s18167_s28, 16 }
  0x90   :  { %p17856_p10 = scmp.ne.s32.totalorder %s18167_s28, %s17855_s13  ;;  %p17859_p11 = scmp.lt.u32.totalorder %s17855_s13, %s18167_s28 }
  0x92   :  { %p17861_p12 = pnand %p17859_p11, %p17856_p10 }
  0x94   :  { %17864 = shalt.err (!%p17861_p12)
}
  0x95   :  { %s17865_s18 = scalar_lea.vmem %s224_s10, 16  ;;  %s17869_s14 = scalar_lea.vmem %s224_s10, 32 }
  0x96   :  { %p17866_p13 = scmp.ne.s32.totalorder %s224_s10, %s17865_s18  ;;  %p17870_p0 = scmp.lt.s32.totalorder %s224_s10, %s224_s10 }
  0x97   :  { %p17871_p1 = scmp.lt.s32.totalorder %s17869_s14, %s17865_s18 }
  0x99   :  { %p17872_p2 = por %p17871_p1, %p17870_p0 }
  0x9b   :  { %p17873_p3 = pnand %p17872_p2, %p17866_p13 }
  0x9d   :  { %17876 = shalt.err (!%p17873_p3)
}
  0x9e   :  { %226 = dma.hbm_to_vmem [thread:$0]  %s18167_s28, 16, %s224_s10, [#allocation10]  }
  0x9f   :  { %17877 = dma.done.wait [#allocation5], 16  }
  0xa0   :  { %17878 = vsyncadd [#allocation5], 4294967280 }
  0xa1   :  { %17879 = dma.done.wait [#allocation7], 32  }
  0xa2   :  { %17880 = vsyncadd [#allocation7], 4294967264 }
  0xa3   :  { %17881 = dma.done.wait [#allocation10], 16  }
  0xa4   :  { %17882 = vsyncadd [#allocation10], 4294967280  ;;  %vm259_vm0 = vcmask 1042432   ;;  %vm252_vm1 = vcmask 89088   ;;  %vm17933_vm2 = vmmov 1   ;;  %v21580_v2 = vmov 0 }
  0xa5   :  { %vm18194_vm3 = vmpackc.low %vm259_vm0, %vm17933_vm2  ;;  %v243_v3 = vld [vmem:[%s17954_s9] sm:$0xff]  ;;  %v244_v4 = vld [vmem:[%s17954_s9 + $0x8] sm:$0x7]  ;;  %vm398_vm4 = vcmask 1040384   ;;  %vm373_vm6 = vcmask 72704   ;;  %vm603_vm7 = vcmask 261120  }
  0xa6   :  { %v21581_v2 = vsel %vm18194_vm3, 4294967295, %v21580_v2  ;;  %v241_v5 = vld [vmem:[%s17949_s5] sm:$0xff]  ;;  %v15786_v6 = vpack.c.bf16 %v244_v4, %v243_v3  ;;  %v242_v7 = vld [vmem:[%s17949_s5 + $0x8] sm:$0xf]  ;;  %vm15793_vm5 = vmpackc.low %vm398_vm4, %vm17933_vm2  ;;  %vm818_vm0 = vcmask 97280   ;;  %s21600_s5 = sld [smem:[#allocation17_spill]] }
  0xa7   :  { %21582 = vst [vmem:[#allocation42_spill] sm:$0xff] %v21581_v2  ;;  %14269 = vmatprep.mubr.msk.f32.mxu0 %vm252_vm1, %v241_v5  ;;  %v364_v8 = vld [vmem:[%s17969_s21] sm:$0xff]  ;;  %v365_v9 = vld [vmem:[%s17969_s21 + $0x8] sm:$0x1]  ;;  %v358_v13 = vld [vmem:[%s17964_s17 + $0x10] sm:$0xff]  ;;  %s21601_s9 = sld [smem:[#allocation18_spill]] }
  0xa8   :  { %15788 = vmatprep.subr.msk.bf16.mxu0 %vm18194_vm3, %v15786_v6  ;;  %v15792_v10 = vpack.c.bf16 %v365_v9, %v364_v8  ;;  %v356_v11 = vld [vmem:[%s17964_s17] sm:$0xff]  ;;  %v357_v12 = vld [vmem:[%s17964_s17 + $0x8] sm:$0xff]  ;;  %v359_v14 = vld [vmem:[%s17964_s17 + $0x18] sm:$0xff]  ;;  %s21603_s21 = sld [smem:[#allocation21_spill]]  ;;  %s21606_s23 = sld [smem:[#allocation19_spill]] }
  0xa9   :  { %15791 = vmatpush3.bf16.msk.msra.mxu0 %vm18194_vm3, %v15786_v6  ;;  %v360_v15 = vld [vmem:[%s17964_s17 + $0x20] sm:$0xff]  ;;  %v361_v16 = vld [vmem:[%s17964_s17 + $0x28] sm:$0xff]  ;;  %v362_v17 = vld [vmem:[%s17964_s17 + $0x30] sm:$0xff]  ;;  %s21607_s28 = sld [smem:[#allocation23_spill]]  ;;  %s21608_s27 = sld [smem:[#allocation24_spill]] }
  0xaa   :  { %15794 = vmatprep.subr.msk.bf16.mxu0 %vm15793_vm5, %v15792_v10  ;;  %16698 = vmatprep.subr.msk.bf16.mxu1 %vm15793_vm5, %v15792_v10  ;;  %v599_v18 = vld [vmem:[%s18004_s24] sm:$0xff]  ;;  %v600_v19 = vld [vmem:[%s18004_s24 + $0x8] sm:$0xff]  ;;  %v363_v20 = vld [vmem:[%s17964_s17 + $0x38] sm:$0xf]  ;;  %s21602_s17 = sld [smem:[#allocation14_spill]]  ;;  %s21611_s0 = sld [smem:[#allocation25_spill]] }
  0xab   :  { %16699 = vmatpush3.bf16.msk.msra.mxu1 %vm15793_vm5, %v15792_v10  ;;  %14282 = vmatprep.mubr.msk.f32.mxu1 %vm373_vm6, %v360_v15  ;;  %v15798_v21 = vpack.c.bf16 %v600_v19, %v599_v18  ;;  %v601_v22 = vld [vmem:[%s18004_s24 + $0x10] sm:$0xff]  ;;  %v602_v23 = vld [vmem:[%s18004_s24 + $0x18] sm:$0xff]  ;;  %v685_v25 = vld [vmem:[%s18009_s30] sm:$0xff]  ;;  %s21713_s16 = sld [smem:[#allocation31_spill]]  ;;  %s21714_s22 = sld [smem:[#allocation33_spill]] }
  0xac   :  { %14270 = vmatmul.mubr.msk.f32.vlgmr.msra.gmra.mrb[0].mxu0 %vm252_vm1, %v242_v7  ;;  %v15802_v24 = vpack.c.bf16 %v602_v23, %v601_v22  ;;  %v686_v26 = vld [vmem:[%s18009_s30 + $0x8] sm:$0xff]  ;;  %v12932_v28 = vld [vmem:[#allocation4] ss:$0 sm:$0xff]  ;;  %v687_v48 = vld [vmem:[%s18009_s30 + $0x10] sm:$0xff]  ;;  %vm21529_vm1 = vcmask 1043456   ;;  %s21715_s26 = sld [smem:[#allocation34_spill]] }
  0xad   :  { %15797 = vmatpush3.bf16.msk.msra.mxu0 %vm15793_vm5, %v15792_v10  ;;  %14276 = vmatprep.mubr.msk.f32.mxu0 %vm373_vm6, %v356_v11  ;;  %v15806_v27 = vpack.c.bf16 %v686_v26, %v685_v25  ;;  %v688_v49 = vld [vmem:[%s18009_s30 + $0x18] sm:$0xff]  ;;  %v12936_v54 = vld [vmem:[%s17974_s25] ss:$0 sm:$0xff]  ;;  %vm18283_vm4 = vmpackc.low %vm21529_vm1, %vm17933_vm2  ;;  %vm1627_vm5 = vcmask 490496   ;;  %s21604_s25 = sld [smem:[#allocation20_spill]]  ;;  %s21716_s1 = sld [smem:[#allocation16_spill]] }
  0xae   :  { %14283 = vmatmul.mubr.msk.f32.vlgmr.msra.gmra.mrb[0].mxu1 %vm373_vm6, %v361_v16  ;;  %15799 = vmatprep.subr.bf16.mxu0 %v15798_v21  ;;  %v15810_v53 = vpack.c.bf16 %v688_v49, %v687_v48  ;;  %v539_v25 = vld [vmem:[%s17984_s3] sm:$0xff]  ;;  %s21717_s2 = sld [smem:[#allocation15_spill]]  ;;  %s21718_s7 = sld [smem:[#allocation35_spill]] }
  0xaf   :  { %14285 = vmatprep.mubr.msk.f32.mxu1 %vm373_vm6, %v362_v17  ;;  %s21719_s20 = sld [smem:[#allocation36_spill]]  ;;  %s21720_s10 = sld [smem:[#allocation37_spill]] }
  0xb0   :  { %14277 = vmatmul.mubr.msk.f32.vlgmr.msra.gmra.mrb[2].mxu0 %vm373_vm6, %v357_v12  ;;  %s21723_s11 = sld [smem:[#allocation38_spill]]  ;;  %s17938_s19 = smov 64  }
  0xb1   :  { %14279 = vmatprep.mubr.msk.f32.mxu0 %vm373_vm6, %v358_v13  ;;  %15801 = vmatpush3.bf16.msra.mxu0 %v15798_v21  ;;  %s17939_s15 = smov 32   ;;  %s21734_s13 = sld [smem:[#allocation40_spill]] }
  0xb2   :  { %14286 = vmatmul.mubr.msk.f32.gmra.mrb[2].mxu1 %vm373_vm6, %v363_v20  ;;  %15803 = vmatprep.subr.bf16.mxu0 %v15802_v24  ;;  %s21736_s18 = sld [smem:[#allocation39_spill]]  ;;  %s21737_s14 = sld [smem:[#allocation41_spill]] }
  0xb4   :  { %14280 = vmatmul.mubr.msk.f32.gmra.mrb[4].mxu0 %vm373_vm6, %v359_v14  ;;  %vm1631_vm6 = vcmask 486400  }
  0xb5   :  { %15805 = vmatpush3.bf16.msra.mxu0 %v15802_v24  ;;  %v18275_v24 = vld [vmem:[%s17979_s29] sm:$0xff] }
  0xb6   :  { %15807 = vmatprep.subr.bf16.mxu0 %v15806_v27  ;;  %14323 = vmatprep.mubr.msk.f32.mxu1 %vm818_vm0, %v18275_v24 }
 0x17f   :  { %v14271_v29 = vpop.f32.mrb[0].mxu0 }
 0x180   :  { %v335_v30 = vadd.f32 %v14271_v29, %v12932_v28  ;;  %v329_v31 = vpop.f32.mrb[1].mxu0 }
 0x181   :  { %v330_v32 = vadd.f32 %v12932_v28, %v329_v31  ;;  %v14284_v6 = vpop.f32.mrb[0].mxu1  ;;  %v540_v31 = vld [vmem:[%s17984_s3 + $0x8] sm:$0xff] }
 0x182   :  { %v341_v33 = vand.u32 2147483647, %v335_v30  ;;  %v339_v50 = vmax.f32 %v335_v30, 0.0  ;;  %v494_v8 = vadd.f32 %v14284_v6, %v12936_v54  ;;  %v488_v9 = vpop.f32.mrb[1].mxu1  ;;  %v532_v30 = vld [vmem:[%s17979_s29 + $0x8] sm:$0xff] }
 0x183   :  { %v340_v34 = vand.u32 2147483647, %v330_v32  ;;  %v338_v46 = vmax.f32 %v330_v32, 0.0  ;;  %v14278_v55 = vpop.f32.mrb[2].mxu0  ;;  %v489_v11 = vadd.f32 %v12936_v54, %v488_v9  ;;  %v533_v32 = vld [vmem:[%s17979_s29 + $0x10] sm:$0xff]  ;;  %v584_v6 = vld [vmem:[%s18049_s8 + $0x48] sm:$0xff] }
 0x184   :  { %v343_v35 = vsub.f32 0.0, %v341_v33  ;;  %v474_v56 = vadd.f32 %v14278_v55, %v12936_v54  ;;  %v468_v57 = vpop.f32.mrb[3].mxu0  ;;  %vm512_vm12 = vcmp.gt.f32.partialorder %v494_v8, 0.0  ;;  %v520_v12 = vmul.f32 0.2, %v494_v8  ;;  %v541_v33 = vld [vmem:[%s17984_s3 + $0x10] sm:$0xff] }
 0x185   :  { %v342_v36 = vsub.f32 0.0, %v340_v34  ;;  %v469_v58 = vadd.f32 %v12936_v54, %v468_v57  ;;  %vm511_vm13 = vcmp.gt.f32.partialorder %v489_v11, 0.0  ;;  %v519_v13 = vmul.f32 0.2, %v489_v11  ;;  %v14287_v14 = vpop.f32.mrb[2].mxu1  ;;  %v534_v34 = vld [vmem:[%s17979_s29 + $0x18] sm:$0xff] }
 0x186   :  { %v346_v37 = vmul.f32 1.442695, %v343_v35  ;;  %vm508_vm8 = vcmp.gt.f32.partialorder %v474_v56, 0.0  ;;  %v516_v59 = vmul.f32 0.2, %v474_v56  ;;  %v18258_v15 = vsel %vm512_vm12, %v494_v8, %v520_v12  ;;  %v498_v17 = vpop.f32.mrb[3].mxu1 }
 0x187   :  { %v344_v38 = vmul.f32 1.442695, %v342_v36  ;;  %vm507_vm9 = vcmp.gt.f32.partialorder %v469_v58, 0.0  ;;  %v515_v60 = vmul.f32 0.2, %v469_v58  ;;  %v14281_v61 = vpop.f32.mrb[4].mxu0  ;;  %v504_v16 = vadd.f32 %v14287_v14, %v12936_v54 }
 0x188   :  { %16762 = vpow2.f32 %v346_v37  ;;  %v18242_v62 = vsel %vm508_vm8, %v474_v56, %v516_v59  ;;  %v484_v63 = vadd.f32 %v14281_v61, %v12936_v54  ;;  %v478_v0 = vpop.f32.mrb[5].mxu0  ;;  %21586 = vst [vmem:[#allocation46_spill] sm:$0xff] %v18258_v15  ;;  %v18260_v18 = vsel %vm511_vm13, %v489_v11, %v519_v13  ;;  %v542_v35 = vld [vmem:[%s17984_s3 + $0x18] sm:$0xff]  ;;  %v535_v36 = vld [vmem:[%s17979_s29 + $0x20] sm:$0xff]  ;;  %v576_v55 = vld [vmem:[%s18049_s8 + $0x8] sm:$0xff] }
 0x189   :  { %16764 = vpow2.f32 %v344_v38  ;;  %21583 = vst [vmem:[#allocation43_spill] sm:$0xff] %v18242_v62  ;;  %v18244_v1 = vsel %vm507_vm9, %v469_v58, %v515_v60  ;;  %v479_v3 = vadd.f32 %v12936_v54, %v478_v0  ;;  %21587 = vst [vmem:[#allocation47_spill] sm:$0xff] %v18260_v18  ;;  %v499_v19 = vadd.f32 %v12936_v54, %v498_v17  ;;  %v543_v37 = vld [vmem:[%s17984_s3 + $0x20] sm:$0xff]  ;;  %v536_v38 = vld [vmem:[%s17979_s29 + $0x28] sm:$0xff] }
 0x18a   :  { %vm510_vm10 = vcmp.gt.f32.partialorder %v484_v63, 0.0  ;;  %v518_v4 = vmul.f32 0.2, %v484_v63  ;;  %vm514_vm14 = vcmp.gt.f32.partialorder %v504_v16, 0.0  ;;  %v522_v20 = vmul.f32 0.2, %v504_v16 }
 0x18b   :  { %vm509_vm11 = vcmp.gt.f32.partialorder %v479_v3, 0.0  ;;  %v517_v5 = vmul.f32 0.2, %v479_v3  ;;  %vm513_vm15 = vcmp.gt.f32.partialorder %v499_v19, 0.0  ;;  %v521_v21 = vmul.f32 0.2, %v499_v19 }
 0x18c   :  { %v18250_v7 = vsel %vm510_vm10, %v484_v63, %v518_v4  ;;  %v18266_v22 = vsel %vm514_vm14, %v504_v16, %v522_v20  ;;  %v575_v54 = vld [vmem:[%s18049_s8] sm:$0xff]  ;;  %v577_v57 = vld [vmem:[%s18049_s8 + $0x10] sm:$0xff]  ;;  %v578_v58 = vld [vmem:[%s18049_s8 + $0x18] sm:$0xff]  ;;  %vm1672_vm8 = vcmask 130112   ;;  %vm1701_vm9 = vcmask 1041409  }
 0x18d   :  { %21584 = vst [vmem:[#allocation44_spill] sm:$0xff] %v18250_v7  ;;  %v18252_v10 = vsel %vm509_vm11, %v479_v3, %v517_v5  ;;  %21588 = vst [vmem:[#allocation48_spill] sm:$0xff] %v18266_v22  ;;  %v18268_v23 = vsel %vm513_vm15, %v499_v19, %v521_v21  ;;  %v18339_v56 = vpack.c.bf16 %v576_v55, %v575_v54  ;;  %v579_v60 = vld [vmem:[%s18049_s8 + $0x20] sm:$0xff]  ;;  %v580_v61 = vld [vmem:[%s18049_s8 + $0x28] sm:$0xff]  ;;  %vm1703_vm10 = vcmask 1042434  }
 0x18e   :  { %21585 = vst [vmem:[#allocation45_spill] sm:$0xff] %v18252_v10  ;;  %21589 = vst [vmem:[#allocation49_spill] sm:$0xff] %v18268_v23  ;;  %v18345_v59 = vpack.c.bf16 %v578_v58, %v577_v57  ;;  %v18351_v63 = vpack.c.bf16 %v580_v61, %v579_v60  ;;  %v581_v0 = vld [vmem:[%s18049_s8 + $0x30] sm:$0xff]  ;;  %v582_v3 = vld [vmem:[%s18049_s8 + $0x38] sm:$0xff]  ;;  %vm21530_vm11 = vcmask 1043459   ;;  %vm21499_vm12 = vcmask 31744  }
 0x18f   :  { %21592 = vst [vmem:[#allocation50_spill] sm:$0xff] %v18339_v56  ;;  %v18357_v4 = vpack.c.bf16 %v582_v3, %v581_v0  ;;  %v583_v5 = vld [vmem:[%s18049_s8 + $0x40] sm:$0xff]  ;;  %v585_v9 = vld [vmem:[%s18049_s8 + $0x50] sm:$0xff]  ;;  %v586_v11 = vld [vmem:[%s18049_s8 + $0x58] sm:$0xff]  ;;  %vm2438_vm13 = vcmask 76800   ;;  %vm2434_vm14 = vcmask 80896  }
 0x190   :  { %21593 = vst [vmem:[#allocation51_spill] sm:$0xff] %v18345_v59  ;;  %21594 = vst [vmem:[#allocation52_spill] sm:$0xff] %v18351_v63  ;;  %v18363_v8 = vpack.c.bf16 %v584_v6, %v583_v5  ;;  %v18369_v12 = vpack.c.bf16 %v586_v11, %v585_v9  ;;  %v587_v13 = vld [vmem:[%s18049_s8 + $0x60] sm:$0xff]  ;;  %v588_v14 = vld [vmem:[%s18049_s8 + $0x68] sm:$0xff]  ;;  %vm21528_vm15 = vcmask 1041408  }
 0x191   :  { %21595 = vst [vmem:[#allocation53_spill] sm:$0xff] %v18357_v4  ;;  %v18375_v16 = vpack.c.bf16 %v588_v14, %v587_v13  ;;  %v589_v17 = vld [vmem:[%s18049_s8 + $0x70] sm:$0xff]  ;;  %v590_v19 = vld [vmem:[%s18049_s8 + $0x78] sm:$0xff]  ;;  %s21605_s8 = sld [smem:[#allocation22_spill]] }
 0x192   :  { %v16763_v39 = vpop.eup %16762  ;;  %21596 = vst [vmem:[#allocation54_spill] sm:$0xff] %v18363_v8  ;;  %21597 = vst [vmem:[#allocation55_spill] sm:$0xff] %v18369_v12  ;;  %v18381_v20 = vpack.c.bf16 %v590_v19, %v589_v17 }
 0x193   :  { %v16765_v40 = vpop.eup %16764  ;;  %v349_v41 = vadd.f32 1.0, %v16763_v39  ;;  %v544_v39 = vld [vmem:[%s17984_s3 + $0x28] sm:$0xff]  ;;  %21598 = vst [vmem:[#allocation56_spill] sm:$0xff] %v18375_v16 }
 0x194   :  { %v348_v42 = vadd.f32 1.0, %v16765_v40  ;;  %v537_v40 = vld [vmem:[%s17979_s29 + $0x30] sm:$0xff]  ;;  %21599 = vst [vmem:[#allocation57_spill] sm:$0xff] %v18381_v20 }
 0x195   :  { %16766 = vlog2.f32 %v349_v41  ;;  %v545_v41 = vld [vmem:[%s17984_s3 + $0x30] sm:$0xff] }
 0x196   :  { %16768 = vlog2.f32 %v348_v42  ;;  %v538_v42 = vld [vmem:[%s17979_s29 + $0x38] sm:$0xf] }
 0x19f   :  { %v16767_v43 = vpop.eup %16766 }
 0x1a0   :  { %v16769_v44 = vpop.eup %16768  ;;  %v353_v45 = vmul.f32 0.6931472, %v16767_v43  ;;  %v546_v43 = vld [vmem:[%s17984_s3 + $0x38] sm:$0xf] }
 0x1a1   :  { %v351_v47 = vmul.f32 0.6931472, %v16769_v44 }
 0x1a2   :  { %v18235_v52 = vadd.f32 %v353_v45, %v339_v50 }
 0x1a3   :  { %v18233_v51 = vadd.f32 %v351_v47, %v338_v46 }
 0x1a5   :  { %14296 = vmatprep.mubr.msk.f32.mxu0 %vm603_vm7, %v18233_v51 }
 0x1a6   :  { %14297 = vmatmul.mubr.msk.f32.vlgmr.msra.gmra.mrb[6].mxu0 %vm603_vm7, %v18235_v52 }
 0x1a7   :  { %15809 = vmatpush3.bf16.msra.mxu0 %v15806_v27  ;;  %14307 = vmatprep.mubr.msk.f32.mxu0 %vm603_vm7, %v18244_v1 }
 0x1a8   :  { %15811 = vmatprep.subr.bf16.mxu0 %v15810_v53 }
 0x1ab   :  { %15813 = vmatpush3.bf16.msra.mxu0 %v15810_v53 }
 0x1ae   :  { %14308 = vmatmul.mubr.msk.f32.vlgmr.msra.gmra.mrb[8].mxu0 %vm603_vm7, %v18242_v62 }
 0x1af   :  { %14310 = vmatprep.mubr.msk.f32.mxu0 %vm603_vm7, %v18252_v10 }
 0x1b2   :  { %14311 = vmatmul.mubr.msk.f32.gmra.mrb[10].mxu0 %vm603_vm7, %v18250_v7 }
 0x1b3   :  { %14313 = vmatprep.mubr.msk.f32.mxu0 %vm603_vm7, %v18260_v18 }
 0x1b6   :  { %14314 = vmatmul.mubr.msk.f32.gmra.mrb[12].mxu0 %vm603_vm7, %v18258_v15 }
 0x1b7   :  { %14316 = vmatprep.mubr.msk.f32.mxu0 %vm603_vm7, %v18268_v23 }
 0x1ba   :  { %14317 = vmatmul.mubr.msk.f32.gmra.mrb[14].mxu0 %vm603_vm7, %v18266_v22 }
 0x1bb   :  { %14339 = vmatprep.mubr.msk.f32.mxu0 %vm818_vm0, %v539_v25 }
 0x279   :  { %v14298_v26 = vpop.f32.mrb[6].mxu0 }
 0x27a   :  { %v676_v28 = vpop.f32.mrb[7].mxu0 }
 0x27b   :  { %v15814_v29 = vpack.c.bf16 %v14298_v26, %v676_v28 }
 0x27d   :  { %15816 = vmatprep.subr.msk.bf16.mxu1 %vm18283_vm4, %v15814_v29  ;;  %15822 = vmatprep.subr.msk.bf16.mxu0 %vm18283_vm4, %v15814_v29 }
 0x27e   :  { %15819 = vmatpush3.bf16.msk.msra.mxu1 %vm18283_vm4, %v15814_v29  ;;  %15825 = vmatpush3.bf16.msk.msra.mxu0 %vm18283_vm4, %v15814_v29 }
 0x27f   :  { %15827 = vmatprep.subr.bf16.mxu1 %v18339_v56 }
 0x281   :  { %14324 = vmatmul.mubr.msk.f32.vlgmr.msra.gmra.mrb[4].mxu1 %vm818_vm0, %v532_v30  ;;  %14340 = vmatmul.mubr.msk.f32.vlgmr.msra.gmra.mrb[16].mxu0 %vm818_vm0, %v540_v31  ;;  %v14309_v44 = vpop.f32.mrb[8].mxu0 }
 0x282   :  { %14326 = vmatprep.mubr.msk.f32.mxu1 %vm818_vm0, %v533_v32  ;;  %14342 = vmatprep.mubr.msk.f32.mxu0 %vm818_vm0, %v541_v33  ;;  %v779_v45 = vpop.f32.mrb[9].mxu0 }
 0x283   :  { %15829 = vmatpush3.bf16.msra.mxu1 %v18339_v56 }
 0x284   :  { %15831 = vmatprep.subr.bf16.mxu1 %v18345_v59 }
 0x285   :  { %14327 = vmatmul.mubr.msk.f32.gmra.mrb[6].mxu1 %vm818_vm0, %v534_v34  ;;  %14343 = vmatmul.mubr.msk.f32.gmra.mrb[18].mxu0 %vm818_vm0, %v542_v35  ;;  %v18325_v46 = vpop.f32.mrb[10].mxu0 }
 0x286   :  { %14329 = vmatprep.mubr.msk.f32.mxu1 %vm818_vm0, %v535_v36  ;;  %14345 = vmatprep.mubr.msk.f32.mxu0 %vm818_vm0, %v543_v37  ;;  %v18327_v47 = vpop.f32.mrb[11].mxu0 }
 0x287   :  { %15833 = vmatpush3.bf16.msra.mxu1 %v18345_v59 }
 0x288   :  { %15835 = vmatprep.subr.bf16.mxu1 %v18351_v63 }
 0x289   :  { %14330 = vmatmul.mubr.msk.f32.gmra.mrb[8].mxu1 %vm818_vm0, %v536_v38  ;;  %14346 = vmatmul.mubr.msk.f32.gmra.mrb[20].mxu0 %vm818_vm0, %v544_v39  ;;  %v18329_v48 = vpop.f32.mrb[12].mxu0 }
 0x28a   :  { %14332 = vmatprep.mubr.msk.f32.mxu1 %vm818_vm0, %v537_v40  ;;  %14348 = vmatprep.mubr.msk.f32.mxu0 %vm818_vm0, %v545_v41  ;;  %v18331_v49 = vpop.f32.mrb[13].mxu0 }
 0x28b   :  { %15837 = vmatpush3.bf16.msra.mxu1 %v18351_v63 }
 0x28c   :  { %15839 = vmatprep.subr.bf16.mxu1 %v18357_v4 }
 0x28d   :  { %14333 = vmatmul.mubr.msk.f32.gmra.mrb[10].mxu1 %vm818_vm0, %v538_v42  ;;  %14349 = vmatmul.mubr.msk.f32.gmra.mrb[22].mxu0 %vm818_vm0, %v546_v43  ;;  %v18333_v50 = vpop.f32.mrb[14].mxu0 }
 0x28e   :  { %14397 = vmatprep.mubr.msk.f32.mxu0 %vm818_vm0, %v18275_v24  ;;  %v18335_v53 = vpop.f32.mrb[15].mxu0 }
 0x28f   :  { %15841 = vmatpush3.bf16.msra.mxu1 %v18357_v4 }
 0x290   :  { %15843 = vmatprep.subr.bf16.mxu1 %v18363_v8 }
 0x293   :  { %15845 = vmatpush3.bf16.msra.mxu1 %v18363_v8 }
 0x294   :  { %15847 = vmatprep.subr.bf16.mxu1 %v18369_v12 }
 0x297   :  { %15849 = vmatpush3.bf16.msra.mxu1 %v18369_v12 }
 0x298   :  { %15851 = vmatprep.subr.bf16.mxu1 %v18375_v16 }
 0x29b   :  { %15853 = vmatpush3.bf16.msra.mxu1 %v18375_v16 }
 0x29c   :  { %15855 = vmatprep.subr.bf16.mxu1 %v18381_v20 }
 0x29f   :  { %15857 = vmatpush3.bf16.msra.mxu1 %v18381_v20 }
 0x354   :  { %v14325_v21 = vpop.f32.mrb[4].mxu1  ;;  %v14341_v25 = vpop.f32.mrb[16].mxu0 }
 0x355   :  { %v18385_v26 = vadd.f32 %v14325_v21, %v14309_v44  ;;  %v18387_v28 = vadd.f32 %v14341_v25, %v14309_v44  ;;  %v913_v29 = vpop.f32.mrb[5].mxu1  ;;  %v1114_v30 = vpop.f32.mrb[17].mxu0 }
 0x356   :  { %v18389_v31 = vadd.f32 %v913_v29, %v779_v45  ;;  %v18391_v32 = vadd.f32 %v1114_v30, %v779_v45 }
 0x357   :  { %v961_v33 = vand.u32 2147483647, %v18385_v26  ;;  %v1162_v34 = vand.u32 2147483647, %v18387_v28 }
 0x358   :  { %v960_v35 = vand.u32 2147483647, %v18389_v31  ;;  %v1161_v36 = vand.u32 2147483647, %v18391_v32  ;;  %v14328_v39 = vpop.f32.mrb[6].mxu1  ;;  %v14344_v40 = vpop.f32.mrb[18].mxu0 }
 0x359   :  { %v969_v37 = vsub.f32 0.0, %v961_v33  ;;  %v1170_v38 = vsub.f32 0.0, %v1162_v34  ;;  %v18398_v43 = vadd.f32 %v14328_v39, %v18325_v46  ;;  %v18401_v44 = vadd.f32 %v14344_v40, %v18325_v46  ;;  %v923_v45 = vpop.f32.mrb[7].mxu1  ;;  %v1124_v54 = vpop.f32.mrb[19].mxu0 }
 0x35a   :  { %v968_v41 = vsub.f32 0.0, %v960_v35  ;;  %v1169_v42 = vsub.f32 0.0, %v1161_v36  ;;  %v18404_v58 = vadd.f32 %v923_v45, %v18327_v47  ;;  %v18407_v60 = vadd.f32 %v1124_v54, %v18327_v47 }
 0x35b   :  { %v978_v55 = vmul.f32 1.442695, %v969_v37  ;;  %v1179_v57 = vmul.f32 1.442695, %v1170_v38  ;;  %v963_v3 = vand.u32 2147483647, %v18398_v43 }
 0x35c   :  { %v976_v61 = vmul.f32 1.442695, %v968_v41  ;;  %v1177_v0 = vmul.f32 1.442695, %v1169_v42  ;;  %v1164_v5 = vand.u32 2147483647, %v18401_v44 }
 0x35d   :  { %16770 = vpow2.f32 %v978_v55  ;;  %v14331_v6 = vpop.f32.mrb[8].mxu1  ;;  %v962_v46 = vand.u32 2147483647, %v18404_v58  ;;  %v1163_v9 = vand.u32 2147483647, %v18407_v60  ;;  %v14347_v11 = vpop.f32.mrb[20].mxu0 }
 0x35e   :  { %16772 = vpow2.f32 %v1179_v57  ;;  %v971_v13 = vsub.f32 0.0, %v963_v3  ;;  %v1172_v14 = vsub.f32 0.0, %v1164_v5  ;;  %v18414_v47 = vadd.f32 %v14331_v6, %v18329_v48  ;;  %v933_v17 = vpop.f32.mrb[9].mxu1  ;;  %v1134_v19 = vpop.f32.mrb[21].mxu0 }
 0x35f   :  { %16774 = vpow2.f32 %v976_v61  ;;  %v970_v21 = vsub.f32 0.0, %v962_v46  ;;  %v1171_v25 = vsub.f32 0.0, %v1163_v9  ;;  %v18417_v29 = vadd.f32 %v14347_v11, %v18329_v48 }
 0x360   :  { %16776 = vpow2.f32 %v1177_v0  ;;  %v14334_v30 = vpop.f32.mrb[10].mxu1  ;;  %v14350_v33 = vpop.f32.mrb[22].mxu0  ;;  %v982_v34 = vmul.f32 1.442695, %v971_v13  ;;  %v1183_v35 = vmul.f32 1.442695, %v1172_v14  ;;  %v18420_v36 = vadd.f32 %v933_v17, %v18331_v49 }
 0x361   :  { %v943_v37 = vpop.f32.mrb[11].mxu1  ;;  %v980_v38 = vmul.f32 1.442695, %v970_v21  ;;  %v1181_v39 = vmul.f32 1.442695, %v1171_v25  ;;  %v18424_v41 = vadd.f32 %v1134_v19, %v18331_v49  ;;  %v1144_v48 = vpop.f32.mrb[23].mxu0  ;;  %v18430_v61 = vadd.f32 %v14334_v30, %v18333_v50 }
 0x362   :  { %v965_v40 = vand.u32 2147483647, %v18414_v47  ;;  %16778 = vpow2.f32 %v982_v34  ;;  %v1166_v42 = vand.u32 2147483647, %v18417_v29  ;;  %v964_v54 = vand.u32 2147483647, %v18420_v36 }
 0x363   :  { %16780 = vpow2.f32 %v1183_v35  ;;  %v1165_v57 = vand.u32 2147483647, %v18424_v41  ;;  %v18433_v49 = vadd.f32 %v14350_v33, %v18333_v50  ;;  %v967_v13 = vand.u32 2147483647, %v18430_v61 }
 0x364   :  { %v973_v45 = vsub.f32 0.0, %v965_v40  ;;  %16782 = vpow2.f32 %v980_v38  ;;  %v1174_v55 = vsub.f32 0.0, %v1166_v42  ;;  %v972_v3 = vsub.f32 0.0, %v964_v54 }
 0x365   :  { %16784 = vpow2.f32 %v1181_v39  ;;  %v1173_v46 = vsub.f32 0.0, %v1165_v57  ;;  %v18437_v34 = vadd.f32 %v943_v37, %v18335_v53  ;;  %v1168_v33 = vand.u32 2147483647, %v18433_v49 }
 0x366   :  { %v986_v0 = vmul.f32 1.442695, %v973_v45  ;;  %v1187_v6 = vmul.f32 1.442695, %v1174_v55  ;;  %v984_v19 = vmul.f32 1.442695, %v972_v3  ;;  %v18441_v35 = vadd.f32 %v1144_v48, %v18335_v53 }
 0x367   :  { %v16771_v5 = vpop.eup %16770  ;;  %v1185_v30 = vmul.f32 1.442695, %v1173_v46  ;;  %v975_v38 = vsub.f32 0.0, %v967_v13  ;;  %v966_v39 = vand.u32 2147483647, %v18437_v34  ;;  %v1176_v57 = vsub.f32 0.0, %v1168_v33 }
 0x368   :  { %v16773_v9 = vpop.eup %16772  ;;  %v993_v11 = vadd.f32 1.0, %v16771_v5  ;;  %16786 = vpow2.f32 %v986_v0  ;;  %v1167_v42 = vand.u32 2147483647, %v18441_v35 }
 0x369   :  { %v16775_v14 = vpop.eup %16774  ;;  %v1194_v17 = vadd.f32 1.0, %v16773_v9  ;;  %16788 = vpow2.f32 %v1187_v6  ;;  %v990_v53 = vmul.f32 1.442695, %v975_v38  ;;  %v974_v48 = vsub.f32 0.0, %v966_v39 }
 0x36a   :  { %v16777_v21 = vpop.eup %16776  ;;  %16790 = vlog2.f32 %v993_v11  ;;  %v992_v25 = vadd.f32 1.0, %v16775_v14  ;;  %v1175_v6 = vsub.f32 0.0, %v1167_v42  ;;  %v1191_v13 = vmul.f32 1.442695, %v1176_v57 }
 0x36b   :  { %16792 = vlog2.f32 %v1194_v17  ;;  %v1193_v50 = vadd.f32 1.0, %v16777_v21  ;;  %v1154_v38 = vmax.f32 %v18387_v28, 0.0 }
 0x36c   :  { %16794 = vlog2.f32 %v992_v25  ;;  %v16779_v40 = vpop.eup %16778  ;;  %v953_v25 = vmax.f32 %v18385_v26, 0.0  ;;  %v18454_v26 = vld [vmem:[%s18019_s12] ss:$0 sm:$0xff] }
 0x36d   :  { %16796 = vlog2.f32 %v1193_v50  ;;  %v16781_v45 = vpop.eup %16780  ;;  %v995_v54 = vadd.f32 1.0, %v16779_v40  ;;  %v1189_v50 = vmul.f32 1.442695, %v1175_v6 }
 0x36e   :  { %16798 = vpow2.f32 %v984_v19  ;;  %v16783_v37 = vpop.eup %16782  ;;  %v1196_v55 = vadd.f32 1.0, %v16781_v45  ;;  %v988_v19 = vmul.f32 1.442695, %v974_v48  ;;  %v18448_v45 = vld [vmem:[%s18014_s6] ss:$0 sm:$0xff] }
 0x36f   :  { %16800 = vpow2.f32 %v1185_v30  ;;  %v16785_v0 = vpop.eup %16784  ;;  %v994_v3 = vadd.f32 1.0, %v16783_v37 }
 0x370   :  { %16802 = vlog2.f32 %v995_v54  ;;  %v1195_v5 = vadd.f32 1.0, %v16785_v0  ;;  %v952_v54 = vmax.f32 %v18389_v31, 0.0  ;;  %v1153_v0 = vmax.f32 %v18391_v32, 0.0 }
 0x371   :  { %16804 = vlog2.f32 %v1196_v55  ;;  %v955_v31 = vmax.f32 %v18398_v43, 0.0  ;;  %v954_v43 = vmax.f32 %v18404_v58, 0.0 }
 0x372   :  { %v16787_v46 = vpop.eup %16786  ;;  %16806 = vlog2.f32 %v994_v3 }
 0x373   :  { %v16789_v9 = vpop.eup %16788  ;;  %16808 = vlog2.f32 %v1195_v5  ;;  %v997_v11 = vadd.f32 1.0, %v16787_v46 }
 0x374   :  { %v16791_v14 = vpop.eup %16790  ;;  %v1198_v17 = vadd.f32 1.0, %v16789_v9  ;;  %16810 = vpow2.f32 %v990_v53 }
 0x375   :  { %v16793_v21 = vpop.eup %16792  ;;  %v1003_v30 = vmul.f32 0.6931472, %v16791_v14  ;;  %16812 = vlog2.f32 %v997_v11 }
 0x376   :  { %v16795_v33 = vpop.eup %16794  ;;  %v1204_v39 = vmul.f32 0.6931472, %v16793_v21  ;;  %16814 = vlog2.f32 %v1198_v17 }
 0x377   :  { %v16797_v40 = vpop.eup %16796  ;;  %v1017_v42 = vadd.f32 %v1003_v30, %v953_v25  ;;  %v1001_v37 = vmul.f32 0.6931472, %v16795_v33  ;;  %16816 = vpow2.f32 %v1191_v13 }
 0x378   :  { %v16799_v55 = vpop.eup %16798  ;;  %v18451_v57 = vadd.f32 %v1204_v39, %v1154_v38  ;;  %v1202_v3 = vmul.f32 0.6931472, %v16797_v40  ;;  %16818 = vpow2.f32 %v988_v19  ;;  %v1156_v19 = vmax.f32 %v18401_v44, 0.0 }
 0x379   :  { %v16801_v28 = vpop.eup %16800  ;;  %v1016_v53 = vadd.f32 %v1001_v37, %v952_v54  ;;  %v996_v48 = vadd.f32 1.0, %v16799_v55  ;;  %16820 = vpow2.f32 %v1189_v50  ;;  %v1233_v6 = vmul.f32 %v18448_v45, %v1017_v42 }
 0x37a   :  { %v16803_v5 = vpop.eup %16802  ;;  %v18458_v46 = vadd.f32 %v1202_v3, %v1153_v0  ;;  %v1197_v9 = vadd.f32 1.0, %v16801_v28  ;;  %v1248_v13 = vmul.f32 %v18454_v26, %v18451_v57  ;;  %v1155_v40 = vmax.f32 %v18407_v60, 0.0 }
 0x37b   :  { %v16805_v11 = vpop.eup %16804  ;;  %v1007_v14 = vmul.f32 0.6931472, %v16803_v5  ;;  %16822 = vlog2.f32 %v996_v48  ;;  %v1232_v32 = vmul.f32 %v18448_v45, %v1016_v53 }
 0x37c   :  { %v16807_v17 = vpop.eup %16806  ;;  %v1208_v21 = vmul.f32 0.6931472, %v16805_v11  ;;  %16824 = vlog2.f32 %v1197_v9  ;;  %v1247_v25 = vmul.f32 %v18454_v26, %v18458_v46  ;;  %v1256_v55 = vadd.f32 %v1248_v13, %v1233_v6 }
 0x37d   :  { %v16809_v30 = vpop.eup %16808  ;;  %v1019_v50 = vadd.f32 %v1007_v14, %v955_v31  ;;  %v1005_v33 = vmul.f32 0.6931472, %v16807_v17  ;;  %v957_v14 = vmax.f32 %v18414_v47, 0.0  ;;  %v1158_v17 = vmax.f32 %v18417_v29, 0.0 }
 0x37e   :  { %v16811_v38 = vpop.eup %16810  ;;  %v18468_v39 = vadd.f32 %v1208_v21, %v1156_v19  ;;  %v1206_v42 = vmul.f32 0.6931472, %v16809_v30  ;;  %v1255_v54 = vadd.f32 %v1247_v25, %v1232_v32  ;;  %v956_v30 = vmax.f32 %v18420_v36, 0.0 }
 0x37f   :  { %v16813_v37 = vpop.eup %16812  ;;  %v1018_v44 = vadd.f32 %v1005_v33, %v954_v43  ;;  %v999_v0 = vadd.f32 1.0, %v16811_v38  ;;  %v1235_v48 = vmul.f32 %v18448_v45, %v1019_v50  ;;  %v1157_v47 = vmax.f32 %v18424_v41, 0.0 }
 0x380   :  { %v16815_v3 = vpop.eup %16814  ;;  %v18471_v28 = vadd.f32 %v1206_v42, %v1155_v40  ;;  %14383 = vmatprep.mubr.f32.mxu1 %v1255_v54  ;;  %v1250_v60 = vmul.f32 %v18454_v26, %v18468_v39  ;;  %v1011_v31 = vmul.f32 0.6931472, %v16813_v37  ;;  %v959_v41 = vmax.f32 %v18430_v61, 0.0 }
 0x381   :  { %v16817_v53 = vpop.eup %16816  ;;  %16826 = vlog2.f32 %v999_v0  ;;  %14384 = vmatmul.mubr.f32.vlgmr.msra.gmra.mrb[12].mxu1 %v1256_v55  ;;  %v1234_v58 = vmul.f32 %v18448_v45, %v1018_v44  ;;  %v1212_v9 = vmul.f32 0.6931472, %v16815_v3 }
 0x382   :  { %v16819_v5 = vpop.eup %16818  ;;  %v1200_v6 = vadd.f32 1.0, %v16817_v53  ;;  %v1249_v11 = vmul.f32 %v18454_v26, %v18471_v28  ;;  %v1258_v50 = vadd.f32 %v1250_v60, %v1235_v48  ;;  %v1021_v33 = vadd.f32 %v1011_v31, %v957_v14 }
 0x383   :  { %v16821_v13 = vpop.eup %16820  ;;  %v998_v32 = vadd.f32 1.0, %v16819_v5  ;;  %v18482_v38 = vadd.f32 %v1212_v9, %v1158_v17  ;;  %v1160_v5 = vmax.f32 %v18433_v49, 0.0 }
 0x384   :  { %16828 = vlog2.f32 %v1200_v6  ;;  %v1199_v19 = vadd.f32 1.0, %v16821_v13  ;;  %v1257_v21 = vadd.f32 %v1249_v11, %v1234_v58  ;;  %v1237_v36 = vmul.f32 %v18448_v45, %v1021_v33 }
 0x385   :  { %v16823_v25 = vpop.eup %16822  ;;  %16830 = vlog2.f32 %v998_v32  ;;  %v1252_v55 = vmul.f32 %v18454_v26, %v18482_v38  ;;  %v958_v11 = vmax.f32 %v18437_v34, 0.0  ;;  %v1159_v32 = vmax.f32 %v18441_v35, 0.0 }
 0x386   :  { %v16825_v43 = vpop.eup %16824  ;;  %v1009_v40 = vmul.f32 0.6931472, %v16823_v25  ;;  %16832 = vlog2.f32 %v1199_v19  ;;  %14386 = vmatprep.mubr.f32.mxu1 %v1257_v21  ;;  %v1578_v35 = vlaneseq }
 0x387   :  { %v1210_v42 = vmul.f32 0.6931472, %v16825_v43  ;;  %14387 = vmatmul.mubr.f32.gmra.mrb[14].mxu1 %v1258_v50  ;;  %v1260_v48 = vadd.f32 %v1252_v55, %v1237_v36 }
 0x388   :  { %v1020_v29 = vadd.f32 %v1009_v40, %v956_v30  ;;  %v18509_v43 = vshrl.u32 %v1578_v35, 7  ;;  %v1662_v33 = vand.u32 127, %v1578_v35 }
 0x389   :  { %v18485_v54 = vadd.f32 %v1210_v42, %v1157_v47 }
 0x38a   :  { %v1236_v37 = vmul.f32 %v18448_v45, %v1020_v29  ;;  %v18512_v40 = vsub.s32 %v1662_v33, %v18509_v43 }
 0x38b   :  { %v16827_v44 = vpop.eup %16826  ;;  %v1251_v0 = vmul.f32 %v18454_v26, %v18485_v54 }
 0x38c   :  { %v1015_v3 = vmul.f32 0.6931472, %v16827_v44 }
 0x38d   :  { %v1259_v53 = vadd.f32 %v1251_v0, %v1236_v37 }
 0x38e   :  { %v16829_v58 = vpop.eup %16828  ;;  %v1023_v6 = vadd.f32 %v1015_v3, %v959_v41 }
 0x38f   :  { %v16831_v60 = vpop.eup %16830  ;;  %v1216_v31 = vmul.f32 0.6931472, %v16829_v58  ;;  %14389 = vmatprep.mubr.f32.mxu1 %v1259_v53 }
 0x390   :  { %v16833_v9 = vpop.eup %16832  ;;  %v1013_v13 = vmul.f32 0.6931472, %v16831_v60  ;;  %14390 = vmatmul.mubr.f32.gmra.mrb[16].mxu1 %v1260_v48  ;;  %v1239_v49 = vmul.f32 %v18448_v45, %v1023_v6 }
 0x391   :  { %v18496_v14 = vadd.f32 %v1216_v31, %v1160_v5  ;;  %v1214_v17 = vmul.f32 0.6931472, %v16833_v9 }
 0x392   :  { %v1022_v19 = vadd.f32 %v1013_v13, %v958_v11 }
 0x393   :  { %v18499_v21 = vadd.f32 %v1214_v17, %v1159_v32  ;;  %v1254_v25 = vmul.f32 %v18454_v26, %v18496_v14 }
 0x394   :  { %v1238_v61 = vmul.f32 %v18448_v45, %v1022_v19  ;;  %v1667_v45 = vadd.s32 4294967288, %v1662_v33 }
 0x395   :  { %v1253_v34 = vmul.f32 %v18454_v26, %v18499_v21  ;;  %v1262_v50 = vadd.f32 %v1254_v25, %v1239_v49 }
 0x396   :  { %v18515_v47 = vsub.s32 %v1667_v45, %v18509_v43 }
 0x397   :  { %v1261_v30 = vadd.f32 %v1253_v34, %v1238_v61 }
 0x399   :  { %14392 = vmatprep.mubr.f32.mxu1 %v1261_v30 }
 0x39a   :  { %14393 = vmatmul.mubr.f32.gmra.mrb[18].mxu1 %v1262_v50 }
 0x39b   :  { %14432 = vmatprep.mubr.msk.f32.mxu1 %vm818_vm0, %v18275_v24 }
 0x454   :  { %v14385_v42 = vpop.f32.mrb[12].mxu1 }
 0x455   :  { %v1377_v26 = vand.u32 2147483647, %v14385_v42  ;;  %v1329_v29 = vpop.f32.mrb[13].mxu1 }
 0x456   :  { %v1376_v37 = vand.u32 2147483647, %v1329_v29 }
 0x457   :  { %v1385_v36 = vsub.f32 0.0, %v1377_v26 }
 0x458   :  { %v1384_v55 = vsub.f32 0.0, %v1376_v37 }
 0x459   :  { %v1394_v44 = vmul.f32 1.442695, %v1385_v36 }
 0x45a   :  { %v1392_v0 = vmul.f32 1.442695, %v1384_v55  ;;  %v18517_v24 = vpop.f32.mrb[14].mxu1 }
 0x45b   :  { %16834 = vpow2.f32 %v1394_v44  ;;  %v1379_v3 = vand.u32 2147483647, %v18517_v24  ;;  %v18520_v53 = vpop.f32.mrb[15].mxu1 }
 0x45c   :  { %16836 = vpow2.f32 %v1392_v0  ;;  %v1378_v58 = vand.u32 2147483647, %v18520_v53 }
 0x45d   :  { %v1387_v41 = vsub.f32 0.0, %v1379_v3 }
 0x45e   :  { %v1386_v48 = vsub.f32 0.0, %v1378_v58 }
 0x45f   :  { %v1398_v60 = vmul.f32 1.442695, %v1387_v41  ;;  %v1369_v41 = vmax.f32 %v14385_v42, 0.0 }
 0x460   :  { %v1396_v5 = vmul.f32 1.442695, %v1386_v48 }
 0x461   :  { %16838 = vpow2.f32 %v1398_v60 }
 0x462   :  { %16840 = vpow2.f32 %v1396_v5 }
 0x463   :  { %v18523_v31 = vpop.f32.mrb[16].mxu1 }
 0x464   :  { %v1381_v9 = vand.u32 2147483647, %v18523_v31  ;;  %v18526_v6 = vpop.f32.mrb[17].mxu1 }
 0x465   :  { %v16835_v11 = vpop.eup %16834  ;;  %v1380_v13 = vand.u32 2147483647, %v18526_v6 }
 0x466   :  { %v16837_v32 = vpop.eup %16836  ;;  %v1409_v17 = vadd.f32 1.0, %v16835_v11  ;;  %v1389_v19 = vsub.f32 0.0, %v1381_v9  ;;  %v18536_v9 = vld [vmem:[%s21600_s5] ss:$0 sm:$0xff]  ;;  %v1368_v11 = vmax.f32 %v1329_v29, 0.0  ;;  %v1371_v29 = vmax.f32 %v18517_v24, 0.0 }
 0x467   :  { %v1408_v61 = vadd.f32 1.0, %v16837_v32  ;;  %v1388_v49 = vsub.f32 0.0, %v1380_v13 }
 0x468   :  { %16842 = vlog2.f32 %v1409_v17  ;;  %v1402_v25 = vmul.f32 1.442695, %v1389_v19 }
 0x469   :  { %16844 = vlog2.f32 %v1408_v61  ;;  %v1400_v34 = vmul.f32 1.442695, %v1388_v49 }
 0x46a   :  { %16846 = vpow2.f32 %v1402_v25  ;;  %v18539_v25 = vld [vmem:[%s21601_s9] ss:$0 sm:$0xff] }
 0x46b   :  { %v16839_v30 = vpop.eup %16838  ;;  %16848 = vpow2.f32 %v1400_v34 }
 0x46c   :  { %v16841_v50 = vpop.eup %16840  ;;  %v1411_v35 = vadd.f32 1.0, %v16839_v30 }
 0x46d   :  { %v1410_v33 = vadd.f32 1.0, %v16841_v50  ;;  %v18529_v45 = vpop.f32.mrb[18].mxu1 }
 0x46e   :  { %16850 = vlog2.f32 %v1411_v35  ;;  %v1383_v26 = vand.u32 2147483647, %v18529_v45  ;;  %v18532_v37 = vpop.f32.mrb[19].mxu1 }
 0x46f   :  { %16852 = vlog2.f32 %v1410_v33  ;;  %v1382_v36 = vand.u32 2147483647, %v18532_v37 }
 0x470   :  { %v1391_v55 = vsub.f32 0.0, %v1383_v26  ;;  %v1370_v26 = vmax.f32 %v18520_v53, 0.0 }
 0x471   :  { %v1390_v44 = vsub.f32 0.0, %v1382_v36 }
 0x472   :  { %v16843_v0 = vpop.eup %16842  ;;  %v1406_v3 = vmul.f32 1.442695, %v1391_v55 }
 0x473   :  { %v16845_v58 = vpop.eup %16844  ;;  %v1419_v48 = vmul.f32 0.6931472, %v16843_v0  ;;  %v1404_v60 = vmul.f32 1.442695, %v1390_v44 }
 0x474   :  { %v16847_v5 = vpop.eup %16846  ;;  %v1417_v13 = vmul.f32 0.6931472, %v16845_v58  ;;  %16854 = vpow2.f32 %v1406_v3 }
 0x475   :  { %v16849_v32 = vpop.eup %16848  ;;  %v1433_v17 = vadd.f32 %v1419_v48, %v1369_v41  ;;  %v1413_v19 = vadd.f32 1.0, %v16847_v5  ;;  %16856 = vpow2.f32 %v1404_v60 }
 0x476   :  { %v1432_v61 = vadd.f32 %v1417_v13, %v1368_v11  ;;  %v1412_v49 = vadd.f32 1.0, %v16849_v32 }
 0x477   :  { %v1448_v34 = vmul.f32 %v18536_v9, %v1433_v17  ;;  %16858 = vlog2.f32 %v1413_v19 }
 0x478   :  { %v16851_v42 = vpop.eup %16850  ;;  %v1447_v30 = vmul.f32 %v18536_v9, %v1432_v61  ;;  %16860 = vlog2.f32 %v1412_v49 }
 0x479   :  { %v16853_v50 = vpop.eup %16852  ;;  %v1423_v35 = vmul.f32 0.6931472, %v16851_v42  ;;  %v18545_v33 = vadd.f32 %v18539_v25, %v1448_v34 }
 0x47a   :  { %v1421_v36 = vmul.f32 0.6931472, %v16853_v50  ;;  %v18549_v55 = vadd.f32 %v18539_v25, %v1447_v30  ;;  %v1373_v30 = vmax.f32 %v18523_v31, 0.0 }
 0x47b   :  { %v1435_v44 = vadd.f32 %v1423_v35, %v1371_v29  ;;  %v1479_v0 = vand.u32 2147483647, %v18545_v33  ;;  %v1372_v35 = vmax.f32 %v18526_v6, 0.0 }
 0x47c   :  { %v1434_v3 = vadd.f32 %v1421_v36, %v1370_v26  ;;  %v1478_v58 = vand.u32 2147483647, %v18549_v55 }
 0x47d   :  { %v1450_v41 = vmul.f32 %v18536_v9, %v1435_v44  ;;  %v1487_v48 = vsub.f32 0.0, %v1479_v0 }
 0x47e   :  { %v16855_v24 = vpop.eup %16854  ;;  %v1449_v60 = vmul.f32 %v18536_v9, %v1434_v3  ;;  %v1486_v5 = vsub.f32 0.0, %v1478_v58 }
 0x47f   :  { %v16857_v11 = vpop.eup %16856  ;;  %v1415_v13 = vadd.f32 1.0, %v16855_v24  ;;  %v18556_v53 = vadd.f32 %v18539_v25, %v1450_v41  ;;  %v1496_v19 = vmul.f32 1.442695, %v1487_v48 }
 0x480   :  { %v1414_v32 = vadd.f32 1.0, %v16857_v11  ;;  %v1494_v17 = vmul.f32 1.442695, %v1486_v5  ;;  %v18559_v61 = vadd.f32 %v18539_v25, %v1449_v60 }
 0x481   :  { %v16859_v49 = vpop.eup %16858  ;;  %16862 = vlog2.f32 %v1415_v13  ;;  %v1481_v34 = vand.u32 2147483647, %v18556_v53 }
 0x482   :  { %v16861_v42 = vpop.eup %16860  ;;  %v1427_v50 = vmul.f32 0.6931472, %v16859_v49  ;;  %16864 = vlog2.f32 %v1414_v32  ;;  %v1480_v29 = vand.u32 2147483647, %v18559_v61  ;;  %v1375_v32 = vmax.f32 %v18529_v45, 0.0 }
 0x483   :  { %v1425_v26 = vmul.f32 0.6931472, %v16861_v42  ;;  %16866 = vpow2.f32 %v1494_v17  ;;  %v1489_v36 = vsub.f32 0.0, %v1481_v34  ;;  %v1374_v34 = vmax.f32 %v18532_v37, 0.0 }
 0x484   :  { %v1437_v44 = vadd.f32 %v1427_v50, %v1373_v30  ;;  %16868 = vpow2.f32 %v1496_v19  ;;  %v1488_v0 = vsub.f32 0.0, %v1480_v29 }
 0x485   :  { %v1436_v3 = vadd.f32 %v1425_v26, %v1372_v35  ;;  %v1500_v58 = vmul.f32 1.442695, %v1489_v36 }
 0x486   :  { %v1452_v41 = vmul.f32 %v18536_v9, %v1437_v44  ;;  %v1498_v48 = vmul.f32 1.442695, %v1488_v0 }
 0x487   :  { %v1451_v24 = vmul.f32 %v18536_v9, %v1436_v3  ;;  %16870 = vpow2.f32 %v1500_v58 }
 0x488   :  { %16872 = vpow2.f32 %v1498_v48  ;;  %v18568_v31 = vadd.f32 %v18539_v25, %v1452_v41 }
 0x489   :  { %v18571_v6 = vadd.f32 %v18539_v25, %v1451_v24 }
 0x48a   :  { %v1483_v60 = vand.u32 2147483647, %v18568_v31 }
 0x48b   :  { %v16863_v5 = vpop.eup %16862  ;;  %v1482_v11 = vand.u32 2147483647, %v18571_v6 }
 0x48c   :  { %v16865_v13 = vpop.eup %16864  ;;  %v1431_v17 = vmul.f32 0.6931472, %v16863_v5  ;;  %v1491_v19 = vsub.f32 0.0, %v1483_v60 }
 0x48d   :  { %v16867_v49 = vpop.eup %16866  ;;  %v1429_v42 = vmul.f32 0.6931472, %v16865_v13  ;;  %v1490_v30 = vsub.f32 0.0, %v1482_v11 }
 0x48e   :  { %v16869_v50 = vpop.eup %16868  ;;  %v1439_v29 = vadd.f32 %v1431_v17, %v1375_v32  ;;  %v1510_v35 = vadd.f32 1.0, %v16867_v49  ;;  %v1504_v0 = vmul.f32 1.442695, %v1491_v19 }
 0x48f   :  { %v1438_v26 = vadd.f32 %v1429_v42, %v1374_v34  ;;  %v1511_v36 = vadd.f32 1.0, %v16869_v50  ;;  %v1502_v44 = vmul.f32 1.442695, %v1490_v30  ;;  %v1470_v34 = vmax.f32 %v18549_v55, 0.0 }
 0x490   :  { %v1454_v3 = vmul.f32 %v18536_v9, %v1439_v29  ;;  %16874 = vlog2.f32 %v1510_v35 }
 0x491   :  { %v16871_v58 = vpop.eup %16870  ;;  %v1453_v45 = vmul.f32 %v18536_v9, %v1438_v26  ;;  %16876 = vlog2.f32 %v1511_v36 }
 0x492   :  { %v16873_v41 = vpop.eup %16872  ;;  %16878 = vpow2.f32 %v1502_v44  ;;  %v18580_v37 = vadd.f32 %v18539_v25, %v1454_v3  ;;  %v1513_v60 = vadd.f32 1.0, %v16871_v58  ;;  %v1471_v44 = vmax.f32 %v18545_v33, 0.0 }
 0x493   :  { %v1512_v48 = vadd.f32 1.0, %v16873_v41  ;;  %16880 = vpow2.f32 %v1504_v0  ;;  %v1468_v24 = vadd.f32 %v18539_v25, %v1453_v45  ;;  %v1472_v58 = vmax.f32 %v18559_v61, 0.0 }
 0x494   :  { %v1485_v5 = vand.u32 2147483647, %v18580_v37  ;;  %v1473_v33 = vmax.f32 %v18556_v53, 0.0  ;;  %v1474_v61 = vmax.f32 %v18571_v6, 0.0 }
 0x495   :  { %16882 = vlog2.f32 %v1512_v48  ;;  %v1484_v11 = vand.u32 2147483647, %v1468_v24 }
 0x496   :  { %v1493_v13 = vsub.f32 0.0, %v1485_v5  ;;  %16884 = vlog2.f32 %v1513_v60 }
 0x497   :  { %v1492_v32 = vsub.f32 0.0, %v1484_v11 }
 0x498   :  { %v1508_v17 = vmul.f32 1.442695, %v1493_v13 }
 0x499   :  { %v1506_v9 = vmul.f32 1.442695, %v1492_v32 }
 0x49a   :  { %v16875_v19 = vpop.eup %16874  ;;  %16886 = vpow2.f32 %v1508_v17 }
 0x49b   :  { %v16877_v49 = vpop.eup %16876  ;;  %v1519_v42 = vmul.f32 0.6931472, %v16875_v19  ;;  %16888 = vpow2.f32 %v1506_v9 }
 0x49c   :  { %v16879_v30 = vpop.eup %16878  ;;  %v1521_v29 = vmul.f32 0.6931472, %v16877_v49 }
 0x49d   :  { %v16881_v50 = vpop.eup %16880  ;;  %v18585_v25 = vadd.f32 %v1519_v42, %v1470_v34  ;;  %v1514_v35 = vadd.f32 1.0, %v16879_v30  ;;  %v1475_v34 = vmax.f32 %v18568_v31, 0.0  ;;  %v17934_v31 = vmov 1966171168  }
 0x49e   :  { %v1515_v26 = vadd.f32 1.0, %v16881_v50  ;;  %v18589_v0 = vadd.f32 %v1521_v29, %v1471_v44  ;;  %v1476_v50 = vmax.f32 %v1468_v24, 0.0  ;;  %v1576_v44 = vunpack.c.l.s4 %v17934_v31  ;;  %v18622_v24 = vld [vmem:[%s21602_s17 + $0x8] sm:$0xf] }
 0x49f   :  { %v16883_v36 = vpop.eup %16882  ;;  %1542 = vxpose.xlu0.b32.start [1/8] (short) (narrow) %v18585_v25, 8  ;;  %16890 = vlog2.f32 %v1514_v35 }
 0x4a0   :  { %16892 = vlog2.f32 %v1515_v26  ;;  %v1523_v3 = vmul.f32 0.6931472, %v16883_v36  ;;  %v16885_v55 = vpop.eup %16884  ;;  %v1477_v26 = vmax.f32 %v18580_v37, 0.0 }
 0x4a1   :  { %v1525_v60 = vmul.f32 0.6931472, %v16885_v55  ;;  %v18616_v55 = vld [vmem:[%s21602_s17] sm:$0xff] }
 0x4a2   :  { %v18593_v48 = vadd.f32 %v1523_v3, %v1472_v58  ;;  %v1577_v3 = vunpack.c.0.s8 %v1576_v44 }
 0x4a3   :  { %1543 = vxpose.xlu0.b32.cont [2/8] (short) (narrow) %v18589_v0, 8  ;;  %v18597_v32 = vadd.f32 %v1525_v60, %v1473_v33  ;;  %v18626_v60 = vsub.s32 0, %v18509_v43 }
 0x4a4   :  { %v16887_v45 = vpop.eup %16886  ;;  %v18619_v58 = vsub.s32 %v1577_v3, %v18509_v43 }
 0x4a5   :  { %v16889_v41 = vpop.eup %16888  ;;  %v1517_v5 = vadd.f32 1.0, %v16887_v45  ;;  %v12946_v45 = vadd.f32 -1.0, %v18616_v55 }
 0x4a6   :  { %v1516_v11 = vadd.f32 1.0, %v16889_v41 }
 0x4a7   :  { %1544 = vxpose.xlu0.b32.cont [3/8] (short) (narrow) %v18593_v48, 8  ;;  %16894 = vlog2.f32 %v1517_v5  ;;  %v12947_v5 = vadd.f32 -1.0, %v18622_v24 }
 0x4a8   :  { %16896 = vlog2.f32 %v1516_v11 }
 0x4a9   :  { %v16891_v13 = vpop.eup %16890 }
 0x4aa   :  { %v16893_v17 = vpop.eup %16892  ;;  %v1527_v9 = vmul.f32 0.6931472, %v16891_v13  ;;  %v18631_v13 = vmul.f32 1e+30, %v12946_v45 }
 0x4ab   :  { %1545 = vxpose.xlu0.b32.cont [4/8] (short) (narrow) %v18597_v32, 8  ;;  %v1529_v49 = vmul.f32 0.6931472, %v16893_v17 }
 0x4ac   :  { %v18601_v19 = vadd.f32 %v1527_v9, %v1474_v61  ;;  %v18635_v61 = vmul.f32 1e+30, %v12947_v5 }
 0x4ad   :  { %v18605_v42 = vadd.f32 %v1529_v49, %v1475_v34 }
 0x4af   :  { %1546 = vxpose.xlu0.b32.cont [5/8] (short) (narrow) %v18601_v19, 8 }
 0x4b1   :  { %v16895_v53 = vpop.eup %16894 }
 0x4b2   :  { %v16897_v30 = vpop.eup %16896  ;;  %v1533_v6 = vmul.f32 0.6931472, %v16895_v53 }
 0x4b3   :  { %1547 = vxpose.xlu0.b32.cont [6/8] (short) (narrow) %v18605_v42, 8  ;;  %v1531_v29 = vmul.f32 0.6931472, %v16897_v30 }
 0x4b4   :  { %v18612_v36 = vadd.f32 %v1533_v6, %v1477_v26 }
 0x4b5   :  { %v18608_v35 = vadd.f32 %v1531_v29, %v1476_v50 }
 0x4b7   :  { %1548 = vxpose.xlu0.b32.cont [7/8] (short) (narrow) %v18608_v35, 8 }
 0x4bb   :  { %1549 = vxpose.xlu0.b32.end [8/8] (short) (narrow) %v18612_v36, 8 }
 0x51f   :  { %v1558_v41 = vpop.trf.xlu0 }
 0x520   :  { %v1581_v37 = vrot.slane %v1558_v41, %v18619_v58 }
 0x522   :  { %v1582_v11 = vcombine.high %v1581_v37, %v1581_v37  ;;  %v1589_v33 = vrot.slane %v1581_v37, %v18619_v58 }
 0x524   :  { %v1596_v17 = vrot.slane %v1582_v11, %v18619_v58  ;;  %v1602_v9 = vrot.slane %v1589_v33, %v18626_v60  ;;  %v1597_v30 = vcombine.high %v1589_v33, %v1589_v33 }
 0x526   :  { %v1619_v49 = vadd.f32 %v1602_v9, %v18631_v13  ;;  %v1620_v34 = vadd.f32 %v1602_v9, %v18635_v61  ;;  %v1606_v53 = vrot.slane %v1596_v17, %v18626_v60  ;;  %v1610_v31 = vrot.slane %v1597_v30, %v18626_v60 }
 0x527   :  { %v1598_v45 = vcombine.high %v1596_v17, %v1596_v17 }
 0x528   :  { %v1628_v43 = vsel %vm1627_vm5, %v1619_v49, -inf  ;;  %v1632_v50 = vsel %vm1631_vm6, %v1620_v34, -inf  ;;  %v1621_v29 = vadd.f32 %v1606_v53, %v18631_v13  ;;  %v1622_v26 = vadd.f32 %v1606_v53, %v18635_v61 }
 0x529   :  { %1629 = vmax.xlane.f32.xlu1 %v1628_v43  ;;  %v1623_v3 = vadd.f32 %v1610_v31, %v18631_v13  ;;  %v1624_v37 = vadd.f32 %v1610_v31, %v18635_v61  ;;  %v1614_v5 = vrot.slane %v1598_v45, %v18626_v60 }
 0x52a   :  { %v1635_v6 = vsel %vm1627_vm5, %v1621_v29, -inf  ;;  %v1638_v44 = vsel %vm1631_vm6, %v1622_v26, -inf }
 0x52b   :  { %v1641_v41 = vsel %vm1627_vm5, %v1623_v3, -inf  ;;  %v1644_v11 = vsel %vm1631_vm6, %v1624_v37, -inf  ;;  %v1625_v33 = vadd.f32 %v1614_v5, %v18631_v13  ;;  %v1626_v49 = vadd.f32 %v1614_v5, %v18635_v61 }
 0x52d   :  { %1633 = vmax.xlane.f32.xlu1 %v1632_v50  ;;  %v1647_v9 = vsel %vm1627_vm5, %v1625_v33, -inf  ;;  %v1650_v17 = vsel %vm1631_vm6, %v1626_v49, -inf }
 0x531   :  { %1636 = vmax.xlane.f32.xlu1 %v1635_v6 }
 0x535   :  { %1639 = vmax.xlane.f32.xlu1 %v1638_v44 }
 0x539   :  { %1642 = vmax.xlane.f32.xlu1 %v1641_v41 }
 0x53d   :  { %1645 = vmax.xlane.f32.xlu1 %v1644_v11 }
 0x541   :  { %1648 = vmax.xlane.f32.xlu1 %v1647_v9 }
 0x545   :  { %1651 = vmax.xlane.f32.xlu1 %v1650_v17 }
 0x5b6   :  { %v1630_v43 = vpop.xlane.xlu1 %1629 }
 0x5b7   :  { %v1666_v41 = vrot.slane %v1630_v43, %v18512_v40 }
 0x5ba   :  { %v1634_v34 = vpop.xlane.xlu1 %1633 }
 0x5bb   :  { %v1671_v44 = vrot.slane %v1634_v34, %v18515_v47 }
 0x5bd   :  { %v1673_v33 = vsel %vm1672_vm8, %v1671_v44, %v1666_v41  ;;  %v18704_v44 = vld [vmem:[%s17979_s29 + $0x38] sm:$0xf] }
 0x5be   :  { %v1637_v53 = vpop.xlane.xlu1 %1636 }
 0x5bf   :  { %v1677_v3 = vrot.slane %v1637_v53, %v18512_v40 }
 0x5c2   :  { %v1640_v30 = vpop.xlane.xlu1 %1639 }
 0x5c3   :  { %v1681_v6 = vrot.slane %v1640_v30, %v18515_v47  ;;  %v18674_v30 = vld [vmem:[%s17979_s29 + $0x8] sm:$0xff] }
 0x5c5   :  { %v1682_v37 = vsel %vm1672_vm8, %v1681_v6, %v1677_v3  ;;  %v18689_v6 = vld [vmem:[%s17979_s29 + $0x20] sm:$0xff] }
 0x5c6   :  { %v1643_v50 = vpop.xlane.xlu1 %1642  ;;  %v1702_v17 = vsel %vm1701_vm9, %v1682_v37, %v1673_v33 }
 0x5c7   :  { %v1686_v45 = vrot.slane %v1643_v50, %v18512_v40  ;;  %v18679_v50 = vld [vmem:[%s17979_s29 + $0x10] sm:$0xff] }
 0x5ca   :  { %v1646_v29 = vpop.xlane.xlu1 %1645 }
 0x5cb   :  { %v1690_v26 = vrot.slane %v1646_v29, %v18515_v47  ;;  %v18684_v29 = vld [vmem:[%s17979_s29 + $0x18] sm:$0xff] }
 0x5cd   :  { %v1691_v5 = vsel %vm1672_vm8, %v1690_v26, %v1686_v45  ;;  %v18694_v26 = vld [vmem:[%s17979_s29 + $0x28] sm:$0xff] }
 0x5ce   :  { %v1649_v31 = vpop.xlane.xlu1 %1648  ;;  %v1704_v34 = vsel %vm1703_vm10, %v1691_v5, %v1702_v17 }
 0x5cf   :  { %v1695_v9 = vrot.slane %v1649_v31, %v18512_v40  ;;  %v18699_v31 = vld [vmem:[%s17979_s29 + $0x30] sm:$0xff] }
 0x5d2   :  { %v1652_v11 = vpop.xlane.xlu1 %1651 }
 0x5d3   :  { %v1699_v49 = vrot.slane %v1652_v11, %v18515_v47 }
 0x5d5   :  { %v1700_v43 = vsel %vm1672_vm8, %v1699_v49, %v1695_v9 }
 0x5d6   :  { %v1706_v53 = vsel %vm21530_vm11, %v1700_v43, %v1704_v34 }
 0x5d7   :  { %14395 = vmatprep.subr.msk.mxu0 %vm818_vm0, %v1706_v53 }
 0x5d8   :  { %14396 = vmatpush3.xpose.msk.msra.mxu0 %vm818_vm0, %v1706_v53 }
 0x5db   :  { %14398 = vmatmul.mubr.msk.f32.vlgmr.msra.gmra.mrb[24].mxu0 %vm818_vm0, %v18674_v30 }
 0x5dc   :  { %14400 = vmatprep.mubr.msk.f32.mxu0 %vm818_vm0, %v18679_v50 }
 0x5df   :  { %14401 = vmatmul.mubr.msk.f32.gmra.mrb[26].mxu0 %vm818_vm0, %v18684_v29 }
 0x5e0   :  { %14403 = vmatprep.mubr.msk.f32.mxu0 %vm818_vm0, %v18689_v6 }
 0x5e3   :  { %14404 = vmatmul.mubr.msk.f32.gmra.mrb[28].mxu0 %vm818_vm0, %v18694_v26 }
 0x5e4   :  { %14406 = vmatprep.mubr.msk.f32.mxu0 %vm818_vm0, %v18699_v31 }
 0x5e7   :  { %14407 = vmatmul.mubr.msk.f32.gmra.mrb[30].mxu0 %vm818_vm0, %v18704_v44 }
 0x5e8   :  { %14425 = vmatprep.mubr.msk.f32.mxu0 %vm1627_vm5, %v18616_v55 }
 0x6ae   :  { %v14399_v3 = vpop.f32.mrb[24].mxu0 }
 0x6af   :  { %v1815_v45 = vsub.f32 %v18589_v0, %v14399_v3  ;;  %v1775_v41 = vpop.f32.mrb[25].mxu0 }
 0x6b0   :  { %v1814_v37 = vsub.f32 %v18585_v25, %v1775_v41 }
 0x6b1   :  { %v1824_v5 = vmul.f32 1.442695, %v1815_v45 }
 0x6b2   :  { %v1822_v11 = vmul.f32 1.442695, %v1814_v37  ;;  %v14402_v33 = vpop.f32.mrb[26].mxu0 }
 0x6b3   :  { %16898 = vpow2.f32 %v1824_v5  ;;  %v1817_v9 = vsub.f32 %v18597_v32, %v14402_v33  ;;  %v1785_v49 = vpop.f32.mrb[27].mxu0 }
 0x6b4   :  { %16900 = vpow2.f32 %v1822_v11  ;;  %v1816_v17 = vsub.f32 %v18593_v48, %v1785_v49 }
 0x6b5   :  { %v1828_v43 = vmul.f32 1.442695, %v1817_v9 }
 0x6b6   :  { %v1826_v34 = vmul.f32 1.442695, %v1816_v17  ;;  %v14405_v53 = vpop.f32.mrb[28].mxu0 }
 0x6b7   :  { %16902 = vpow2.f32 %v1828_v43  ;;  %v1819_v2 = vsub.f32 %v18605_v42, %v14405_v53  ;;  %v1795_v0 = vpop.f32.mrb[29].mxu0 }
 0x6b8   :  { %16904 = vpow2.f32 %v1826_v34  ;;  %v1818_v25 = vsub.f32 %v18601_v19, %v1795_v0 }
 0x6b9   :  { %v1832_v3 = vmul.f32 1.442695, %v1819_v2 }
 0x6ba   :  { %v1830_v45 = vmul.f32 1.442695, %v1818_v25  ;;  %v14408_v41 = vpop.f32.mrb[30].mxu0 }
 0x6bb   :  { %16906 = vpow2.f32 %v1832_v3  ;;  %v1821_v32 = vsub.f32 %v18612_v36, %v14408_v41  ;;  %v1805_v37 = vpop.f32.mrb[31].mxu0 }
 0x6bc   :  { %16908 = vpow2.f32 %v1830_v45  ;;  %v1820_v48 = vsub.f32 %v18608_v35, %v1805_v37 }
 0x6bd   :  { %v16899_v5 = vpop.eup %16898  ;;  %v1836_v11 = vmul.f32 1.442695, %v1821_v32  ;;  %v574_v32 = vld [vmem:[%s21603_s21] sm:$0xf] }
 0x6be   :  { %v16901_v33 = vpop.eup %16900  ;;  %v1834_v9 = vmul.f32 1.442695, %v1820_v48 }
 0x6bf   :  { %16910 = vpow2.f32 %v1836_v11  ;;  %v15858_v42 = vpack.c.bf16 %v16899_v5, %v16901_v33 }
 0x6c0   :  { %16912 = vpow2.f32 %v1834_v9 }
 0x6c1   :  { %v16903_v49 = vpop.eup %16902  ;;  %15859 = vmatprep.subr.bf16.mxu0 %v15858_v42 }
 0x6c2   :  { %v16905_v19 = vpop.eup %16904  ;;  %15861 = vmatpush3.bf16.msra.mxu0 %v15858_v42 }
 0x6c3   :  { %v15862_v2 = vpack.c.bf16 %v16903_v49, %v16905_v19 }
 0x6c5   :  { %v18718_v17 = vpop.eup %16906  ;;  %15863 = vmatprep.subr.bf16.mxu0 %v15862_v2 }
 0x6c6   :  { %v16909_v36 = vpop.eup %16908  ;;  %15865 = vmatpush3.bf16.msra.mxu0 %v15862_v2 }
 0x6c7   :  { %v15866_v43 = vpack.c.bf16 %v18718_v17, %v16909_v36 }
 0x6c9   :  { %v18721_v35 = vpop.eup %16910  ;;  %15867 = vmatprep.subr.bf16.mxu0 %v15866_v43 }
 0x6ca   :  { %v16913_v34 = vpop.eup %16912  ;;  %15869 = vmatpush3.bf16.msra.mxu0 %v15866_v43 }
 0x6cb   :  { %v15870_v53 = vpack.c.bf16 %v18721_v35, %v16913_v34 }
 0x6cd   :  { %15872 = vmatprep.subr.msk.bf16.mxu0 %vm18283_vm4, %v15870_v53 }
 0x6ce   :  { %15875 = vmatpush3.bf16.msk.msra.mxu0 %vm18283_vm4, %v15870_v53 }
 0x6cf   :  { %14444 = vmatprep.subr.msk.mxu0 %vm21529_vm1, %v574_v32 }
 0x6d1   :  { %14426 = vmatmul.mubr.msk.f32.vlgmr.msra.gmra.mrb[32].mxu0 %vm1627_vm5, %v18622_v24 }
 0x6d2   :  { %14445 = vmatpush3.msk.msra.mxu0 %vm21529_vm1, %v574_v32 }
 0x7a4   :  { %v14427_v0 = vpop.f32.mrb[32].mxu0 }
 0x7a5   :  { %v1919_v25 = vadd.f32 1e-16, %v14427_v0  ;;  %v1913_v3 = vpop.f32.mrb[33].mxu0 }
 0x7a6   :  { %v1914_v45 = vadd.f32 1e-16, %v1913_v3 }
 0x7a8   :  { %v15876_v41 = vpack.c.bf16 %v1919_v25, %v1914_v45 }
 0x7aa   :  { %15878 = vmatprep.subr.msk.bf16.mxu1 %vm18283_vm4, %v15876_v41 }
 0x7ab   :  { %15881 = vmatpush3.bf16.msk.msra.mxu1 %vm18283_vm4, %v15876_v41 }
 0x7ae   :  { %14433 = vmatmul.mubr.msk.f32.vlgmr.msra.gmra.mrb[20].mxu1 %vm818_vm0, %v18674_v30 }
 0x7af   :  { %14435 = vmatprep.mubr.msk.f32.mxu1 %vm818_vm0, %v18679_v50 }
 0x7b2   :  { %14436 = vmatmul.mubr.msk.f32.gmra.mrb[22].mxu1 %vm818_vm0, %v18684_v29 }
 0x7b3   :  { %14438 = vmatprep.mubr.msk.f32.mxu1 %vm818_vm0, %v18689_v6 }
 0x7b6   :  { %14439 = vmatmul.mubr.msk.f32.gmra.mrb[24].mxu1 %vm818_vm0, %v18694_v26 }
 0x7b7   :  { %14441 = vmatprep.mubr.msk.f32.mxu1 %vm818_vm0, %v18699_v31 }
 0x7ba   :  { %14442 = vmatmul.mubr.msk.f32.gmra.mrb[26].mxu1 %vm818_vm0, %v18704_v44 }
 0x7bb   :  { %14474 = vmatprep.mubr.msk.f32.mxu1 %vm1627_vm5, %v18616_v55 }
 0x881   :  { %v14434_v37 = vpop.f32.mrb[20].mxu1 }
 0x882   :  { %16914 = vrcp.f32 %v14434_v37  ;;  %v1991_v48 = vpop.f32.mrb[21].mxu1 }
 0x883   :  { %16916 = vrcp.f32 %v1991_v48 }
 0x885   :  { %v14437_v11 = vpop.f32.mrb[22].mxu1 }
 0x886   :  { %16918 = vrcp.f32 %v14437_v11  ;;  %v2001_v9 = vpop.f32.mrb[23].mxu1 }
 0x887   :  { %16920 = vrcp.f32 %v2001_v9 }
 0x889   :  { %v14440_v42 = vpop.f32.mrb[24].mxu1 }
 0x88a   :  { %16922 = vrcp.f32 %v14440_v42  ;;  %v2011_v2 = vpop.f32.mrb[25].mxu1 }
 0x88b   :  { %16924 = vrcp.f32 %v2011_v2  ;;  %v559_v2 = vld [vmem:[%s21604_s25 + $0x8] sm:$0xff] }
 0x88c   :  { %v16915_v43 = vpop.eup %16914 }
 0x88d   :  { %v16917_v53 = vpop.eup %16916  ;;  %v14443_v55 = vpop.f32.mrb[26].mxu1  ;;  %v2039_v3 = vmul.f32 %v16915_v43, %v16899_v5 }
 0x88e   :  { %16926 = vrcp.f32 %v14443_v55  ;;  %v2021_v0 = vpop.f32.mrb[27].mxu1  ;;  %v2038_v25 = vmul.f32 %v16917_v53, %v16901_v33  ;;  %v561_v53 = vld [vmem:[%s21604_s25 + $0x18] sm:$0xff] }
 0x88f   :  { %16928 = vrcp.f32 %v2021_v0  ;;  %v562_v0 = vld [vmem:[%s21604_s25 + $0x20] sm:$0xff] }
 0x890   :  { %v16919_v45 = vpop.eup %16918  ;;  %14446 = vmatprep.mubr.msk.f32.mxu0 %vm21499_vm12, %v2038_v25  ;;  %v564_v25 = vld [vmem:[%s21604_s25 + $0x30] sm:$0xff] }
 0x891   :  { %v16921_v41 = vpop.eup %16920  ;;  %14447 = vmatmul.mubr.msk.f32.vlgmr.msra.gmra.mrb[34].mxu0 %vm21499_vm12, %v2039_v3  ;;  %v2041_v37 = vmul.f32 %v16919_v45, %v16903_v49  ;;  %v565_v3 = vld [vmem:[%s21604_s25 + $0x38] sm:$0xff] }
 0x892   :  { %v2040_v32 = vmul.f32 %v16921_v41, %v16905_v19  ;;  %v18782_v45 = vpack.c.bf16 %v565_v3, %v564_v25  ;;  %v566_v41 = vld [vmem:[%s21604_s25 + $0x40] sm:$0xff] }
 0x894   :  { %v16923_v48 = vpop.eup %16922  ;;  %14449 = vmatprep.mubr.msk.f32.mxu0 %vm21499_vm12, %v2040_v32  ;;  %v567_v32 = vld [vmem:[%s21604_s25 + $0x48] sm:$0xff] }
 0x895   :  { %v16925_v11 = vpop.eup %16924  ;;  %14450 = vmatmul.mubr.msk.f32.gmra.mrb[36].mxu0 %vm21499_vm12, %v2041_v37  ;;  %v2043_v33 = vmul.f32 %v16923_v48, %v18718_v17  ;;  %v560_v17 = vld [vmem:[%s21604_s25 + $0x10] sm:$0xff]  ;;  %v18788_v37 = vpack.c.bf16 %v567_v32, %v566_v41 }
 0x896   :  { %v2042_v5 = vmul.f32 %v16925_v11, %v16909_v36  ;;  %v558_v36 = vld [vmem:[%s21604_s25] sm:$0xff]  ;;  %v18769_v55 = vpack.c.bf16 %v561_v53, %v560_v17  ;;  %v568_v48 = vld [vmem:[%s21604_s25 + $0x50] sm:$0xff]  ;;  %v569_v11 = vld [vmem:[%s21604_s25 + $0x58] sm:$0xff] }
 0x897   :  { %v18766_v43 = vpack.c.bf16 %v559_v2, %v558_v36 }
 0x898   :  { %v16927_v9 = vpop.eup %16926  ;;  %14452 = vmatprep.mubr.msk.f32.mxu0 %vm21499_vm12, %v2042_v5  ;;  %v18794_v5 = vpack.c.bf16 %v569_v11, %v568_v48 }
 0x899   :  { %v16929_v19 = vpop.eup %16928  ;;  %14453 = vmatmul.mubr.msk.f32.gmra.mrb[38].mxu0 %vm21499_vm12, %v2043_v33  ;;  %v2045_v42 = vmul.f32 %v16927_v9, %v18721_v35  ;;  %15901 = vmatprep.subr.bf16.mxu0 %v18766_v43  ;;  %v570_v33 = vld [vmem:[%s21604_s25 + $0x60] sm:$0xff]  ;;  %v571_v9 = vld [vmem:[%s21604_s25 + $0x68] sm:$0xff] }
 0x89a   :  { %v2044_v49 = vmul.f32 %v16929_v19, %v16913_v34  ;;  %v563_v34 = vld [vmem:[%s21604_s25 + $0x28] sm:$0xff]  ;;  %15903 = vmatpush3.bf16.msra.mxu0 %v18766_v43  ;;  %v18800_v19 = vpack.c.bf16 %v571_v9, %v570_v33 }
 0x89b   :  { %15905 = vmatprep.subr.bf16.mxu0 %v18769_v55  ;;  %v18776_v35 = vpack.c.bf16 %v563_v34, %v562_v0 }
 0x89c   :  { %14455 = vmatprep.mubr.msk.f32.mxu0 %vm21499_vm12, %v2044_v49  ;;  %v572_v49 = vld [vmem:[%s21604_s25 + $0x70] sm:$0xff] }
 0x89d   :  { %14456 = vmatmul.mubr.msk.f32.gmra.mrb[40].mxu0 %vm21499_vm12, %v2045_v42  ;;  %v573_v42 = vld [vmem:[%s21604_s25 + $0x78] sm:$0xff]  ;;  %vm18905_vm12 = vmpackc.low %vm21528_vm15, %vm17933_vm2  ;;  %vm21614_vm2 = vcmask 31744  }
 0x89e   :  { %15907 = vmatpush3.bf16.msra.mxu0 %v18769_v55  ;;  %v18806_v36 = vpack.c.bf16 %v573_v42, %v572_v49  ;;  %vm21615_vm15 = vmmov %vm21614_vm2 }
 0x89f   :  { %15909 = vmatprep.subr.bf16.mxu0 %v18776_v35 }
 0x8a2   :  { %15911 = vmatpush3.bf16.msra.mxu0 %v18776_v35 }
 0x8a3   :  { %15913 = vmatprep.subr.bf16.mxu0 %v18782_v45 }
 0x8a6   :  { %15915 = vmatpush3.bf16.msra.mxu0 %v18782_v45 }
 0x8a7   :  { %15917 = vmatprep.subr.bf16.mxu0 %v18788_v37 }
 0x8aa   :  { %15919 = vmatpush3.bf16.msra.mxu0 %v18788_v37 }
 0x8ab   :  { %15921 = vmatprep.subr.bf16.mxu0 %v18794_v5 }
 0x8ae   :  { %15923 = vmatpush3.bf16.msra.mxu0 %v18794_v5 }
 0x8af   :  { %15925 = vmatprep.subr.bf16.mxu0 %v18800_v19 }
 0x8b2   :  { %15927 = vmatpush3.bf16.msra.mxu0 %v18800_v19 }
 0x8b3   :  { %15929 = vmatprep.subr.bf16.mxu0 %v18806_v36 }
 0x8b6   :  { %15931 = vmatpush3.bf16.msra.mxu0 %v18806_v36 }
 0x964   :  { %v14448_v2 = vpop.f32.mrb[34].mxu0 }
 0x965   :  { %v2180_v17 = vmul.f32 %v14448_v2, %v18451_v57  ;;  %v2140_v53 = vpop.f32.mrb[35].mxu0  ;;  %v13029_v2 = vld [vmem:[%s18009_s30 + $0x28] sm:$0xff] }
 0x966   :  { %v2179_v0 = vmul.f32 %v2140_v53, %v18458_v46 }
 0x968   :  { %v15882_v34 = vpack.c.bf16 %v2180_v17, %v2179_v0  ;;  %v14451_v25 = vpop.f32.mrb[36].mxu0  ;;  %v591_v17 = vld [vmem:[%s21605_s8] sm:$0xff]  ;;  %v13030_v0 = vld [vmem:[%s18009_s30 + $0x30] sm:$0xff] }
 0x969   :  { %v2182_v3 = vmul.f32 %v14451_v25, %v18468_v39  ;;  %v2150_v41 = vpop.f32.mrb[37].mxu0 }
 0x96a   :  { %v2181_v32 = vmul.f32 %v2150_v41, %v18471_v28  ;;  %15883 = vmatprep.subr.bf16.mxu1 %v15882_v34 }
 0x96b   :  { %15885 = vmatpush3.bf16.msra.mxu1 %v15882_v34  ;;  %v13031_v34 = vld [vmem:[%s18009_s30 + $0x38] sm:$0xff] }
 0x96c   :  { %v15886_v48 = vpack.c.bf16 %v2182_v3, %v2181_v32  ;;  %v14454_v11 = vpop.f32.mrb[38].mxu0  ;;  %v15958_v41 = vpack.c.bf16 %v13031_v34, %v13030_v0  ;;  %v594_v32 = vld [vmem:[%s21605_s8 + $0x18] sm:$0xff] }
 0x96d   :  { %v2184_v33 = vmul.f32 %v14454_v11, %v18482_v38  ;;  %v2160_v9 = vpop.f32.mrb[39].mxu0  ;;  %v13014_v11 = vld [vmem:[%s21606_s23] ss:$0 sm:$0xff] }
 0x96e   :  { %v2183_v57 = vmul.f32 %v2160_v9, %v18485_v54  ;;  %15887 = vmatprep.subr.bf16.mxu1 %v15886_v48  ;;  %v13028_v54 = vld [vmem:[%s18009_s30 + $0x20] sm:$0xff] }
 0x96f   :  { %15889 = vmatpush3.bf16.msra.mxu1 %v15886_v48 }
 0x970   :  { %v15890_v46 = vpack.c.bf16 %v2184_v33, %v2183_v57  ;;  %v14457_v39 = vpop.f32.mrb[40].mxu0 }
 0x971   :  { %v2186_v49 = vmul.f32 %v14457_v39, %v18496_v14  ;;  %v2170_v28 = vpop.f32.mrb[41].mxu0  ;;  %v15954_v14 = vpack.c.bf16 %v13029_v2, %v13028_v54 }
 0x972   :  { %v2185_v42 = vmul.f32 %v2170_v28, %v18499_v21  ;;  %15891 = vmatprep.subr.bf16.mxu1 %v15890_v46  ;;  %v592_v21 = vld [vmem:[%s21605_s8 + $0x8] sm:$0xff] }
 0x973   :  { %15893 = vmatpush3.bf16.msra.mxu1 %v15890_v46  ;;  %15955 = vmatprep.subr.bf16.mxu0 %v15954_v14  ;;  %v18829_v53 = vpack.c.bf16 %v592_v21, %v591_v17  ;;  %v13015_v17 = vld [vmem:[%s21607_s28] ss:$0 sm:$0xff] }
 0x974   :  { %v15894_v38 = vpack.c.bf16 %v2186_v49, %v2185_v42 }
 0x976   :  { %15896 = vmatprep.subr.msk.bf16.mxu1 %vm18283_vm4, %v15894_v38 }
 0x977   :  { %15899 = vmatpush3.bf16.msk.msra.mxu1 %vm18283_vm4, %v15894_v38 }
 0x978   :  { %15933 = vmatprep.subr.bf16.mxu1 %v18829_v53 }
 0x97a   :  { %14475 = vmatmul.mubr.msk.f32.vlgmr.msra.gmra.mrb[28].mxu1 %vm1627_vm5, %v18622_v24  ;;  %v593_v24 = vld [vmem:[%s21605_s8 + $0x10] sm:$0xff] }
 0x97b   :  { %15935 = vmatpush3.bf16.msra.mxu1 %v18829_v53  ;;  %v18869_v48 = vpack.c.bf16 %v594_v32, %v593_v24 }
 0x97d   :  { %15937 = vmatprep.subr.bf16.mxu1 %v18869_v48 }
 0x97f   :  { %15939 = vmatpush3.bf16.msra.mxu1 %v18869_v48 }
 0xa4d   :  { %v14476_v25 = vpop.f32.mrb[28].mxu1 }
 0xa4e   :  { %v2256_v3 = vpop.f32.mrb[29].mxu1 }
 0xa4f   :  { %14509 = vmatprep.mubr.f32.mxu0 %v2256_v3 }
 0xa50   :  { %14510 = vmatmul.mubr.f32.vlgmr.msra.gmra.mrb[42].mxu0 %v14476_v25 }
 0xa51   :  { %15957 = vmatpush3.bf16.msra.mxu0 %v15954_v14  ;;  %14549 = vmatprep.mubr.msk.f32.mxu0 %vm603_vm7, %v18244_v1 }
 0xa52   :  { %15959 = vmatprep.subr.bf16.mxu0 %v15958_v41 }
 0xa55   :  { %15961 = vmatpush3.bf16.msra.mxu0 %v15958_v41 }
 0xa56   :  { %15975 = vmatprep.subr.bf16.mxu0 %v18339_v56 }
 0xa58   :  { %14550 = vmatmul.mubr.msk.f32.vlgmr.msra.gmra.mrb[44].mxu0 %vm603_vm7, %v18242_v62 }
 0xa59   :  { %14552 = vmatprep.mubr.msk.f32.mxu0 %vm603_vm7, %v18252_v10  ;;  %15977 = vmatpush3.bf16.msra.mxu0 %v18339_v56 }
 0xa5a   :  { %15979 = vmatprep.subr.bf16.mxu0 %v18345_v59 }
 0xa5c   :  { %14553 = vmatmul.mubr.msk.f32.gmra.mrb[46].mxu0 %vm603_vm7, %v18250_v7 }
 0xa5d   :  { %14555 = vmatprep.mubr.msk.f32.mxu0 %vm603_vm7, %v18260_v18  ;;  %15981 = vmatpush3.bf16.msra.mxu0 %v18345_v59 }
 0xa5e   :  { %15983 = vmatprep.subr.bf16.mxu0 %v18351_v63 }
 0xa60   :  { %14556 = vmatmul.mubr.msk.f32.gmra.mrb[48].mxu0 %vm603_vm7, %v18258_v15 }
 0xa61   :  { %14558 = vmatprep.mubr.msk.f32.mxu0 %vm603_vm7, %v18268_v23  ;;  %15985 = vmatpush3.bf16.msra.mxu0 %v18351_v63 }
 0xa62   :  { %15987 = vmatprep.subr.bf16.mxu0 %v18357_v4 }
 0xa64   :  { %14559 = vmatmul.mubr.msk.f32.gmra.mrb[50].mxu0 %vm603_vm7, %v18266_v22 }
 0xa65   :  { %15989 = vmatpush3.bf16.msra.mxu0 %v18357_v4 }
 0xa66   :  { %15991 = vmatprep.subr.bf16.mxu0 %v18363_v8 }
 0xa69   :  { %15993 = vmatpush3.bf16.msra.mxu0 %v18363_v8 }
 0xa6a   :  { %15995 = vmatprep.subr.bf16.mxu0 %v18369_v12 }
 0xa6d   :  { %15997 = vmatpush3.bf16.msra.mxu0 %v18369_v12  ;;  %v13025_v12 = vld [vmem:[%s18004_s24 + $0x38] sm:$0xff] }
 0xa6e   :  { %15999 = vmatprep.subr.bf16.mxu0 %v18375_v16 }
 0xa71   :  { %16001 = vmatpush3.bf16.msra.mxu0 %v18375_v16 }
 0xa72   :  { %16003 = vmatprep.subr.bf16.mxu0 %v18381_v20 }
 0xa75   :  { %16005 = vmatpush3.bf16.msra.mxu0 %v18381_v20 }
 0xb23   :  { %v14511_v33 = vpop.f32.mrb[42].mxu0 }
 0xb24   :  { %v2338_v9 = vpop.f32.mrb[43].mxu0  ;;  %v18876_v46 = vadd.f32 %v14511_v33, %v13014_v11 }
 0xb25   :  { %v18874_v57 = vadd.f32 %v13014_v11, %v2338_v9 }
 0xb27   :  { %14520 = vmatprep.mubr.msk.f32.mxu1 %vm603_vm7, %v18874_v57 }
 0xb28   :  { %14521 = vmatmul.mubr.msk.f32.vlgmr.msra.gmra.mrb[30].mxu1 %vm603_vm7, %v18876_v46 }
 0xb2b   :  { %v18882_v39 = vpop.f32.mrb[44].mxu0 }
 0xb2c   :  { %v18884_v49 = vpop.f32.mrb[45].mxu0 }
 0xb2f   :  { %v18886_v28 = vpop.f32.mrb[46].mxu0 }
 0xb30   :  { %v18888_v42 = vpop.f32.mrb[47].mxu0 }
 0xb33   :  { %v18890_v38 = vpop.f32.mrb[48].mxu0 }
 0xb34   :  { %v18892_v54 = vpop.f32.mrb[49].mxu0 }
 0xb37   :  { %v18894_v2 = vpop.f32.mrb[50].mxu0 }
 0xb38   :  { %v18896_v14 = vpop.f32.mrb[51].mxu0 }
 0xbfb   :  { %v14522_v21 = vpop.f32.mrb[30].mxu1 }
 0xbfc   :  { %v2431_v0 = vadd.f32 %v14522_v21, %v13015_v17  ;;  %v2425_v34 = vpop.f32.mrb[31].mxu1 }
 0xbfd   :  { %v2426_v25 = vadd.f32 %v13015_v17, %v2425_v34 }
 0xbfe   :  { %v2439_v3 = vsel %vm2438_vm13, %v2431_v0, -inf }
 0xbff   :  { %2440 = vmax.xlane.f32.xlu1 %v2439_v3  ;;  %v2435_v41 = vsel %vm2434_vm14, %v2426_v25, -inf }
 0xc00   :  { %2436 = vmax.xlane.f32.xlu0 %v2435_v41 }
 0xc8c   :  { %v2441_v24 = vpop.xlane.xlu1 %2440 }
 0xc8d   :  { %v2443_v32 = vsub.f32 %v2431_v0, %v2441_v24  ;;  %v2437_v11 = vpop.xlane.xlu0 %2436 }
 0xc8e   :  { %v2442_v33 = vsub.f32 %v2426_v25, %v2437_v11  ;;  %v596_v25 = vld [vmem:[%s21608_s27] sm:$0xff] }
 0xc8f   :  { %v2446_v9 = vmul.f32 1.442695, %v2443_v32 }
 0xc90   :  { %v2444_v20 = vmul.f32 1.442695, %v2442_v33 }
 0xc92   :  { %16930 = vpow2.f32 %v2444_v20  ;;  %v597_v20 = vld [vmem:[%s21608_s27 + $0x8] sm:$0x3] }
 0xc93   :  { %16932 = vpow2.f32 %v2446_v9  ;;  %v18911_v3 = vpack.c.bf16 %v597_v20, %v596_v25  ;;  %v13022_v9 = vld [vmem:[%s18004_s24 + $0x20] sm:$0xff]  ;;  %v13024_v25 = vld [vmem:[%s18004_s24 + $0x30] sm:$0xff] }
 0xc94   :  { %v15950_v8 = vpack.c.bf16 %v13025_v12, %v13024_v25 }
 0xc95   :  { %15942 = vmatprep.subr.msk.bf16.mxu1 %vm18905_vm12, %v18911_v3 }
 0xc96   :  { %15945 = vmatpush3.bf16.msk.msra.mxu1 %vm18905_vm12, %v18911_v3 }
 0xc9c   :  { %v16931_v21 = vpop.eup %16930 }
 0xc9d   :  { %v2448_v16 = vsel %vm2434_vm14, %v16931_v21, 0.0  ;;  %v16933_v17 = vpop.eup %16932 }
 0xc9e   :  { %2449 = vadd.xlane.f32.xlu1 %v2448_v16  ;;  %v2451_v34 = vsel %vm2438_vm13, %v16933_v17, 0.0 }
 0xca2   :  { %2452 = vadd.xlane.f32.xlu1 %v2451_v34  ;;  %v13023_v34 = vld [vmem:[%s18004_s24 + $0x28] sm:$0xff] }
 0xca3   :  { %v15946_v20 = vpack.c.bf16 %v13023_v34, %v13022_v9 }
 0xca5   :  { %15947 = vmatprep.subr.bf16.mxu1 %v15946_v20 }
 0xd2b   :  { %v2450_v16 = vpop.xlane.xlu1 %2449 }
 0xd2c   :  { %16934 = vrcp.f32 %v2450_v16 }
 0xd2f   :  { %v2453_v41 = vpop.xlane.xlu1 %2452 }
 0xd30   :  { %16936 = vrcp.f32 %v2453_v41 }
 0xd36   :  { %v16935_v24 = vpop.eup %16934 }
 0xd37   :  { %v2456_v32 = vmul.f32 %v16935_v24, %v16931_v21  ;;  %v13021_v24 = vld [vmem:[%s21611_s0] ss:$0 sm:$0xff] }
 0xd39   :  { %14527 = vmatprep.mubr.msk.f32.mxu1 %vm2434_vm14, %v2456_v32 }
 0xd3a   :  { %v16937_v11 = vpop.eup %16936 }
 0xd3b   :  { %v2457_v33 = vmul.f32 %v16937_v11, %v16933_v17 }
 0xd3d   :  { %14528 = vmatmul.mubr.msk.f32.vlgmr.msra.gmra.mrb[32].mxu1 %vm2434_vm14, %v2457_v33 }
 0xd3e   :  { %15949 = vmatpush3.bf16.msra.mxu1 %v15946_v20 }
 0xd3f   :  { %15951 = vmatprep.subr.bf16.mxu1 %v15950_v8 }
 0xd42   :  { %15953 = vmatpush3.bf16.msra.mxu1 %v15950_v8  ;;  %v18939_v8 = vld [vmem:[%s17979_s29] sm:$0xff] }
 0xe10   :  { %v14529_v16 = vpop.f32.mrb[32].mxu1 }
 0xe11   :  { %v2540_v21 = vadd.f32 1.0, %v14529_v16  ;;  %v2534_v41 = vpop.f32.mrb[33].mxu1 }
 0xe12   :  { %v2535_v32 = vadd.f32 1.0, %v2534_v41 }
 0xe13   :  { %v2544_v17 = vmul.f32 %v2540_v21, %v18876_v46 }
 0xe14   :  { %v2543_v11 = vmul.f32 %v2535_v32, %v18874_v57 }
 0xe15   :  { %v2552_v33 = vadd.f32 %v13021_v24, %v2544_v17 }
 0xe16   :  { %v2551_v22 = vadd.f32 %v13021_v24, %v2543_v11 }
 0xe17   :  { %v18932_v12 = vadd.f32 %v2552_v33, %v18235_v52  ;;  %v17706_v52 = vld [vmem:[%s17984_s3] sm:$0xff] }
 0xe18   :  { %v18929_v9 = vadd.f32 %v2551_v22, %v18233_v51  ;;  %v17707_v22 = vld [vmem:[%s17984_s3 + $0x8] sm:$0xff] }
 0xe19   :  { %21613 = vst [vmem:[#allocation59_spill] sm:$0xff] %v18932_v12 }
 0xe1a   :  { %21612 = vst [vmem:[#allocation58_spill] sm:$0xff] %v18929_v9  ;;  %14538 = vmatprep.mubr.msk.f32.mxu1 %vm603_vm7, %v18929_v9 }
 0xe1b   :  { %14539 = vmatmul.mubr.msk.f32.vlgmr.msra.gmra.mrb[34].mxu1 %vm603_vm7, %v18932_v12 }
 0xe1c   :  { %14565 = vmatprep.mubr.msk.f32.mxu1 %vm818_vm0, %v18939_v8 }
 0xeee   :  { %v14540_v57 = vpop.f32.mrb[34].mxu1 }
 0xeef   :  { %v2632_v46 = vpop.f32.mrb[35].mxu1 }
 0xef0   :  { %v15962_v51 = vpack.c.bf16 %v14540_v57, %v2632_v46 }
 0xef2   :  { %15964 = vmatprep.subr.msk.bf16.mxu1 %vm18283_vm4, %v15962_v51 }
 0xef3   :  { %15967 = vmatpush3.bf16.msk.msra.mxu1 %vm18283_vm4, %v15962_v51 }
 0xef4   :  { %15970 = vmatprep.subr.msk.bf16.mxu1 %vm18283_vm4, %v15962_v51 }
 0xef6   :  { %14566 = vmatmul.mubr.msk.f32.vlgmr.msra.gmra.mrb[36].mxu1 %vm818_vm0, %v18674_v30  ;;  %v17708_v30 = vld [vmem:[%s17984_s3 + $0x10] sm:$0xff] }
 0xef7   :  { %15973 = vmatpush3.bf16.msk.msra.mxu1 %vm18283_vm4, %v15962_v51  ;;  %14568 = vmatprep.mubr.msk.f32.mxu1 %vm818_vm0, %v18679_v50  ;;  %v17709_v50 = vld [vmem:[%s17984_s3 + $0x18] sm:$0xff] }
 0xefa   :  { %14569 = vmatmul.mubr.msk.f32.gmra.mrb[38].mxu1 %vm818_vm0, %v18684_v29  ;;  %v17710_v29 = vld [vmem:[%s17984_s3 + $0x20] sm:$0xff] }
 0xefb   :  { %14571 = vmatprep.mubr.msk.f32.mxu1 %vm818_vm0, %v18689_v6  ;;  %v17711_v6 = vld [vmem:[%s17984_s3 + $0x28] sm:$0xff] }
 0xefe   :  { %14572 = vmatmul.mubr.msk.f32.gmra.mrb[40].mxu1 %vm818_vm0, %v18694_v26  ;;  %v17712_v26 = vld [vmem:[%s17984_s3 + $0x30] sm:$0xff] }
 0xeff   :  { %14574 = vmatprep.mubr.msk.f32.mxu1 %vm818_vm0, %v18699_v31  ;;  %v17713_v31 = vld [vmem:[%s17984_s3 + $0x38] sm:$0xf] }
 0xf02   :  { %14575 = vmatmul.mubr.msk.f32.gmra.mrb[42].mxu1 %vm818_vm0, %v18704_v44 }
 0xf03   :  { %14581 = vmatprep.mubr.msk.f32.mxu1 %vm818_vm0, %v17706_v52 }
 0xf06   :  { %14582 = vmatmul.mubr.msk.f32.vlgmr.msra.gmra.mrb[44].mxu1 %vm818_vm0, %v17707_v22 }
 0xf07   :  { %14584 = vmatprep.mubr.msk.f32.mxu1 %vm818_vm0, %v17708_v30 }
 0xf0a   :  { %14585 = vmatmul.mubr.msk.f32.gmra.mrb[46].mxu1 %vm818_vm0, %v17709_v50 }
 0xf0b   :  { %14587 = vmatprep.mubr.msk.f32.mxu1 %vm818_vm0, %v17710_v29 }
 0xf0e   :  { %14588 = vmatmul.mubr.msk.f32.gmra.mrb[48].mxu1 %vm818_vm0, %v17711_v6 }
 0xf0f   :  { %14590 = vmatprep.mubr.msk.f32.mxu1 %vm818_vm0, %v17712_v26 }
 0xf12   :  { %14591 = vmatmul.mubr.msk.f32.gmra.mrb[50].mxu1 %vm818_vm0, %v17713_v31 }
 0xf13   :  { %14639 = vmatprep.mubr.msk.f32.mxu1 %vm818_vm0, %v18939_v8 }
 0xfc9   :  { %v14567_v44 = vpop.f32.mrb[36].mxu1 }
 0xfca   :  { %v18984_v34 = vadd.f32 %v14567_v44, %v18882_v39  ;;  %v2820_v25 = vpop.f32.mrb[37].mxu1 }
 0xfcb   :  { %v18987_v20 = vadd.f32 %v2820_v25, %v18884_v49 }
 0xfcc   :  { %v2868_v16 = vand.u32 2147483647, %v18984_v34 }
 0xfcd   :  { %v2867_v21 = vand.u32 2147483647, %v18987_v20  ;;  %v14570_v41 = vpop.f32.mrb[38].mxu1 }
 0xfce   :  { %v18992_v24 = vadd.f32 %v14570_v41, %v18886_v28  ;;  %v2830_v32 = vpop.f32.mrb[39].mxu1  ;;  %v2876_v17 = vsub.f32 0.0, %v2868_v16 }
 0xfcf   :  { %v18995_v11 = vadd.f32 %v2830_v32, %v18888_v42  ;;  %v2875_v33 = vsub.f32 0.0, %v2867_v21 }
 0xfd0   :  { %v2870_v57 = vand.u32 2147483647, %v18992_v24  ;;  %v2885_v22 = vmul.f32 1.442695, %v2876_v17 }
 0xfd1   :  { %v14573_v46 = vpop.f32.mrb[40].mxu1  ;;  %v2869_v50 = vand.u32 2147483647, %v18995_v11  ;;  %v2883_v29 = vmul.f32 1.442695, %v2875_v33 }
 0xfd2   :  { %v18999_v51 = vadd.f32 %v14573_v46, %v18890_v38  ;;  %v2840_v52 = vpop.f32.mrb[41].mxu1  ;;  %v2878_v6 = vsub.f32 0.0, %v2870_v57  ;;  %16938 = vpow2.f32 %v2885_v22 }
 0xfd3   :  { %v19002_v30 = vadd.f32 %v2840_v52, %v18892_v54  ;;  %v2877_v21 = vsub.f32 0.0, %v2869_v50  ;;  %16940 = vpow2.f32 %v2883_v29 }
 0xfd4   :  { %v2872_v41 = vand.u32 2147483647, %v18999_v51  ;;  %v2889_v32 = vmul.f32 1.442695, %v2878_v6 }
 0xfd5   :  { %v2871_v26 = vand.u32 2147483647, %v19002_v30  ;;  %v14576_v31 = vpop.f32.mrb[42].mxu1 }
 0xfd6   :  { %v19007_v44 = vadd.f32 %v14576_v31, %v18894_v2  ;;  %v2850_v25 = vpop.f32.mrb[43].mxu1  ;;  %v2880_v12 = vsub.f32 0.0, %v2872_v41  ;;  %16942 = vpow2.f32 %v2889_v32 }
 0xfd7   :  { %v19010_v16 = vadd.f32 %v2850_v25, %v18896_v14  ;;  %v2879_v17 = vsub.f32 0.0, %v2871_v26  ;;  %v2887_v25 = vmul.f32 1.442695, %v2877_v21 }
 0xfd8   :  { %v2874_v33 = vand.u32 2147483647, %v19007_v44 }
 0xfd9   :  { %v14583_v46 = vpop.f32.mrb[44].mxu1  ;;  %v2873_v31 = vand.u32 2147483647, %v19010_v16  ;;  %v2891_v29 = vmul.f32 1.442695, %v2879_v17  ;;  %16944 = vpow2.f32 %v2887_v25 }
 0xfda   :  { %v19015_v57 = vadd.f32 %v14583_v46, %v18882_v39  ;;  %v2997_v52 = vpop.f32.mrb[45].mxu1  ;;  %v2882_v26 = vsub.f32 0.0, %v2874_v33 }
 0xfdb   :  { %v19019_v22 = vadd.f32 %v2997_v52, %v18884_v49  ;;  %v2881_v23 = vsub.f32 0.0, %v2873_v31  ;;  %v2893_v49 = vmul.f32 1.442695, %v2880_v12  ;;  %16946 = vpow2.f32 %v2891_v29 }
 0xfdc   :  { %v3045_v50 = vand.u32 2147483647, %v19015_v57  ;;  %v16939_v41 = vpop.eup %16938  ;;  %v2897_v63 = vmul.f32 1.442695, %v2882_v26 }
 0xfdd   :  { %v3044_v6 = vand.u32 2147483647, %v19019_v22  ;;  %v14586_v4 = vpop.f32.mrb[46].mxu1 }
 0xfde   :  { %v3053_v9 = vsub.f32 0.0, %v3045_v50  ;;  %v19024_v46 = vadd.f32 %v14586_v4, %v18886_v28  ;;  %v3007_v15 = vpop.f32.mrb[47].mxu1  ;;  %v16941_v50 = vpop.eup %16940 }
 0xfdf   :  { %v3052_v39 = vsub.f32 0.0, %v3044_v6  ;;  %v19027_v21 = vadd.f32 %v3007_v15, %v18888_v42  ;;  %v2895_v6 = vmul.f32 1.442695, %v2881_v23  ;;  %v2900_v15 = vadd.f32 1.0, %v16939_v41 }
 0xfe0   :  { %v3062_v52 = vmul.f32 1.442695, %v3053_v9  ;;  %v3047_v33 = vand.u32 2147483647, %v19024_v46  ;;  %v2899_v29 = vadd.f32 1.0, %v16941_v50  ;;  %v16943_v23 = vpop.eup %16942 }
 0xfe1   :  { %v3060_v32 = vmul.f32 1.442695, %v3052_v39  ;;  %v14589_v17 = vpop.f32.mrb[48].mxu1  ;;  %v3046_v4 = vand.u32 2147483647, %v19027_v21 }
 0xfe2   :  { %16948 = vpow2.f32 %v3062_v52  ;;  %v3017_v31 = vpop.f32.mrb[49].mxu1  ;;  %v19032_v28 = vadd.f32 %v14589_v17, %v18890_v38  ;;  %v3055_v42 = vsub.f32 0.0, %v3047_v33  ;;  %v2902_v33 = vadd.f32 1.0, %v16943_v23 }
 0xfe3   :  { %v19035_v9 = vadd.f32 %v3017_v31, %v18892_v54  ;;  %16950 = vpow2.f32 %v2893_v49  ;;  %v3054_v12 = vsub.f32 0.0, %v3046_v4 }
 0xfe4   :  { %16952 = vpow2.f32 %v3060_v32  ;;  %v3066_v26 = vmul.f32 1.442695, %v3055_v42  ;;  %v3049_v39 = vand.u32 2147483647, %v19032_v28 }
 0xfe5   :  { %v14592_v25 = vpop.f32.mrb[50].mxu1  ;;  %16954 = vpow2.f32 %v2897_v63  ;;  %v3064_v52 = vmul.f32 1.442695, %v3054_v12  ;;  %v3048_v38 = vand.u32 2147483647, %v19035_v9  ;;  %v16945_v63 = vpop.eup %16944 }
 0xfe6   :  { %16956 = vpow2.f32 %v2895_v6  ;;  %v19040_v17 = vadd.f32 %v14592_v25, %v18894_v2  ;;  %v3027_v54 = vpop.f32.mrb[51].mxu1  ;;  %v3057_v49 = vsub.f32 0.0, %v3049_v39  ;;  %v16947_v6 = vpop.eup %16946  ;;  %v2901_v12 = vadd.f32 1.0, %v16945_v63 }
 0xfe7   :  { %16958 = vlog2.f32 %v2900_v15  ;;  %v19043_v41 = vadd.f32 %v3027_v54, %v18896_v14  ;;  %v3056_v32 = vsub.f32 0.0, %v3048_v38  ;;  %v2903_v38 = vadd.f32 1.0, %v16947_v6 }
 0xfe8   :  { %16960 = vpow2.f32 %v3066_v26  ;;  %v3070_v31 = vmul.f32 1.442695, %v3057_v49  ;;  %v3051_v50 = vand.u32 2147483647, %v19040_v17 }
 0xfe9   :  { %16962 = vpow2.f32 %v3064_v52  ;;  %v3068_v4 = vmul.f32 1.442695, %v3056_v32  ;;  %v3050_v14 = vand.u32 2147483647, %v19043_v41 }
 0xfea   :  { %16964 = vlog2.f32 %v2899_v29  ;;  %v3059_v2 = vsub.f32 0.0, %v3051_v50 }
 0xfeb   :  { %16966 = vpow2.f32 %v3070_v31  ;;  %v3058_v23 = vsub.f32 0.0, %v3050_v14 }
 0xfec   :  { %v16949_v42 = vpop.eup %16948  ;;  %16968 = vpow2.f32 %v3068_v4  ;;  %v3074_v26 = vmul.f32 1.442695, %v3059_v2 }
 0xfed   :  { %v3077_v15 = vadd.f32 1.0, %v16949_v42  ;;  %v16951_v25 = vpop.eup %16950  ;;  %16970 = vlog2.f32 %v2902_v33  ;;  %v3072_v32 = vmul.f32 1.442695, %v3058_v23 }
 0xfee   :  { %v16953_v39 = vpop.eup %16952  ;;  %v2904_v49 = vadd.f32 1.0, %v16951_v25 }
 0xfef   :  { %16972 = vlog2.f32 %v3077_v15  ;;  %v16955_v52 = vpop.eup %16954  ;;  %v3076_v54 = vadd.f32 1.0, %v16953_v39 }
 0xff0   :  { %16974 = vpow2.f32 %v3074_v26  ;;  %v16957_v29 = vpop.eup %16956  ;;  %v2906_v14 = vadd.f32 1.0, %v16955_v52 }
 0xff1   :  { %16976 = vlog2.f32 %v2901_v12  ;;  %v16959_v31 = vpop.eup %16958  ;;  %v2905_v4 = vadd.f32 1.0, %v16957_v29  ;;  %v3037_v29 = vmax.f32 %v19015_v57, 0.0 }
 0xff2   :  { %16978 = vlog2.f32 %v3076_v54  ;;  %v16961_v63 = vpop.eup %16960 }
 0xff3   :  { %16980 = vpow2.f32 %v3072_v32  ;;  %v16963_v50 = vpop.eup %16962  ;;  %v3079_v33 = vadd.f32 1.0, %v16961_v63  ;;  %v2859_v63 = vmax.f32 %v18987_v20, 0.0  ;;  %v2862_v20 = vmax.f32 %v18992_v24, 0.0 }
 0xff4   :  { %16982 = vlog2.f32 %v2903_v38  ;;  %v16965_v42 = vpop.eup %16964  ;;  %v3078_v2 = vadd.f32 1.0, %v16963_v50  ;;  %v2910_v38 = vmul.f32 0.6931472, %v16959_v31  ;;  %v3036_v31 = vmax.f32 %v19019_v22, 0.0 }
 0xff5   :  { %16984 = vlog2.f32 %v2904_v49  ;;  %v16967_v15 = vpop.eup %16966  ;;  %v2908_v23 = vmul.f32 0.6931472, %v16965_v42  ;;  %v2863_v22 = vmax.f32 %v19002_v30, 0.0  ;;  %v3038_v30 = vmax.f32 %v19027_v21, 0.0 }
 0xff6   :  { %16986 = vlog2.f32 %v3079_v33  ;;  %v16969_v6 = vpop.eup %16968  ;;  %v3081_v26 = vadd.f32 1.0, %v16967_v15  ;;  %v19053_v15 = vld [vmem:[%s18019_s12 + $0x1] ss:$0 sm:$0xff] }
 0xff7   :  { %16988 = vlog2.f32 %v3078_v2  ;;  %v16971_v12 = vpop.eup %16970  ;;  %v3080_v25 = vadd.f32 1.0, %v16969_v6  ;;  %v2923_v2 = vadd.f32 %v2908_v23, %v2859_v63  ;;  %v2864_v23 = vmax.f32 %v18999_v51, 0.0 }
 0xff8   :  { %16990 = vlog2.f32 %v2905_v4  ;;  %v2860_v4 = vmax.f32 %v18984_v34, 0.0  ;;  %v2914_v34 = vmul.f32 0.6931472, %v16971_v12 }
 0xff9   :  { %v16973_v39 = vpop.eup %16972  ;;  %16992 = vlog2.f32 %v3081_v26 }
 0xffa   :  { %v16975_v54 = vpop.eup %16974  ;;  %v3087_v32 = vmul.f32 0.6931472, %v16973_v39  ;;  %16994 = vlog2.f32 %v3080_v25  ;;  %v2924_v26 = vadd.f32 %v2910_v38, %v2860_v4  ;;  %v19057_v25 = vld [vmem:[%s18014_s6 + $0x1] ss:$0 sm:$0xff]  ;;  %v2926_v18 = vadd.f32 %v2914_v34, %v2862_v20 }
 0xffb   :  { %v16977_v49 = vpop.eup %16976  ;;  %16996 = vlog2.f32 %v2906_v14  ;;  %v3083_v52 = vadd.f32 1.0, %v16975_v54  ;;  %v3116_v12 = vmul.f32 %v19057_v25, %v2923_v2  ;;  %v3041_v2 = vmax.f32 %v19032_v28, 0.0 }
 0xffc   :  { %v16979_v50 = vpop.eup %16978  ;;  %v19050_v33 = vadd.f32 %v3087_v32, %v3037_v29  ;;  %v2912_v14 = vmul.f32 0.6931472, %v16977_v49  ;;  %v2861_v29 = vmax.f32 %v18995_v11, 0.0  ;;  %v3117_v4 = vmul.f32 %v19057_v25, %v2924_v26 }
 0xffd   :  { %v16981_v42 = vpop.eup %16980  ;;  %v3085_v57 = vmul.f32 0.6931472, %v16979_v50  ;;  %16998 = vlog2.f32 %v3083_v52  ;;  %v3039_v52 = vmax.f32 %v19024_v46, 0.0  ;;  %v3040_v26 = vmax.f32 %v19035_v9, 0.0 }
 0xffe   :  { %v16983_v6 = vpop.eup %16982  ;;  %v3082_v39 = vadd.f32 1.0, %v16981_v42  ;;  %v3133_v38 = vmul.f32 %v19053_v15, %v19050_v33  ;;  %v2925_v42 = vadd.f32 %v2912_v14, %v2861_v29  ;;  %v2865_v20 = vmax.f32 %v19010_v16, 0.0 }
 0xfff   :  { %v16985_v54 = vpop.eup %16984  ;;  %v19062_v32 = vadd.f32 %v3085_v57, %v3036_v31  ;;  %v2916_v49 = vmul.f32 0.6931472, %v16983_v6  ;;  %v3119_v9 = vmul.f32 %v19057_v25, %v2926_v18 }
0x1000   :  { %v16987_v63 = vpop.eup %16986  ;;  %17000 = vlog2.f32 %v3082_v39  ;;  %v2918_v7 = vmul.f32 0.6931472, %v16985_v54  ;;  %v3118_v34 = vmul.f32 %v19057_v25, %v2925_v42 }
0x1001   :  { %v16989_v24 = vpop.eup %16988  ;;  %v3091_v50 = vmul.f32 0.6931472, %v16987_v63  ;;  %v3132_v11 = vmul.f32 %v19053_v15, %v19062_v32  ;;  %v3141_v63 = vadd.f32 %v3133_v38, %v3117_v4  ;;  %v2927_v56 = vadd.f32 %v2916_v49, %v2863_v22 }
0x1002   :  { %v16991_v51 = vpop.eup %16990  ;;  %v3089_v31 = vmul.f32 0.6931472, %v16989_v24  ;;  %v2928_v38 = vadd.f32 %v2918_v7, %v2864_v23  ;;  %v3043_v49 = vmax.f32 %v19040_v17, 0.0  ;;  %v2866_v23 = vmax.f32 %v19007_v44, 0.0 }
0x1003   :  { %v16993_v57 = vpop.eup %16992  ;;  %v19073_v46 = vadd.f32 %v3091_v50, %v3039_v52  ;;  %v3140_v39 = vadd.f32 %v3132_v11, %v3116_v12  ;;  %v2920_v22 = vmul.f32 0.6931472, %v16991_v51  ;;  %v3120_v12 = vmul.f32 %v19057_v25, %v2927_v56 }
0x1004   :  { %v16995_v6 = vpop.eup %16994  ;;  %v19075_v59 = vadd.f32 %v3089_v31, %v3038_v30  ;;  %v3095_v10 = vmul.f32 0.6931472, %v16993_v57  ;;  %v3121_v56 = vmul.f32 %v19057_v25, %v2928_v38 }
0x1005   :  { %v16997_v62 = vpop.eup %16996  ;;  %v3093_v14 = vmul.f32 0.6931472, %v16995_v6  ;;  %14625 = vmatprep.mubr.f32.mxu0 %v3140_v39  ;;  %v3135_v21 = vmul.f32 %v19053_v15, %v19073_v46  ;;  %v2929_v18 = vadd.f32 %v2920_v22, %v2865_v20 }
0x1006   :  { %v19082_v54 = vadd.f32 %v3095_v10, %v3041_v2  ;;  %14626 = vmatmul.mubr.f32.vlgmr.msra.gmra.mrb[52].mxu0 %v3141_v63  ;;  %v3134_v28 = vmul.f32 %v19053_v15, %v19075_v59  ;;  %v2922_v24 = vmul.f32 0.6931472, %v16997_v62  ;;  %v3042_v62 = vmax.f32 %v19043_v41, 0.0 }
0x1007   :  { %v16999_v29 = vpop.eup %16998  ;;  %v19087_v52 = vadd.f32 %v3093_v14, %v3040_v26  ;;  %v3143_v10 = vadd.f32 %v3135_v21, %v3119_v9  ;;  %v3122_v44 = vmul.f32 %v19057_v25, %v2929_v18 }
0x1008   :  { %v3099_v50 = vmul.f32 0.6931472, %v16999_v29  ;;  %v3142_v16 = vadd.f32 %v3134_v28, %v3118_v34  ;;  %v3137_v4 = vmul.f32 %v19053_v15, %v19082_v54  ;;  %v2930_v30 = vadd.f32 %v2922_v24, %v2866_v23 }
0x1009   :  { %v3136_v11 = vmul.f32 %v19053_v15, %v19087_v52 }
0x100a   :  { %v17001_v7 = vpop.eup %17000  ;;  %v19097_v51 = vadd.f32 %v3099_v50, %v3043_v49  ;;  %14628 = vmatprep.mubr.f32.mxu0 %v3142_v16  ;;  %v3145_v57 = vadd.f32 %v3137_v4, %v3121_v56  ;;  %v3123_v6 = vmul.f32 %v19057_v25, %v2930_v30 }
0x100b   :  { %v3097_v17 = vmul.f32 0.6931472, %v17001_v7  ;;  %14629 = vmatmul.mubr.f32.gmra.mrb[54].mxu0 %v3143_v10  ;;  %v3144_v42 = vadd.f32 %v3136_v11, %v3120_v12 }
0x100c   :  { %v3139_v39 = vmul.f32 %v19053_v15, %v19097_v51 }
0x100d   :  { %v19101_v31 = vadd.f32 %v3097_v17, %v3042_v62  ;;  %14631 = vmatprep.mubr.f32.mxu0 %v3144_v42 }
0x100e   :  { %v3147_v2 = vadd.f32 %v3139_v39, %v3123_v6 }
0x100f   :  { %14632 = vmatmul.mubr.f32.gmra.mrb[56].mxu0 %v3145_v57  ;;  %v3138_v41 = vmul.f32 %v19053_v15, %v19101_v31 }
0x1011   :  { %v3146_v63 = vadd.f32 %v3138_v41, %v3122_v44 }
0x1013   :  { %14634 = vmatprep.mubr.f32.mxu0 %v3146_v63 }
0x1014   :  { %14635 = vmatmul.mubr.f32.gmra.mrb[58].mxu0 %v3147_v2 }
0x1015   :  { %14674 = vmatprep.mubr.msk.f32.mxu0 %vm818_vm0, %v18939_v8 }
0x10d9   :  { %v19111_v26 = vpop.f32.mrb[52].mxu0 }
0x10da   :  { %v3262_v14 = vand.u32 2147483647, %v19111_v26  ;;  %v19114_v21 = vpop.f32.mrb[53].mxu0 }
0x10db   :  { %v3261_v20 = vand.u32 2147483647, %v19114_v21 }
0x10dc   :  { %v3270_v34 = vsub.f32 0.0, %v3262_v14 }
0x10dd   :  { %v3269_v28 = vsub.f32 0.0, %v3261_v20 }
0x10de   :  { %v3279_v15 = vmul.f32 1.442695, %v3270_v34  ;;  %v19117_v29 = vpop.f32.mrb[54].mxu0 }
0x10df   :  { %v3277_v25 = vmul.f32 1.442695, %v3269_v28  ;;  %v3264_v38 = vand.u32 2147483647, %v19117_v29  ;;  %v19120_v22 = vpop.f32.mrb[55].mxu0 }
0x10e0   :  { %17002 = vpow2.f32 %v3279_v15  ;;  %v3263_v8 = vand.u32 2147483647, %v19120_v22 }
0x10e1   :  { %17004 = vpow2.f32 %v3277_v25  ;;  %v3272_v9 = vsub.f32 0.0, %v3264_v38 }
0x10e2   :  { %v3271_v24 = vsub.f32 0.0, %v3263_v8  ;;  %v19123_v49 = vpop.f32.mrb[56].mxu0 }
0x10e3   :  { %v3283_v50 = vmul.f32 1.442695, %v3272_v9  ;;  %v3266_v16 = vand.u32 2147483647, %v19123_v49  ;;  %v19126_v10 = vpop.f32.mrb[57].mxu0 }
0x10e4   :  { %v3281_v12 = vmul.f32 1.442695, %v3271_v24  ;;  %v3265_v11 = vand.u32 2147483647, %v19126_v10 }
0x10e5   :  { %17006 = vpow2.f32 %v3283_v50  ;;  %v3274_v4 = vsub.f32 0.0, %v3266_v16  ;;  %v3254_v50 = vmax.f32 %v19111_v26, 0.0 }
0x10e6   :  { %17008 = vpow2.f32 %v3281_v12  ;;  %v3273_v7 = vsub.f32 0.0, %v3265_v11  ;;  %v19137_v11 = vld [vmem:[%s21600_s5 + $0x1] ss:$0 sm:$0xff] }
0x10e7   :  { %v3287_v23 = vmul.f32 1.442695, %v3274_v4  ;;  %v19129_v62 = vpop.f32.mrb[58].mxu0  ;;  %v3253_v4 = vmax.f32 %v19114_v21, 0.0 }
0x10e8   :  { %v3285_v18 = vmul.f32 1.442695, %v3273_v7  ;;  %v3268_v17 = vand.u32 2147483647, %v19129_v62  ;;  %v19132_v42 = vpop.f32.mrb[59].mxu0 }
0x10e9   :  { %17010 = vpow2.f32 %v3287_v23  ;;  %v3267_v56 = vand.u32 2147483647, %v19132_v42 }
0x10ea   :  { %v17003_v30 = vpop.eup %17002  ;;  %17012 = vpow2.f32 %v3285_v18  ;;  %v3276_v57 = vsub.f32 0.0, %v3268_v17 }
0x10eb   :  { %v17005_v39 = vpop.eup %17004  ;;  %v3294_v44 = vadd.f32 1.0, %v17003_v30  ;;  %v3275_v41 = vsub.f32 0.0, %v3267_v56  ;;  %v19141_v56 = vld [vmem:[%s21601_s9 + $0x1] ss:$0 sm:$0xff] }
0x10ec   :  { %v3293_v6 = vadd.f32 1.0, %v17005_v39  ;;  %v3291_v63 = vmul.f32 1.442695, %v3276_v57 }
0x10ed   :  { %17014 = vlog2.f32 %v3294_v44  ;;  %v3289_v2 = vmul.f32 1.442695, %v3275_v41 }
0x10ee   :  { %17016 = vlog2.f32 %v3293_v6  ;;  %v3256_v6 = vmax.f32 %v19117_v29, 0.0  ;;  %v3258_v29 = vmax.f32 %v19123_v49, 0.0 }
0x10ef   :  { %v17007_v14 = vpop.eup %17006  ;;  %17018 = vpow2.f32 %v3291_v63 }
0x10f0   :  { %v17009_v20 = vpop.eup %17008  ;;  %v3296_v34 = vadd.f32 1.0, %v17007_v14  ;;  %17020 = vpow2.f32 %v3289_v2  ;;  %v3255_v2 = vmax.f32 %v19120_v22, 0.0 }
0x10f1   :  { %v3295_v28 = vadd.f32 1.0, %v17009_v20 }
0x10f2   :  { %17022 = vlog2.f32 %v3296_v34 }
0x10f3   :  { %v17011_v15 = vpop.eup %17010  ;;  %17024 = vlog2.f32 %v3295_v28 }
0x10f4   :  { %v17013_v25 = vpop.eup %17012  ;;  %v3298_v38 = vadd.f32 1.0, %v17011_v15 }
0x10f5   :  { %v3297_v8 = vadd.f32 1.0, %v17013_v25 }
0x10f6   :  { %17026 = vlog2.f32 %v3298_v38 }
0x10f7   :  { %v17015_v9 = vpop.eup %17014  ;;  %17028 = vlog2.f32 %v3297_v8 }
0x10f8   :  { %v17017_v24 = vpop.eup %17016  ;;  %v3304_v16 = vmul.f32 0.6931472, %v17015_v9 }
0x10f9   :  { %v17019_v12 = vpop.eup %17018  ;;  %v3302_v7 = vmul.f32 0.6931472, %v17017_v24 }
0x10fa   :  { %v17021_v23 = vpop.eup %17020  ;;  %v3318_v18 = vadd.f32 %v3304_v16, %v3254_v50  ;;  %v3300_v17 = vadd.f32 1.0, %v17019_v12  ;;  %v3257_v16 = vmax.f32 %v19126_v10, 0.0 }
0x10fb   :  { %v3317_v30 = vadd.f32 %v3302_v7, %v3253_v4  ;;  %v3299_v57 = vadd.f32 1.0, %v17021_v23 }
0x10fc   :  { %v17023_v39 = vpop.eup %17022  ;;  %v3334_v44 = vmul.f32 %v19137_v11, %v3318_v18  ;;  %17030 = vlog2.f32 %v3300_v17 }
0x10fd   :  { %v17025_v41 = vpop.eup %17024  ;;  %v3333_v26 = vmul.f32 %v19137_v11, %v3317_v30  ;;  %v3308_v63 = vmul.f32 0.6931472, %v17023_v39  ;;  %17032 = vlog2.f32 %v3299_v57 }
0x10fe   :  { %v19147_v21 = vadd.f32 %v19141_v56, %v3334_v44  ;;  %v3306_v14 = vmul.f32 0.6931472, %v17025_v41 }
0x10ff   :  { %v3320_v20 = vadd.f32 %v3308_v63, %v3256_v6  ;;  %v19151_v34 = vadd.f32 %v19141_v56, %v3333_v26  ;;  %v3260_v26 = vmax.f32 %v19129_v62, 0.0 }
0x1100   :  { %v17027_v28 = vpop.eup %17026  ;;  %v3366_v15 = vand.u32 2147483647, %v19147_v21  ;;  %v3319_v25 = vadd.f32 %v3306_v14, %v3255_v2 }
0x1101   :  { %v17029_v38 = vpop.eup %17028  ;;  %v3336_v8 = vmul.f32 %v19137_v11, %v3320_v20  ;;  %v3312_v9 = vmul.f32 0.6931472, %v17027_v28  ;;  %v3365_v24 = vand.u32 2147483647, %v19151_v34 }
0x1102   :  { %v3374_v50 = vsub.f32 0.0, %v3366_v15  ;;  %v3335_v22 = vmul.f32 %v19137_v11, %v3319_v25  ;;  %v3310_v12 = vmul.f32 0.6931472, %v17029_v38  ;;  %v3259_v15 = vmax.f32 %v19132_v42, 0.0 }
0x1103   :  { %v19160_v4 = vadd.f32 %v19141_v56, %v3336_v8  ;;  %v3322_v7 = vadd.f32 %v3312_v9, %v3258_v29  ;;  %v3373_v23 = vsub.f32 0.0, %v3365_v24 }
0x1104   :  { %v3383_v18 = vmul.f32 1.442695, %v3374_v50  ;;  %v19163_v17 = vadd.f32 %v19141_v56, %v3335_v22  ;;  %v3321_v30 = vadd.f32 %v3310_v12, %v3257_v16 }
0x1105   :  { %v3368_v49 = vand.u32 2147483647, %v19160_v4  ;;  %v3338_v57 = vmul.f32 %v19137_v11, %v3322_v7  ;;  %v3381_v39 = vmul.f32 1.442695, %v3373_v23 }
0x1106   :  { %v17031_v44 = vpop.eup %17030  ;;  %17034 = vpow2.f32 %v3383_v18  ;;  %v3367_v10 = vand.u32 2147483647, %v19163_v17  ;;  %v3337_v41 = vmul.f32 %v19137_v11, %v3321_v30 }
0x1107   :  { %v17033_v6 = vpop.eup %17032  ;;  %v3376_v63 = vsub.f32 0.0, %v3368_v49  ;;  %v19171_v2 = vadd.f32 %v19141_v56, %v3338_v57  ;;  %v3316_v14 = vmul.f32 0.6931472, %v17031_v44  ;;  %17036 = vpow2.f32 %v3381_v39 }
0x1108   :  { %v3375_v20 = vsub.f32 0.0, %v3367_v10  ;;  %v19174_v28 = vadd.f32 %v19141_v56, %v3337_v41  ;;  %v3314_v25 = vmul.f32 0.6931472, %v17033_v6 }
0x1109   :  { %v3387_v38 = vmul.f32 1.442695, %v3376_v63  ;;  %v3370_v8 = vand.u32 2147483647, %v19171_v2  ;;  %v3324_v29 = vadd.f32 %v3316_v14, %v3260_v26 }
0x110a   :  { %v3385_v9 = vmul.f32 1.442695, %v3375_v20  ;;  %v3369_v62 = vand.u32 2147483647, %v19174_v28  ;;  %v3323_v24 = vadd.f32 %v3314_v25, %v3259_v15 }
0x110b   :  { %17038 = vpow2.f32 %v3387_v38  ;;  %v3378_v50 = vsub.f32 0.0, %v3370_v8  ;;  %v3340_v22 = vmul.f32 %v19137_v11, %v3324_v29 }
0x110c   :  { %17040 = vpow2.f32 %v3385_v9  ;;  %v3377_v16 = vsub.f32 0.0, %v3369_v62  ;;  %v3339_v12 = vmul.f32 %v19137_v11, %v3323_v24  ;;  %v3357_v9 = vmax.f32 %v19151_v34, 0.0 }
0x110d   :  { %v19182_v7 = vadd.f32 %v19141_v56, %v3340_v22  ;;  %v3391_v42 = vmul.f32 1.442695, %v3378_v50  ;;  %v3359_v34 = vmax.f32 %v19163_v17, 0.0 }
0x110e   :  { %v3389_v23 = vmul.f32 1.442695, %v3377_v16  ;;  %v19185_v18 = vadd.f32 %v19141_v56, %v3339_v12 }
0x110f   :  { %v3372_v30 = vand.u32 2147483647, %v19182_v7 }
0x1110   :  { %v17035_v49 = vpop.eup %17034  ;;  %17042 = vpow2.f32 %v3389_v23  ;;  %v3371_v57 = vand.u32 2147483647, %v19185_v18 }
0x1111   :  { %v17037_v39 = vpop.eup %17036  ;;  %v3398_v44 = vadd.f32 1.0, %v17035_v49  ;;  %17044 = vpow2.f32 %v3391_v42  ;;  %v3380_v11 = vsub.f32 0.0, %v3372_v30  ;;  %v3358_v42 = vmax.f32 %v19147_v21, 0.0 }
0x1112   :  { %v3379_v10 = vsub.f32 0.0, %v3371_v57  ;;  %v3397_v41 = vadd.f32 1.0, %v17037_v39  ;;  %v3360_v21 = vmax.f32 %v19160_v4, 0.0 }
0x1113   :  { %17046 = vlog2.f32 %v3398_v44  ;;  %v3395_v14 = vmul.f32 1.442695, %v3380_v11 }
0x1114   :  { %v3393_v26 = vmul.f32 1.442695, %v3379_v10  ;;  %17048 = vlog2.f32 %v3397_v41 }
0x1115   :  { %v17039_v6 = vpop.eup %17038 }
0x1116   :  { %v17041_v63 = vpop.eup %17040  ;;  %17050 = vpow2.f32 %v3393_v26  ;;  %v3400_v20 = vadd.f32 1.0, %v17039_v6 }
0x1117   :  { %v3399_v56 = vadd.f32 1.0, %v17041_v63 }
0x1119   :  { %17052 = vlog2.f32 %v3399_v56 }
0x111a   :  { %v17043_v15 = vpop.eup %17042  ;;  %17054 = vpow2.f32 %v3395_v14  ;;  %v3361_v14 = vmax.f32 %v19174_v28, 0.0  ;;  %v3364_v28 = vmax.f32 %v19182_v7, 0.0 }
0x111b   :  { %v17045_v25 = vpop.eup %17044  ;;  %17056 = vlog2.f32 %v3400_v20  ;;  %v3401_v38 = vadd.f32 1.0, %v17043_v15  ;;  %v3362_v15 = vmax.f32 %v19171_v2, 0.0 }
0x111c   :  { %v3402_v24 = vadd.f32 1.0, %v17045_v25 }
0x111d   :  { %v17047_v8 = vpop.eup %17046  ;;  %17058 = vlog2.f32 %v3401_v38 }
0x111e   :  { %v17049_v29 = vpop.eup %17048  ;;  %v3408_v16 = vmul.f32 0.6931472, %v17047_v8  ;;  %17060 = vlog2.f32 %v3402_v24  ;;  %v3363_v8 = vmax.f32 %v19185_v18, 0.0 }
0x111f   :  { %v3406_v62 = vmul.f32 0.6931472, %v17049_v29 }
0x1120   :  { %v17051_v50 = vpop.eup %17050  ;;  %v19194_v49 = vadd.f32 %v3408_v16, %v3358_v42 }
0x1121   :  { %v19190_v22 = vadd.f32 %v3406_v62, %v3357_v9  ;;  %v3403_v23 = vadd.f32 1.0, %v17051_v50 }
0x1123   :  { %v17053_v12 = vpop.eup %17052  ;;  %3429 = vxpose.xlu1.b32.start [1/8] (short) (narrow) %v19190_v22, 8  ;;  %17062 = vlog2.f32 %v3403_v23 }
0x1124   :  { %v17055_v30 = vpop.eup %17054  ;;  %v3410_v57 = vmul.f32 0.6931472, %v17053_v12 }
0x1125   :  { %v17057_v39 = vpop.eup %17056  ;;  %v3404_v44 = vadd.f32 1.0, %v17055_v30 }
0x1126   :  { %v19198_v10 = vadd.f32 %v3410_v57, %v3359_v34  ;;  %v3412_v41 = vmul.f32 0.6931472, %v17057_v39 }
0x1127   :  { %3430 = vxpose.xlu1.b32.cont [2/8] (short) (narrow) %v19194_v49, 8  ;;  %v17059_v11 = vpop.eup %17058  ;;  %17064 = vlog2.f32 %v3404_v44 }
0x1128   :  { %v19202_v26 = vadd.f32 %v3412_v41, %v3360_v21  ;;  %v3414_v6 = vmul.f32 0.6931472, %v17059_v11  ;;  %v17061_v63 = vpop.eup %17060 }
0x1129   :  { %v3416_v56 = vmul.f32 0.6931472, %v17061_v63 }
0x112a   :  { %v19206_v17 = vadd.f32 %v3414_v6, %v3361_v14 }
0x112b   :  { %3431 = vxpose.xlu1.b32.cont [3/8] (short) (narrow) %v19198_v10, 8  ;;  %v19210_v25 = vadd.f32 %v3416_v56, %v3362_v15 }
0x112d   :  { %v17063_v20 = vpop.eup %17062 }
0x112e   :  { %v3418_v4 = vmul.f32 0.6931472, %v17063_v20 }
0x112f   :  { %3432 = vxpose.xlu1.b32.cont [4/8] (short) (narrow) %v19202_v26, 8 }
0x1130   :  { %v19214_v29 = vadd.f32 %v3418_v4, %v3363_v8 }
0x1131   :  { %v17065_v38 = vpop.eup %17064 }
0x1132   :  { %v3420_v9 = vmul.f32 0.6931472, %v17065_v38 }
0x1133   :  { %3433 = vxpose.xlu1.b32.cont [5/8] (short) (narrow) %v19206_v17, 8 }
0x1134   :  { %v19218_v62 = vadd.f32 %v3420_v9, %v3364_v28 }
0x1137   :  { %3434 = vxpose.xlu1.b32.cont [6/8] (short) (narrow) %v19210_v25, 8 }
0x113b   :  { %3435 = vxpose.xlu1.b32.cont [7/8] (short) (narrow) %v19214_v29, 8 }
0x113f   :  { %3436 = vxpose.xlu1.b32.end [8/8] (short) (narrow) %v19218_v62, 8 }
0x11a3   :  { %v3445_v2 = vpop.trf.xlu1 }
0x11a4   :  { %v3468_v24 = vrot.slane %v3445_v2, %v18619_v58 }
0x11a6   :  { %v3469_v50 = vcombine.high %v3468_v24, %v3468_v24  ;;  %v3476_v16 = vrot.slane %v3468_v24, %v18619_v58 }
0x11a8   :  { %v3483_v12 = vrot.slane %v3469_v50, %v18619_v58  ;;  %v3489_v18 = vrot.slane %v3476_v16, %v18626_v60  ;;  %v3484_v57 = vcombine.high %v3476_v16, %v3476_v16 }
0x11aa   :  { %v3506_v42 = vadd.f32 %v3489_v18, %v18631_v13  ;;  %v3507_v7 = vadd.f32 %v3489_v18, %v18635_v61  ;;  %v3493_v30 = vrot.slane %v3483_v12, %v18626_v60  ;;  %v3497_v11 = vrot.slane %v3484_v57, %v18626_v60 }
0x11ab   :  { %v3485_v63 = vcombine.high %v3483_v12, %v3483_v12 }
0x11ac   :  { %v3514_v23 = vsel %vm1627_vm5, %v3506_v42, -inf  ;;  %v3517_v39 = vsel %vm1631_vm6, %v3507_v7, -inf  ;;  %v3508_v34 = vadd.f32 %v3493_v30, %v18631_v13  ;;  %v3509_v41 = vadd.f32 %v3493_v30, %v18635_v61 }
0x11ad   :  { %3515 = vmax.xlane.f32.xlu0 %v3514_v23  ;;  %v3510_v6 = vadd.f32 %v3497_v11, %v18631_v13  ;;  %v3511_v56 = vadd.f32 %v3497_v11, %v18635_v61  ;;  %v3501_v20 = vrot.slane %v3485_v63, %v18626_v60 }
0x11ae   :  { %v3520_v44 = vsel %vm1627_vm5, %v3508_v34, -inf  ;;  %v3523_v21 = vsel %vm1631_vm6, %v3509_v41, -inf }
0x11af   :  { %v3526_v14 = vsel %vm1627_vm5, %v3510_v6, -inf  ;;  %v3529_v15 = vsel %vm1631_vm6, %v3511_v56, -inf  ;;  %v3512_v4 = vadd.f32 %v3501_v20, %v18631_v13  ;;  %v3513_v8 = vadd.f32 %v3501_v20, %v18635_v61 }
0x11b1   :  { %3518 = vmax.xlane.f32.xlu0 %v3517_v39  ;;  %v3532_v38 = vsel %vm1627_vm5, %v3512_v4, -inf  ;;  %v3535_v9 = vsel %vm1631_vm6, %v3513_v8, -inf  ;;  %v19267_v4 = vld [vmem:[%s17979_s29 + $0x10] sm:$0xff]  ;;  %v19277_v8 = vld [vmem:[%s17979_s29 + $0x20] sm:$0xff] }
0x11b5   :  { %3521 = vmax.xlane.f32.xlu0 %v3520_v44 }
0x11b9   :  { %3524 = vmax.xlane.f32.xlu0 %v3523_v21 }
0x11bd   :  { %3527 = vmax.xlane.f32.xlu0 %v3526_v14 }
0x11c1   :  { %3530 = vmax.xlane.f32.xlu0 %v3529_v15  ;;  %v19262_v15 = vld [vmem:[%s17979_s29 + $0x8] sm:$0xff] }
0x11c5   :  { %3533 = vmax.xlane.f32.xlu0 %v3532_v38  ;;  %v19272_v38 = vld [vmem:[%s17979_s29 + $0x18] sm:$0xff] }
0x11c9   :  { %3536 = vmax.xlane.f32.xlu0 %v3535_v9  ;;  %v19282_v9 = vld [vmem:[%s17979_s29 + $0x28] sm:$0xff] }
0x123a   :  { %v3516_v28 = vpop.xlane.xlu0 %3515 }
0x123b   :  { %v3549_v39 = vrot.slane %v3516_v28, %v18512_v40  ;;  %v19287_v28 = vld [vmem:[%s17979_s29 + $0x30] sm:$0xff] }
0x123e   :  { %v3519_v2 = vpop.xlane.xlu0 %3518 }
0x123f   :  { %v3553_v7 = vrot.slane %v3519_v2, %v18515_v47  ;;  %v19292_v2 = vld [vmem:[%s17979_s29 + $0x38] sm:$0xf] }
0x1241   :  { %v3554_v11 = vsel %vm1672_vm8, %v3553_v7, %v3549_v39 }
0x1242   :  { %v3522_v24 = vpop.xlane.xlu0 %3521 }
0x1243   :  { %v3558_v30 = vrot.slane %v3522_v24, %v18512_v40  ;;  %v19297_v24 = vld [vmem:[%s21602_s17] sm:$0xff] }
0x1246   :  { %v3525_v50 = vpop.xlane.xlu0 %3524 }
0x1247   :  { %v3562_v18 = vrot.slane %v3525_v50, %v18515_v47 }
0x1249   :  { %v3563_v34 = vsel %vm1672_vm8, %v3562_v18, %v3558_v30 }
0x124a   :  { %v3528_v16 = vpop.xlane.xlu0 %3527  ;;  %v3582_v63 = vsel %vm1701_vm9, %v3563_v34, %v3554_v11 }
0x124b   :  { %v3567_v57 = vrot.slane %v3528_v16, %v18512_v40 }
0x124e   :  { %v3531_v12 = vpop.xlane.xlu0 %3530 }
0x124f   :  { %v3571_v42 = vrot.slane %v3531_v12, %v18515_v47 }
0x1251   :  { %v3572_v44 = vsel %vm1672_vm8, %v3571_v42, %v3567_v57 }
0x1252   :  { %v3534_v23 = vpop.xlane.xlu0 %3533  ;;  %v3583_v56 = vsel %vm1703_vm10, %v3572_v44, %v3582_v63 }
0x1253   :  { %v3576_v21 = vrot.slane %v3534_v23, %v18512_v40 }
0x1256   :  { %v3537_v41 = vpop.xlane.xlu0 %3536 }
0x1257   :  { %v3580_v6 = vrot.slane %v3537_v41, %v18515_v47 }
0x1259   :  { %v3581_v14 = vsel %vm1672_vm8, %v3580_v6, %v3576_v21 }
0x125a   :  { %v3584_v20 = vsel %vm21530_vm11, %v3581_v14, %v3583_v56 }
0x125b   :  { %14637 = vmatprep.subr.msk.mxu1 %vm818_vm0, %v3584_v20 }
0x125c   :  { %14638 = vmatpush3.xpose.msk.msra.mxu1 %vm818_vm0, %v3584_v20 }
0x125f   :  { %14640 = vmatmul.mubr.msk.f32.vlgmr.msra.gmra.mrb[52].mxu1 %vm818_vm0, %v19262_v15 }
0x1260   :  { %14642 = vmatprep.mubr.msk.f32.mxu1 %vm818_vm0, %v19267_v4 }
0x1263   :  { %14643 = vmatmul.mubr.msk.f32.gmra.mrb[54].mxu1 %vm818_vm0, %v19272_v38 }
0x1264   :  { %14645 = vmatprep.mubr.msk.f32.mxu1 %vm818_vm0, %v19277_v8 }
0x1267   :  { %14646 = vmatmul.mubr.msk.f32.gmra.mrb[56].mxu1 %vm818_vm0, %v19282_v9 }
0x1268   :  { %14648 = vmatprep.mubr.msk.f32.mxu1 %vm818_vm0, %v19287_v28 }
0x126b   :  { %14649 = vmatmul.mubr.msk.f32.gmra.mrb[58].mxu1 %vm818_vm0, %v19292_v2 }
0x126c   :  { %14667 = vmatprep.mubr.msk.f32.mxu1 %vm1627_vm5, %v19297_v24 }
0x1332   :  { %v14641_v50 = vpop.f32.mrb[52].mxu1 }
0x1333   :  { %v3693_v16 = vsub.f32 %v19194_v49, %v14641_v50  ;;  %v3653_v12 = vpop.f32.mrb[53].mxu1 }
0x1334   :  { %v3692_v18 = vsub.f32 %v19190_v22, %v3653_v12 }
0x1335   :  { %v3702_v42 = vmul.f32 1.442695, %v3693_v16 }
0x1336   :  { %v3700_v23 = vmul.f32 1.442695, %v3692_v18  ;;  %v14644_v7 = vpop.f32.mrb[54].mxu1 }
0x1337   :  { %17066 = vpow2.f32 %v3702_v42  ;;  %v3695_v30 = vsub.f32 %v19202_v26, %v14644_v7  ;;  %v3663_v57 = vpop.f32.mrb[55].mxu1 }
0x1338   :  { %17068 = vpow2.f32 %v3700_v23  ;;  %v3694_v39 = vsub.f32 %v19198_v10, %v3663_v57  ;;  %v17722_v57 = vld [vmem:[%s21603_s21] sm:$0xf] }
0x1339   :  { %v3706_v34 = vmul.f32 1.442695, %v3695_v30 }
0x133a   :  { %v3704_v44 = vmul.f32 1.442695, %v3694_v39  ;;  %v14647_v41 = vpop.f32.mrb[56].mxu1  ;;  %v19334_v39 = vld [vmem:[%s21602_s17 + $0x8] sm:$0xf] }
0x133b   :  { %17070 = vpow2.f32 %v3706_v34  ;;  %v3697_v11 = vsub.f32 %v19210_v25, %v14647_v41  ;;  %v3673_v49 = vpop.f32.mrb[57].mxu1 }
0x133c   :  { %17072 = vpow2.f32 %v3704_v44  ;;  %v3696_v22 = vsub.f32 %v19206_v17, %v3673_v49 }
0x133d   :  { %v3710_v21 = vmul.f32 1.442695, %v3697_v11 }
0x133e   :  { %v3708_v6 = vmul.f32 1.442695, %v3696_v22  ;;  %v14650_v63 = vpop.f32.mrb[58].mxu1 }
0x133f   :  { %17074 = vpow2.f32 %v3710_v21  ;;  %v3699_v26 = vsub.f32 %v19218_v62, %v14650_v63  ;;  %v3683_v14 = vpop.f32.mrb[59].mxu1 }
0x1340   :  { %17076 = vpow2.f32 %v3708_v6  ;;  %v3698_v10 = vsub.f32 %v19214_v29, %v3683_v14 }
0x1341   :  { %v19309_v56 = vpop.eup %17066  ;;  %v3714_v20 = vmul.f32 1.442695, %v3699_v26 }
0x1342   :  { %v17069_v50 = vpop.eup %17068  ;;  %v3712_v16 = vmul.f32 1.442695, %v3698_v10 }
0x1343   :  { %17078 = vpow2.f32 %v3714_v20  ;;  %v16006_v25 = vpack.c.bf16 %v19309_v56, %v17069_v50 }
0x1344   :  { %17080 = vpow2.f32 %v3712_v16 }
0x1345   :  { %v19312_v17 = vpop.eup %17070  ;;  %16007 = vmatprep.subr.bf16.mxu1 %v16006_v25 }
0x1346   :  { %v17073_v12 = vpop.eup %17072  ;;  %16009 = vmatpush3.bf16.msra.mxu1 %v16006_v25 }
0x1347   :  { %v16010_v62 = vpack.c.bf16 %v19312_v17, %v17073_v12 }
0x1349   :  { %v19315_v18 = vpop.eup %17074  ;;  %16011 = vmatprep.subr.bf16.mxu1 %v16010_v62 }
0x134a   :  { %v19317_v29 = vpop.eup %17076  ;;  %16013 = vmatpush3.bf16.msra.mxu1 %v16010_v62 }
0x134b   :  { %v16014_v42 = vpack.c.bf16 %v19315_v18, %v19317_v29 }
0x134d   :  { %v19321_v23 = vpop.eup %17078  ;;  %16015 = vmatprep.subr.bf16.mxu1 %v16014_v42 }
0x134e   :  { %v19323_v7 = vpop.eup %17080  ;;  %16017 = vmatpush3.bf16.msra.mxu1 %v16014_v42 }
0x134f   :  { %v16018_v30 = vpack.c.bf16 %v19321_v23, %v19323_v7 }
0x1351   :  { %16020 = vmatprep.subr.msk.bf16.mxu1 %vm18283_vm4, %v16018_v30 }
0x1352   :  { %16023 = vmatpush3.bf16.msk.msra.mxu1 %vm18283_vm4, %v16018_v30 }
0x1353   :  { %14686 = vmatprep.subr.msk.mxu1 %vm21529_vm1, %v17722_v57 }
0x1355   :  { %14668 = vmatmul.mubr.msk.f32.vlgmr.msra.gmra.mrb[60].mxu1 %vm1627_vm5, %v19334_v39 }
0x1356   :  { %14687 = vmatpush3.msk.msra.mxu1 %vm21529_vm1, %v17722_v57  ;;  %vm21616_vm1 = vmmov %vm21614_vm2 }
0x1357   :  { %16049 = vmatprep.subr.bf16.mxu1 %v18766_v43  ;;  %vm21617_vm11 = vmmov %vm21616_vm1 }
0x1428   :  { %v14669_v34 = vpop.f32.mrb[60].mxu1 }
0x1429   :  { %v3791_v44 = vadd.f32 1e-16, %v14669_v34  ;;  %v3785_v41 = vpop.f32.mrb[61].mxu1 }
0x142a   :  { %v3786_v11 = vadd.f32 1e-16, %v3785_v41 }
0x142c   :  { %v16024_v49 = vpack.c.bf16 %v3791_v44, %v3786_v11 }
0x142e   :  { %16026 = vmatprep.subr.msk.bf16.mxu0 %vm18283_vm4, %v16024_v49 }
0x142f   :  { %16029 = vmatpush3.bf16.msk.msra.mxu0 %vm18283_vm4, %v16024_v49 }
0x1432   :  { %14675 = vmatmul.mubr.msk.f32.vlgmr.msra.gmra.mrb[60].mxu0 %vm818_vm0, %v19262_v15 }
0x1433   :  { %14677 = vmatprep.mubr.msk.f32.mxu0 %vm818_vm0, %v19267_v4 }
0x1436   :  { %14678 = vmatmul.mubr.msk.f32.gmra.mrb[62].mxu0 %vm818_vm0, %v19272_v38 }
0x1437   :  { %14680 = vmatprep.mubr.msk.f32.mxu0 %vm818_vm0, %v19277_v8 }
0x143a   :  { %14681 = vmatmul.mubr.msk.f32.gmra.mrb[64].mxu0 %vm818_vm0, %v19282_v9 }
0x143b   :  { %14683 = vmatprep.mubr.msk.f32.mxu0 %vm818_vm0, %v19287_v28 }
0x143e   :  { %14684 = vmatmul.mubr.msk.f32.gmra.mrb[66].mxu0 %vm818_vm0, %v19292_v2 }
0x143f   :  { %14716 = vmatprep.mubr.msk.f32.mxu0 %vm1627_vm5, %v19297_v24 }
0x1505   :  { %v14676_v22 = vpop.f32.mrb[60].mxu0 }
0x1506   :  { %17082 = vrcp.f32 %v14676_v22  ;;  %v3863_v21 = vpop.f32.mrb[61].mxu0 }
0x1507   :  { %17084 = vrcp.f32 %v3863_v21 }
0x1509   :  { %v14679_v6 = vpop.f32.mrb[62].mxu0 }
0x150a   :  { %17086 = vrcp.f32 %v14679_v6  ;;  %v3873_v63 = vpop.f32.mrb[63].mxu0 }
0x150b   :  { %17088 = vrcp.f32 %v3873_v63 }
0x150d   :  { %v14682_v26 = vpop.f32.mrb[64].mxu0 }
0x150e   :  { %17090 = vrcp.f32 %v14682_v26  ;;  %v3883_v14 = vpop.f32.mrb[65].mxu0 }
0x150f   :  { %17092 = vrcp.f32 %v3883_v14 }
0x1510   :  { %v17083_v10 = vpop.eup %17082 }
0x1511   :  { %v17085_v20 = vpop.eup %17084  ;;  %v14685_v16 = vpop.f32.mrb[66].mxu0  ;;  %v3911_v24 = vmul.f32 %v17083_v10, %v19309_v56 }
0x1512   :  { %17094 = vrcp.f32 %v14685_v16  ;;  %v3893_v25 = vpop.f32.mrb[67].mxu0  ;;  %v3910_v62 = vmul.f32 %v17085_v20, %v17069_v50 }
0x1513   :  { %17096 = vrcp.f32 %v3893_v25 }
0x1514   :  { %v17087_v42 = vpop.eup %17086  ;;  %14688 = vmatprep.mubr.msk.f32.mxu1 %vm21614_vm2, %v3910_v62  ;;  %vm21619_vm2 = vmmov %vm21616_vm1 }
0x1515   :  { %v17089_v30 = vpop.eup %17088  ;;  %14689 = vmatmul.mubr.msk.f32.vlgmr.msra.gmra.mrb[62].mxu1 %vm21615_vm15, %v3911_v24  ;;  %v3913_v34 = vmul.f32 %v17087_v42, %v19312_v17  ;;  %vm21618_vm15 = vmmov %vm21616_vm1  ;;  %v13115_v42 = vld [vmem:[%s18009_s30 + $0x58] sm:$0xff] }
0x1516   :  { %v3912_v57 = vmul.f32 %v17089_v30, %v17073_v12  ;;  %16051 = vmatpush3.bf16.msra.mxu1 %v18766_v43 }
0x1517   :  { %16053 = vmatprep.subr.bf16.mxu1 %v18769_v55 }
0x1518   :  { %v17091_v44 = vpop.eup %17090  ;;  %14691 = vmatprep.mubr.msk.f32.mxu1 %vm21616_vm1, %v3912_v57 }
0x1519   :  { %v17093_v50 = vpop.eup %17092  ;;  %14692 = vmatmul.mubr.msk.f32.gmra.mrb[64].mxu1 %vm21617_vm11, %v3913_v34  ;;  %v3915_v41 = vmul.f32 %v17091_v44, %v19315_v18  ;;  %vm21620_vm11 = vmmov %vm21616_vm1  ;;  %v21622_v44 = vld [vmem:[#allocation43_spill] sm:$0xff] }
0x151a   :  { %v3914_v56 = vmul.f32 %v17093_v50, %v19317_v29  ;;  %16055 = vmatpush3.bf16.msra.mxu1 %v18769_v55  ;;  %v21623_v50 = vld [vmem:[#allocation45_spill] sm:$0xff] }
0x151b   :  { %16057 = vmatprep.subr.bf16.mxu1 %v18776_v35 }
0x151c   :  { %v17095_v12 = vpop.eup %17094  ;;  %14694 = vmatprep.mubr.msk.f32.mxu1 %vm21618_vm15, %v3914_v56  ;;  %v21624_v56 = vld [vmem:[#allocation51_spill] sm:$0xff]  ;;  %vm21640_vm15 = vcmask 1043459  }
0x151d   :  { %v17097_v17 = vpop.eup %17096  ;;  %14695 = vmatmul.mubr.msk.f32.gmra.mrb[66].mxu1 %vm21619_vm2, %v3915_v41  ;;  %v3917_v49 = vmul.f32 %v17095_v12, %v19321_v23  ;;  %v21625_v41 = vld [vmem:[#allocation44_spill] sm:$0xff]  ;;  %v21626_v12 = vld [vmem:[#allocation47_spill] sm:$0xff]  ;;  %vm21641_vm2 = vcmask 1043456  }
0x151e   :  { %v3916_v11 = vmul.f32 %v17097_v17, %v19323_v7  ;;  %16059 = vmatpush3.bf16.msra.mxu1 %v18776_v35  ;;  %v21627_v17 = vld [vmem:[#allocation52_spill] sm:$0xff] }
0x151f   :  { %16061 = vmatprep.subr.bf16.mxu1 %v18782_v45 }
0x1520   :  { %14697 = vmatprep.mubr.msk.f32.mxu1 %vm21616_vm1, %v3916_v11  ;;  %v21628_v11 = vld [vmem:[#allocation46_spill] sm:$0xff]  ;;  %vm21642_vm1 = vmmov %vm21641_vm2 }
0x1521   :  { %14698 = vmatmul.mubr.msk.f32.gmra.mrb[68].mxu1 %vm21620_vm11, %v3917_v49  ;;  %v21629_v49 = vld [vmem:[#allocation49_spill] sm:$0xff] }
0x1522   :  { %16063 = vmatpush3.bf16.msra.mxu1 %v18782_v45 }
0x1523   :  { %16065 = vmatprep.subr.bf16.mxu1 %v18788_v37 }
0x1526   :  { %16067 = vmatpush3.bf16.msra.mxu1 %v18788_v37 }
0x1527   :  { %16069 = vmatprep.subr.bf16.mxu1 %v18794_v5 }
0x152a   :  { %16071 = vmatpush3.bf16.msra.mxu1 %v18794_v5 }
0x152b   :  { %16073 = vmatprep.subr.bf16.mxu1 %v18800_v19 }
0x152e   :  { %16075 = vmatpush3.bf16.msra.mxu1 %v18800_v19 }
0x152f   :  { %16077 = vmatprep.subr.bf16.mxu1 %v18806_v36 }
0x1532   :  { %16079 = vmatpush3.bf16.msra.mxu1 %v18806_v36 }
0x15e8   :  { %v14690_v18 = vpop.f32.mrb[62].mxu1 }
0x15e9   :  { %v4048_v29 = vmul.f32 %v14690_v18, %v19050_v33  ;;  %v4008_v23 = vpop.f32.mrb[63].mxu1  ;;  %v21630_v18 = vld [vmem:[#allocation53_spill] sm:$0xff] }
0x15ea   :  { %v4047_v7 = vmul.f32 %v4008_v23, %v19062_v32  ;;  %v21632_v23 = vld [vmem:[#allocation54_spill] sm:$0xff] }
0x15ec   :  { %v16030_v22 = vpack.c.bf16 %v4048_v29, %v4047_v7  ;;  %v14693_v21 = vpop.f32.mrb[64].mxu1  ;;  %v21631_v29 = vld [vmem:[#allocation48_spill] sm:$0xff]  ;;  %v21633_v7 = vld [vmem:[#allocation55_spill] sm:$0xff] }
0x15ed   :  { %v4050_v6 = vmul.f32 %v14693_v21, %v19073_v46  ;;  %v4018_v63 = vpop.f32.mrb[65].mxu1  ;;  %v21635_v21 = vld [vmem:[#allocation57_spill] sm:$0xff] }
0x15ee   :  { %v4049_v26 = vmul.f32 %v4018_v63, %v19075_v59  ;;  %16031 = vmatprep.subr.bf16.mxu0 %v16030_v22 }
0x15ef   :  { %16033 = vmatpush3.bf16.msra.mxu0 %v16030_v22  ;;  %v21634_v22 = vld [vmem:[#allocation56_spill] sm:$0xff] }
0x15f0   :  { %v16034_v14 = vpack.c.bf16 %v4050_v6, %v4049_v26  ;;  %v14696_v10 = vpop.f32.mrb[66].mxu1  ;;  %v13100_v6 = vld [vmem:[%s21606_s23 + $0x1] ss:$0 sm:$0xff] }
0x15f1   :  { %v4052_v20 = vmul.f32 %v14696_v10, %v19082_v54  ;;  %v4028_v16 = vpop.f32.mrb[67].mxu1  ;;  %v13112_v54 = vld [vmem:[%s18009_s30 + $0x40] sm:$0xff] }
0x15f2   :  { %v4051_v25 = vmul.f32 %v4028_v16, %v19087_v52  ;;  %16035 = vmatprep.subr.bf16.mxu0 %v16034_v14  ;;  %v13113_v52 = vld [vmem:[%s18009_s30 + $0x48] sm:$0xff] }
0x15f3   :  { %16037 = vmatpush3.bf16.msra.mxu0 %v16034_v14 }
0x15f4   :  { %v16038_v33 = vpack.c.bf16 %v4052_v20, %v4051_v25  ;;  %v14699_v32 = vpop.f32.mrb[68].mxu1 }
0x15f5   :  { %v4054_v46 = vmul.f32 %v14699_v32, %v19097_v51  ;;  %v4038_v62 = vpop.f32.mrb[69].mxu1  ;;  %v16102_v51 = vpack.c.bf16 %v13113_v52, %v13112_v54  ;;  %v17724_v52 = vld [vmem:[%s21607_s28] ss:$0 sm:$0xff] }
0x15f6   :  { %v4053_v59 = vmul.f32 %v4038_v62, %v19101_v31  ;;  %16039 = vmatprep.subr.bf16.mxu0 %v16038_v33  ;;  %v13114_v31 = vld [vmem:[%s18009_s30 + $0x50] sm:$0xff] }
0x15f7   :  { %16041 = vmatpush3.bf16.msra.mxu0 %v16038_v33  ;;  %16103 = vmatprep.subr.bf16.mxu1 %v16102_v51  ;;  %v16106_v34 = vpack.c.bf16 %v13115_v42, %v13114_v31 }
0x15f8   :  { %v16042_v24 = vpack.c.bf16 %v4054_v46, %v4053_v59 }
0x15fa   :  { %16044 = vmatprep.subr.msk.bf16.mxu0 %vm18283_vm4, %v16042_v24 }
0x15fb   :  { %16047 = vmatpush3.bf16.msk.msra.mxu0 %vm18283_vm4, %v16042_v24 }
0x15fc   :  { %16081 = vmatprep.subr.bf16.mxu0 %v18829_v53 }
0x15fe   :  { %14717 = vmatmul.mubr.msk.f32.vlgmr.msra.gmra.mrb[68].mxu0 %vm1627_vm5, %v19334_v39  ;;  %v21621_v39 = vld [vmem:[#allocation50_spill] sm:$0xff] }
0x15ff   :  { %16083 = vmatpush3.bf16.msra.mxu0 %v18829_v53 }
0x1600   :  { %16085 = vmatprep.subr.bf16.mxu0 %v18869_v48 }
0x1603   :  { %16087 = vmatpush3.bf16.msra.mxu0 %v18869_v48 }
0x1604   :  { %16090 = vmatprep.subr.msk.bf16.mxu0 %vm18905_vm12, %v18911_v3 }
0x16d1   :  { %v14718_v30 = vpop.f32.mrb[68].mxu0 }
0x16d2   :  { %v4124_v57 = vpop.f32.mrb[69].mxu0 }
0x16d3   :  { %14751 = vmatprep.mubr.f32.mxu1 %v4124_v57 }
0x16d4   :  { %14752 = vmatmul.mubr.f32.vlgmr.msra.gmra.mrb[70].mxu1 %v14718_v30 }
0x16d5   :  { %16105 = vmatpush3.bf16.msra.mxu1 %v16102_v51  ;;  %14791 = vmatprep.mubr.msk.f32.mxu1 %vm603_vm7, %v18244_v1 }
0x16d6   :  { %16107 = vmatprep.subr.bf16.mxu1 %v16106_v34 }
0x16d9   :  { %16109 = vmatpush3.bf16.msra.mxu1 %v16106_v34 }
0x16da   :  { %16123 = vmatprep.subr.bf16.mxu1 %v21621_v39 }
0x16dc   :  { %14792 = vmatmul.mubr.msk.f32.vlgmr.msra.gmra.mrb[72].mxu1 %vm603_vm7, %v21622_v44 }
0x16dd   :  { %14794 = vmatprep.mubr.msk.f32.mxu1 %vm603_vm7, %v21623_v50  ;;  %16125 = vmatpush3.bf16.msra.mxu1 %v21621_v39 }
0x16de   :  { %16127 = vmatprep.subr.bf16.mxu1 %v21624_v56 }
0x16e0   :  { %14795 = vmatmul.mubr.msk.f32.gmra.mrb[74].mxu1 %vm603_vm7, %v21625_v41 }
0x16e1   :  { %14797 = vmatprep.mubr.msk.f32.mxu1 %vm603_vm7, %v21626_v12  ;;  %16129 = vmatpush3.bf16.msra.mxu1 %v21624_v56 }
0x16e2   :  { %16131 = vmatprep.subr.bf16.mxu1 %v21627_v17 }
0x16e4   :  { %14798 = vmatmul.mubr.msk.f32.gmra.mrb[76].mxu1 %vm603_vm7, %v21628_v11 }
0x16e5   :  { %14800 = vmatprep.mubr.msk.f32.mxu1 %vm603_vm7, %v21629_v49  ;;  %16133 = vmatpush3.bf16.msra.mxu1 %v21627_v17 }
0x16e6   :  { %16135 = vmatprep.subr.bf16.mxu1 %v21630_v18 }
0x16e8   :  { %14801 = vmatmul.mubr.msk.f32.gmra.mrb[78].mxu1 %vm603_vm7, %v21631_v29 }
0x16e9   :  { %16137 = vmatpush3.bf16.msra.mxu1 %v21630_v18 }
0x16ea   :  { %16139 = vmatprep.subr.bf16.mxu1 %v21632_v23 }
0x16ed   :  { %16141 = vmatpush3.bf16.msra.mxu1 %v21632_v23  ;;  %v21636_v23 = vld [vmem:[#allocation58_spill] sm:$0xff] }
0x16ee   :  { %16143 = vmatprep.subr.bf16.mxu1 %v21633_v7 }
0x16f1   :  { %16145 = vmatpush3.bf16.msra.mxu1 %v21633_v7 }
0x16f2   :  { %16147 = vmatprep.subr.bf16.mxu1 %v21634_v22 }
0x16f5   :  { %16149 = vmatpush3.bf16.msra.mxu1 %v21634_v22 }
0x16f6   :  { %16151 = vmatprep.subr.bf16.mxu1 %v21635_v21 }
0x16f9   :  { %16153 = vmatpush3.bf16.msra.mxu1 %v21635_v21 }
0x17a7   :  { %v14753_v63 = vpop.f32.mrb[70].mxu1 }
0x17a8   :  { %v4207_v26 = vpop.f32.mrb[71].mxu1  ;;  %v4213_v10 = vadd.f32 %v14753_v63, %v13100_v6 }
0x17a9   :  { %v4208_v14 = vadd.f32 %v13100_v6, %v4207_v26 }
0x17ab   :  { %14762 = vmatprep.mubr.msk.f32.mxu0 %vm603_vm7, %v4208_v14 }
0x17ac   :  { %14763 = vmatmul.mubr.msk.f32.vlgmr.msra.gmra.mrb[70].mxu0 %vm603_vm7, %v4213_v10 }
0x17ad   :  { %16093 = vmatpush3.bf16.msk.msra.mxu0 %vm18905_vm12, %v18911_v3 }
0x17af   :  { %v19452_v20 = vpop.f32.mrb[72].mxu1 }
0x17b0   :  { %v19454_v16 = vpop.f32.mrb[73].mxu1 }
0x17b3   :  { %v19456_v25 = vpop.f32.mrb[74].mxu1 }
0x17b4   :  { %v19458_v33 = vpop.f32.mrb[75].mxu1 }
0x17b7   :  { %v19460_v32 = vpop.f32.mrb[76].mxu1 }
0x17b8   :  { %v19462_v46 = vpop.f32.mrb[77].mxu1 }
0x17bb   :  { %v19464_v62 = vpop.f32.mrb[78].mxu1 }
0x17bc   :  { %v19466_v59 = vpop.f32.mrb[79].mxu1 }
0x187f   :  { %v14764_v24 = vpop.f32.mrb[70].mxu0 }
0x1880   :  { %v4288_v54 = vpop.f32.mrb[71].mxu0  ;;  %v4294_v31 = vadd.f32 %v17724_v52, %v14764_v24 }
0x1881   :  { %v4289_v51 = vadd.f32 %v17724_v52, %v4288_v54 }
0x1882   :  { %v4300_v30 = vsel %vm2438_vm13, %v4294_v31, -inf }
0x1883   :  { %v4297_v42 = vsel %vm2434_vm14, %v4289_v51, -inf }
0x1884   :  { %4298 = vmax.xlane.f32.xlu0 %v4297_v42 }
0x1888   :  { %4301 = vmax.xlane.f32.xlu0 %v4300_v30 }
0x1911   :  { %v4299_v57 = vpop.xlane.xlu0 %4298 }
0x1912   :  { %v4303_v34 = vsub.f32 %v4289_v51, %v4299_v57  ;;  %v13106_v57 = vld [vmem:[%s18004_s24 + $0x40] sm:$0xff] }
0x1914   :  { %v4305_v6 = vmul.f32 1.442695, %v4303_v34  ;;  %v13108_v34 = vld [vmem:[%s18004_s24 + $0x50] sm:$0xff] }
0x1915   :  { %v4302_v63 = vpop.xlane.xlu0 %4301 }
0x1916   :  { %17098 = vpow2.f32 %v4305_v6  ;;  %v4304_v26 = vsub.f32 %v4294_v31, %v4302_v63  ;;  %v13109_v63 = vld [vmem:[%s18004_s24 + $0x58] sm:$0xff] }
0x1918   :  { %v4307_v21 = vmul.f32 1.442695, %v4304_v26  ;;  %v16098_v26 = vpack.c.bf16 %v13109_v63, %v13108_v34  ;;  %v19491_v34 = vld [vmem:[%s17979_s29] sm:$0xff] }
0x191a   :  { %17100 = vpow2.f32 %v4307_v21 }
0x1920   :  { %v17099_v22 = vpop.eup %17098 }
0x1921   :  { %v4309_v7 = vsel %vm2434_vm14, %v17099_v22, 0.0 }
0x1922   :  { %4310 = vadd.xlane.f32.xlu0 %v4309_v7  ;;  %v13107_v7 = vld [vmem:[%s18004_s24 + $0x48] sm:$0xff] }
0x1923   :  { %v16094_v6 = vpack.c.bf16 %v13107_v7, %v13106_v57  ;;  %v21638_v57 = vld [vmem:[#allocation59_spill] sm:$0xff] }
0x1924   :  { %v17101_v24 = vpop.eup %17100 }
0x1925   :  { %v4312_v54 = vsel %vm2438_vm13, %v17101_v24, 0.0  ;;  %16095 = vmatprep.subr.bf16.mxu0 %v16094_v6 }
0x1926   :  { %4313 = vadd.xlane.f32.xlu0 %v4312_v54 }
0x19af   :  { %v4311_v52 = vpop.xlane.xlu0 %4310 }
0x19b0   :  { %17102 = vrcp.f32 %v4311_v52 }
0x19b3   :  { %v4314_v51 = vpop.xlane.xlu0 %4313 }
0x19b4   :  { %17104 = vrcp.f32 %v4314_v51 }
0x19ba   :  { %v17103_v42 = vpop.eup %17102 }
0x19bb   :  { %v4317_v31 = vmul.f32 %v17103_v42, %v17099_v22 }
0x19bd   :  { %14769 = vmatprep.mubr.msk.f32.mxu0 %vm2434_vm14, %v4317_v31  ;;  %v17725_v31 = vld [vmem:[%s21611_s0] ss:$0 sm:$0xff] }
0x19be   :  { %v17105_v21 = vpop.eup %17104 }
0x19bf   :  { %v4318_v30 = vmul.f32 %v17105_v21, %v17101_v24 }
0x19c1   :  { %14770 = vmatmul.mubr.msk.f32.vlgmr.msra.gmra.mrb[72].mxu0 %vm2434_vm14, %v4318_v30 }
0x19c2   :  { %16097 = vmatpush3.bf16.msra.mxu0 %v16094_v6  ;;  %v17733_v6 = vld [vmem:[%s17984_s3 + $0x30] sm:$0xff] }
0x19c3   :  { %16099 = vmatprep.subr.bf16.mxu0 %v16098_v26 }
0x19c6   :  { %16101 = vmatpush3.bf16.msra.mxu0 %v16098_v26 }
0x1a94   :  { %v14771_v54 = vpop.f32.mrb[72].mxu0 }
0x1a95   :  { %v4397_v22 = vadd.f32 1.0, %v14771_v54  ;;  %v4391_v52 = vpop.f32.mrb[73].mxu0 }
0x1a96   :  { %v4392_v51 = vadd.f32 1.0, %v4391_v52 }
0x1a97   :  { %v4401_v42 = vmul.f32 %v4397_v22, %v4213_v10 }
0x1a98   :  { %v4400_v24 = vmul.f32 %v4392_v51, %v4208_v14 }
0x1a99   :  { %v4403_v21 = vadd.f32 %v17725_v31, %v4401_v42 }
0x1a9a   :  { %v4402_v30 = vadd.f32 %v17725_v31, %v4400_v24 }
0x1a9b   :  { %v19484_v7 = vadd.f32 %v4403_v21, %v21638_v57 }
0x1a9c   :  { %v19481_v29 = vadd.f32 %v4402_v30, %v21636_v23 }
0x1a9d   :  { %21639 = vst [vmem:[#allocation59_spill] sm:$0xff] %v19484_v7 }
0x1a9e   :  { %21637 = vst [vmem:[#allocation58_spill] sm:$0xff] %v19481_v29  ;;  %14780 = vmatprep.mubr.msk.f32.mxu0 %vm603_vm7, %v19481_v29 }
0x1a9f   :  { %14781 = vmatmul.mubr.msk.f32.vlgmr.msra.gmra.mrb[74].mxu0 %vm603_vm7, %v19484_v7 }
0x1aa0   :  { %14807 = vmatprep.mubr.msk.f32.mxu0 %vm818_vm0, %v19491_v34 }
0x1b72   :  { %v14782_v14 = vpop.f32.mrb[74].mxu0 }
0x1b73   :  { %v4483_v10 = vpop.f32.mrb[75].mxu0 }
0x1b74   :  { %v16110_v23 = vpack.c.bf16 %v14782_v14, %v4483_v10 }
0x1b76   :  { %16112 = vmatprep.subr.msk.bf16.mxu0 %vm18283_vm4, %v16110_v23 }
0x1b77   :  { %16115 = vmatpush3.bf16.msk.msra.mxu0 %vm18283_vm4, %v16110_v23 }
0x1b78   :  { %16118 = vmatprep.subr.msk.bf16.mxu0 %vm18283_vm4, %v16110_v23 }
0x1b7a   :  { %14808 = vmatmul.mubr.msk.f32.vlgmr.msra.gmra.mrb[76].mxu0 %vm818_vm0, %v19262_v15  ;;  %v17727_v15 = vld [vmem:[%s17984_s3] sm:$0xff] }
0x1b7b   :  { %16121 = vmatpush3.bf16.msk.msra.mxu0 %vm18283_vm4, %v16110_v23  ;;  %14810 = vmatprep.mubr.msk.f32.mxu0 %vm818_vm0, %v19267_v4  ;;  %v17728_v4 = vld [vmem:[%s17984_s3 + $0x8] sm:$0xff] }
0x1b7e   :  { %14811 = vmatmul.mubr.msk.f32.gmra.mrb[78].mxu0 %vm818_vm0, %v19272_v38  ;;  %v17729_v38 = vld [vmem:[%s17984_s3 + $0x10] sm:$0xff] }
0x1b7f   :  { %14813 = vmatprep.mubr.msk.f32.mxu0 %vm818_vm0, %v19277_v8  ;;  %v17730_v8 = vld [vmem:[%s17984_s3 + $0x18] sm:$0xff] }
0x1b82   :  { %14814 = vmatmul.mubr.msk.f32.gmra.mrb[80].mxu0 %vm818_vm0, %v19282_v9  ;;  %v17731_v9 = vld [vmem:[%s17984_s3 + $0x20] sm:$0xff] }
0x1b83   :  { %14816 = vmatprep.mubr.msk.f32.mxu0 %vm818_vm0, %v19287_v28  ;;  %v17732_v28 = vld [vmem:[%s17984_s3 + $0x28] sm:$0xff] }
0x1b86   :  { %14817 = vmatmul.mubr.msk.f32.gmra.mrb[82].mxu0 %vm818_vm0, %v19292_v2  ;;  %v17734_v2 = vld [vmem:[%s17984_s3 + $0x38] sm:$0xf] }
0x1b87   :  { %14823 = vmatprep.mubr.msk.f32.mxu0 %vm818_vm0, %v17727_v15 }
0x1b8a   :  { %14824 = vmatmul.mubr.msk.f32.vlgmr.msra.gmra.mrb[84].mxu0 %vm818_vm0, %v17728_v4 }
0x1b8b   :  { %14826 = vmatprep.mubr.msk.f32.mxu0 %vm818_vm0, %v17729_v38 }
0x1b8e   :  { %14827 = vmatmul.mubr.msk.f32.gmra.mrb[86].mxu0 %vm818_vm0, %v17730_v8 }
0x1b8f   :  { %14829 = vmatprep.mubr.msk.f32.mxu0 %vm818_vm0, %v17731_v9 }
0x1b92   :  { %14830 = vmatmul.mubr.msk.f32.gmra.mrb[88].mxu0 %vm818_vm0, %v17732_v28 }
0x1b93   :  { %14832 = vmatprep.mubr.msk.f32.mxu0 %vm818_vm0, %v17733_v6 }
0x1b96   :  { %14833 = vmatmul.mubr.msk.f32.gmra.mrb[90].mxu0 %vm818_vm0, %v17734_v2 }
0x1b97   :  { %14881 = vmatprep.mubr.msk.f32.mxu0 %vm818_vm0, %v19491_v34 }
0x1c4d   :  { %v14809_v63 = vpop.f32.mrb[76].mxu0 }
0x1c4e   :  { %v19536_v26 = vadd.f32 %v14809_v63, %v19452_v20  ;;  %v4671_v54 = vpop.f32.mrb[77].mxu0 }
0x1c4f   :  { %v19539_v22 = vadd.f32 %v4671_v54, %v19454_v16 }
0x1c50   :  { %v4719_v52 = vand.u32 2147483647, %v19536_v26 }
0x1c51   :  { %v4718_v51 = vand.u32 2147483647, %v19539_v22  ;;  %v14812_v42 = vpop.f32.mrb[78].mxu0 }
0x1c52   :  { %v19544_v24 = vadd.f32 %v14812_v42, %v19456_v25  ;;  %v4681_v31 = vpop.f32.mrb[79].mxu0  ;;  %v4727_v21 = vsub.f32 0.0, %v4719_v52 }
0x1c53   :  { %v19547_v30 = vadd.f32 %v4681_v31, %v19458_v33  ;;  %v4726_v57 = vsub.f32 0.0, %v4718_v51 }
0x1c54   :  { %v4721_v14 = vand.u32 2147483647, %v19544_v24  ;;  %v4736_v4 = vmul.f32 1.442695, %v4727_v21 }
0x1c55   :  { %v14815_v10 = vpop.f32.mrb[80].mxu0  ;;  %v4720_v8 = vand.u32 2147483647, %v19547_v30  ;;  %v4734_v9 = vmul.f32 1.442695, %v4726_v57 }
0x1c56   :  { %v19551_v23 = vadd.f32 %v14815_v10, %v19460_v32  ;;  %v4691_v15 = vpop.f32.mrb[81].mxu0  ;;  %v4729_v28 = vsub.f32 0.0, %v4721_v14  ;;  %17106 = vpow2.f32 %v4736_v4 }
0x1c57   :  { %v19554_v38 = vadd.f32 %v4691_v15, %v19462_v46  ;;  %v4728_v51 = vsub.f32 0.0, %v4720_v8  ;;  %17108 = vpow2.f32 %v4734_v9 }
0x1c58   :  { %v4723_v42 = vand.u32 2147483647, %v19551_v23  ;;  %v4740_v31 = vmul.f32 1.442695, %v4729_v28 }
0x1c59   :  { %v4722_v6 = vand.u32 2147483647, %v19554_v38  ;;  %v14818_v2 = vpop.f32.mrb[82].mxu0 }
0x1c5a   :  { %v19559_v63 = vadd.f32 %v14818_v2, %v19464_v62  ;;  %v4701_v54 = vpop.f32.mrb[83].mxu0  ;;  %v4731_v7 = vsub.f32 0.0, %v4723_v42  ;;  %17110 = vpow2.f32 %v4740_v31 }
0x1c5b   :  { %v19562_v52 = vadd.f32 %v4701_v54, %v19466_v59  ;;  %v4730_v21 = vsub.f32 0.0, %v4722_v6  ;;  %v4738_v54 = vmul.f32 1.442695, %v4728_v51 }
0x1c5c   :  { %v4725_v57 = vand.u32 2147483647, %v19559_v63 }
0x1c5d   :  { %v14825_v10 = vpop.f32.mrb[84].mxu0  ;;  %v4724_v2 = vand.u32 2147483647, %v19562_v52  ;;  %v4742_v9 = vmul.f32 1.442695, %v4730_v21  ;;  %17112 = vpow2.f32 %v4738_v54 }
0x1c5e   :  { %v19567_v14 = vadd.f32 %v14825_v10, %v19452_v20  ;;  %v4848_v15 = vpop.f32.mrb[85].mxu0  ;;  %v4733_v6 = vsub.f32 0.0, %v4725_v57 }
0x1c5f   :  { %v19571_v4 = vadd.f32 %v4848_v15, %v19454_v16  ;;  %v4732_v49 = vsub.f32 0.0, %v4724_v2  ;;  %v4744_v16 = vmul.f32 1.442695, %v4731_v7  ;;  %17114 = vpow2.f32 %v4742_v9 }
0x1c60   :  { %v4896_v8 = vand.u32 2147483647, %v19567_v14  ;;  %v17107_v42 = vpop.eup %17106  ;;  %v4748_v17 = vmul.f32 1.442695, %v4733_v6 }
0x1c61   :  { %v4895_v28 = vand.u32 2147483647, %v19571_v4  ;;  %v14828_v18 = vpop.f32.mrb[86].mxu0 }
0x1c62   :  { %v4904_v29 = vsub.f32 0.0, %v4896_v8  ;;  %v19576_v10 = vadd.f32 %v14828_v18, %v19456_v25  ;;  %v4858_v11 = vpop.f32.mrb[87].mxu0  ;;  %v17109_v8 = vpop.eup %17108 }
0x1c63   :  { %v4903_v20 = vsub.f32 0.0, %v4895_v28  ;;  %v19579_v51 = vadd.f32 %v4858_v11, %v19458_v33  ;;  %v4746_v28 = vmul.f32 1.442695, %v4732_v49  ;;  %v4751_v11 = vadd.f32 1.0, %v17107_v42 }
0x1c64   :  { %v4913_v15 = vmul.f32 1.442695, %v4904_v29  ;;  %v4898_v57 = vand.u32 2147483647, %v19576_v10  ;;  %v4750_v9 = vadd.f32 1.0, %v17109_v8  ;;  %v17111_v49 = vpop.eup %17110 }
0x1c65   :  { %v4911_v31 = vmul.f32 1.442695, %v4903_v20  ;;  %v14831_v21 = vpop.f32.mrb[88].mxu0  ;;  %v4897_v18 = vand.u32 2147483647, %v19579_v51 }
0x1c66   :  { %17116 = vpow2.f32 %v4913_v15  ;;  %v4868_v2 = vpop.f32.mrb[89].mxu0  ;;  %v19584_v25 = vadd.f32 %v14831_v21, %v19460_v32  ;;  %v4906_v33 = vsub.f32 0.0, %v4898_v57  ;;  %v4753_v57 = vadd.f32 1.0, %v17111_v49 }
0x1c67   :  { %v19587_v29 = vadd.f32 %v4868_v2, %v19462_v46  ;;  %17118 = vpow2.f32 %v4744_v16  ;;  %v4905_v7 = vsub.f32 0.0, %v4897_v18 }
0x1c68   :  { %17120 = vpow2.f32 %v4911_v31  ;;  %v4917_v6 = vmul.f32 1.442695, %v4906_v33  ;;  %v4900_v20 = vand.u32 2147483647, %v19584_v25 }
0x1c69   :  { %v14834_v54 = vpop.f32.mrb[90].mxu0  ;;  %17122 = vpow2.f32 %v4748_v17  ;;  %v4915_v15 = vmul.f32 1.442695, %v4905_v7  ;;  %v4899_v32 = vand.u32 2147483647, %v19587_v29  ;;  %v17113_v17 = vpop.eup %17112 }
0x1c6a   :  { %17124 = vpow2.f32 %v4746_v28  ;;  %v19592_v21 = vadd.f32 %v14834_v54, %v19464_v62  ;;  %v4878_v46 = vpop.f32.mrb[91].mxu0  ;;  %v4908_v16 = vsub.f32 0.0, %v4900_v20  ;;  %v17115_v28 = vpop.eup %17114  ;;  %v4752_v7 = vadd.f32 1.0, %v17113_v17 }
0x1c6b   :  { %17126 = vlog2.f32 %v4751_v11  ;;  %v19595_v42 = vadd.f32 %v4878_v46, %v19466_v59  ;;  %v4907_v31 = vsub.f32 0.0, %v4899_v32  ;;  %v4754_v32 = vadd.f32 1.0, %v17115_v28 }
0x1c6c   :  { %17128 = vpow2.f32 %v4917_v6  ;;  %v4921_v2 = vmul.f32 1.442695, %v4908_v16  ;;  %v4902_v8 = vand.u32 2147483647, %v19592_v21 }
0x1c6d   :  { %17130 = vpow2.f32 %v4915_v15  ;;  %v4919_v18 = vmul.f32 1.442695, %v4907_v31  ;;  %v4901_v59 = vand.u32 2147483647, %v19595_v42 }
0x1c6e   :  { %17132 = vlog2.f32 %v4750_v9  ;;  %v4910_v62 = vsub.f32 0.0, %v4902_v8 }
0x1c6f   :  { %17134 = vpow2.f32 %v4921_v2  ;;  %v4909_v49 = vsub.f32 0.0, %v4901_v59 }
0x1c70   :  { %v17117_v33 = vpop.eup %17116  ;;  %17136 = vpow2.f32 %v4919_v18  ;;  %v4925_v6 = vmul.f32 1.442695, %v4910_v62 }
0x1c71   :  { %v4928_v11 = vadd.f32 1.0, %v17117_v33  ;;  %v17119_v54 = vpop.eup %17118  ;;  %17138 = vlog2.f32 %v4753_v57  ;;  %v4923_v31 = vmul.f32 1.442695, %v4909_v49 }
0x1c72   :  { %v17121_v20 = vpop.eup %17120  ;;  %v4755_v16 = vadd.f32 1.0, %v17119_v54 }
0x1c73   :  { %17140 = vlog2.f32 %v4928_v11  ;;  %v17123_v15 = vpop.eup %17122  ;;  %v4927_v46 = vadd.f32 1.0, %v17121_v20 }
0x1c74   :  { %17142 = vpow2.f32 %v4925_v6  ;;  %v17125_v9 = vpop.eup %17124  ;;  %v4757_v59 = vadd.f32 1.0, %v17123_v15 }
0x1c75   :  { %17144 = vlog2.f32 %v4752_v7  ;;  %v17127_v2 = vpop.eup %17126  ;;  %v4756_v18 = vadd.f32 1.0, %v17125_v9  ;;  %v4888_v9 = vmax.f32 %v19567_v14, 0.0 }
0x1c76   :  { %17146 = vlog2.f32 %v4927_v46  ;;  %v17129_v17 = vpop.eup %17128 }
0x1c77   :  { %17148 = vpow2.f32 %v4923_v31  ;;  %v17131_v8 = vpop.eup %17130  ;;  %v4930_v57 = vadd.f32 1.0, %v17129_v17  ;;  %v4710_v17 = vmax.f32 %v19539_v22, 0.0  ;;  %v4713_v22 = vmax.f32 %v19544_v24, 0.0 }
0x1c78   :  { %17150 = vlog2.f32 %v4754_v32  ;;  %v17133_v33 = vpop.eup %17132  ;;  %v4929_v62 = vadd.f32 1.0, %v17131_v8  ;;  %v4761_v32 = vmul.f32 0.6931472, %v17127_v2  ;;  %v4887_v2 = vmax.f32 %v19571_v4, 0.0 }
0x1c79   :  { %17152 = vlog2.f32 %v4755_v16  ;;  %v17135_v11 = vpop.eup %17134  ;;  %v4759_v49 = vmul.f32 0.6931472, %v17133_v33  ;;  %v4714_v4 = vmax.f32 %v19554_v38, 0.0  ;;  %v4889_v38 = vmax.f32 %v19579_v51, 0.0 }
0x1c7a   :  { %17154 = vlog2.f32 %v4930_v57  ;;  %v17137_v28 = vpop.eup %17136  ;;  %v4932_v6 = vadd.f32 1.0, %v17135_v11  ;;  %v19605_v11 = vld [vmem:[%s18019_s12 + $0x2] ss:$0 sm:$0xff] }
0x1c7b   :  { %17156 = vlog2.f32 %v4929_v62  ;;  %v17139_v7 = vpop.eup %17138  ;;  %v4931_v54 = vadd.f32 1.0, %v17137_v28  ;;  %v4774_v62 = vadd.f32 %v4759_v49, %v4710_v17  ;;  %v4715_v49 = vmax.f32 %v19551_v23, 0.0 }
0x1c7c   :  { %17158 = vlog2.f32 %v4756_v18  ;;  %v4711_v18 = vmax.f32 %v19536_v26, 0.0  ;;  %v4765_v26 = vmul.f32 0.6931472, %v17139_v7 }
0x1c7d   :  { %v17141_v20 = vpop.eup %17140  ;;  %17160 = vlog2.f32 %v4932_v6 }
0x1c7e   :  { %v17143_v46 = vpop.eup %17142  ;;  %v4938_v31 = vmul.f32 0.6931472, %v17141_v20  ;;  %17162 = vlog2.f32 %v4931_v54  ;;  %v4775_v6 = vadd.f32 %v4761_v32, %v4711_v18  ;;  %v19609_v54 = vld [vmem:[%s18014_s6 + $0x2] ss:$0 sm:$0xff]  ;;  %v4777_v12 = vadd.f32 %v4765_v26, %v4713_v22 }
0x1c7f   :  { %v17145_v16 = vpop.eup %17144  ;;  %17164 = vlog2.f32 %v4757_v59  ;;  %v4934_v15 = vadd.f32 1.0, %v17143_v46  ;;  %v4967_v7 = vmul.f32 %v19609_v54, %v4774_v62  ;;  %v4892_v62 = vmax.f32 %v19584_v25, 0.0 }
0x1c80   :  { %v17147_v8 = vpop.eup %17146  ;;  %v19602_v57 = vadd.f32 %v4938_v31, %v4888_v9  ;;  %v4763_v59 = vmul.f32 0.6931472, %v17145_v16  ;;  %v4712_v9 = vmax.f32 %v19547_v30, 0.0  ;;  %v4968_v18 = vmul.f32 %v19609_v54, %v4775_v6 }
0x1c81   :  { %v17149_v33 = vpop.eup %17148  ;;  %v4936_v14 = vmul.f32 0.6931472, %v17147_v8  ;;  %17166 = vlog2.f32 %v4934_v15  ;;  %v4890_v15 = vmax.f32 %v19576_v10, 0.0  ;;  %v4891_v6 = vmax.f32 %v19587_v29, 0.0 }
0x1c82   :  { %v17151_v28 = vpop.eup %17150  ;;  %v4933_v20 = vadd.f32 1.0, %v17149_v33  ;;  %v4984_v32 = vmul.f32 %v19605_v11, %v19602_v57  ;;  %v4776_v33 = vadd.f32 %v4763_v59, %v4712_v9  ;;  %v4716_v22 = vmax.f32 %v19562_v52, 0.0 }
0x1c83   :  { %v17153_v46 = vpop.eup %17152  ;;  %v19614_v31 = vadd.f32 %v4936_v14, %v4887_v2  ;;  %v4767_v16 = vmul.f32 0.6931472, %v17151_v28  ;;  %v4970_v29 = vmul.f32 %v19609_v54, %v4777_v12 }
0x1c84   :  { %v17155_v17 = vpop.eup %17154  ;;  %17168 = vlog2.f32 %v4933_v20  ;;  %v4769_v41 = vmul.f32 0.6931472, %v17153_v46  ;;  %v4969_v26 = vmul.f32 %v19609_v54, %v4776_v33 }
0x1c85   :  { %v17157_v24 = vpop.eup %17156  ;;  %v4942_v8 = vmul.f32 0.6931472, %v17155_v17  ;;  %v4983_v30 = vmul.f32 %v19605_v11, %v19614_v31  ;;  %v4992_v17 = vadd.f32 %v4984_v32, %v4968_v18  ;;  %v4778_v39 = vadd.f32 %v4767_v16, %v4714_v4 }
0x1c86   :  { %v17159_v23 = vpop.eup %17158  ;;  %v4940_v2 = vmul.f32 0.6931472, %v17157_v24  ;;  %v4779_v32 = vadd.f32 %v4769_v41, %v4715_v49  ;;  %v4894_v16 = vmax.f32 %v19592_v21, 0.0  ;;  %v4717_v49 = vmax.f32 %v19559_v63, 0.0 }
0x1c87   :  { %v17161_v14 = vpop.eup %17160  ;;  %v19625_v10 = vadd.f32 %v4942_v8, %v4890_v15  ;;  %v4991_v20 = vadd.f32 %v4983_v30, %v4967_v7  ;;  %v4771_v4 = vmul.f32 0.6931472, %v17159_v23  ;;  %v4971_v7 = vmul.f32 %v19609_v54, %v4778_v39 }
0x1c88   :  { %v17163_v28 = vpop.eup %17162  ;;  %v19627_v56 = vadd.f32 %v4940_v2, %v4889_v38  ;;  %v4946_v50 = vmul.f32 0.6931472, %v17161_v14  ;;  %v4972_v39 = vmul.f32 %v19609_v54, %v4779_v32 }
0x1c89   :  { %v17165_v44 = vpop.eup %17164  ;;  %v4944_v59 = vmul.f32 0.6931472, %v17163_v28  ;;  %14867 = vmatprep.mubr.f32.mxu1 %v4991_v20  ;;  %v4986_v51 = vmul.f32 %v19605_v11, %v19625_v10  ;;  %v4780_v12 = vadd.f32 %v4771_v4, %v4716_v22 }
0x1c8a   :  { %v19634_v46 = vadd.f32 %v4946_v50, %v4892_v62  ;;  %14868 = vmatmul.mubr.f32.vlgmr.msra.gmra.mrb[80].mxu1 %v4992_v17  ;;  %v4985_v25 = vmul.f32 %v19605_v11, %v19627_v56  ;;  %v4773_v24 = vmul.f32 0.6931472, %v17165_v44  ;;  %v4893_v44 = vmax.f32 %v19595_v42, 0.0 }
0x1c8b   :  { %v17167_v9 = vpop.eup %17166  ;;  %v19639_v15 = vadd.f32 %v4944_v59, %v4891_v6  ;;  %v4994_v50 = vadd.f32 %v4986_v51, %v4970_v29  ;;  %v4973_v63 = vmul.f32 %v19609_v54, %v4780_v12 }
0x1c8c   :  { %v4950_v8 = vmul.f32 0.6931472, %v17167_v9  ;;  %v4993_v52 = vadd.f32 %v4985_v25, %v4969_v26  ;;  %v4988_v18 = vmul.f32 %v19605_v11, %v19634_v46  ;;  %v4781_v38 = vadd.f32 %v4773_v24, %v4717_v49 }
0x1c8d   :  { %v4987_v30 = vmul.f32 %v19605_v11, %v19639_v15 }
0x1c8e   :  { %v17169_v41 = vpop.eup %17168  ;;  %v19649_v23 = vadd.f32 %v4950_v8, %v4894_v16  ;;  %14870 = vmatprep.mubr.f32.mxu1 %v4993_v52  ;;  %v4996_v14 = vadd.f32 %v4988_v18, %v4972_v39  ;;  %v4974_v28 = vmul.f32 %v19609_v54, %v4781_v38 }
0x1c8f   :  { %v4948_v21 = vmul.f32 0.6931472, %v17169_v41  ;;  %14871 = vmatmul.mubr.f32.gmra.mrb[82].mxu1 %v4994_v50  ;;  %v4995_v33 = vadd.f32 %v4987_v30, %v4971_v7 }
0x1c90   :  { %v4990_v20 = vmul.f32 %v19605_v11, %v19649_v23 }
0x1c91   :  { %v19653_v2 = vadd.f32 %v4948_v21, %v4893_v44  ;;  %14873 = vmatprep.mubr.f32.mxu1 %v4995_v33 }
0x1c92   :  { %v4998_v62 = vadd.f32 %v4990_v20, %v4974_v28 }
0x1c93   :  { %14874 = vmatmul.mubr.f32.gmra.mrb[84].mxu1 %v4996_v14  ;;  %v4989_v42 = vmul.f32 %v19605_v11, %v19653_v2 }
0x1c95   :  { %v4997_v17 = vadd.f32 %v4989_v42, %v4973_v63 }
0x1c97   :  { %14876 = vmatprep.mubr.f32.mxu1 %v4997_v17 }
0x1c98   :  { %14877 = vmatmul.mubr.f32.gmra.mrb[86].mxu1 %v4998_v62 }
0x1c99   :  { %14916 = vmatprep.mubr.msk.f32.mxu1 %vm818_vm0, %v19491_v34 }
0x1d5d   :  { %v19663_v6 = vpop.f32.mrb[80].mxu1 }
0x1d5e   :  { %v5113_v59 = vand.u32 2147483647, %v19663_v6  ;;  %v19666_v51 = vpop.f32.mrb[81].mxu1 }
0x1d5f   :  { %v5112_v22 = vand.u32 2147483647, %v19666_v51 }
0x1d60   :  { %v5121_v26 = vsub.f32 0.0, %v5113_v59 }
0x1d61   :  { %v5120_v25 = vsub.f32 0.0, %v5112_v22 }
0x1d62   :  { %v5130_v11 = vmul.f32 1.442695, %v5121_v26  ;;  %v19669_v9 = vpop.f32.mrb[82].mxu1 }
0x1d63   :  { %v5128_v54 = vmul.f32 1.442695, %v5120_v25  ;;  %v5115_v32 = vand.u32 2147483647, %v19669_v9  ;;  %v19672_v4 = vpop.f32.mrb[83].mxu1 }
0x1d64   :  { %17170 = vpow2.f32 %v5130_v11  ;;  %v5114_v34 = vand.u32 2147483647, %v19672_v4 }
0x1d65   :  { %17172 = vpow2.f32 %v5128_v54  ;;  %v5123_v29 = vsub.f32 0.0, %v5115_v32 }
0x1d66   :  { %v5122_v24 = vsub.f32 0.0, %v5114_v34  ;;  %v19675_v16 = vpop.f32.mrb[84].mxu1 }
0x1d67   :  { %v5134_v8 = vmul.f32 1.442695, %v5123_v29  ;;  %v5117_v52 = vand.u32 2147483647, %v19675_v16  ;;  %v19678_v50 = vpop.f32.mrb[85].mxu1 }
0x1d68   :  { %v5132_v7 = vmul.f32 1.442695, %v5122_v24  ;;  %v5116_v30 = vand.u32 2147483647, %v19678_v50 }
0x1d69   :  { %17174 = vpow2.f32 %v5134_v8  ;;  %v5125_v18 = vsub.f32 0.0, %v5117_v52  ;;  %v5105_v8 = vmax.f32 %v19663_v6, 0.0 }
0x1d6a   :  { %17176 = vpow2.f32 %v5132_v7  ;;  %v5124_v41 = vsub.f32 0.0, %v5116_v30  ;;  %v19689_v30 = vld [vmem:[%s21600_s5 + $0x2] ss:$0 sm:$0xff] }
0x1d6b   :  { %v5138_v49 = vmul.f32 1.442695, %v5125_v18  ;;  %v19681_v44 = vpop.f32.mrb[86].mxu1  ;;  %v5104_v18 = vmax.f32 %v19666_v51, 0.0 }
0x1d6c   :  { %v5136_v12 = vmul.f32 1.442695, %v5124_v41  ;;  %v5119_v21 = vand.u32 2147483647, %v19681_v44  ;;  %v19684_v33 = vpop.f32.mrb[87].mxu1 }
0x1d6d   :  { %17178 = vpow2.f32 %v5138_v49  ;;  %v5118_v39 = vand.u32 2147483647, %v19684_v33 }
0x1d6e   :  { %v17171_v38 = vpop.eup %17170  ;;  %17180 = vpow2.f32 %v5136_v12  ;;  %v5127_v14 = vsub.f32 0.0, %v5119_v21 }
0x1d6f   :  { %v17173_v20 = vpop.eup %17172  ;;  %v5145_v63 = vadd.f32 1.0, %v17171_v38  ;;  %v5126_v42 = vsub.f32 0.0, %v5118_v39  ;;  %v19693_v39 = vld [vmem:[%s21601_s9 + $0x2] ss:$0 sm:$0xff] }
0x1d70   :  { %v5144_v28 = vadd.f32 1.0, %v17173_v20  ;;  %v5142_v17 = vmul.f32 1.442695, %v5127_v14 }
0x1d71   :  { %17182 = vlog2.f32 %v5145_v63  ;;  %v5140_v62 = vmul.f32 1.442695, %v5126_v42 }
0x1d72   :  { %17184 = vlog2.f32 %v5144_v28  ;;  %v5107_v28 = vmax.f32 %v19669_v9, 0.0  ;;  %v5109_v9 = vmax.f32 %v19675_v16, 0.0 }
0x1d73   :  { %v17175_v59 = vpop.eup %17174  ;;  %17186 = vpow2.f32 %v5142_v17 }
0x1d74   :  { %v17177_v22 = vpop.eup %17176  ;;  %v5147_v26 = vadd.f32 1.0, %v17175_v59  ;;  %17188 = vpow2.f32 %v5140_v62  ;;  %v5106_v62 = vmax.f32 %v19672_v4, 0.0 }
0x1d75   :  { %v5146_v25 = vadd.f32 1.0, %v17177_v22 }
0x1d76   :  { %17190 = vlog2.f32 %v5147_v26 }
0x1d77   :  { %v17179_v11 = vpop.eup %17178  ;;  %17192 = vlog2.f32 %v5146_v25 }
0x1d78   :  { %v17181_v54 = vpop.eup %17180  ;;  %v5149_v32 = vadd.f32 1.0, %v17179_v11 }
0x1d79   :  { %v5148_v34 = vadd.f32 1.0, %v17181_v54 }
0x1d7a   :  { %17194 = vlog2.f32 %v5149_v32 }
0x1d7b   :  { %v17183_v29 = vpop.eup %17182  ;;  %17196 = vlog2.f32 %v5148_v34 }
0x1d7c   :  { %v17185_v24 = vpop.eup %17184  ;;  %v5155_v52 = vmul.f32 0.6931472, %v17183_v29 }
0x1d7d   :  { %v17187_v7 = vpop.eup %17186  ;;  %v5153_v41 = vmul.f32 0.6931472, %v17185_v24 }
0x1d7e   :  { %v17189_v49 = vpop.eup %17188  ;;  %v5169_v12 = vadd.f32 %v5155_v52, %v5105_v8  ;;  %v5151_v21 = vadd.f32 1.0, %v17187_v7  ;;  %v5108_v52 = vmax.f32 %v19678_v50, 0.0 }
0x1d7f   :  { %v5168_v38 = vadd.f32 %v5153_v41, %v5104_v18  ;;  %v5150_v14 = vadd.f32 1.0, %v17189_v49 }
0x1d80   :  { %v17191_v20 = vpop.eup %17190  ;;  %v5185_v63 = vmul.f32 %v19689_v30, %v5169_v12  ;;  %17198 = vlog2.f32 %v5151_v21 }
0x1d81   :  { %v17193_v42 = vpop.eup %17192  ;;  %v5184_v6 = vmul.f32 %v19689_v30, %v5168_v38  ;;  %v5159_v17 = vmul.f32 0.6931472, %v17191_v20  ;;  %17200 = vlog2.f32 %v5150_v14 }
0x1d82   :  { %v19699_v51 = vadd.f32 %v19693_v39, %v5185_v63  ;;  %v5157_v59 = vmul.f32 0.6931472, %v17193_v42 }
0x1d83   :  { %v5171_v22 = vadd.f32 %v5159_v17, %v5107_v28  ;;  %v19703_v26 = vadd.f32 %v19693_v39, %v5184_v6  ;;  %v5111_v6 = vmax.f32 %v19681_v44, 0.0 }
0x1d84   :  { %v17195_v25 = vpop.eup %17194  ;;  %v5217_v11 = vand.u32 2147483647, %v19699_v51  ;;  %v5170_v54 = vadd.f32 %v5157_v59, %v5106_v62 }
0x1d85   :  { %v17197_v32 = vpop.eup %17196  ;;  %v5187_v34 = vmul.f32 %v19689_v30, %v5171_v22  ;;  %v5163_v29 = vmul.f32 0.6931472, %v17195_v25  ;;  %v5216_v24 = vand.u32 2147483647, %v19703_v26 }
0x1d86   :  { %v5225_v8 = vsub.f32 0.0, %v5217_v11  ;;  %v5186_v4 = vmul.f32 %v19689_v30, %v5170_v54  ;;  %v5161_v7 = vmul.f32 0.6931472, %v17197_v32  ;;  %v5110_v11 = vmax.f32 %v19684_v33, 0.0 }
0x1d87   :  { %v19712_v18 = vadd.f32 %v19693_v39, %v5187_v34  ;;  %v5173_v41 = vadd.f32 %v5163_v29, %v5109_v9  ;;  %v5224_v49 = vsub.f32 0.0, %v5216_v24 }
0x1d88   :  { %v5234_v12 = vmul.f32 1.442695, %v5225_v8  ;;  %v19715_v21 = vadd.f32 %v19693_v39, %v5186_v4  ;;  %v5172_v38 = vadd.f32 %v5161_v7, %v5108_v52 }
0x1d89   :  { %v5219_v16 = vand.u32 2147483647, %v19712_v18  ;;  %v5189_v14 = vmul.f32 %v19689_v30, %v5173_v41  ;;  %v5232_v20 = vmul.f32 1.442695, %v5224_v49 }
0x1d8a   :  { %v17199_v63 = vpop.eup %17198  ;;  %17202 = vpow2.f32 %v5234_v12  ;;  %v5218_v50 = vand.u32 2147483647, %v19715_v21  ;;  %v5188_v42 = vmul.f32 %v19689_v30, %v5172_v38 }
0x1d8b   :  { %v17201_v28 = vpop.eup %17200  ;;  %v5227_v17 = vsub.f32 0.0, %v5219_v16  ;;  %v19723_v62 = vadd.f32 %v19693_v39, %v5189_v14  ;;  %v5167_v59 = vmul.f32 0.6931472, %v17199_v63  ;;  %17204 = vpow2.f32 %v5232_v20 }
0x1d8c   :  { %v5226_v22 = vsub.f32 0.0, %v5218_v50  ;;  %v19726_v25 = vadd.f32 %v19693_v39, %v5188_v42  ;;  %v5165_v54 = vmul.f32 0.6931472, %v17201_v28 }
0x1d8d   :  { %v5238_v32 = vmul.f32 1.442695, %v5227_v17  ;;  %v5221_v34 = vand.u32 2147483647, %v19723_v62  ;;  %v5175_v9 = vadd.f32 %v5167_v59, %v5111_v6 }
0x1d8e   :  { %v5236_v29 = vmul.f32 1.442695, %v5226_v22  ;;  %v5220_v44 = vand.u32 2147483647, %v19726_v25  ;;  %v5174_v24 = vadd.f32 %v5165_v54, %v5110_v11 }
0x1d8f   :  { %17206 = vpow2.f32 %v5238_v32  ;;  %v5229_v8 = vsub.f32 0.0, %v5221_v34  ;;  %v5191_v4 = vmul.f32 %v19689_v30, %v5175_v9 }
0x1d90   :  { %17208 = vpow2.f32 %v5236_v29  ;;  %v5228_v52 = vsub.f32 0.0, %v5220_v44  ;;  %v5190_v7 = vmul.f32 %v19689_v30, %v5174_v24  ;;  %v5208_v29 = vmax.f32 %v19703_v26, 0.0 }
0x1d91   :  { %v19734_v41 = vadd.f32 %v19693_v39, %v5191_v4  ;;  %v5242_v33 = vmul.f32 1.442695, %v5229_v8  ;;  %v5210_v26 = vmax.f32 %v19715_v21, 0.0 }
0x1d92   :  { %v5240_v49 = vmul.f32 1.442695, %v5228_v52  ;;  %v19737_v12 = vadd.f32 %v19693_v39, %v5190_v7 }
0x1d93   :  { %v5223_v38 = vand.u32 2147483647, %v19734_v41 }
0x1d94   :  { %v17203_v16 = vpop.eup %17202  ;;  %17210 = vpow2.f32 %v5240_v49  ;;  %v5222_v14 = vand.u32 2147483647, %v19737_v12 }
0x1d95   :  { %v17205_v20 = vpop.eup %17204  ;;  %v5249_v63 = vadd.f32 1.0, %v17203_v16  ;;  %17212 = vpow2.f32 %v5242_v33  ;;  %v5231_v30 = vsub.f32 0.0, %v5223_v38  ;;  %v5209_v33 = vmax.f32 %v19699_v51, 0.0 }
0x1d96   :  { %v5230_v50 = vsub.f32 0.0, %v5222_v14  ;;  %v5248_v42 = vadd.f32 1.0, %v17205_v20  ;;  %v5211_v51 = vmax.f32 %v19712_v18, 0.0 }
0x1d97   :  { %17214 = vlog2.f32 %v5249_v63  ;;  %v5246_v59 = vmul.f32 1.442695, %v5231_v30 }
0x1d98   :  { %v5244_v6 = vmul.f32 1.442695, %v5230_v50  ;;  %17216 = vlog2.f32 %v5248_v42 }
0x1d99   :  { %v17207_v28 = vpop.eup %17206 }
0x1d9a   :  { %v17209_v17 = vpop.eup %17208  ;;  %17218 = vpow2.f32 %v5244_v6  ;;  %v5251_v22 = vadd.f32 1.0, %v17207_v28 }
0x1d9b   :  { %v5250_v39 = vadd.f32 1.0, %v17209_v17 }
0x1d9d   :  { %17220 = vlog2.f32 %v5250_v39 }
0x1d9e   :  { %v17211_v11 = vpop.eup %17210  ;;  %17222 = vpow2.f32 %v5246_v59  ;;  %v5212_v59 = vmax.f32 %v19726_v25, 0.0  ;;  %v5215_v25 = vmax.f32 %v19734_v41, 0.0 }
0x1d9f   :  { %v17213_v54 = vpop.eup %17212  ;;  %17224 = vlog2.f32 %v5251_v22  ;;  %v5252_v32 = vadd.f32 1.0, %v17211_v11  ;;  %v5213_v11 = vmax.f32 %v19723_v62, 0.0 }
0x1da0   :  { %v5253_v24 = vadd.f32 1.0, %v17213_v54 }
0x1da1   :  { %v17215_v34 = vpop.eup %17214  ;;  %17226 = vlog2.f32 %v5252_v32 }
0x1da2   :  { %v17217_v9 = vpop.eup %17216  ;;  %v5259_v52 = vmul.f32 0.6931472, %v17215_v34  ;;  %17228 = vlog2.f32 %v5253_v24  ;;  %v5214_v34 = vmax.f32 %v19737_v12, 0.0 }
0x1da3   :  { %v5257_v44 = vmul.f32 0.6931472, %v17217_v9 }
0x1da4   :  { %v17219_v8 = vpop.eup %17218  ;;  %v19746_v16 = vadd.f32 %v5259_v52, %v5209_v33 }
0x1da5   :  { %v19742_v4 = vadd.f32 %v5257_v44, %v5208_v29  ;;  %v5254_v49 = vadd.f32 1.0, %v17219_v8 }
0x1da7   :  { %v17221_v7 = vpop.eup %17220  ;;  %5280 = vxpose.xlu1.b32.start [1/8] (short) (narrow) %v19742_v4, 8  ;;  %17230 = vlog2.f32 %v5254_v49 }
0x1da8   :  { %v17223_v38 = vpop.eup %17222  ;;  %v5261_v14 = vmul.f32 0.6931472, %v17221_v7 }
0x1da9   :  { %v17225_v20 = vpop.eup %17224  ;;  %v5255_v63 = vadd.f32 1.0, %v17223_v38 }
0x1daa   :  { %v19750_v50 = vadd.f32 %v5261_v14, %v5210_v26  ;;  %v5263_v42 = vmul.f32 0.6931472, %v17225_v20 }
0x1dab   :  { %5281 = vxpose.xlu1.b32.cont [2/8] (short) (narrow) %v19746_v16, 8  ;;  %v17227_v30 = vpop.eup %17226  ;;  %17232 = vlog2.f32 %v5255_v63 }
0x1dac   :  { %v19754_v6 = vadd.f32 %v5263_v42, %v5211_v51  ;;  %v5265_v28 = vmul.f32 0.6931472, %v17227_v30  ;;  %v17229_v17 = vpop.eup %17228 }
0x1dad   :  { %v5267_v39 = vmul.f32 0.6931472, %v17229_v17 }
0x1dae   :  { %v19758_v21 = vadd.f32 %v5265_v28, %v5212_v59 }
0x1daf   :  { %5282 = vxpose.xlu1.b32.cont [3/8] (short) (narrow) %v19750_v50, 8  ;;  %v19762_v54 = vadd.f32 %v5267_v39, %v5213_v11 }
0x1db1   :  { %v17231_v22 = vpop.eup %17230 }
0x1db2   :  { %v5269_v18 = vmul.f32 0.6931472, %v17231_v22 }
0x1db3   :  { %5283 = vxpose.xlu1.b32.cont [4/8] (short) (narrow) %v19754_v6, 8 }
0x1db4   :  { %v19766_v9 = vadd.f32 %v5269_v18, %v5214_v34 }
0x1db5   :  { %v17233_v32 = vpop.eup %17232 }
0x1db6   :  { %v5271_v29 = vmul.f32 0.6931472, %v17233_v32 }
0x1db7   :  { %5284 = vxpose.xlu1.b32.cont [5/8] (short) (narrow) %v19758_v21, 8 }
0x1db8   :  { %v19770_v44 = vadd.f32 %v5271_v29, %v5215_v25 }
0x1dbb   :  { %5285 = vxpose.xlu1.b32.cont [6/8] (short) (narrow) %v19762_v54, 8 }
0x1dbf   :  { %5286 = vxpose.xlu1.b32.cont [7/8] (short) (narrow) %v19766_v9, 8 }
0x1dc3   :  { %5287 = vxpose.xlu1.b32.end [8/8] (short) (narrow) %v19770_v44, 8 }
0x1e27   :  { %v5296_v62 = vpop.trf.xlu1 }
0x1e28   :  { %v5319_v24 = vrot.slane %v5296_v62, %v18619_v58 }
0x1e2a   :  { %v5320_v8 = vcombine.high %v5319_v24, %v5319_v24  ;;  %v5327_v52 = vrot.slane %v5319_v24, %v18619_v58 }
0x1e2c   :  { %v5334_v7 = vrot.slane %v5320_v8, %v18619_v58  ;;  %v5340_v12 = vrot.slane %v5327_v52, %v18626_v60  ;;  %v5335_v14 = vcombine.high %v5327_v52, %v5327_v52 }
0x1e2e   :  { %v5357_v33 = vadd.f32 %v5340_v12, %v18631_v13  ;;  %v5358_v41 = vadd.f32 %v5340_v12, %v18635_v61  ;;  %v5344_v38 = vrot.slane %v5334_v7, %v18626_v60  ;;  %v5348_v30 = vrot.slane %v5335_v14, %v18626_v60 }
0x1e2f   :  { %v5336_v17 = vcombine.high %v5334_v7, %v5334_v7 }
0x1e30   :  { %v5365_v49 = vsel %vm1627_vm5, %v5357_v33, -inf  ;;  %v5368_v20 = vsel %vm1631_vm6, %v5358_v41, -inf  ;;  %v5359_v26 = vadd.f32 %v5344_v38, %v18631_v13  ;;  %v5360_v42 = vadd.f32 %v5344_v38, %v18635_v61 }
0x1e31   :  { %5366 = vmax.xlane.f32.xlu0 %v5365_v49  ;;  %v5361_v28 = vadd.f32 %v5348_v30, %v18631_v13  ;;  %v5362_v39 = vadd.f32 %v5348_v30, %v18635_v61  ;;  %v5352_v22 = vrot.slane %v5336_v17, %v18626_v60 }
0x1e32   :  { %v5371_v63 = vsel %vm1627_vm5, %v5359_v26, -inf  ;;  %v5374_v51 = vsel %vm1631_vm6, %v5360_v42, -inf }
0x1e33   :  { %v5377_v59 = vsel %vm1627_vm5, %v5361_v28, -inf  ;;  %v5380_v11 = vsel %vm1631_vm6, %v5362_v39, -inf  ;;  %v5363_v18 = vadd.f32 %v5352_v22, %v18631_v13  ;;  %v5364_v34 = vadd.f32 %v5352_v22, %v18635_v61 }
0x1e35   :  { %5369 = vmax.xlane.f32.xlu0 %v5368_v20  ;;  %v5383_v32 = vsel %vm1627_vm5, %v5363_v18, -inf  ;;  %v5386_v29 = vsel %vm1631_vm6, %v5364_v34, -inf  ;;  %v19819_v18 = vld [vmem:[%s17979_s29 + $0x10] sm:$0xff]  ;;  %v19829_v34 = vld [vmem:[%s17979_s29 + $0x20] sm:$0xff] }
0x1e39   :  { %5372 = vmax.xlane.f32.xlu0 %v5371_v63 }
0x1e3d   :  { %5375 = vmax.xlane.f32.xlu0 %v5374_v51 }
0x1e41   :  { %5378 = vmax.xlane.f32.xlu0 %v5377_v59 }
0x1e45   :  { %5381 = vmax.xlane.f32.xlu0 %v5380_v11  ;;  %v19814_v11 = vld [vmem:[%s17979_s29 + $0x8] sm:$0xff] }
0x1e49   :  { %5384 = vmax.xlane.f32.xlu0 %v5383_v32  ;;  %v19824_v32 = vld [vmem:[%s17979_s29 + $0x18] sm:$0xff] }
0x1e4d   :  { %5387 = vmax.xlane.f32.xlu0 %v5386_v29  ;;  %v19834_v29 = vld [vmem:[%s17979_s29 + $0x28] sm:$0xff] }
0x1ebe   :  { %v5367_v25 = vpop.xlane.xlu0 %5366 }
0x1ebf   :  { %v5400_v20 = vrot.slane %v5367_v25, %v18512_v40  ;;  %v19839_v25 = vld [vmem:[%s17979_s29 + $0x30] sm:$0xff] }
0x1ec2   :  { %v5370_v62 = vpop.xlane.xlu0 %5369 }
0x1ec3   :  { %v5404_v41 = vrot.slane %v5370_v62, %v18515_v47  ;;  %v19844_v62 = vld [vmem:[%s17979_s29 + $0x38] sm:$0xf] }
0x1ec5   :  { %v5405_v30 = vsel %vm1672_vm8, %v5404_v41, %v5400_v20 }
0x1ec6   :  { %v5373_v24 = vpop.xlane.xlu0 %5372 }
0x1ec7   :  { %v5409_v38 = vrot.slane %v5373_v24, %v18512_v40  ;;  %v19849_v24 = vld [vmem:[%s21602_s17] sm:$0xff] }
0x1eca   :  { %v5376_v8 = vpop.xlane.xlu0 %5375 }
0x1ecb   :  { %v5413_v12 = vrot.slane %v5376_v8, %v18515_v47 }
0x1ecd   :  { %v5414_v26 = vsel %vm1672_vm8, %v5413_v12, %v5409_v38 }
0x1ece   :  { %v5379_v52 = vpop.xlane.xlu0 %5378  ;;  %v5433_v17 = vsel %vm1701_vm9, %v5414_v26, %v5405_v30 }
0x1ecf   :  { %v5418_v14 = vrot.slane %v5379_v52, %v18512_v40 }
0x1ed2   :  { %v5382_v7 = vpop.xlane.xlu0 %5381 }
0x1ed3   :  { %v5422_v33 = vrot.slane %v5382_v7, %v18515_v47 }
0x1ed5   :  { %v5423_v63 = vsel %vm1672_vm8, %v5422_v33, %v5418_v14 }
0x1ed6   :  { %v5385_v49 = vpop.xlane.xlu0 %5384  ;;  %v5434_v39 = vsel %vm1703_vm10, %v5423_v63, %v5433_v17 }
0x1ed7   :  { %v5427_v51 = vrot.slane %v5385_v49, %v18512_v40 }
0x1eda   :  { %v5388_v42 = vpop.xlane.xlu0 %5387 }
0x1edb   :  { %v5431_v28 = vrot.slane %v5388_v42, %v18515_v47 }
0x1edd   :  { %v5432_v59 = vsel %vm1672_vm8, %v5431_v28, %v5427_v51 }
0x1ede   :  { %v5435_v22 = vsel %vm21640_vm15, %v5432_v59, %v5434_v39  ;;  %vm21643_vm15 = vmmov %vm21620_vm11 }
0x1edf   :  { %14879 = vmatprep.subr.msk.mxu0 %vm818_vm0, %v5435_v22 }
0x1ee0   :  { %14880 = vmatpush3.xpose.msk.msra.mxu0 %vm818_vm0, %v5435_v22 }
0x1ee3   :  { %14882 = vmatmul.mubr.msk.f32.vlgmr.msra.gmra.mrb[92].mxu0 %vm818_vm0, %v19814_v11 }
0x1ee4   :  { %14884 = vmatprep.mubr.msk.f32.mxu0 %vm818_vm0, %v19819_v18 }
0x1ee7   :  { %14885 = vmatmul.mubr.msk.f32.gmra.mrb[94].mxu0 %vm818_vm0, %v19824_v32 }
0x1ee8   :  { %14887 = vmatprep.mubr.msk.f32.mxu0 %vm818_vm0, %v19829_v34 }
0x1eeb   :  { %14888 = vmatmul.mubr.msk.f32.gmra.mrb[96].mxu0 %vm818_vm0, %v19834_v29 }
0x1eec   :  { %14890 = vmatprep.mubr.msk.f32.mxu0 %vm818_vm0, %v19839_v25 }
0x1eef   :  { %14891 = vmatmul.mubr.msk.f32.gmra.mrb[98].mxu0 %vm818_vm0, %v19844_v62 }
0x1ef0   :  { %14909 = vmatprep.mubr.msk.f32.mxu0 %vm1627_vm5, %v19849_v24 }
0x1fb6   :  { %v14883_v8 = vpop.f32.mrb[92].mxu0 }
0x1fb7   :  { %v5544_v52 = vsub.f32 %v19746_v16, %v14883_v8  ;;  %v5504_v7 = vpop.f32.mrb[93].mxu0 }
0x1fb8   :  { %v5543_v12 = vsub.f32 %v19742_v4, %v5504_v7 }
0x1fb9   :  { %v5553_v33 = vmul.f32 1.442695, %v5544_v52 }
0x1fba   :  { %v5551_v49 = vmul.f32 1.442695, %v5543_v12  ;;  %v14886_v41 = vpop.f32.mrb[94].mxu0 }
0x1fbb   :  { %17234 = vpow2.f32 %v5553_v33  ;;  %v5546_v38 = vsub.f32 %v19754_v6, %v14886_v41  ;;  %v5514_v14 = vpop.f32.mrb[95].mxu0 }
0x1fbc   :  { %17236 = vpow2.f32 %v5551_v49  ;;  %v5545_v20 = vsub.f32 %v19750_v50, %v5514_v14  ;;  %v17743_v14 = vld [vmem:[%s21603_s21] sm:$0xf] }
0x1fbd   :  { %v5557_v26 = vmul.f32 1.442695, %v5546_v38 }
0x1fbe   :  { %v5555_v63 = vmul.f32 1.442695, %v5545_v20  ;;  %v14889_v42 = vpop.f32.mrb[96].mxu0  ;;  %v19886_v20 = vld [vmem:[%s21602_s17 + $0x8] sm:$0xf] }
0x1fbf   :  { %17238 = vpow2.f32 %v5557_v26  ;;  %v5548_v30 = vsub.f32 %v19762_v54, %v14889_v42  ;;  %v5524_v16 = vpop.f32.mrb[97].mxu0 }
0x1fc0   :  { %17240 = vpow2.f32 %v5555_v63  ;;  %v5547_v4 = vsub.f32 %v19758_v21, %v5524_v16 }
0x1fc1   :  { %v5561_v51 = vmul.f32 1.442695, %v5548_v30 }
0x1fc2   :  { %v5559_v28 = vmul.f32 1.442695, %v5547_v4  ;;  %v14892_v17 = vpop.f32.mrb[98].mxu0 }
0x1fc3   :  { %17242 = vpow2.f32 %v5561_v51  ;;  %v5550_v6 = vsub.f32 %v19770_v44, %v14892_v17  ;;  %v5534_v59 = vpop.f32.mrb[99].mxu0 }
0x1fc4   :  { %17244 = vpow2.f32 %v5559_v28  ;;  %v5549_v50 = vsub.f32 %v19766_v9, %v5534_v59 }
0x1fc5   :  { %v19861_v39 = vpop.eup %17234  ;;  %v5565_v22 = vmul.f32 1.442695, %v5550_v6 }
0x1fc6   :  { %v17237_v8 = vpop.eup %17236  ;;  %v5563_v52 = vmul.f32 1.442695, %v5549_v50 }
0x1fc7   :  { %17246 = vpow2.f32 %v5565_v22  ;;  %v16154_v54 = vpack.c.bf16 %v19861_v39, %v17237_v8 }
0x1fc8   :  { %17248 = vpow2.f32 %v5563_v52 }
0x1fc9   :  { %v19864_v21 = vpop.eup %17238  ;;  %16155 = vmatprep.subr.bf16.mxu0 %v16154_v54 }
0x1fca   :  { %v17241_v7 = vpop.eup %17240  ;;  %16157 = vmatpush3.bf16.msra.mxu0 %v16154_v54 }
0x1fcb   :  { %v16158_v44 = vpack.c.bf16 %v19864_v21, %v17241_v7 }
0x1fcd   :  { %v19867_v12 = vpop.eup %17242  ;;  %16159 = vmatprep.subr.bf16.mxu0 %v16158_v44 }
0x1fce   :  { %v19869_v9 = vpop.eup %17244  ;;  %16161 = vmatpush3.bf16.msra.mxu0 %v16158_v44 }
0x1fcf   :  { %v16162_v33 = vpack.c.bf16 %v19867_v12, %v19869_v9 }
0x1fd1   :  { %v19873_v49 = vpop.eup %17246  ;;  %16163 = vmatprep.subr.bf16.mxu0 %v16162_v33 }
0x1fd2   :  { %v19875_v41 = vpop.eup %17248  ;;  %16165 = vmatpush3.bf16.msra.mxu0 %v16162_v33 }
0x1fd3   :  { %v16166_v38 = vpack.c.bf16 %v19873_v49, %v19875_v41 }
0x1fd5   :  { %16168 = vmatprep.subr.msk.bf16.mxu0 %vm18283_vm4, %v16166_v38 }
0x1fd6   :  { %16171 = vmatpush3.bf16.msk.msra.mxu0 %vm18283_vm4, %v16166_v38 }
0x1fd7   :  { %14928 = vmatprep.subr.msk.mxu0 %vm21641_vm2, %v17743_v14  ;;  %vm21644_vm2 = vmmov %vm21620_vm11 }
0x1fd9   :  { %14910 = vmatmul.mubr.msk.f32.vlgmr.msra.gmra.mrb[100].mxu0 %vm1627_vm5, %v19886_v20 }
0x1fda   :  { %14929 = vmatpush3.msk.msra.mxu0 %vm21642_vm1, %v17743_v14  ;;  %vm21645_vm1 = vmmov %vm21644_vm2 }
0x1fdb   :  { %16197 = vmatprep.subr.bf16.mxu0 %v18766_v43 }
0x20ac   :  { %v14911_v26 = vpop.f32.mrb[100].mxu0 }
0x20ad   :  { %v5642_v63 = vadd.f32 1e-16, %v14911_v26  ;;  %v5636_v42 = vpop.f32.mrb[101].mxu0 }
0x20ae   :  { %v5637_v30 = vadd.f32 1e-16, %v5636_v42 }
0x20b0   :  { %v16172_v16 = vpack.c.bf16 %v5642_v63, %v5637_v30 }
0x20b2   :  { %16174 = vmatprep.subr.msk.bf16.mxu1 %vm18283_vm4, %v16172_v16 }
0x20b3   :  { %16177 = vmatpush3.bf16.msk.msra.mxu1 %vm18283_vm4, %v16172_v16 }
0x20b6   :  { %14917 = vmatmul.mubr.msk.f32.vlgmr.msra.gmra.mrb[88].mxu1 %vm818_vm0, %v19814_v11 }
0x20b7   :  { %14919 = vmatprep.mubr.msk.f32.mxu1 %vm818_vm0, %v19819_v18 }
0x20ba   :  { %14920 = vmatmul.mubr.msk.f32.gmra.mrb[90].mxu1 %vm818_vm0, %v19824_v32 }
0x20bb   :  { %14922 = vmatprep.mubr.msk.f32.mxu1 %vm818_vm0, %v19829_v34 }
0x20be   :  { %14923 = vmatmul.mubr.msk.f32.gmra.mrb[92].mxu1 %vm818_vm0, %v19834_v29 }
0x20bf   :  { %14925 = vmatprep.mubr.msk.f32.mxu1 %vm818_vm0, %v19839_v25 }
0x20c2   :  { %14926 = vmatmul.mubr.msk.f32.gmra.mrb[94].mxu1 %vm818_vm0, %v19844_v62 }
0x20c3   :  { %14958 = vmatprep.mubr.msk.f32.mxu1 %vm1627_vm5, %v19849_v24 }
0x2189   :  { %v14918_v4 = vpop.f32.mrb[88].mxu1 }
0x218a   :  { %17250 = vrcp.f32 %v14918_v4  ;;  %v5714_v51 = vpop.f32.mrb[89].mxu1 }
0x218b   :  { %17252 = vrcp.f32 %v5714_v51 }
0x218d   :  { %v14921_v28 = vpop.f32.mrb[90].mxu1 }
0x218e   :  { %17254 = vrcp.f32 %v14921_v28  ;;  %v5724_v17 = vpop.f32.mrb[91].mxu1 }
0x218f   :  { %17256 = vrcp.f32 %v5724_v17 }
0x2191   :  { %v14924_v6 = vpop.f32.mrb[92].mxu1 }
0x2192   :  { %17258 = vrcp.f32 %v14924_v6  ;;  %v5734_v59 = vpop.f32.mrb[93].mxu1 }
0x2193   :  { %17260 = vrcp.f32 %v5734_v59 }
0x2194   :  { %v17251_v50 = vpop.eup %17250 }
0x2195   :  { %v17253_v22 = vpop.eup %17252  ;;  %v14927_v52 = vpop.f32.mrb[94].mxu1  ;;  %v5762_v24 = vmul.f32 %v17251_v50, %v19861_v39 }
0x2196   :  { %17262 = vrcp.f32 %v14927_v52  ;;  %v5744_v54 = vpop.f32.mrb[95].mxu1  ;;  %v5761_v44 = vmul.f32 %v17253_v22, %v17237_v8 }
0x2197   :  { %17264 = vrcp.f32 %v5744_v54 }
0x2198   :  { %v17255_v33 = vpop.eup %17254  ;;  %14930 = vmatprep.mubr.msk.f32.mxu0 %vm21620_vm11, %v5761_v44  ;;  %vm21646_vm11 = vmmov %vm21645_vm1 }
0x2199   :  { %v17257_v38 = vpop.eup %17256  ;;  %14931 = vmatmul.mubr.msk.f32.vlgmr.msra.gmra.mrb[102].mxu0 %vm21643_vm15, %v5762_v24  ;;  %v5764_v26 = vmul.f32 %v17255_v33, %v19864_v21  ;;  %vm21647_vm15 = vmmov %vm21645_vm1  ;;  %v13199_v33 = vld [vmem:[%s18009_s30 + $0x78] sm:$0xff] }
0x219a   :  { %v5763_v14 = vmul.f32 %v17257_v38, %v17241_v7  ;;  %16199 = vmatpush3.bf16.msra.mxu0 %v18766_v43 }
0x219b   :  { %16201 = vmatprep.subr.bf16.mxu0 %v18769_v55 }
0x219c   :  { %v17259_v63 = vpop.eup %17258  ;;  %14933 = vmatprep.mubr.msk.f32.mxu0 %vm21644_vm2, %v5763_v14  ;;  %vm21648_vm2 = vmmov %vm21645_vm1 }
0x219d   :  { %v17261_v8 = vpop.eup %17260  ;;  %14934 = vmatmul.mubr.msk.f32.gmra.mrb[104].mxu0 %vm21645_vm1, %v5764_v26  ;;  %v5766_v42 = vmul.f32 %v17259_v63, %v19867_v12  ;;  %v21650_v63 = vld [vmem:[#allocation43_spill] sm:$0xff] }
0x219e   :  { %v5765_v39 = vmul.f32 %v17261_v8, %v19869_v9  ;;  %16203 = vmatpush3.bf16.msra.mxu0 %v18769_v55  ;;  %v21651_v8 = vld [vmem:[#allocation45_spill] sm:$0xff] }
0x219f   :  { %16205 = vmatprep.subr.bf16.mxu0 %v18776_v35 }
0x21a0   :  { %v17263_v7 = vpop.eup %17262  ;;  %14936 = vmatprep.mubr.msk.f32.mxu0 %vm21646_vm11, %v5765_v39  ;;  %v21652_v39 = vld [vmem:[#allocation51_spill] sm:$0xff]  ;;  %vm21668_vm11 = vcmask 1043459  }
0x21a1   :  { %v17265_v21 = vpop.eup %17264  ;;  %14937 = vmatmul.mubr.msk.f32.gmra.mrb[106].mxu0 %vm21647_vm15, %v5766_v42  ;;  %v5768_v16 = vmul.f32 %v17263_v7, %v19873_v49  ;;  %v21653_v42 = vld [vmem:[#allocation44_spill] sm:$0xff]  ;;  %v21654_v7 = vld [vmem:[#allocation47_spill] sm:$0xff]  ;;  %vm21669_vm15 = vcmask 1043456  }
0x21a2   :  { %v5767_v30 = vmul.f32 %v17265_v21, %v19875_v41  ;;  %16207 = vmatpush3.bf16.msra.mxu0 %v18776_v35  ;;  %v21655_v21 = vld [vmem:[#allocation52_spill] sm:$0xff] }
0x21a3   :  { %16209 = vmatprep.subr.bf16.mxu0 %v18782_v45 }
0x21a4   :  { %14939 = vmatprep.mubr.msk.f32.mxu0 %vm21648_vm2, %v5767_v30  ;;  %v21656_v30 = vld [vmem:[#allocation46_spill] sm:$0xff]  ;;  %vm21670_vm2 = vmmov %vm21669_vm15 }
0x21a5   :  { %14940 = vmatmul.mubr.msk.f32.gmra.mrb[108].mxu0 %vm21645_vm1, %v5768_v16  ;;  %v21657_v16 = vld [vmem:[#allocation49_spill] sm:$0xff] }
0x21a6   :  { %16211 = vmatpush3.bf16.msra.mxu0 %v18782_v45 }
0x21a7   :  { %16213 = vmatprep.subr.bf16.mxu0 %v18788_v37 }
0x21aa   :  { %16215 = vmatpush3.bf16.msra.mxu0 %v18788_v37 }
0x21ab   :  { %16217 = vmatprep.subr.bf16.mxu0 %v18794_v5 }
0x21ae   :  { %16219 = vmatpush3.bf16.msra.mxu0 %v18794_v5 }
0x21af   :  { %16221 = vmatprep.subr.bf16.mxu0 %v18800_v19 }
0x21b2   :  { %16223 = vmatpush3.bf16.msra.mxu0 %v18800_v19 }
0x21b3   :  { %16225 = vmatprep.subr.bf16.mxu0 %v18806_v36 }
0x21b6   :  { %16227 = vmatpush3.bf16.msra.mxu0 %v18806_v36 }
0x226c   :  { %v14932_v12 = vpop.f32.mrb[102].mxu0 }
0x226d   :  { %v5899_v9 = vmul.f32 %v14932_v12, %v19602_v57  ;;  %v5859_v49 = vpop.f32.mrb[103].mxu0  ;;  %v21658_v12 = vld [vmem:[#allocation53_spill] sm:$0xff] }
0x226e   :  { %v5898_v41 = vmul.f32 %v5859_v49, %v19614_v31  ;;  %v21660_v49 = vld [vmem:[#allocation54_spill] sm:$0xff] }
0x2270   :  { %v16178_v4 = vpack.c.bf16 %v5899_v9, %v5898_v41  ;;  %v14935_v51 = vpop.f32.mrb[104].mxu0  ;;  %v21659_v9 = vld [vmem:[#allocation48_spill] sm:$0xff]  ;;  %v21661_v41 = vld [vmem:[#allocation55_spill] sm:$0xff] }
0x2271   :  { %v5901_v28 = vmul.f32 %v14935_v51, %v19625_v10  ;;  %v5869_v17 = vpop.f32.mrb[105].mxu0  ;;  %v21663_v51 = vld [vmem:[#allocation57_spill] sm:$0xff] }
0x2272   :  { %v5900_v6 = vmul.f32 %v5869_v17, %v19627_v56  ;;  %16179 = vmatprep.subr.bf16.mxu1 %v16178_v4 }
0x2273   :  { %16181 = vmatpush3.bf16.msra.mxu1 %v16178_v4  ;;  %v21662_v4 = vld [vmem:[#allocation56_spill] sm:$0xff] }
0x2274   :  { %v16182_v59 = vpack.c.bf16 %v5901_v28, %v5900_v6  ;;  %v14938_v50 = vpop.f32.mrb[106].mxu0  ;;  %v13184_v28 = vld [vmem:[%s21606_s23 + $0x2] ss:$0 sm:$0xff] }
0x2275   :  { %v5903_v22 = vmul.f32 %v14938_v50, %v19634_v46  ;;  %v5879_v52 = vpop.f32.mrb[107].mxu0  ;;  %v13196_v46 = vld [vmem:[%s18009_s30 + $0x60] sm:$0xff] }
0x2276   :  { %v5902_v54 = vmul.f32 %v5879_v52, %v19639_v15  ;;  %16183 = vmatprep.subr.bf16.mxu1 %v16182_v59  ;;  %v13197_v15 = vld [vmem:[%s18009_s30 + $0x68] sm:$0xff] }
0x2277   :  { %16185 = vmatpush3.bf16.msra.mxu1 %v16182_v59 }
0x2278   :  { %v16186_v57 = vpack.c.bf16 %v5903_v22, %v5902_v54  ;;  %v14941_v31 = vpop.f32.mrb[108].mxu0 }
0x2279   :  { %v5905_v10 = vmul.f32 %v14941_v31, %v19649_v23  ;;  %v5889_v44 = vpop.f32.mrb[109].mxu0  ;;  %v16250_v23 = vpack.c.bf16 %v13197_v15, %v13196_v46  ;;  %v17745_v46 = vld [vmem:[%s21607_s28] ss:$0 sm:$0xff] }
0x227a   :  { %v5904_v56 = vmul.f32 %v5889_v44, %v19653_v2  ;;  %16187 = vmatprep.subr.bf16.mxu1 %v16186_v57  ;;  %v13198_v2 = vld [vmem:[%s18009_s30 + $0x70] sm:$0xff] }
0x227b   :  { %16189 = vmatpush3.bf16.msra.mxu1 %v16186_v57  ;;  %16251 = vmatprep.subr.bf16.mxu0 %v16250_v23  ;;  %v16254_v26 = vpack.c.bf16 %v13199_v33, %v13198_v2 }
0x227c   :  { %v16190_v24 = vpack.c.bf16 %v5905_v10, %v5904_v56 }
0x227e   :  { %16192 = vmatprep.subr.msk.bf16.mxu1 %vm18283_vm4, %v16190_v24 }
0x227f   :  { %16195 = vmatpush3.bf16.msk.msra.mxu1 %vm18283_vm4, %v16190_v24 }
0x2280   :  { %16229 = vmatprep.subr.bf16.mxu1 %v18829_v53 }
0x2282   :  { %14959 = vmatmul.mubr.msk.f32.vlgmr.msra.gmra.mrb[96].mxu1 %vm1627_vm5, %v19886_v20  ;;  %v21649_v20 = vld [vmem:[#allocation50_spill] sm:$0xff] }
0x2283   :  { %16231 = vmatpush3.bf16.msra.mxu1 %v18829_v53 }
0x2284   :  { %16233 = vmatprep.subr.bf16.mxu1 %v18869_v48 }
0x2287   :  { %16235 = vmatpush3.bf16.msra.mxu1 %v18869_v48 }
0x2288   :  { %16238 = vmatprep.subr.msk.bf16.mxu1 %vm18905_vm12, %v18911_v3 }
0x2355   :  { %v14960_v38 = vpop.f32.mrb[96].mxu1 }
0x2356   :  { %v5975_v14 = vpop.f32.mrb[97].mxu1 }
0x2357   :  { %14993 = vmatprep.mubr.f32.mxu0 %v5975_v14 }
0x2358   :  { %14994 = vmatmul.mubr.f32.vlgmr.msra.gmra.mrb[110].mxu0 %v14960_v38 }
0x2359   :  { %16253 = vmatpush3.bf16.msra.mxu0 %v16250_v23  ;;  %15033 = vmatprep.mubr.msk.f32.mxu0 %vm603_vm7, %v18244_v1 }
0x235a   :  { %16255 = vmatprep.subr.bf16.mxu0 %v16254_v26 }
0x235d   :  { %16257 = vmatpush3.bf16.msra.mxu0 %v16254_v26 }
0x235e   :  { %16271 = vmatprep.subr.bf16.mxu0 %v21649_v20 }
0x2360   :  { %15034 = vmatmul.mubr.msk.f32.vlgmr.msra.gmra.mrb[112].mxu0 %vm603_vm7, %v21650_v63 }
0x2361   :  { %15036 = vmatprep.mubr.msk.f32.mxu0 %vm603_vm7, %v21651_v8  ;;  %16273 = vmatpush3.bf16.msra.mxu0 %v21649_v20 }
0x2362   :  { %16275 = vmatprep.subr.bf16.mxu0 %v21652_v39 }
0x2364   :  { %15037 = vmatmul.mubr.msk.f32.gmra.mrb[114].mxu0 %vm603_vm7, %v21653_v42 }
0x2365   :  { %15039 = vmatprep.mubr.msk.f32.mxu0 %vm603_vm7, %v21654_v7  ;;  %16277 = vmatpush3.bf16.msra.mxu0 %v21652_v39 }
0x2366   :  { %16279 = vmatprep.subr.bf16.mxu0 %v21655_v21 }
0x2368   :  { %15040 = vmatmul.mubr.msk.f32.gmra.mrb[116].mxu0 %vm603_vm7, %v21656_v30 }
0x2369   :  { %15042 = vmatprep.mubr.msk.f32.mxu0 %vm603_vm7, %v21657_v16  ;;  %16281 = vmatpush3.bf16.msra.mxu0 %v21655_v21 }
0x236a   :  { %16283 = vmatprep.subr.bf16.mxu0 %v21658_v12 }
0x236c   :  { %15043 = vmatmul.mubr.msk.f32.gmra.mrb[118].mxu0 %vm603_vm7, %v21659_v9 }
0x236d   :  { %16285 = vmatpush3.bf16.msra.mxu0 %v21658_v12 }
0x236e   :  { %16287 = vmatprep.subr.bf16.mxu0 %v21660_v49 }
0x2371   :  { %16289 = vmatpush3.bf16.msra.mxu0 %v21660_v49  ;;  %v21664_v49 = vld [vmem:[#allocation58_spill] sm:$0xff] }
0x2372   :  { %16291 = vmatprep.subr.bf16.mxu0 %v21661_v41 }
0x2375   :  { %16293 = vmatpush3.bf16.msra.mxu0 %v21661_v41 }
0x2376   :  { %16295 = vmatprep.subr.bf16.mxu0 %v21662_v4 }
0x2379   :  { %16297 = vmatpush3.bf16.msra.mxu0 %v21662_v4 }
0x237a   :  { %16299 = vmatprep.subr.bf16.mxu0 %v21663_v51 }
0x237d   :  { %16301 = vmatpush3.bf16.msra.mxu0 %v21663_v51 }
0x242b   :  { %v14995_v17 = vpop.f32.mrb[110].mxu0 }
0x242c   :  { %v6058_v6 = vpop.f32.mrb[111].mxu0  ;;  %v6064_v50 = vadd.f32 %v14995_v17, %v13184_v28 }
0x242d   :  { %v6059_v59 = vadd.f32 %v13184_v28, %v6058_v6 }
0x242f   :  { %15004 = vmatprep.mubr.msk.f32.mxu1 %vm603_vm7, %v6059_v59 }
0x2430   :  { %15005 = vmatmul.mubr.msk.f32.vlgmr.msra.gmra.mrb[98].mxu1 %vm603_vm7, %v6064_v50 }
0x2431   :  { %16241 = vmatpush3.bf16.msk.msra.mxu1 %vm18905_vm12, %v18911_v3 }
0x2433   :  { %v20004_v22 = vpop.f32.mrb[112].mxu0 }
0x2434   :  { %v20006_v52 = vpop.f32.mrb[113].mxu0 }
0x2437   :  { %v20008_v54 = vpop.f32.mrb[114].mxu0 }
0x2438   :  { %v20010_v57 = vpop.f32.mrb[115].mxu0 }
0x243b   :  { %v20012_v31 = vpop.f32.mrb[116].mxu0 }
0x243c   :  { %v20014_v10 = vpop.f32.mrb[117].mxu0 }
0x243f   :  { %v20016_v44 = vpop.f32.mrb[118].mxu0 }
0x2440   :  { %v20018_v56 = vpop.f32.mrb[119].mxu0 }
0x2503   :  { %v15006_v24 = vpop.f32.mrb[98].mxu1 }
0x2504   :  { %v6145_v15 = vadd.f32 %v17745_v46, %v15006_v24  ;;  %v6139_v23 = vpop.f32.mrb[99].mxu1 }
0x2505   :  { %v6140_v2 = vadd.f32 %v17745_v46, %v6139_v23 }
0x2506   :  { %v6151_v33 = vsel %vm2438_vm13, %v6145_v15, -inf }
0x2507   :  { %6152 = vmax.xlane.f32.xlu0 %v6151_v33  ;;  %v6148_v38 = vsel %vm2434_vm14, %v6140_v2, -inf }
0x2508   :  { %6149 = vmax.xlane.f32.xlu1 %v6148_v38 }
0x2594   :  { %v6153_v14 = vpop.xlane.xlu0 %6152 }
0x2595   :  { %v6155_v26 = vsub.f32 %v6145_v15, %v6153_v14  ;;  %v6150_v28 = vpop.xlane.xlu1 %6149 }
0x2596   :  { %v6154_v17 = vsub.f32 %v6140_v2, %v6150_v28  ;;  %v13191_v28 = vld [vmem:[%s18004_s24 + $0x68] sm:$0xff] }
0x2597   :  { %v6158_v6 = vmul.f32 1.442695, %v6155_v26  ;;  %v13190_v26 = vld [vmem:[%s18004_s24 + $0x60] sm:$0xff] }
0x2598   :  { %v6156_v51 = vmul.f32 1.442695, %v6154_v17  ;;  %v13192_v17 = vld [vmem:[%s18004_s24 + $0x70] sm:$0xff] }
0x259a   :  { %17266 = vpow2.f32 %v6156_v51 }
0x259b   :  { %17268 = vpow2.f32 %v6158_v6  ;;  %v16242_v6 = vpack.c.bf16 %v13191_v28, %v13190_v26  ;;  %v21666_v26 = vld [vmem:[#allocation59_spill] sm:$0xff] }
0x259d   :  { %16243 = vmatprep.subr.bf16.mxu1 %v16242_v6 }
0x25a4   :  { %v17267_v4 = vpop.eup %17266 }
0x25a5   :  { %v6160_v24 = vsel %vm2434_vm14, %v17267_v4, 0.0  ;;  %v17269_v46 = vpop.eup %17268 }
0x25a6   :  { %6161 = vadd.xlane.f32.xlu0 %v6160_v24  ;;  %v6163_v23 = vsel %vm2438_vm13, %v17269_v46, 0.0  ;;  %v13193_v24 = vld [vmem:[%s18004_s24 + $0x78] sm:$0xff] }
0x25a7   :  { %v16246_v41 = vpack.c.bf16 %v13193_v24, %v13192_v17  ;;  %v17754_v17 = vld [vmem:[%s17984_s3 + $0x30] sm:$0xff] }
0x25aa   :  { %6164 = vadd.xlane.f32.xlu0 %v6163_v23 }
0x2633   :  { %v6162_v33 = vpop.xlane.xlu0 %6161 }
0x2634   :  { %17270 = vrcp.f32 %v6162_v33 }
0x2637   :  { %v6165_v15 = vpop.xlane.xlu0 %6164 }
0x2638   :  { %17272 = vrcp.f32 %v6165_v15 }
0x263e   :  { %v17271_v2 = vpop.eup %17270 }
0x263f   :  { %v6168_v38 = vmul.f32 %v17271_v2, %v17267_v4 }
0x2641   :  { %15011 = vmatprep.mubr.msk.f32.mxu1 %vm2434_vm14, %v6168_v38  ;;  %v17746_v38 = vld [vmem:[%s21611_s0] ss:$0 sm:$0xff] }
0x2642   :  { %v17273_v51 = vpop.eup %17272 }
0x2643   :  { %v6169_v14 = vmul.f32 %v17273_v51, %v17269_v46 }
0x2645   :  { %15012 = vmatmul.mubr.msk.f32.vlgmr.msra.gmra.mrb[100].mxu1 %vm2434_vm14, %v6169_v14 }
0x2646   :  { %16245 = vmatpush3.bf16.msra.mxu1 %v16242_v6 }
0x2647   :  { %16247 = vmatprep.subr.bf16.mxu1 %v16246_v41 }
0x264a   :  { %16249 = vmatpush3.bf16.msra.mxu1 %v16246_v41  ;;  %v20043_v41 = vld [vmem:[%s17979_s29] sm:$0xff] }
0x2718   :  { %v15013_v23 = vpop.f32.mrb[100].mxu1 }
0x2719   :  { %v6248_v4 = vadd.f32 1.0, %v15013_v23  ;;  %v6242_v33 = vpop.f32.mrb[101].mxu1 }
0x271a   :  { %v6243_v15 = vadd.f32 1.0, %v6242_v33 }
0x271b   :  { %v6252_v2 = vmul.f32 %v6248_v4, %v6064_v50 }
0x271c   :  { %v6251_v46 = vmul.f32 %v6243_v15, %v6059_v59 }
0x271d   :  { %v6254_v51 = vadd.f32 %v17746_v38, %v6252_v2 }
0x271e   :  { %v6253_v14 = vadd.f32 %v17746_v38, %v6251_v46 }
0x271f   :  { %v20036_v28 = vadd.f32 %v6254_v51, %v21666_v26 }
0x2720   :  { %v20033_v9 = vadd.f32 %v6253_v14, %v21664_v49 }
0x2721   :  { %21667 = vst [vmem:[#allocation59_spill] sm:$0xff] %v20036_v28 }
0x2722   :  { %21665 = vst [vmem:[#allocation58_spill] sm:$0xff] %v20033_v9  ;;  %15022 = vmatprep.mubr.msk.f32.mxu1 %vm603_vm7, %v20033_v9 }
0x2723   :  { %15023 = vmatmul.mubr.msk.f32.vlgmr.msra.gmra.mrb[102].mxu1 %vm603_vm7, %v20036_v28 }
0x2724   :  { %15049 = vmatprep.mubr.msk.f32.mxu1 %vm818_vm0, %v20043_v41 }
0x27f6   :  { %v15024_v59 = vpop.f32.mrb[102].mxu1 }
0x27f7   :  { %v6334_v50 = vpop.f32.mrb[103].mxu1 }
0x27f8   :  { %v16258_v49 = vpack.c.bf16 %v15024_v59, %v6334_v50 }
0x27fa   :  { %16260 = vmatprep.subr.msk.bf16.mxu1 %vm18283_vm4, %v16258_v49 }
0x27fb   :  { %16263 = vmatpush3.bf16.msk.msra.mxu1 %vm18283_vm4, %v16258_v49 }
0x27fc   :  { %16266 = vmatprep.subr.msk.bf16.mxu1 %vm18283_vm4, %v16258_v49 }
0x27fe   :  { %15050 = vmatmul.mubr.msk.f32.vlgmr.msra.gmra.mrb[104].mxu1 %vm818_vm0, %v19814_v11  ;;  %v17748_v11 = vld [vmem:[%s17984_s3] sm:$0xff] }
0x27ff   :  { %16269 = vmatpush3.bf16.msk.msra.mxu1 %vm18283_vm4, %v16258_v49  ;;  %15052 = vmatprep.mubr.msk.f32.mxu1 %vm818_vm0, %v19819_v18  ;;  %v17749_v18 = vld [vmem:[%s17984_s3 + $0x8] sm:$0xff] }
0x2802   :  { %15053 = vmatmul.mubr.msk.f32.gmra.mrb[106].mxu1 %vm818_vm0, %v19824_v32  ;;  %v17750_v32 = vld [vmem:[%s17984_s3 + $0x10] sm:$0xff] }
0x2803   :  { %15055 = vmatprep.mubr.msk.f32.mxu1 %vm818_vm0, %v19829_v34  ;;  %v17751_v34 = vld [vmem:[%s17984_s3 + $0x18] sm:$0xff] }
0x2806   :  { %15056 = vmatmul.mubr.msk.f32.gmra.mrb[108].mxu1 %vm818_vm0, %v19834_v29  ;;  %v17752_v29 = vld [vmem:[%s17984_s3 + $0x20] sm:$0xff] }
0x2807   :  { %15058 = vmatprep.mubr.msk.f32.mxu1 %vm818_vm0, %v19839_v25  ;;  %v17753_v25 = vld [vmem:[%s17984_s3 + $0x28] sm:$0xff] }
0x280a   :  { %15059 = vmatmul.mubr.msk.f32.gmra.mrb[110].mxu1 %vm818_vm0, %v19844_v62  ;;  %v17755_v62 = vld [vmem:[%s17984_s3 + $0x38] sm:$0xf] }
0x280b   :  { %15065 = vmatprep.mubr.msk.f32.mxu1 %vm818_vm0, %v17748_v11 }
0x280e   :  { %15066 = vmatmul.mubr.msk.f32.vlgmr.msra.gmra.mrb[112].mxu1 %vm818_vm0, %v17749_v18 }
0x280f   :  { %15068 = vmatprep.mubr.msk.f32.mxu1 %vm818_vm0, %v17750_v32 }
0x2812   :  { %15069 = vmatmul.mubr.msk.f32.gmra.mrb[114].mxu1 %vm818_vm0, %v17751_v34 }
0x2813   :  { %15071 = vmatprep.mubr.msk.f32.mxu1 %vm818_vm0, %v17752_v29 }
0x2816   :  { %15072 = vmatmul.mubr.msk.f32.gmra.mrb[116].mxu1 %vm818_vm0, %v17753_v25 }
0x2817   :  { %15074 = vmatprep.mubr.msk.f32.mxu1 %vm818_vm0, %v17754_v17 }
0x281a   :  { %15075 = vmatmul.mubr.msk.f32.gmra.mrb[118].mxu1 %vm818_vm0, %v17755_v62 }
0x281b   :  { %15123 = vmatprep.mubr.msk.f32.mxu1 %vm818_vm0, %v20043_v41 }
0x28d1   :  { %v15051_v6 = vpop.f32.mrb[104].mxu1 }
0x28d2   :  { %v20088_v24 = vadd.f32 %v15051_v6, %v20004_v22  ;;  %v6522_v23 = vpop.f32.mrb[105].mxu1 }
0x28d3   :  { %v20091_v4 = vadd.f32 %v6522_v23, %v20006_v52 }
0x28d4   :  { %v6570_v33 = vand.u32 2147483647, %v20088_v24 }
0x28d5   :  { %v6569_v15 = vand.u32 2147483647, %v20091_v4  ;;  %v15054_v2 = vpop.f32.mrb[106].mxu1 }
0x28d6   :  { %v20096_v46 = vadd.f32 %v15054_v2, %v20008_v54  ;;  %v6532_v38 = vpop.f32.mrb[107].mxu1  ;;  %v6578_v51 = vsub.f32 0.0, %v6570_v33 }
0x28d7   :  { %v20099_v14 = vadd.f32 %v6532_v38, %v20010_v57  ;;  %v6577_v26 = vsub.f32 0.0, %v6569_v15 }
0x28d8   :  { %v6572_v59 = vand.u32 2147483647, %v20096_v46  ;;  %v6587_v18 = vmul.f32 1.442695, %v6578_v51 }
0x28d9   :  { %v15057_v50 = vpop.f32.mrb[108].mxu1  ;;  %v6571_v34 = vand.u32 2147483647, %v20099_v14  ;;  %v6585_v29 = vmul.f32 1.442695, %v6577_v26 }
0x28da   :  { %v20103_v49 = vadd.f32 %v15057_v50, %v20012_v31  ;;  %v6542_v11 = vpop.f32.mrb[109].mxu1  ;;  %v6580_v25 = vsub.f32 0.0, %v6572_v59  ;;  %17274 = vpow2.f32 %v6587_v18 }
0x28db   :  { %v20106_v32 = vadd.f32 %v6542_v11, %v20014_v10  ;;  %v6579_v15 = vsub.f32 0.0, %v6571_v34  ;;  %17276 = vpow2.f32 %v6585_v29 }
0x28dc   :  { %v6574_v2 = vand.u32 2147483647, %v20103_v49  ;;  %v6591_v38 = vmul.f32 1.442695, %v6580_v25 }
0x28dd   :  { %v6573_v17 = vand.u32 2147483647, %v20106_v32  ;;  %v15060_v62 = vpop.f32.mrb[110].mxu1 }
0x28de   :  { %v20111_v6 = vadd.f32 %v15060_v62, %v20016_v44  ;;  %v6552_v23 = vpop.f32.mrb[111].mxu1  ;;  %v6582_v28 = vsub.f32 0.0, %v6574_v2  ;;  %17278 = vpow2.f32 %v6591_v38 }
0x28df   :  { %v20114_v33 = vadd.f32 %v6552_v23, %v20018_v56  ;;  %v6581_v51 = vsub.f32 0.0, %v6573_v17  ;;  %v6589_v23 = vmul.f32 1.442695, %v6579_v15 }
0x28e0   :  { %v6576_v26 = vand.u32 2147483647, %v20111_v6 }
0x28e1   :  { %v15067_v50 = vpop.f32.mrb[112].mxu1  ;;  %v6575_v62 = vand.u32 2147483647, %v20114_v33  ;;  %v6593_v29 = vmul.f32 1.442695, %v6581_v51  ;;  %17280 = vpow2.f32 %v6589_v23 }
0x28e2   :  { %v20119_v59 = vadd.f32 %v15067_v50, %v20004_v22  ;;  %v6699_v11 = vpop.f32.mrb[113].mxu1  ;;  %v6584_v17 = vsub.f32 0.0, %v6576_v26 }
0x28e3   :  { %v20123_v18 = vadd.f32 %v6699_v11, %v20006_v52  ;;  %v6583_v16 = vsub.f32 0.0, %v6575_v62  ;;  %v6595_v52 = vmul.f32 1.442695, %v6582_v28  ;;  %17282 = vpow2.f32 %v6593_v29 }
0x28e4   :  { %v6747_v34 = vand.u32 2147483647, %v20119_v59  ;;  %v17275_v2 = vpop.eup %17274  ;;  %v6599_v21 = vmul.f32 1.442695, %v6584_v17 }
0x28e5   :  { %v6746_v25 = vand.u32 2147483647, %v20123_v18  ;;  %v15070_v12 = vpop.f32.mrb[114].mxu1 }
0x28e6   :  { %v6755_v9 = vsub.f32 0.0, %v6747_v34  ;;  %v20128_v50 = vadd.f32 %v15070_v12, %v20008_v54  ;;  %v6709_v30 = vpop.f32.mrb[115].mxu1  ;;  %v17277_v34 = vpop.eup %17276 }
0x28e7   :  { %v6754_v22 = vsub.f32 0.0, %v6746_v25  ;;  %v20131_v15 = vadd.f32 %v6709_v30, %v20010_v57  ;;  %v6597_v25 = vmul.f32 1.442695, %v6583_v16  ;;  %v6602_v30 = vadd.f32 1.0, %v17275_v2 }
0x28e8   :  { %v6764_v11 = vmul.f32 1.442695, %v6755_v9  ;;  %v6749_v26 = vand.u32 2147483647, %v20128_v50  ;;  %v6601_v29 = vadd.f32 1.0, %v17277_v34  ;;  %v17279_v16 = vpop.eup %17278 }
0x28e9   :  { %v6762_v38 = vmul.f32 1.442695, %v6754_v22  ;;  %v15073_v51 = vpop.f32.mrb[116].mxu1  ;;  %v6748_v12 = vand.u32 2147483647, %v20131_v15 }
0x28ea   :  { %17284 = vpow2.f32 %v6764_v11  ;;  %v6719_v62 = vpop.f32.mrb[117].mxu1  ;;  %v20136_v54 = vadd.f32 %v15073_v51, %v20012_v31  ;;  %v6757_v57 = vsub.f32 0.0, %v6749_v26  ;;  %v6604_v26 = vadd.f32 1.0, %v17279_v16 }
0x28eb   :  { %v20139_v9 = vadd.f32 %v6719_v62, %v20014_v10  ;;  %17286 = vpow2.f32 %v6595_v52  ;;  %v6756_v28 = vsub.f32 0.0, %v6748_v12 }
0x28ec   :  { %17288 = vpow2.f32 %v6762_v38  ;;  %v6768_v17 = vmul.f32 1.442695, %v6757_v57  ;;  %v6751_v22 = vand.u32 2147483647, %v20136_v54 }
0x28ed   :  { %v15076_v23 = vpop.f32.mrb[118].mxu1  ;;  %17290 = vpow2.f32 %v6599_v21  ;;  %v6766_v11 = vmul.f32 1.442695, %v6756_v28  ;;  %v6750_v31 = vand.u32 2147483647, %v20139_v9  ;;  %v17281_v21 = vpop.eup %17280 }
0x28ee   :  { %17292 = vpow2.f32 %v6597_v25  ;;  %v20144_v51 = vadd.f32 %v15076_v23, %v20016_v44  ;;  %v6729_v10 = vpop.f32.mrb[119].mxu1  ;;  %v6759_v52 = vsub.f32 0.0, %v6751_v22  ;;  %v17283_v25 = vpop.eup %17282  ;;  %v6603_v28 = vadd.f32 1.0, %v17281_v21 }
0x28ef   :  { %17294 = vlog2.f32 %v6602_v30  ;;  %v20147_v2 = vadd.f32 %v6729_v10, %v20018_v56  ;;  %v6758_v38 = vsub.f32 0.0, %v6750_v31  ;;  %v6605_v31 = vadd.f32 1.0, %v17283_v25 }
0x28f0   :  { %17296 = vpow2.f32 %v6768_v17  ;;  %v6772_v62 = vmul.f32 1.442695, %v6759_v52  ;;  %v6753_v34 = vand.u32 2147483647, %v20144_v51 }
0x28f1   :  { %17298 = vpow2.f32 %v6766_v11  ;;  %v6770_v12 = vmul.f32 1.442695, %v6758_v38  ;;  %v6752_v56 = vand.u32 2147483647, %v20147_v2 }
0x28f2   :  { %17300 = vlog2.f32 %v6601_v29  ;;  %v6761_v44 = vsub.f32 0.0, %v6753_v34 }
0x28f3   :  { %17302 = vpow2.f32 %v6772_v62  ;;  %v6760_v16 = vsub.f32 0.0, %v6752_v56 }
0x28f4   :  { %v17285_v57 = vpop.eup %17284  ;;  %17304 = vpow2.f32 %v6770_v12  ;;  %v6776_v17 = vmul.f32 1.442695, %v6761_v44 }
0x28f5   :  { %v6779_v30 = vadd.f32 1.0, %v17285_v57  ;;  %v17287_v23 = vpop.eup %17286  ;;  %17306 = vlog2.f32 %v6604_v26  ;;  %v6774_v38 = vmul.f32 1.442695, %v6760_v16 }
0x28f6   :  { %v17289_v22 = vpop.eup %17288  ;;  %v6606_v52 = vadd.f32 1.0, %v17287_v23 }
0x28f7   :  { %17308 = vlog2.f32 %v6779_v30  ;;  %v17291_v11 = vpop.eup %17290  ;;  %v6778_v10 = vadd.f32 1.0, %v17289_v22 }
0x28f8   :  { %17310 = vpow2.f32 %v6776_v17  ;;  %v17293_v29 = vpop.eup %17292  ;;  %v6608_v56 = vadd.f32 1.0, %v17291_v11 }
0x28f9   :  { %17312 = vlog2.f32 %v6603_v28  ;;  %v17295_v62 = vpop.eup %17294  ;;  %v6607_v12 = vadd.f32 1.0, %v17293_v29  ;;  %v6739_v29 = vmax.f32 %v20119_v59, 0.0 }
0x28fa   :  { %17314 = vlog2.f32 %v6778_v10  ;;  %v17297_v21 = vpop.eup %17296 }
0x28fb   :  { %17316 = vpow2.f32 %v6774_v38  ;;  %v17299_v34 = vpop.eup %17298  ;;  %v6781_v26 = vadd.f32 1.0, %v17297_v21  ;;  %v6561_v21 = vmax.f32 %v20091_v4, 0.0  ;;  %v6564_v4 = vmax.f32 %v20096_v46, 0.0 }
0x28fc   :  { %17318 = vlog2.f32 %v6605_v31  ;;  %v17301_v57 = vpop.eup %17300  ;;  %v6780_v44 = vadd.f32 1.0, %v17299_v34  ;;  %v6612_v31 = vmul.f32 0.6931472, %v17295_v62  ;;  %v6738_v62 = vmax.f32 %v20123_v18, 0.0 }
0x28fd   :  { %17320 = vlog2.f32 %v6606_v52  ;;  %v17303_v30 = vpop.eup %17302  ;;  %v6610_v16 = vmul.f32 0.6931472, %v17301_v57  ;;  %v6565_v18 = vmax.f32 %v20106_v32, 0.0  ;;  %v6740_v32 = vmax.f32 %v20131_v15, 0.0 }
0x28fe   :  { %17322 = vlog2.f32 %v6781_v26  ;;  %v17305_v25 = vpop.eup %17304  ;;  %v6783_v17 = vadd.f32 1.0, %v17303_v30  ;;  %v20157_v30 = vld [vmem:[%s18019_s12 + $0x3] ss:$0 sm:$0xff] }
0x28ff   :  { %17324 = vlog2.f32 %v6780_v44  ;;  %v17307_v28 = vpop.eup %17306  ;;  %v6782_v23 = vadd.f32 1.0, %v17305_v25  ;;  %v6625_v44 = vadd.f32 %v6610_v16, %v6561_v21  ;;  %v6566_v16 = vmax.f32 %v20103_v49, 0.0 }
0x2900   :  { %17326 = vlog2.f32 %v6607_v12  ;;  %v6562_v12 = vmax.f32 %v20088_v24, 0.0  ;;  %v6616_v24 = vmul.f32 0.6931472, %v17307_v28 }
0x2901   :  { %v17309_v22 = vpop.eup %17308  ;;  %17328 = vlog2.f32 %v6783_v17 }
0x2902   :  { %v17311_v10 = vpop.eup %17310  ;;  %v6789_v38 = vmul.f32 0.6931472, %v17309_v22  ;;  %17330 = vlog2.f32 %v6782_v23  ;;  %v6626_v17 = vadd.f32 %v6612_v31, %v6562_v12  ;;  %v20161_v23 = vld [vmem:[%s18014_s6 + $0x3] ss:$0 sm:$0xff]  ;;  %v6628_v7 = vadd.f32 %v6616_v24, %v6564_v4 }
0x2903   :  { %v17313_v52 = vpop.eup %17312  ;;  %17332 = vlog2.f32 %v6608_v56  ;;  %v6785_v11 = vadd.f32 1.0, %v17311_v10  ;;  %v6818_v28 = vmul.f32 %v20161_v23, %v6625_v44  ;;  %v6743_v44 = vmax.f32 %v20136_v54, 0.0 }
0x2904   :  { %v17315_v34 = vpop.eup %17314  ;;  %v20154_v26 = vadd.f32 %v6789_v38, %v6739_v29  ;;  %v6614_v56 = vmul.f32 0.6931472, %v17313_v52  ;;  %v6563_v29 = vmax.f32 %v20099_v14, 0.0  ;;  %v6819_v12 = vmul.f32 %v20161_v23, %v6626_v17 }
0x2905   :  { %v17317_v57 = vpop.eup %17316  ;;  %v6787_v59 = vmul.f32 0.6931472, %v17315_v34  ;;  %17334 = vlog2.f32 %v6785_v11  ;;  %v6741_v11 = vmax.f32 %v20128_v50, 0.0  ;;  %v6742_v17 = vmax.f32 %v20139_v9, 0.0 }
0x2906   :  { %v17319_v25 = vpop.eup %17318  ;;  %v6784_v22 = vadd.f32 1.0, %v17317_v57  ;;  %v6835_v31 = vmul.f32 %v20157_v30, %v20154_v26  ;;  %v6627_v57 = vadd.f32 %v6614_v56, %v6563_v29  ;;  %v6567_v4 = vmax.f32 %v20114_v33, 0.0 }
0x2907   :  { %v17321_v10 = vpop.eup %17320  ;;  %v20166_v38 = vadd.f32 %v6787_v59, %v6738_v62  ;;  %v6618_v52 = vmul.f32 0.6931472, %v17319_v25  ;;  %v6821_v9 = vmul.f32 %v20161_v23, %v6628_v7 }
0x2908   :  { %v17323_v21 = vpop.eup %17322  ;;  %17336 = vlog2.f32 %v6784_v22  ;;  %v6620_v42 = vmul.f32 0.6931472, %v17321_v10  ;;  %v6820_v24 = vmul.f32 %v20161_v23, %v6627_v57 }
0x2909   :  { %v17325_v46 = vpop.eup %17324  ;;  %v6793_v34 = vmul.f32 0.6931472, %v17323_v21  ;;  %v6834_v14 = vmul.f32 %v20157_v30, %v20166_v38  ;;  %v6843_v21 = vadd.f32 %v6835_v31, %v6819_v12  ;;  %v6629_v20 = vadd.f32 %v6618_v52, %v6565_v18 }
0x290a   :  { %v17327_v49 = vpop.eup %17326  ;;  %v6791_v62 = vmul.f32 0.6931472, %v17325_v46  ;;  %v6630_v31 = vadd.f32 %v6620_v42, %v6566_v16  ;;  %v6745_v52 = vmax.f32 %v20144_v51, 0.0  ;;  %v6568_v16 = vmax.f32 %v20111_v6, 0.0 }
0x290b   :  { %v17329_v59 = vpop.eup %17328  ;;  %v20177_v50 = vadd.f32 %v6793_v34, %v6741_v11  ;;  %v6842_v22 = vadd.f32 %v6834_v14, %v6818_v28  ;;  %v6622_v18 = vmul.f32 0.6931472, %v17327_v49  ;;  %v6822_v28 = vmul.f32 %v20161_v23, %v6629_v20 }
0x290c   :  { %v17331_v25 = vpop.eup %17330  ;;  %v20179_v39 = vadd.f32 %v6791_v62, %v6740_v32  ;;  %v6797_v8 = vmul.f32 0.6931472, %v17329_v59  ;;  %v6823_v20 = vmul.f32 %v20161_v23, %v6630_v31 }
0x290d   :  { %v17333_v63 = vpop.eup %17332  ;;  %v6795_v56 = vmul.f32 0.6931472, %v17331_v25  ;;  %15109 = vmatprep.mubr.f32.mxu0 %v6842_v22  ;;  %v6837_v15 = vmul.f32 %v20157_v30, %v20177_v50  ;;  %v6631_v7 = vadd.f32 %v6622_v18, %v6567_v4 }
0x290e   :  { %v20186_v10 = vadd.f32 %v6797_v8, %v6743_v44  ;;  %15110 = vmatmul.mubr.f32.vlgmr.msra.gmra.mrb[120].mxu0 %v6843_v21  ;;  %v6836_v54 = vmul.f32 %v20157_v30, %v20179_v39  ;;  %v6624_v46 = vmul.f32 0.6931472, %v17333_v63  ;;  %v6744_v63 = vmax.f32 %v20147_v2, 0.0 }
0x290f   :  { %v17335_v29 = vpop.eup %17334  ;;  %v20191_v11 = vadd.f32 %v6795_v56, %v6742_v17  ;;  %v6845_v8 = vadd.f32 %v6837_v15, %v6821_v9  ;;  %v6824_v6 = vmul.f32 %v20161_v23, %v6631_v7 }
0x2910   :  { %v6801_v34 = vmul.f32 0.6931472, %v17335_v29  ;;  %v6844_v33 = vadd.f32 %v6836_v54, %v6820_v24  ;;  %v6839_v12 = vmul.f32 %v20157_v30, %v20186_v10  ;;  %v6632_v32 = vadd.f32 %v6624_v46, %v6568_v16 }
0x2911   :  { %v6838_v14 = vmul.f32 %v20157_v30, %v20191_v11 }
0x2912   :  { %v17337_v42 = vpop.eup %17336  ;;  %v20201_v49 = vadd.f32 %v6801_v34, %v6745_v52  ;;  %15112 = vmatprep.mubr.f32.mxu0 %v6844_v33  ;;  %v6847_v59 = vadd.f32 %v6839_v12, %v6823_v20  ;;  %v6825_v25 = vmul.f32 %v20161_v23, %v6632_v32 }
0x2913   :  { %v6799_v51 = vmul.f32 0.6931472, %v17337_v42  ;;  %15113 = vmatmul.mubr.f32.gmra.mrb[122].mxu0 %v6845_v8  ;;  %v6846_v57 = vadd.f32 %v6838_v14, %v6822_v28 }
0x2914   :  { %v6841_v22 = vmul.f32 %v20157_v30, %v20201_v49 }
0x2915   :  { %v20205_v62 = vadd.f32 %v6799_v51, %v6744_v63  ;;  %15115 = vmatprep.mubr.f32.mxu0 %v6846_v57 }
0x2916   :  { %v6849_v44 = vadd.f32 %v6841_v22, %v6825_v25 }
0x2917   :  { %15116 = vmatmul.mubr.f32.gmra.mrb[124].mxu0 %v6847_v59  ;;  %v6840_v2 = vmul.f32 %v20157_v30, %v20205_v62 }
0x2919   :  { %v6848_v21 = vadd.f32 %v6840_v2, %v6824_v6 }
0x291b   :  { %15118 = vmatprep.mubr.f32.mxu0 %v6848_v21 }
0x291c   :  { %15119 = vmatmul.mubr.f32.gmra.mrb[126].mxu0 %v6849_v44 }
0x291d   :  { %15158 = vmatprep.mubr.msk.f32.mxu0 %vm818_vm0, %v20043_v41 }
0x29e1   :  { %v20215_v17 = vpop.f32.mrb[120].mxu0 }
0x29e2   :  { %v6964_v56 = vand.u32 2147483647, %v20215_v17  ;;  %v20218_v15 = vpop.f32.mrb[121].mxu0 }
0x29e3   :  { %v6963_v4 = vand.u32 2147483647, %v20218_v15 }
0x29e4   :  { %v6972_v24 = vsub.f32 0.0, %v6964_v56 }
0x29e5   :  { %v6971_v54 = vsub.f32 0.0, %v6963_v4 }
0x29e6   :  { %v6981_v30 = vmul.f32 1.442695, %v6972_v24  ;;  %v20221_v29 = vpop.f32.mrb[122].mxu0 }
0x29e7   :  { %v6979_v23 = vmul.f32 1.442695, %v6971_v54  ;;  %v6966_v31 = vand.u32 2147483647, %v20221_v29  ;;  %v20224_v18 = vpop.f32.mrb[123].mxu0 }
0x29e8   :  { %17338 = vpow2.f32 %v6981_v30  ;;  %v6965_v41 = vand.u32 2147483647, %v20224_v18 }
0x29e9   :  { %17340 = vpow2.f32 %v6979_v23  ;;  %v6974_v9 = vsub.f32 0.0, %v6966_v31 }
0x29ea   :  { %v6973_v46 = vsub.f32 0.0, %v6965_v41  ;;  %v20227_v52 = vpop.f32.mrb[124].mxu0 }
0x29eb   :  { %v6985_v34 = vmul.f32 1.442695, %v6974_v9  ;;  %v6968_v33 = vand.u32 2147483647, %v20227_v52  ;;  %v20230_v8 = vpop.f32.mrb[125].mxu0 }
0x29ec   :  { %v6983_v28 = vmul.f32 1.442695, %v6973_v46  ;;  %v6967_v14 = vand.u32 2147483647, %v20230_v8 }
0x29ed   :  { %17342 = vpow2.f32 %v6985_v34  ;;  %v6976_v12 = vsub.f32 0.0, %v6968_v33  ;;  %v6956_v34 = vmax.f32 %v20215_v17, 0.0 }
0x29ee   :  { %17344 = vpow2.f32 %v6983_v28  ;;  %v6975_v42 = vsub.f32 0.0, %v6967_v14  ;;  %v20241_v14 = vld [vmem:[%s21600_s5 + $0x3] ss:$0 sm:$0xff] }
0x29ef   :  { %v6989_v16 = vmul.f32 1.442695, %v6976_v12  ;;  %v20233_v63 = vpop.f32.mrb[126].mxu0  ;;  %v6955_v12 = vmax.f32 %v20218_v15, 0.0 }
0x29f0   :  { %v6987_v7 = vmul.f32 1.442695, %v6975_v42  ;;  %v6970_v51 = vand.u32 2147483647, %v20233_v63  ;;  %v20236_v57 = vpop.f32.mrb[127].mxu0 }
0x29f1   :  { %17346 = vpow2.f32 %v6989_v16  ;;  %v6969_v20 = vand.u32 2147483647, %v20236_v57 }
0x29f2   :  { %v17339_v32 = vpop.eup %17338  ;;  %17348 = vpow2.f32 %v6987_v7  ;;  %v6978_v59 = vsub.f32 0.0, %v6970_v51 }
0x29f3   :  { %v17341_v22 = vpop.eup %17340  ;;  %v6996_v6 = vadd.f32 1.0, %v17339_v32  ;;  %v6977_v2 = vsub.f32 0.0, %v6969_v20  ;;  %v20245_v20 = vld [vmem:[%s21601_s9 + $0x3] ss:$0 sm:$0xff] }
0x29f4   :  { %v6995_v25 = vadd.f32 1.0, %v17341_v22  ;;  %v6993_v21 = vmul.f32 1.442695, %v6978_v59 }
0x29f5   :  { %17350 = vlog2.f32 %v6996_v6  ;;  %v6991_v44 = vmul.f32 1.442695, %v6977_v2 }
0x29f6   :  { %17352 = vlog2.f32 %v6995_v25  ;;  %v6958_v25 = vmax.f32 %v20221_v29, 0.0 }
0x29f7   :  { %v17343_v56 = vpop.eup %17342  ;;  %17354 = vpow2.f32 %v6993_v21 }
0x29f8   :  { %v17345_v4 = vpop.eup %17344  ;;  %v6998_v24 = vadd.f32 1.0, %v17343_v56  ;;  %17356 = vpow2.f32 %v6991_v44  ;;  %v6957_v44 = vmax.f32 %v20224_v18, 0.0 }
0x29f9   :  { %v6997_v54 = vadd.f32 1.0, %v17345_v4 }
0x29fa   :  { %17358 = vlog2.f32 %v6998_v24 }
0x29fb   :  { %v17347_v30 = vpop.eup %17346  ;;  %17360 = vlog2.f32 %v6997_v54 }
0x29fc   :  { %v17349_v23 = vpop.eup %17348  ;;  %v7000_v31 = vadd.f32 1.0, %v17347_v30 }
0x29fd   :  { %v6999_v41 = vadd.f32 1.0, %v17349_v23 }
0x29fe   :  { %17362 = vlog2.f32 %v7000_v31 }
0x29ff   :  { %v17351_v9 = vpop.eup %17350  ;;  %17364 = vlog2.f32 %v6999_v41 }
0x2a00   :  { %v17353_v46 = vpop.eup %17352  ;;  %v7006_v33 = vmul.f32 0.6931472, %v17351_v9  ;;  %v6960_v9 = vmax.f32 %v20227_v52, 0.0 }
0x2a01   :  { %v17355_v28 = vpop.eup %17354  ;;  %v7004_v42 = vmul.f32 0.6931472, %v17353_v46 }
0x2a02   :  { %v17357_v16 = vpop.eup %17356  ;;  %v7020_v7 = vadd.f32 %v7006_v33, %v6956_v34  ;;  %v7002_v51 = vadd.f32 1.0, %v17355_v28  ;;  %v6959_v33 = vmax.f32 %v20230_v8, 0.0 }
0x2a03   :  { %v7019_v32 = vadd.f32 %v7004_v42, %v6955_v12  ;;  %v7001_v59 = vadd.f32 1.0, %v17357_v16 }
0x2a04   :  { %v17359_v22 = vpop.eup %17358  ;;  %v7036_v6 = vmul.f32 %v20241_v14, %v7020_v7  ;;  %17366 = vlog2.f32 %v7002_v51 }
0x2a05   :  { %v17361_v2 = vpop.eup %17360  ;;  %v7035_v17 = vmul.f32 %v20241_v14, %v7019_v32  ;;  %v7010_v21 = vmul.f32 0.6931472, %v17359_v22  ;;  %17368 = vlog2.f32 %v7001_v59 }
0x2a06   :  { %v20251_v15 = vadd.f32 %v20245_v20, %v7036_v6  ;;  %v7008_v56 = vmul.f32 0.6931472, %v17361_v2 }
0x2a07   :  { %v20255_v4 = vadd.f32 %v20245_v20, %v7035_v17  ;;  %v7022_v24 = vadd.f32 %v7010_v21, %v6958_v25  ;;  %v6962_v17 = vmax.f32 %v20233_v63, 0.0 }
0x2a08   :  { %v17363_v54 = vpop.eup %17362  ;;  %v7068_v30 = vand.u32 2147483647, %v20251_v15  ;;  %v7021_v23 = vadd.f32 %v7008_v56, %v6957_v44 }
0x2a09   :  { %v17365_v31 = vpop.eup %17364  ;;  %v7067_v41 = vand.u32 2147483647, %v20255_v4  ;;  %v7038_v29 = vmul.f32 %v20241_v14, %v7022_v24  ;;  %v7014_v46 = vmul.f32 0.6931472, %v17363_v54 }
0x2a0a   :  { %v7076_v34 = vsub.f32 0.0, %v7068_v30  ;;  %v7037_v18 = vmul.f32 %v20241_v14, %v7021_v23  ;;  %v7012_v28 = vmul.f32 0.6931472, %v17365_v31  ;;  %v6961_v30 = vmax.f32 %v20236_v57, 0.0 }
0x2a0b   :  { %v7075_v12 = vsub.f32 0.0, %v7067_v41  ;;  %v20264_v42 = vadd.f32 %v20245_v20, %v7038_v29  ;;  %v7024_v16 = vadd.f32 %v7014_v46, %v6960_v9 }
0x2a0c   :  { %v7085_v7 = vmul.f32 1.442695, %v7076_v34  ;;  %v20267_v51 = vadd.f32 %v20245_v20, %v7037_v18  ;;  %v7023_v32 = vadd.f32 %v7012_v28, %v6959_v33 }
0x2a0d   :  { %v7083_v59 = vmul.f32 1.442695, %v7075_v12  ;;  %v7070_v52 = vand.u32 2147483647, %v20264_v42  ;;  %v7040_v22 = vmul.f32 %v20241_v14, %v7024_v16 }
0x2a0e   :  { %v17367_v6 = vpop.eup %17366  ;;  %17370 = vpow2.f32 %v7085_v7  ;;  %v7069_v8 = vand.u32 2147483647, %v20267_v51  ;;  %v7039_v2 = vmul.f32 %v20241_v14, %v7023_v32 }
0x2a0f   :  { %v17369_v25 = vpop.eup %17368  ;;  %17372 = vpow2.f32 %v7083_v59  ;;  %v7078_v21 = vsub.f32 0.0, %v7070_v52  ;;  %v20275_v44 = vadd.f32 %v20245_v20, %v7040_v22  ;;  %v7018_v56 = vmul.f32 0.6931472, %v17367_v6 }
0x2a10   :  { %v7077_v24 = vsub.f32 0.0, %v7069_v8  ;;  %v20278_v54 = vadd.f32 %v20245_v20, %v7039_v2  ;;  %v7016_v23 = vmul.f32 0.6931472, %v17369_v25 }
0x2a11   :  { %v7089_v31 = vmul.f32 1.442695, %v7078_v21  ;;  %v7072_v41 = vand.u32 2147483647, %v20275_v44  ;;  %v7026_v29 = vadd.f32 %v7018_v56, %v6962_v17 }
0x2a12   :  { %v7087_v9 = vmul.f32 1.442695, %v7077_v24  ;;  %v7071_v63 = vand.u32 2147483647, %v20278_v54  ;;  %v7025_v46 = vadd.f32 %v7016_v23, %v6961_v30 }
0x2a13   :  { %17374 = vpow2.f32 %v7089_v31  ;;  %v7080_v34 = vsub.f32 0.0, %v7072_v41  ;;  %v7042_v18 = vmul.f32 %v20241_v14, %v7026_v29 }
0x2a14   :  { %17376 = vpow2.f32 %v7087_v9  ;;  %v7079_v33 = vsub.f32 0.0, %v7071_v63  ;;  %v7041_v28 = vmul.f32 %v20241_v14, %v7025_v46  ;;  %v7059_v9 = vmax.f32 %v20255_v4, 0.0 }
0x2a15   :  { %v20286_v12 = vadd.f32 %v20245_v20, %v7042_v18  ;;  %v7093_v57 = vmul.f32 1.442695, %v7080_v34  ;;  %v7061_v4 = vmax.f32 %v20267_v51, 0.0 }
0x2a16   :  { %v7091_v16 = vmul.f32 1.442695, %v7079_v33  ;;  %v20289_v7 = vadd.f32 %v20245_v20, %v7041_v28 }
0x2a17   :  { %v7074_v32 = vand.u32 2147483647, %v20286_v12 }
0x2a18   :  { %v17371_v59 = vpop.eup %17370  ;;  %17378 = vpow2.f32 %v7091_v16  ;;  %v7073_v52 = vand.u32 2147483647, %v20289_v7 }
0x2a19   :  { %v17373_v22 = vpop.eup %17372  ;;  %v7100_v6 = vadd.f32 1.0, %v17371_v59  ;;  %17380 = vpow2.f32 %v7093_v57  ;;  %v7082_v14 = vsub.f32 0.0, %v7074_v32  ;;  %v7060_v57 = vmax.f32 %v20251_v15, 0.0 }
0x2a1a   :  { %v7081_v8 = vsub.f32 0.0, %v7073_v52  ;;  %v7099_v2 = vadd.f32 1.0, %v17373_v22  ;;  %v7062_v15 = vmax.f32 %v20264_v42, 0.0 }
0x2a1b   :  { %17382 = vlog2.f32 %v7100_v6  ;;  %v7097_v56 = vmul.f32 1.442695, %v7082_v14 }
0x2a1c   :  { %v7095_v17 = vmul.f32 1.442695, %v7081_v8  ;;  %17384 = vlog2.f32 %v7099_v2 }
0x2a1d   :  { %v17375_v25 = vpop.eup %17374 }
0x2a1e   :  { %v17377_v21 = vpop.eup %17376  ;;  %17386 = vpow2.f32 %v7095_v17  ;;  %v7102_v24 = vadd.f32 1.0, %v17375_v25 }
0x2a1f   :  { %v7101_v20 = vadd.f32 1.0, %v17377_v21 }
0x2a21   :  { %17388 = vlog2.f32 %v7101_v20 }
0x2a22   :  { %v17379_v30 = vpop.eup %17378  ;;  %17390 = vpow2.f32 %v7097_v56  ;;  %v7063_v56 = vmax.f32 %v20278_v54, 0.0  ;;  %v7066_v54 = vmax.f32 %v20286_v12, 0.0 }
0x2a23   :  { %v17381_v23 = vpop.eup %17380  ;;  %17392 = vlog2.f32 %v7102_v24  ;;  %v7103_v31 = vadd.f32 1.0, %v17379_v30  ;;  %v7064_v30 = vmax.f32 %v20275_v44, 0.0 }
0x2a24   :  { %v7104_v46 = vadd.f32 1.0, %v17381_v23 }
0x2a25   :  { %v17383_v41 = vpop.eup %17382  ;;  %17394 = vlog2.f32 %v7103_v31 }
0x2a26   :  { %v17385_v29 = vpop.eup %17384  ;;  %v7110_v33 = vmul.f32 0.6931472, %v17383_v41  ;;  %17396 = vlog2.f32 %v7104_v46  ;;  %v7065_v41 = vmax.f32 %v20289_v7, 0.0 }
0x2a27   :  { %v7108_v63 = vmul.f32 0.6931472, %v17385_v29 }
0x2a28   :  { %v17387_v34 = vpop.eup %17386  ;;  %v20298_v59 = vadd.f32 %v7110_v33, %v7060_v57 }
0x2a29   :  { %v20294_v18 = vadd.f32 %v7108_v63, %v7059_v9  ;;  %v7105_v16 = vadd.f32 1.0, %v17387_v34 }
0x2a2b   :  { %v17389_v28 = vpop.eup %17388  ;;  %7131 = vxpose.xlu0.b32.start [1/8] (short) (narrow) %v20294_v18, 8  ;;  %17398 = vlog2.f32 %v7105_v16 }
0x2a2c   :  { %v17391_v32 = vpop.eup %17390  ;;  %v7112_v52 = vmul.f32 0.6931472, %v17389_v28 }
0x2a2d   :  { %v17393_v22 = vpop.eup %17392  ;;  %v7106_v6 = vadd.f32 1.0, %v17391_v32 }
0x2a2e   :  { %v20302_v8 = vadd.f32 %v7112_v52, %v7061_v4  ;;  %v7114_v2 = vmul.f32 0.6931472, %v17393_v22 }
0x2a2f   :  { %7132 = vxpose.xlu0.b32.cont [2/8] (short) (narrow) %v20298_v59, 8  ;;  %v17395_v14 = vpop.eup %17394  ;;  %17400 = vlog2.f32 %v7106_v6 }
0x2a30   :  { %v20306_v17 = vadd.f32 %v7114_v2, %v7062_v15  ;;  %v7116_v25 = vmul.f32 0.6931472, %v17395_v14  ;;  %v17397_v21 = vpop.eup %17396 }
0x2a31   :  { %v7118_v20 = vmul.f32 0.6931472, %v17397_v21 }
0x2a32   :  { %v20310_v51 = vadd.f32 %v7116_v25, %v7063_v56 }
0x2a33   :  { %7133 = vxpose.xlu0.b32.cont [3/8] (short) (narrow) %v20302_v8, 8  ;;  %v20314_v23 = vadd.f32 %v7118_v20, %v7064_v30 }
0x2a35   :  { %v17399_v24 = vpop.eup %17398 }
0x2a36   :  { %v7120_v42 = vmul.f32 0.6931472, %v17399_v24 }
0x2a37   :  { %7134 = vxpose.xlu0.b32.cont [4/8] (short) (narrow) %v20306_v17, 8 }
0x2a38   :  { %v20318_v29 = vadd.f32 %v7120_v42, %v7065_v41 }
0x2a39   :  { %v17401_v31 = vpop.eup %17400 }
0x2a3a   :  { %v7122_v9 = vmul.f32 0.6931472, %v17401_v31 }
0x2a3b   :  { %7135 = vxpose.xlu0.b32.cont [5/8] (short) (narrow) %v20310_v51, 8 }
0x2a3c   :  { %v20322_v63 = vadd.f32 %v7122_v9, %v7066_v54 }
0x2a3f   :  { %7136 = vxpose.xlu0.b32.cont [6/8] (short) (narrow) %v20314_v23, 8 }
0x2a43   :  { %7137 = vxpose.xlu0.b32.cont [7/8] (short) (narrow) %v20318_v29, 8 }
0x2a47   :  { %7138 = vxpose.xlu0.b32.end [8/8] (short) (narrow) %v20322_v63, 8 }
0x2aab   :  { %v7147_v44 = vpop.trf.xlu0 }
0x2aac   :  { %v7170_v46 = vrot.slane %v7147_v44, %v18619_v58 }
0x2aae   :  { %v7171_v34 = vcombine.high %v7170_v46, %v7170_v46  ;;  %v7178_v33 = vrot.slane %v7170_v46, %v18619_v58 }
0x2ab0   :  { %v7185_v28 = vrot.slane %v7171_v34, %v18619_v58  ;;  %v7191_v7 = vrot.slane %v7178_v33, %v18626_v60  ;;  %v7186_v52 = vcombine.high %v7178_v33, %v7178_v33 }
0x2ab2   :  { %v7208_v57 = vadd.f32 %v7191_v7, %v18631_v13  ;;  %v7209_v12 = vadd.f32 %v7191_v7, %v18635_v61  ;;  %v7195_v32 = vrot.slane %v7185_v28, %v18626_v60  ;;  %v7199_v14 = vrot.slane %v7186_v52, %v18626_v60 }
0x2ab3   :  { %v7187_v21 = vcombine.high %v7185_v28, %v7185_v28 }
0x2ab4   :  { %v7216_v16 = vsel %vm1627_vm5, %v7208_v57, -inf  ;;  %v7219_v22 = vsel %vm1631_vm6, %v7209_v12, -inf  ;;  %v7210_v4 = vadd.f32 %v7195_v32, %v18631_v13  ;;  %v7211_v2 = vadd.f32 %v7195_v32, %v18635_v61 }
0x2ab5   :  { %7217 = vmax.xlane.f32.xlu1 %v7216_v16  ;;  %v7212_v25 = vadd.f32 %v7199_v14, %v18631_v13  ;;  %v7213_v20 = vadd.f32 %v7199_v14, %v18635_v61  ;;  %v7203_v24 = vrot.slane %v7187_v21, %v18626_v60 }
0x2ab6   :  { %v7222_v6 = vsel %vm1627_vm5, %v7210_v4, -inf  ;;  %v7225_v15 = vsel %vm1631_vm6, %v7211_v2, -inf }
0x2ab7   :  { %v7228_v56 = vsel %vm1627_vm5, %v7212_v25, -inf  ;;  %v7231_v30 = vsel %vm1631_vm6, %v7213_v20, -inf  ;;  %v7214_v42 = vadd.f32 %v7203_v24, %v18631_v13  ;;  %v7215_v41 = vadd.f32 %v7203_v24, %v18635_v61 }
0x2ab9   :  { %7220 = vmax.xlane.f32.xlu1 %v7219_v22  ;;  %v7234_v31 = vsel %vm1627_vm5, %v7214_v42, -inf  ;;  %v7237_v9 = vsel %vm1631_vm6, %v7215_v41, -inf  ;;  %v20371_v42 = vld [vmem:[%s17979_s29 + $0x10] sm:$0xff]  ;;  %v20381_v41 = vld [vmem:[%s17979_s29 + $0x20] sm:$0xff] }
0x2abd   :  { %7223 = vmax.xlane.f32.xlu1 %v7222_v6 }
0x2ac1   :  { %7226 = vmax.xlane.f32.xlu1 %v7225_v15 }
0x2ac5   :  { %7229 = vmax.xlane.f32.xlu1 %v7228_v56 }
0x2ac9   :  { %7232 = vmax.xlane.f32.xlu1 %v7231_v30  ;;  %v20366_v30 = vld [vmem:[%s17979_s29 + $0x8] sm:$0xff] }
0x2acd   :  { %7235 = vmax.xlane.f32.xlu1 %v7234_v31  ;;  %v20376_v31 = vld [vmem:[%s17979_s29 + $0x18] sm:$0xff] }
0x2ad1   :  { %7238 = vmax.xlane.f32.xlu1 %v7237_v9  ;;  %v20386_v9 = vld [vmem:[%s17979_s29 + $0x28] sm:$0xff] }
0x2b42   :  { %v7218_v54 = vpop.xlane.xlu1 %7217 }
0x2b43   :  { %v7251_v22 = vrot.slane %v7218_v54, %v18512_v40  ;;  %v20391_v54 = vld [vmem:[%s17979_s29 + $0x30] sm:$0xff] }
0x2b46   :  { %v7221_v44 = vpop.xlane.xlu1 %7220 }
0x2b47   :  { %v7255_v12 = vrot.slane %v7221_v44, %v18515_v47  ;;  %v20396_v44 = vld [vmem:[%s17979_s29 + $0x38] sm:$0xf] }
0x2b49   :  { %v7256_v14 = vsel %vm1672_vm8, %v7255_v12, %v7251_v22 }
0x2b4a   :  { %v7224_v46 = vpop.xlane.xlu1 %7223 }
0x2b4b   :  { %v7260_v32 = vrot.slane %v7224_v46, %v18512_v40  ;;  %v20401_v46 = vld [vmem:[%s21602_s17] sm:$0xff] }
0x2b4e   :  { %v7227_v34 = vpop.xlane.xlu1 %7226 }
0x2b4f   :  { %v7264_v7 = vrot.slane %v7227_v34, %v18515_v47 }
0x2b51   :  { %v7265_v4 = vsel %vm1672_vm8, %v7264_v7, %v7260_v32 }
0x2b52   :  { %v7230_v33 = vpop.xlane.xlu1 %7229  ;;  %v7284_v21 = vsel %vm1701_vm9, %v7265_v4, %v7256_v14 }
0x2b53   :  { %v7269_v52 = vrot.slane %v7230_v33, %v18512_v40 }
0x2b56   :  { %v7233_v28 = vpop.xlane.xlu1 %7232 }
0x2b57   :  { %v7273_v57 = vrot.slane %v7233_v28, %v18515_v47 }
0x2b59   :  { %v7274_v6 = vsel %vm1672_vm8, %v7273_v57, %v7269_v52 }
0x2b5a   :  { %v7236_v16 = vpop.xlane.xlu1 %7235  ;;  %v7285_v20 = vsel %vm1703_vm10, %v7274_v6, %v7284_v21 }
0x2b5b   :  { %v7278_v15 = vrot.slane %v7236_v16, %v18512_v40 }
0x2b5e   :  { %v7239_v2 = vpop.xlane.xlu1 %7238 }
0x2b5f   :  { %v7282_v25 = vrot.slane %v7239_v2, %v18515_v47 }
0x2b61   :  { %v7283_v56 = vsel %vm1672_vm8, %v7282_v25, %v7278_v15 }
0x2b62   :  { %v7286_v24 = vsel %vm21668_vm11, %v7283_v56, %v7285_v20  ;;  %vm21671_vm11 = vmmov %vm21645_vm1 }
0x2b63   :  { %15121 = vmatprep.subr.msk.mxu1 %vm818_vm0, %v7286_v24 }
0x2b64   :  { %15122 = vmatpush3.xpose.msk.msra.mxu1 %vm818_vm0, %v7286_v24 }
0x2b67   :  { %15124 = vmatmul.mubr.msk.f32.vlgmr.msra.gmra.mrb[120].mxu1 %vm818_vm0, %v20366_v30 }
0x2b68   :  { %15126 = vmatprep.mubr.msk.f32.mxu1 %vm818_vm0, %v20371_v42 }
0x2b6b   :  { %15127 = vmatmul.mubr.msk.f32.gmra.mrb[122].mxu1 %vm818_vm0, %v20376_v31 }
0x2b6c   :  { %15129 = vmatprep.mubr.msk.f32.mxu1 %vm818_vm0, %v20381_v41 }
0x2b6f   :  { %15130 = vmatmul.mubr.msk.f32.gmra.mrb[124].mxu1 %vm818_vm0, %v20386_v9 }
0x2b70   :  { %15132 = vmatprep.mubr.msk.f32.mxu1 %vm818_vm0, %v20391_v54 }
0x2b73   :  { %15133 = vmatmul.mubr.msk.f32.gmra.mrb[126].mxu1 %vm818_vm0, %v20396_v44 }
0x2b74   :  { %15151 = vmatprep.mubr.msk.f32.mxu1 %vm1627_vm5, %v20401_v46 }
0x2c3a   :  { %v15125_v34 = vpop.f32.mrb[120].mxu1 }
0x2c3b   :  { %v7395_v33 = vsub.f32 %v20298_v59, %v15125_v34  ;;  %v7355_v28 = vpop.f32.mrb[121].mxu1 }
0x2c3c   :  { %v7394_v7 = vsub.f32 %v20294_v18, %v7355_v28 }
0x2c3d   :  { %v7404_v57 = vmul.f32 1.442695, %v7395_v33 }
0x2c3e   :  { %v7402_v16 = vmul.f32 1.442695, %v7394_v7  ;;  %v15128_v12 = vpop.f32.mrb[122].mxu1 }
0x2c3f   :  { %17402 = vpow2.f32 %v7404_v57  ;;  %v7397_v32 = vsub.f32 %v20306_v17, %v15128_v12  ;;  %v7365_v52 = vpop.f32.mrb[123].mxu1 }
0x2c40   :  { %17404 = vpow2.f32 %v7402_v16  ;;  %v7396_v22 = vsub.f32 %v20302_v8, %v7365_v52  ;;  %v17764_v52 = vld [vmem:[%s21603_s21] sm:$0xf] }
0x2c41   :  { %v7408_v4 = vmul.f32 1.442695, %v7397_v32 }
0x2c42   :  { %v7406_v6 = vmul.f32 1.442695, %v7396_v22  ;;  %v15131_v2 = vpop.f32.mrb[124].mxu1  ;;  %v20438_v22 = vld [vmem:[%s21602_s17 + $0x8] sm:$0xf] }
0x2c43   :  { %17406 = vpow2.f32 %v7408_v4  ;;  %v7399_v14 = vsub.f32 %v20314_v23, %v15131_v2  ;;  %v7375_v59 = vpop.f32.mrb[125].mxu1 }
0x2c44   :  { %17408 = vpow2.f32 %v7406_v6  ;;  %v7398_v18 = vsub.f32 %v20310_v51, %v7375_v59 }
0x2c45   :  { %v7412_v15 = vmul.f32 1.442695, %v7399_v14 }
0x2c46   :  { %v7410_v25 = vmul.f32 1.442695, %v7398_v18  ;;  %v15134_v21 = vpop.f32.mrb[126].mxu1 }
0x2c47   :  { %17410 = vpow2.f32 %v7412_v15  ;;  %v7401_v17 = vsub.f32 %v20322_v63, %v15134_v21  ;;  %v7385_v56 = vpop.f32.mrb[127].mxu1 }
0x2c48   :  { %17412 = vpow2.f32 %v7410_v25  ;;  %v7400_v8 = vsub.f32 %v20318_v29, %v7385_v56 }
0x2c49   :  { %v20413_v20 = vpop.eup %17402  ;;  %v7416_v24 = vmul.f32 1.442695, %v7401_v17 }
0x2c4a   :  { %v17405_v34 = vpop.eup %17404  ;;  %v7414_v33 = vmul.f32 1.442695, %v7400_v8 }
0x2c4b   :  { %17414 = vpow2.f32 %v7416_v24  ;;  %v16302_v23 = vpack.c.bf16 %v20413_v20, %v17405_v34 }
0x2c4c   :  { %17416 = vpow2.f32 %v7414_v33 }
0x2c4d   :  { %v20416_v51 = vpop.eup %17406  ;;  %16303 = vmatprep.subr.bf16.mxu1 %v16302_v23 }
0x2c4e   :  { %v17409_v28 = vpop.eup %17408  ;;  %16305 = vmatpush3.bf16.msra.mxu1 %v16302_v23 }
0x2c4f   :  { %v16306_v63 = vpack.c.bf16 %v20416_v51, %v17409_v28 }
0x2c51   :  { %v20419_v7 = vpop.eup %17410  ;;  %16307 = vmatprep.subr.bf16.mxu1 %v16306_v63 }
0x2c52   :  { %v20421_v29 = vpop.eup %17412  ;;  %16309 = vmatpush3.bf16.msra.mxu1 %v16306_v63 }
0x2c53   :  { %v16310_v57 = vpack.c.bf16 %v20419_v7, %v20421_v29 }
0x2c55   :  { %v20425_v16 = vpop.eup %17414  ;;  %16311 = vmatprep.subr.bf16.mxu1 %v16310_v57 }
0x2c56   :  { %v20427_v12 = vpop.eup %17416  ;;  %16313 = vmatpush3.bf16.msra.mxu1 %v16310_v57 }
0x2c57   :  { %v16314_v32 = vpack.c.bf16 %v20425_v16, %v20427_v12 }
0x2c59   :  { %16316 = vmatprep.subr.msk.bf16.mxu1 %vm18283_vm4, %v16314_v32 }
0x2c5a   :  { %16319 = vmatpush3.bf16.msk.msra.mxu1 %vm18283_vm4, %v16314_v32 }
0x2c5b   :  { %15170 = vmatprep.subr.msk.mxu1 %vm21669_vm15, %v17764_v52  ;;  %vm21672_vm15 = vmmov %vm21645_vm1 }
0x2c5d   :  { %15152 = vmatmul.mubr.msk.f32.vlgmr.msra.gmra.mrb[128].mxu1 %vm1627_vm5, %v20438_v22 }
0x2c5e   :  { %15171 = vmatpush3.msk.msra.mxu1 %vm21670_vm2, %v17764_v52  ;;  %vm21673_vm2 = vmmov %vm21645_vm1 }
0x2c5f   :  { %16345 = vmatprep.subr.bf16.mxu1 %v18766_v43 }
0x2d30   :  { %v15153_v4 = vpop.f32.mrb[128].mxu1 }
0x2d31   :  { %v7493_v6 = vadd.f32 1e-16, %v15153_v4  ;;  %v7487_v2 = vpop.f32.mrb[129].mxu1 }
0x2d32   :  { %v7488_v14 = vadd.f32 1e-16, %v7487_v2 }
0x2d34   :  { %v16320_v59 = vpack.c.bf16 %v7493_v6, %v7488_v14 }
0x2d36   :  { %16322 = vmatprep.subr.msk.bf16.mxu0 %vm18283_vm4, %v16320_v59 }
0x2d37   :  { %16325 = vmatpush3.bf16.msk.msra.mxu0 %vm18283_vm4, %v16320_v59 }
0x2d3a   :  { %15159 = vmatmul.mubr.msk.f32.vlgmr.msra.gmra.mrb[128].mxu0 %vm818_vm0, %v20366_v30 }
0x2d3b   :  { %15161 = vmatprep.mubr.msk.f32.mxu0 %vm818_vm0, %v20371_v42 }
0x2d3e   :  { %15162 = vmatmul.mubr.msk.f32.gmra.mrb[130].mxu0 %vm818_vm0, %v20376_v31 }
0x2d3f   :  { %15164 = vmatprep.mubr.msk.f32.mxu0 %vm818_vm0, %v20381_v41 }
0x2d42   :  { %15165 = vmatmul.mubr.msk.f32.gmra.mrb[132].mxu0 %vm818_vm0, %v20386_v9 }
0x2d43   :  { %15167 = vmatprep.mubr.msk.f32.mxu0 %vm818_vm0, %v20391_v54 }
0x2d46   :  { %15168 = vmatmul.mubr.msk.f32.gmra.mrb[134].mxu0 %vm818_vm0, %v20396_v44 }
0x2d47   :  { %15200 = vmatprep.mubr.msk.f32.mxu0 %vm1627_vm5, %v20401_v46 }
0x2e0d   :  { %v15160_v18 = vpop.f32.mrb[128].mxu0 }
0x2e0e   :  { %17418 = vrcp.f32 %v15160_v18  ;;  %v7565_v15 = vpop.f32.mrb[129].mxu0 }
0x2e0f   :  { %17420 = vrcp.f32 %v7565_v15 }
0x2e11   :  { %v15163_v25 = vpop.f32.mrb[130].mxu0 }
0x2e12   :  { %17422 = vrcp.f32 %v15163_v25  ;;  %v7575_v21 = vpop.f32.mrb[131].mxu0 }
0x2e13   :  { %17424 = vrcp.f32 %v7575_v21 }
0x2e15   :  { %v15166_v17 = vpop.f32.mrb[132].mxu0 }
0x2e16   :  { %17426 = vrcp.f32 %v15166_v17  ;;  %v7585_v56 = vpop.f32.mrb[133].mxu0 }
0x2e17   :  { %17428 = vrcp.f32 %v7585_v56 }
0x2e18   :  { %v17419_v8 = vpop.eup %17418 }
0x2e19   :  { %v17421_v24 = vpop.eup %17420  ;;  %v15169_v33 = vpop.f32.mrb[134].mxu0  ;;  %v7613_v46 = vmul.f32 %v17419_v8, %v20413_v20 }
0x2e1a   :  { %17430 = vrcp.f32 %v15169_v33  ;;  %v7595_v23 = vpop.f32.mrb[135].mxu0  ;;  %v7612_v63 = vmul.f32 %v17421_v24, %v17405_v34 }
0x2e1b   :  { %17432 = vrcp.f32 %v7595_v23 }
0x2e1c   :  { %v17423_v57 = vpop.eup %17422  ;;  %15172 = vmatprep.mubr.msk.f32.mxu1 %vm21645_vm1, %v7612_v63 }
0x2e1d   :  { %v17425_v32 = vpop.eup %17424  ;;  %15173 = vmatmul.mubr.msk.f32.vlgmr.msra.gmra.mrb[130].mxu1 %vm21671_vm11, %v7613_v46  ;;  %v7615_v4 = vmul.f32 %v17423_v57, %v20416_v51  ;;  %vm21674_vm11 = vmmov %vm21645_vm1  ;;  %v13283_v57 = vld [vmem:[%s18009_s30 + $0x98] sm:$0xff] }
0x2e1e   :  { %v7614_v52 = vmul.f32 %v17425_v32, %v17409_v28  ;;  %16347 = vmatpush3.bf16.msra.mxu1 %v18766_v43 }
0x2e1f   :  { %16349 = vmatprep.subr.bf16.mxu1 %v18769_v55 }
0x2e20   :  { %v17427_v6 = vpop.eup %17426  ;;  %15175 = vmatprep.mubr.msk.f32.mxu1 %vm21672_vm15, %v7614_v52  ;;  %vm21675_vm15 = vmmov %vm21645_vm1 }
0x2e21   :  { %v17429_v34 = vpop.eup %17428  ;;  %15176 = vmatmul.mubr.msk.f32.gmra.mrb[132].mxu1 %vm21673_vm2, %v7615_v4  ;;  %v7617_v2 = vmul.f32 %v17427_v6, %v20419_v7  ;;  %vm21676_vm2 = vmmov %vm21645_vm1  ;;  %v21678_v6 = vld [vmem:[#allocation43_spill] sm:$0xff] }
0x2e22   :  { %v7616_v20 = vmul.f32 %v17429_v34, %v20421_v29  ;;  %16351 = vmatpush3.bf16.msra.mxu1 %v18769_v55  ;;  %v21679_v34 = vld [vmem:[#allocation45_spill] sm:$0xff] }
0x2e23   :  { %16353 = vmatprep.subr.bf16.mxu1 %v18776_v35 }
0x2e24   :  { %v17431_v28 = vpop.eup %17430  ;;  %15178 = vmatprep.mubr.msk.f32.mxu1 %vm21645_vm1, %v7616_v20  ;;  %v21680_v20 = vld [vmem:[#allocation51_spill] sm:$0xff] }
0x2e25   :  { %v17433_v51 = vpop.eup %17432  ;;  %15179 = vmatmul.mubr.msk.f32.gmra.mrb[134].mxu1 %vm21674_vm11, %v7617_v2  ;;  %v7619_v59 = vmul.f32 %v17431_v28, %v20425_v16  ;;  %v21681_v2 = vld [vmem:[#allocation44_spill] sm:$0xff]  ;;  %v21682_v28 = vld [vmem:[#allocation47_spill] sm:$0xff]  ;;  %vm21699_vm11 = vmmov %vm21645_vm1 }
0x2e26   :  { %v7618_v14 = vmul.f32 %v17433_v51, %v20427_v12  ;;  %16355 = vmatpush3.bf16.msra.mxu1 %v18776_v35  ;;  %v21684_v51 = vld [vmem:[#allocation46_spill] sm:$0xff] }
0x2e27   :  { %16357 = vmatprep.subr.bf16.mxu1 %v18782_v45 }
0x2e28   :  { %15181 = vmatprep.mubr.msk.f32.mxu1 %vm21675_vm15, %v7618_v14  ;;  %v21685_v14 = vld [vmem:[#allocation49_spill] sm:$0xff]  ;;  %vm21700_vm15 = vmmov %vm21645_vm1 }
0x2e29   :  { %15182 = vmatmul.mubr.msk.f32.gmra.mrb[136].mxu1 %vm21676_vm2, %v7619_v59  ;;  %v21686_v59 = vld [vmem:[#allocation53_spill] sm:$0xff]  ;;  %vm21701_vm2 = vmmov %vm21645_vm1 }
0x2e2a   :  { %16359 = vmatpush3.bf16.msra.mxu1 %v18782_v45 }
0x2e2b   :  { %16361 = vmatprep.subr.bf16.mxu1 %v18788_v37 }
0x2e2e   :  { %16363 = vmatpush3.bf16.msra.mxu1 %v18788_v37 }
0x2e2f   :  { %16365 = vmatprep.subr.bf16.mxu1 %v18794_v5 }
0x2e32   :  { %16367 = vmatpush3.bf16.msra.mxu1 %v18794_v5 }
0x2e33   :  { %16369 = vmatprep.subr.bf16.mxu1 %v18800_v19 }
0x2e36   :  { %16371 = vmatpush3.bf16.msra.mxu1 %v18800_v19 }
0x2e37   :  { %16373 = vmatprep.subr.bf16.mxu1 %v18806_v36 }
0x2e3a   :  { %16375 = vmatpush3.bf16.msra.mxu1 %v18806_v36 }
0x2ef0   :  { %v15174_v7 = vpop.f32.mrb[130].mxu1 }
0x2ef1   :  { %v7750_v29 = vmul.f32 %v15174_v7, %v20154_v26  ;;  %v7710_v16 = vpop.f32.mrb[131].mxu1  ;;  %v21687_v7 = vld [vmem:[#allocation48_spill] sm:$0xff] }
0x2ef2   :  { %v7749_v12 = vmul.f32 %v7710_v16, %v20166_v38  ;;  %v21689_v16 = vld [vmem:[#allocation55_spill] sm:$0xff] }
0x2ef4   :  { %v16326_v18 = vpack.c.bf16 %v7750_v29, %v7749_v12  ;;  %v15177_v15 = vpop.f32.mrb[132].mxu1  ;;  %v21688_v29 = vld [vmem:[#allocation54_spill] sm:$0xff]  ;;  %v21690_v12 = vld [vmem:[#allocation56_spill] sm:$0xff] }
0x2ef5   :  { %v7752_v25 = vmul.f32 %v15177_v15, %v20177_v50  ;;  %v7720_v21 = vpop.f32.mrb[133].mxu1  ;;  %v13268_v15 = vld [vmem:[%s21606_s23 + $0x3] ss:$0 sm:$0xff] }
0x2ef6   :  { %v7751_v17 = vmul.f32 %v7720_v21, %v20179_v39  ;;  %16327 = vmatprep.subr.bf16.mxu0 %v16326_v18 }
0x2ef7   :  { %16329 = vmatpush3.bf16.msra.mxu0 %v16326_v18  ;;  %v21691_v18 = vld [vmem:[#allocation57_spill] sm:$0xff] }
0x2ef8   :  { %v16330_v56 = vpack.c.bf16 %v7752_v25, %v7751_v17  ;;  %v15180_v8 = vpop.f32.mrb[134].mxu1 }
0x2ef9   :  { %v7754_v24 = vmul.f32 %v15180_v8, %v20186_v10  ;;  %v7730_v33 = vpop.f32.mrb[135].mxu1  ;;  %v13280_v10 = vld [vmem:[%s18009_s30 + $0x80] sm:$0xff] }
0x2efa   :  { %v7753_v23 = vmul.f32 %v7730_v33, %v20191_v11  ;;  %16331 = vmatprep.subr.bf16.mxu0 %v16330_v56  ;;  %v13281_v11 = vld [vmem:[%s18009_s30 + $0x88] sm:$0xff] }
0x2efb   :  { %16333 = vmatpush3.bf16.msra.mxu0 %v16330_v56 }
0x2efc   :  { %v16334_v26 = vpack.c.bf16 %v7754_v24, %v7753_v23  ;;  %v15183_v38 = vpop.f32.mrb[136].mxu1 }
0x2efd   :  { %v7756_v50 = vmul.f32 %v15183_v38, %v20201_v49  ;;  %v7740_v63 = vpop.f32.mrb[137].mxu1  ;;  %v16398_v49 = vpack.c.bf16 %v13281_v11, %v13280_v10  ;;  %v17766_v10 = vld [vmem:[%s21607_s28] ss:$0 sm:$0xff] }
0x2efe   :  { %v7755_v39 = vmul.f32 %v7740_v63, %v20205_v62  ;;  %16335 = vmatprep.subr.bf16.mxu0 %v16334_v26  ;;  %v13282_v62 = vld [vmem:[%s18009_s30 + $0x90] sm:$0xff]  ;;  %s21709_s30 = sld [smem:[#allocation30_spill]] }
0x2eff   :  { %16337 = vmatpush3.bf16.msra.mxu0 %v16334_v26  ;;  %16399 = vmatprep.subr.bf16.mxu1 %v16398_v49  ;;  %v16402_v4 = vpack.c.bf16 %v13283_v57, %v13282_v62 }
0x2f00   :  { %v16338_v46 = vpack.c.bf16 %v7756_v50, %v7755_v39 }
0x2f02   :  { %16340 = vmatprep.subr.msk.bf16.mxu0 %vm18283_vm4, %v16338_v46 }
0x2f03   :  { %16343 = vmatpush3.bf16.msk.msra.mxu0 %vm18283_vm4, %v16338_v46 }
0x2f04   :  { %16377 = vmatprep.subr.bf16.mxu0 %v18829_v53 }
0x2f06   :  { %15201 = vmatmul.mubr.msk.f32.vlgmr.msra.gmra.mrb[136].mxu0 %vm1627_vm5, %v20438_v22  ;;  %v21677_v22 = vld [vmem:[#allocation50_spill] sm:$0xff] }
0x2f07   :  { %16379 = vmatpush3.bf16.msra.mxu0 %v18829_v53 }
0x2f08   :  { %16381 = vmatprep.subr.bf16.mxu0 %v18869_v48 }
0x2f0b   :  { %16383 = vmatpush3.bf16.msra.mxu0 %v18869_v48 }
0x2f0c   :  { %16386 = vmatprep.subr.msk.bf16.mxu0 %vm18905_vm12, %v18911_v3 }
0x2fd9   :  { %v15202_v32 = vpop.f32.mrb[136].mxu0 }
0x2fda   :  { %v7826_v52 = vpop.f32.mrb[137].mxu0 }
0x2fdb   :  { %15235 = vmatprep.mubr.f32.mxu1 %v7826_v52 }
0x2fdc   :  { %15236 = vmatmul.mubr.f32.vlgmr.msra.gmra.mrb[138].mxu1 %v15202_v32 }
0x2fdd   :  { %16401 = vmatpush3.bf16.msra.mxu1 %v16398_v49  ;;  %15275 = vmatprep.mubr.msk.f32.mxu1 %vm603_vm7, %v18244_v1  ;;  %v21683_v1 = vld [vmem:[#allocation52_spill] sm:$0xff] }
0x2fde   :  { %16403 = vmatprep.subr.bf16.mxu1 %v16402_v4 }
0x2fe1   :  { %16405 = vmatpush3.bf16.msra.mxu1 %v16402_v4 }
0x2fe2   :  { %16419 = vmatprep.subr.bf16.mxu1 %v21677_v22 }
0x2fe4   :  { %15276 = vmatmul.mubr.msk.f32.vlgmr.msra.gmra.mrb[140].mxu1 %vm603_vm7, %v21678_v6 }
0x2fe5   :  { %15278 = vmatprep.mubr.msk.f32.mxu1 %vm603_vm7, %v21679_v34  ;;  %16421 = vmatpush3.bf16.msra.mxu1 %v21677_v22 }
0x2fe6   :  { %16423 = vmatprep.subr.bf16.mxu1 %v21680_v20 }
0x2fe8   :  { %15279 = vmatmul.mubr.msk.f32.gmra.mrb[142].mxu1 %vm603_vm7, %v21681_v2 }
0x2fe9   :  { %15281 = vmatprep.mubr.msk.f32.mxu1 %vm603_vm7, %v21682_v28  ;;  %16425 = vmatpush3.bf16.msra.mxu1 %v21680_v20 }
0x2fea   :  { %16427 = vmatprep.subr.bf16.mxu1 %v21683_v1 }
0x2fec   :  { %15282 = vmatmul.mubr.msk.f32.gmra.mrb[144].mxu1 %vm603_vm7, %v21684_v51 }
0x2fed   :  { %15284 = vmatprep.mubr.msk.f32.mxu1 %vm603_vm7, %v21685_v14  ;;  %16429 = vmatpush3.bf16.msra.mxu1 %v21683_v1 }
0x2fee   :  { %16431 = vmatprep.subr.bf16.mxu1 %v21686_v59 }
0x2ff0   :  { %15285 = vmatmul.mubr.msk.f32.gmra.mrb[146].mxu1 %vm603_vm7, %v21687_v7 }
0x2ff1   :  { %16433 = vmatpush3.bf16.msra.mxu1 %v21686_v59 }
0x2ff2   :  { %16435 = vmatprep.subr.bf16.mxu1 %v21688_v29 }
0x2ff5   :  { %16437 = vmatpush3.bf16.msra.mxu1 %v21688_v29 }
0x2ff6   :  { %16439 = vmatprep.subr.bf16.mxu1 %v21689_v16 }
0x2ff9   :  { %16441 = vmatpush3.bf16.msra.mxu1 %v21689_v16 }
0x2ffa   :  { %16443 = vmatprep.subr.bf16.mxu1 %v21690_v12 }
0x2ffd   :  { %16445 = vmatpush3.bf16.msra.mxu1 %v21690_v12  ;;  %v13274_v12 = vld [vmem:[%s18004_s24 + $0x80] sm:$0xff] }
0x2ffe   :  { %16447 = vmatprep.subr.bf16.mxu1 %v21691_v18 }
0x3001   :  { %16449 = vmatpush3.bf16.msra.mxu1 %v21691_v18  ;;  %v13275_v18 = vld [vmem:[%s18004_s24 + $0x88] sm:$0xff] }
0x30af   :  { %v15237_v25 = vpop.f32.mrb[138].mxu1 }
0x30b0   :  { %v7909_v21 = vpop.f32.mrb[139].mxu1  ;;  %v7915_v56 = vadd.f32 %v15237_v25, %v13268_v15  ;;  %v13276_v25 = vld [vmem:[%s18004_s24 + $0x90] sm:$0xff] }
0x30b1   :  { %v7910_v17 = vadd.f32 %v13268_v15, %v7909_v21  ;;  %v16390_v15 = vpack.c.bf16 %v13275_v18, %v13274_v12  ;;  %v13277_v21 = vld [vmem:[%s18004_s24 + $0x98] sm:$0xff]  ;;  %s21707_s24 = sld [smem:[#allocation26_spill]] }
0x30b3   :  { %15246 = vmatprep.mubr.msk.f32.mxu0 %vm603_vm7, %v7910_v17 }
0x30b4   :  { %15247 = vmatmul.mubr.msk.f32.vlgmr.msra.gmra.mrb[138].mxu0 %vm603_vm7, %v7915_v56 }
0x30b5   :  { %16389 = vmatpush3.bf16.msk.msra.mxu0 %vm18905_vm12, %v18911_v3 }
0x30b6   :  { %16391 = vmatprep.subr.bf16.mxu0 %v16390_v15 }
0x30b7   :  { %v20556_v8 = vpop.f32.mrb[140].mxu1 }
0x30b8   :  { %v20558_v24 = vpop.f32.mrb[141].mxu1 }
0x30bb   :  { %v20560_v33 = vpop.f32.mrb[142].mxu1 }
0x30bc   :  { %v20562_v23 = vpop.f32.mrb[143].mxu1 }
0x30bf   :  { %v20564_v26 = vpop.f32.mrb[144].mxu1 }
0x30c0   :  { %v20566_v38 = vpop.f32.mrb[145].mxu1 }
0x30c3   :  { %v20568_v50 = vpop.f32.mrb[146].mxu1 }
0x30c4   :  { %v20570_v63 = vpop.f32.mrb[147].mxu1 }
0x3187   :  { %v15248_v39 = vpop.f32.mrb[138].mxu0 }
0x3188   :  { %v7990_v46 = vpop.f32.mrb[139].mxu0  ;;  %v7996_v49 = vadd.f32 %v17766_v10, %v15248_v39  ;;  %v16394_v39 = vpack.c.bf16 %v13277_v21, %v13276_v25 }
0x3189   :  { %v7991_v11 = vadd.f32 %v17766_v10, %v7990_v46 }
0x318a   :  { %v8002_v57 = vsel %vm2438_vm13, %v7996_v49, -inf }
0x318b   :  { %v7999_v62 = vsel %vm2434_vm14, %v7991_v11, -inf }
0x318c   :  { %8000 = vmax.xlane.f32.xlu1 %v7999_v62 }
0x3190   :  { %8003 = vmax.xlane.f32.xlu1 %v8002_v57 }
0x3219   :  { %v8001_v32 = vpop.xlane.xlu1 %8000 }
0x321a   :  { %v8005_v52 = vsub.f32 %v7991_v11, %v8001_v32  ;;  %v17767_v32 = vld [vmem:[%s21611_s0] ss:$0 sm:$0xff] }
0x321c   :  { %v8007_v4 = vmul.f32 1.442695, %v8005_v52 }
0x321d   :  { %v8004_v22 = vpop.xlane.xlu1 %8003 }
0x321e   :  { %17434 = vpow2.f32 %v8007_v4  ;;  %v8006_v6 = vsub.f32 %v7996_v49, %v8004_v22  ;;  %v21692_v22 = vld [vmem:[#allocation58_spill] sm:$0xff] }
0x3220   :  { %v8009_v34 = vmul.f32 1.442695, %v8006_v6 }
0x3222   :  { %17436 = vpow2.f32 %v8009_v34  ;;  %v21693_v34 = vld [vmem:[#allocation59_spill] sm:$0xff] }
0x3228   :  { %v17435_v20 = vpop.eup %17434 }
0x3229   :  { %v8011_v2 = vsel %vm2434_vm14, %v17435_v20, 0.0 }
0x322a   :  { %8012 = vadd.xlane.f32.xlu1 %v8011_v2  ;;  %v20595_v2 = vld [vmem:[%s17979_s29] sm:$0xff] }
0x322c   :  { %v17437_v28 = vpop.eup %17436 }
0x322d   :  { %v8014_v1 = vsel %vm2438_vm13, %v17437_v28, 0.0 }
0x322e   :  { %8015 = vadd.xlane.f32.xlu1 %v8014_v1  ;;  %v17775_v1 = vld [vmem:[%s17984_s3 + $0x30] sm:$0xff] }
0x32b7   :  { %v8013_v51 = vpop.xlane.xlu1 %8012 }
0x32b8   :  { %17438 = vrcp.f32 %v8013_v51 }
0x32bb   :  { %v8016_v14 = vpop.xlane.xlu1 %8015 }
0x32bc   :  { %17440 = vrcp.f32 %v8016_v14 }
0x32c2   :  { %v17439_v59 = vpop.eup %17438 }
0x32c3   :  { %v8019_v7 = vmul.f32 %v17439_v59, %v17435_v20 }
0x32c5   :  { %15253 = vmatprep.mubr.msk.f32.mxu0 %vm2434_vm14, %v8019_v7 }
0x32c6   :  { %v17441_v29 = vpop.eup %17440 }
0x32c7   :  { %v8020_v16 = vmul.f32 %v17441_v29, %v17437_v28 }
0x32c9   :  { %15254 = vmatmul.mubr.msk.f32.vlgmr.msra.gmra.mrb[140].mxu0 %vm2434_vm14, %v8020_v16 }
0x32ca   :  { %16393 = vmatpush3.bf16.msra.mxu0 %v16390_v15 }
0x32cb   :  { %16395 = vmatprep.subr.bf16.mxu0 %v16394_v39 }
0x32ce   :  { %16397 = vmatpush3.bf16.msra.mxu0 %v16394_v39 }
0x339c   :  { %v15255_v46 = vpop.f32.mrb[140].mxu0 }
0x339d   :  { %v8099_v10 = vadd.f32 1.0, %v15255_v46  ;;  %v8093_v11 = vpop.f32.mrb[141].mxu0 }
0x339e   :  { %v8094_v49 = vadd.f32 1.0, %v8093_v11 }
0x339f   :  { %v8103_v62 = vmul.f32 %v8099_v10, %v7915_v56 }
0x33a0   :  { %v8102_v57 = vmul.f32 %v8094_v49, %v7910_v17 }
0x33a1   :  { %v8105_v52 = vadd.f32 %v17767_v32, %v8103_v62 }
0x33a2   :  { %v8104_v4 = vadd.f32 %v17767_v32, %v8102_v57 }
0x33a3   :  { %v20588_v20 = vadd.f32 %v8105_v52, %v21693_v34 }
0x33a4   :  { %v20585_v6 = vadd.f32 %v8104_v4, %v21692_v22 }
0x33a5   :  { %21694 = vst [vmem:[#allocation50_spill] sm:$0xff] %v20588_v20 }
0x33a6   :  { %15264 = vmatprep.mubr.msk.f32.mxu0 %vm603_vm7, %v20585_v6 }
0x33a7   :  { %15265 = vmatmul.mubr.msk.f32.vlgmr.msra.gmra.mrb[142].mxu0 %vm603_vm7, %v20588_v20 }
0x33a8   :  { %15291 = vmatprep.mubr.msk.f32.mxu0 %vm818_vm0, %v20595_v2 }
0x347a   :  { %v15266_v17 = vpop.f32.mrb[142].mxu0 }
0x347b   :  { %v8185_v56 = vpop.f32.mrb[143].mxu0 }
0x347c   :  { %v16406_v28 = vpack.c.bf16 %v15266_v17, %v8185_v56 }
0x347e   :  { %16408 = vmatprep.subr.msk.bf16.mxu0 %vm18283_vm4, %v16406_v28 }
0x347f   :  { %16411 = vmatpush3.bf16.msk.msra.mxu0 %vm18283_vm4, %v16406_v28 }
0x3480   :  { %16414 = vmatprep.subr.msk.bf16.mxu0 %vm18283_vm4, %v16406_v28 }
0x3482   :  { %15292 = vmatmul.mubr.msk.f32.vlgmr.msra.gmra.mrb[144].mxu0 %vm818_vm0, %v20366_v30  ;;  %v17769_v30 = vld [vmem:[%s17984_s3] sm:$0xff] }
0x3483   :  { %16417 = vmatpush3.bf16.msk.msra.mxu0 %vm18283_vm4, %v16406_v28  ;;  %15294 = vmatprep.mubr.msk.f32.mxu0 %vm818_vm0, %v20371_v42  ;;  %v17770_v42 = vld [vmem:[%s17984_s3 + $0x8] sm:$0xff] }
0x3486   :  { %15295 = vmatmul.mubr.msk.f32.gmra.mrb[146].mxu0 %vm818_vm0, %v20376_v31  ;;  %v17771_v31 = vld [vmem:[%s17984_s3 + $0x10] sm:$0xff] }
0x3487   :  { %15297 = vmatprep.mubr.msk.f32.mxu0 %vm818_vm0, %v20381_v41  ;;  %v17772_v41 = vld [vmem:[%s17984_s3 + $0x18] sm:$0xff] }
0x348a   :  { %15298 = vmatmul.mubr.msk.f32.gmra.mrb[148].mxu0 %vm818_vm0, %v20386_v9  ;;  %v17773_v9 = vld [vmem:[%s17984_s3 + $0x20] sm:$0xff] }
0x348b   :  { %15300 = vmatprep.mubr.msk.f32.mxu0 %vm818_vm0, %v20391_v54  ;;  %v17774_v54 = vld [vmem:[%s17984_s3 + $0x28] sm:$0xff] }
0x348e   :  { %15301 = vmatmul.mubr.msk.f32.gmra.mrb[150].mxu0 %vm818_vm0, %v20396_v44  ;;  %v17776_v44 = vld [vmem:[%s17984_s3 + $0x38] sm:$0xf]  ;;  %s21706_s3 = sld [smem:[#allocation27_spill]] }
0x348f   :  { %15307 = vmatprep.mubr.msk.f32.mxu0 %vm818_vm0, %v17769_v30 }
0x3492   :  { %15308 = vmatmul.mubr.msk.f32.vlgmr.msra.gmra.mrb[152].mxu0 %vm818_vm0, %v17770_v42 }
0x3493   :  { %15310 = vmatprep.mubr.msk.f32.mxu0 %vm818_vm0, %v17771_v31 }
0x3496   :  { %15311 = vmatmul.mubr.msk.f32.gmra.mrb[154].mxu0 %vm818_vm0, %v17772_v41 }
0x3497   :  { %15313 = vmatprep.mubr.msk.f32.mxu0 %vm818_vm0, %v17773_v9 }
0x349a   :  { %15314 = vmatmul.mubr.msk.f32.gmra.mrb[156].mxu0 %vm818_vm0, %v17774_v54 }
0x349b   :  { %15316 = vmatprep.mubr.msk.f32.mxu0 %vm818_vm0, %v17775_v1 }
0x349e   :  { %15317 = vmatmul.mubr.msk.f32.gmra.mrb[158].mxu0 %vm818_vm0, %v17776_v44 }
0x349f   :  { %15365 = vmatprep.mubr.msk.f32.mxu0 %vm818_vm0, %v20595_v2 }
0x3555   :  { %v15293_v51 = vpop.f32.mrb[144].mxu0 }
0x3556   :  { %v20640_v14 = vadd.f32 %v15293_v51, %v20556_v8  ;;  %v8373_v59 = vpop.f32.mrb[145].mxu0 }
0x3557   :  { %v20643_v7 = vadd.f32 %v8373_v59, %v20558_v24 }
0x3558   :  { %v8421_v29 = vand.u32 2147483647, %v20640_v14 }
0x3559   :  { %v8420_v16 = vand.u32 2147483647, %v20643_v7  ;;  %v15296_v12 = vpop.f32.mrb[146].mxu0 }
0x355a   :  { %v20648_v18 = vadd.f32 %v15296_v12, %v20560_v33  ;;  %v8383_v15 = vpop.f32.mrb[147].mxu0  ;;  %v8429_v25 = vsub.f32 0.0, %v8421_v29 }
0x355b   :  { %v20651_v21 = vadd.f32 %v8383_v15, %v20562_v23  ;;  %v8428_v39 = vsub.f32 0.0, %v8420_v16 }
0x355c   :  { %v8423_v46 = vand.u32 2147483647, %v20648_v18  ;;  %v8438_v62 = vmul.f32 1.442695, %v8429_v25 }
0x355d   :  { %v15299_v10 = vpop.f32.mrb[148].mxu0  ;;  %v8422_v32 = vand.u32 2147483647, %v20651_v21  ;;  %v8436_v52 = vmul.f32 1.442695, %v8428_v39 }
0x355e   :  { %v20655_v11 = vadd.f32 %v15299_v10, %v20564_v26  ;;  %v8393_v49 = vpop.f32.mrb[149].mxu0  ;;  %v8431_v4 = vsub.f32 0.0, %v8423_v46  ;;  %17442 = vpow2.f32 %v8438_v62 }
0x355f   :  { %v20658_v57 = vadd.f32 %v8393_v49, %v20566_v38  ;;  %v8430_v30 = vsub.f32 0.0, %v8422_v32  ;;  %17444 = vpow2.f32 %v8436_v52 }
0x3560   :  { %v8425_v42 = vand.u32 2147483647, %v20655_v11  ;;  %v8442_v31 = vmul.f32 1.442695, %v8431_v4 }
0x3561   :  { %v8424_v22 = vand.u32 2147483647, %v20658_v57  ;;  %v15302_v34 = vpop.f32.mrb[150].mxu0  ;;  %v8440_v29 = vmul.f32 1.442695, %v8430_v30 }
0x3562   :  { %v20663_v17 = vadd.f32 %v15302_v34, %v20568_v50  ;;  %v8403_v56 = vpop.f32.mrb[151].mxu0  ;;  %v8433_v16 = vsub.f32 0.0, %v8425_v42  ;;  %17446 = vpow2.f32 %v8442_v31 }
0x3563   :  { %v20666_v28 = vadd.f32 %v8403_v56, %v20570_v63  ;;  %v8432_v41 = vsub.f32 0.0, %v8424_v22  ;;  %17448 = vpow2.f32 %v8440_v29 }
0x3564   :  { %v8427_v54 = vand.u32 2147483647, %v20663_v17 }
0x3565   :  { %v15309_v9 = vpop.f32.mrb[152].mxu0  ;;  %v8426_v51 = vand.u32 2147483647, %v20666_v28  ;;  %v8444_v15 = vmul.f32 1.442695, %v8432_v41 }
0x3566   :  { %v20671_v1 = vadd.f32 %v15309_v9, %v20556_v8  ;;  %v8550_v44 = vpop.f32.mrb[153].mxu0  ;;  %v8435_v39 = vsub.f32 0.0, %v8427_v54 }
0x3567   :  { %v20675_v59 = vadd.f32 %v8550_v44, %v20558_v24  ;;  %v8434_v49 = vsub.f32 0.0, %v8426_v51  ;;  %v8446_v24 = vmul.f32 1.442695, %v8433_v16  ;;  %17450 = vpow2.f32 %v8444_v15 }
0x3568   :  { %v8598_v12 = vand.u32 2147483647, %v20671_v1  ;;  %v17443_v22 = vpop.eup %17442  ;;  %v8450_v30 = vmul.f32 1.442695, %v8435_v39 }
0x3569   :  { %v8597_v25 = vand.u32 2147483647, %v20675_v59  ;;  %v15312_v10 = vpop.f32.mrb[154].mxu0  ;;  %v17445_v41 = vpop.eup %17444  ;;  %v8448_v9 = vmul.f32 1.442695, %v8434_v49 }
0x356a   :  { %v8606_v46 = vsub.f32 0.0, %v8598_v12  ;;  %v20680_v62 = vadd.f32 %v15312_v10, %v20560_v33  ;;  %v8560_v32 = vpop.f32.mrb[155].mxu0  ;;  %v8452_v12 = vadd.f32 1.0, %v17445_v41 }
0x356b   :  { %v8605_v8 = vsub.f32 0.0, %v8597_v25  ;;  %v20683_v4 = vadd.f32 %v8560_v32, %v20562_v23  ;;  %v8453_v23 = vadd.f32 1.0, %v17443_v22 }
0x356c   :  { %v8615_v52 = vmul.f32 1.442695, %v8606_v46  ;;  %v8600_v42 = vand.u32 2147483647, %v20680_v62  ;;  %v17447_v39 = vpop.eup %17446 }
0x356d   :  { %v8613_v34 = vmul.f32 1.442695, %v8605_v8  ;;  %v15315_v56 = vpop.f32.mrb[156].mxu0  ;;  %v8599_v33 = vand.u32 2147483647, %v20683_v4 }
0x356e   :  { %17452 = vpow2.f32 %v8615_v52  ;;  %v8570_v31 = vpop.f32.mrb[157].mxu0  ;;  %v20688_v54 = vadd.f32 %v15315_v56, %v20564_v26  ;;  %v8608_v51 = vsub.f32 0.0, %v8600_v42  ;;  %v8455_v52 = vadd.f32 1.0, %v17447_v39 }
0x356f   :  { %v20691_v44 = vadd.f32 %v8570_v31, %v20566_v38  ;;  %17454 = vpow2.f32 %v8446_v24  ;;  %v8607_v29 = vsub.f32 0.0, %v8599_v33  ;;  %v17449_v24 = vpop.eup %17448 }
0x3570   :  { %17456 = vpow2.f32 %v8613_v34  ;;  %v8619_v15 = vmul.f32 1.442695, %v8608_v51  ;;  %v8602_v25 = vand.u32 2147483647, %v20688_v54  ;;  %v8454_v31 = vadd.f32 1.0, %v17449_v24 }
0x3571   :  { %v15318_v16 = vpop.f32.mrb[158].mxu0  ;;  %17458 = vpow2.f32 %v8450_v30  ;;  %v8617_v46 = vmul.f32 1.442695, %v8607_v29  ;;  %v8601_v26 = vand.u32 2147483647, %v20691_v44  ;;  %v17451_v56 = vpop.eup %17450 }
0x3572   :  { %17460 = vpow2.f32 %v8448_v9  ;;  %v20696_v10 = vadd.f32 %v15318_v16, %v20568_v50  ;;  %v8580_v38 = vpop.f32.mrb[159].mxu0  ;;  %v8610_v49 = vsub.f32 0.0, %v8602_v25  ;;  %v8456_v16 = vadd.f32 1.0, %v17451_v56 }
0x3573   :  { %17462 = vlog2.f32 %v8453_v23  ;;  %v20699_v8 = vadd.f32 %v8580_v38, %v20570_v63  ;;  %v8609_v32 = vsub.f32 0.0, %v8601_v26 }
0x3574   :  { %17464 = vpow2.f32 %v8619_v15  ;;  %v8623_v22 = vmul.f32 1.442695, %v8610_v49  ;;  %v8604_v34 = vand.u32 2147483647, %v20696_v10 }
0x3575   :  { %17466 = vpow2.f32 %v8617_v46  ;;  %v8621_v30 = vmul.f32 1.442695, %v8609_v32  ;;  %v8603_v63 = vand.u32 2147483647, %v20699_v8 }
0x3576   :  { %17468 = vlog2.f32 %v8452_v12  ;;  %v8612_v50 = vsub.f32 0.0, %v8604_v34 }
0x3577   :  { %17470 = vpow2.f32 %v8623_v22  ;;  %v8611_v51 = vsub.f32 0.0, %v8603_v63 }
0x3578   :  { %v17453_v42 = vpop.eup %17452  ;;  %17472 = vpow2.f32 %v8621_v30  ;;  %v8627_v33 = vmul.f32 1.442695, %v8612_v50 }
0x3579   :  { %v8630_v41 = vadd.f32 1.0, %v17453_v42  ;;  %v17455_v9 = vpop.eup %17454  ;;  %17474 = vlog2.f32 %v8455_v52  ;;  %v8625_v39 = vmul.f32 1.442695, %v8611_v51 }
0x357a   :  { %v17457_v23 = vpop.eup %17456  ;;  %v8457_v25 = vadd.f32 1.0, %v17455_v9 }
0x357b   :  { %17476 = vlog2.f32 %v8630_v41  ;;  %v17459_v29 = vpop.eup %17458  ;;  %v8629_v15 = vadd.f32 1.0, %v17457_v23 }
0x357c   :  { %17478 = vpow2.f32 %v8627_v33  ;;  %v17461_v12 = vpop.eup %17460  ;;  %v8459_v56 = vadd.f32 1.0, %v17459_v29  ;;  %v8590_v33 = vmax.f32 %v20671_v1, 0.0 }
0x357d   :  { %17480 = vlog2.f32 %v8454_v31  ;;  %v17463_v46 = vpop.eup %17462  ;;  %v8458_v49 = vadd.f32 1.0, %v17461_v12  ;;  %v8413_v12 = vmax.f32 %v20640_v14, 0.0 }
0x357e   :  { %17482 = vlog2.f32 %v8629_v15  ;;  %v17465_v26 = vpop.eup %17464  ;;  %v8463_v9 = vmul.f32 0.6931472, %v17463_v46  ;;  %v8589_v46 = vmax.f32 %v20675_v59, 0.0  ;;  %v8416_v59 = vmax.f32 %v20658_v57, 0.0 }
0x357f   :  { %17484 = vpow2.f32 %v8625_v39  ;;  %v17467_v38 = vpop.eup %17466  ;;  %v8632_v32 = vadd.f32 1.0, %v17465_v26  ;;  %v8591_v57 = vmax.f32 %v20683_v4, 0.0 }
0x3580   :  { %17486 = vlog2.f32 %v8456_v16  ;;  %v17469_v24 = vpop.eup %17468  ;;  %v8631_v52 = vadd.f32 1.0, %v17467_v38  ;;  %v8412_v16 = vmax.f32 %v20643_v7, 0.0  ;;  %v20709_v38 = vld [vmem:[%s18019_s12 + $0x4] ss:$0 sm:$0xff]  ;;  %v8415_v7 = vmax.f32 %v20648_v18, 0.0  ;;  %s21712_s12 = sld [smem:[#allocation32_spill]] }
0x3581   :  { %17488 = vlog2.f32 %v8457_v25  ;;  %v17471_v22 = vpop.eup %17470  ;;  %v8461_v41 = vmul.f32 0.6931472, %v17469_v24  ;;  %v20713_v24 = vld [vmem:[%s18014_s6 + $0x4] ss:$0 sm:$0xff]  ;;  %s21710_s6 = sld [smem:[#allocation29_spill]] }
0x3582   :  { %17490 = vlog2.f32 %v8632_v32  ;;  %v17473_v34 = vpop.eup %17472  ;;  %v8634_v30 = vadd.f32 1.0, %v17471_v22  ;;  %v8477_v32 = vadd.f32 %v8463_v9, %v8413_v12 }
0x3583   :  { %17492 = vlog2.f32 %v8631_v52  ;;  %v17475_v42 = vpop.eup %17474  ;;  %v8633_v50 = vadd.f32 1.0, %v17473_v34  ;;  %v8476_v26 = vadd.f32 %v8461_v41, %v8412_v16 }
0x3584   :  { %17494 = vlog2.f32 %v8458_v49  ;;  %v8467_v14 = vmul.f32 0.6931472, %v17475_v42 }
0x3585   :  { %v17477_v31 = vpop.eup %17476  ;;  %17496 = vlog2.f32 %v8634_v30  ;;  %v8417_v30 = vmax.f32 %v20655_v11, 0.0  ;;  %v8669_v42 = vmul.f32 %v20713_v24, %v8476_v26  ;;  %v8594_v26 = vmax.f32 %v20688_v54, 0.0 }
0x3586   :  { %v17479_v63 = vpop.eup %17478  ;;  %v8640_v23 = vmul.f32 0.6931472, %v17477_v31  ;;  %17498 = vlog2.f32 %v8633_v50 }
0x3587   :  { %v17481_v51 = vpop.eup %17480  ;;  %17500 = vlog2.f32 %v8459_v56  ;;  %v8636_v29 = vadd.f32 1.0, %v17479_v63  ;;  %v8414_v56 = vmax.f32 %v20651_v21, 0.0  ;;  %v8592_v63 = vmax.f32 %v20680_v62, 0.0 }
0x3588   :  { %v17483_v15 = vpop.eup %17482  ;;  %v20706_v25 = vadd.f32 %v8640_v23, %v8590_v33  ;;  %v8465_v52 = vmul.f32 0.6931472, %v17481_v51  ;;  %v8670_v23 = vmul.f32 %v20713_v24, %v8477_v32  ;;  %v8593_v32 = vmax.f32 %v20691_v44, 0.0 }
0x3589   :  { %v17485_v39 = vpop.eup %17484  ;;  %v8638_v1 = vmul.f32 0.6931472, %v17483_v15  ;;  %17502 = vlog2.f32 %v8636_v29  ;;  %v8479_v15 = vadd.f32 %v8467_v14, %v8415_v7  ;;  %v8418_v7 = vmax.f32 %v20666_v28, 0.0 }
0x358a   :  { %v17487_v49 = vpop.eup %17486  ;;  %v8635_v22 = vadd.f32 1.0, %v17485_v39  ;;  %v8686_v41 = vmul.f32 %v20709_v38, %v20706_v25  ;;  %v8478_v51 = vadd.f32 %v8465_v52, %v8414_v56 }
0x358b   :  { %v17489_v34 = vpop.eup %17488  ;;  %v20718_v50 = vadd.f32 %v8638_v1, %v8589_v46  ;;  %v8469_v9 = vmul.f32 0.6931472, %v17487_v49  ;;  %v8672_v44 = vmul.f32 %v20713_v24, %v8479_v15 }
0x358c   :  { %v17491_v31 = vpop.eup %17490  ;;  %17504 = vlog2.f32 %v8635_v22  ;;  %v8471_v12 = vmul.f32 0.6931472, %v17489_v34  ;;  %v8694_v1 = vadd.f32 %v8686_v41, %v8670_v23  ;;  %v8671_v14 = vmul.f32 %v20713_v24, %v8478_v51 }
0x358d   :  { %v17493_v18 = vpop.eup %17492  ;;  %v8644_v33 = vmul.f32 0.6931472, %v17491_v31  ;;  %v8685_v21 = vmul.f32 %v20709_v38, %v20718_v50  ;;  %v8480_v20 = vadd.f32 %v8469_v9, %v8416_v59  ;;  %v8596_v9 = vmax.f32 %v20696_v10, 0.0 }
0x358e   :  { %v17495_v11 = vpop.eup %17494  ;;  %v8642_v16 = vmul.f32 0.6931472, %v17493_v18  ;;  %v8481_v41 = vadd.f32 %v8471_v12, %v8417_v30 }
0x358f   :  { %v17497_v29 = vpop.eup %17496  ;;  %v20729_v62 = vadd.f32 %v8644_v33, %v8592_v63  ;;  %v8693_v39 = vadd.f32 %v8685_v21, %v8669_v42  ;;  %v8473_v59 = vmul.f32 0.6931472, %v17495_v11  ;;  %v8673_v21 = vmul.f32 %v20713_v24, %v8480_v20 }
0x3590   :  { %v17499_v46 = vpop.eup %17498  ;;  %v20731_v49 = vadd.f32 %v8642_v16, %v8591_v57  ;;  %v8648_v22 = vmul.f32 0.6931472, %v17497_v29  ;;  %v8419_v11 = vmax.f32 %v20663_v17, 0.0  ;;  %v8595_v16 = vmax.f32 %v20699_v8, 0.0 }
0x3591   :  { %v17501_v31 = vpop.eup %17500  ;;  %v8646_v52 = vmul.f32 0.6931472, %v17499_v46  ;;  %15351 = vmatprep.mubr.f32.mxu1 %v8693_v39  ;;  %v8688_v4 = vmul.f32 %v20709_v38, %v20729_v62  ;;  %v8482_v10 = vadd.f32 %v8473_v59, %v8418_v7  ;;  %v8674_v20 = vmul.f32 %v20713_v24, %v8481_v41 }
0x3592   :  { %v20738_v34 = vadd.f32 %v8648_v22, %v8594_v26  ;;  %15352 = vmatmul.mubr.f32.vlgmr.msra.gmra.mrb[148].mxu1 %v8694_v1  ;;  %v8687_v54 = vmul.f32 %v20709_v38, %v20731_v49  ;;  %v8475_v18 = vmul.f32 0.6931472, %v17501_v31 }
0x3593   :  { %v17503_v56 = vpop.eup %17502  ;;  %v20743_v63 = vadd.f32 %v8646_v52, %v8593_v32  ;;  %v8696_v42 = vadd.f32 %v8688_v4, %v8672_v44  ;;  %v8675_v17 = vmul.f32 %v20713_v24, %v8482_v10 }
0x3594   :  { %v8652_v33 = vmul.f32 0.6931472, %v17503_v56  ;;  %v8695_v28 = vadd.f32 %v8687_v54, %v8671_v14  ;;  %v8690_v51 = vmul.f32 %v20709_v38, %v20738_v34  ;;  %v8483_v12 = vadd.f32 %v8475_v18, %v8419_v11 }
0x3595   :  { %v8689_v23 = vmul.f32 %v20709_v38, %v20743_v63 }
0x3596   :  { %v17505_v30 = vpop.eup %17504  ;;  %v20753_v57 = vadd.f32 %v8652_v33, %v8596_v9  ;;  %15354 = vmatprep.mubr.f32.mxu1 %v8695_v28  ;;  %v8698_v46 = vadd.f32 %v8690_v51, %v8674_v20  ;;  %v8676_v26 = vmul.f32 %v20713_v24, %v8483_v12 }
0x3597   :  { %v8650_v29 = vmul.f32 0.6931472, %v17505_v30  ;;  %15355 = vmatmul.mubr.f32.gmra.mrb[150].mxu1 %v8696_v42  ;;  %v8697_v15 = vadd.f32 %v8689_v23, %v8673_v21 }
0x3598   :  { %v8692_v1 = vmul.f32 %v20709_v38, %v20753_v57 }
0x3599   :  { %v20757_v39 = vadd.f32 %v8650_v29, %v8595_v16  ;;  %15357 = vmatprep.mubr.f32.mxu1 %v8697_v15 }
0x359a   :  { %v8700_v31 = vadd.f32 %v8692_v1, %v8676_v26 }
0x359b   :  { %15358 = vmatmul.mubr.f32.gmra.mrb[152].mxu1 %v8698_v46  ;;  %v8691_v8 = vmul.f32 %v20709_v38, %v20757_v39 }
0x359d   :  { %v8699_v22 = vadd.f32 %v8691_v8, %v8675_v17 }
0x359f   :  { %15360 = vmatprep.mubr.f32.mxu1 %v8699_v22 }
0x35a0   :  { %15361 = vmatmul.mubr.f32.gmra.mrb[154].mxu1 %v8700_v31 }
0x35a1   :  { %15400 = vmatprep.mubr.msk.f32.mxu1 %vm818_vm0, %v20595_v2 }
0x3665   :  { %v20767_v32 = vpop.f32.mrb[148].mxu1 }
0x3666   :  { %v8815_v52 = vand.u32 2147483647, %v20767_v32  ;;  %v20770_v4 = vpop.f32.mrb[149].mxu1 }
0x3667   :  { %v8814_v7 = vand.u32 2147483647, %v20770_v4 }
0x3668   :  { %v8823_v14 = vsub.f32 0.0, %v8815_v52 }
0x3669   :  { %v8822_v54 = vsub.f32 0.0, %v8814_v7 }
0x366a   :  { %v8832_v38 = vmul.f32 1.442695, %v8823_v14  ;;  %v20773_v56 = vpop.f32.mrb[150].mxu1 }
0x366b   :  { %v8830_v24 = vmul.f32 1.442695, %v8822_v54  ;;  %v8817_v41 = vand.u32 2147483647, %v20773_v56  ;;  %v20776_v59 = vpop.f32.mrb[151].mxu1 }
0x366c   :  { %17506 = vpow2.f32 %v8832_v38  ;;  %v8816_v2 = vand.u32 2147483647, %v20776_v59 }
0x366d   :  { %17508 = vpow2.f32 %v8830_v24  ;;  %v8825_v44 = vsub.f32 0.0, %v8817_v41 }
0x366e   :  { %v8824_v18 = vsub.f32 0.0, %v8816_v2  ;;  %v20779_v9 = vpop.f32.mrb[152].mxu1 }
0x366f   :  { %v8836_v33 = vmul.f32 1.442695, %v8825_v44  ;;  %v8819_v28 = vand.u32 2147483647, %v20779_v9  ;;  %v20782_v42 = vpop.f32.mrb[153].mxu1 }
0x3670   :  { %v8834_v21 = vmul.f32 1.442695, %v8824_v18  ;;  %v8818_v23 = vand.u32 2147483647, %v20782_v42 }
0x3671   :  { %17510 = vpow2.f32 %v8836_v33  ;;  %v8827_v51 = vsub.f32 0.0, %v8819_v28  ;;  %v8807_v33 = vmax.f32 %v20767_v32, 0.0 }
0x3672   :  { %17512 = vpow2.f32 %v8834_v21  ;;  %v8826_v30 = vsub.f32 0.0, %v8818_v23  ;;  %v20793_v23 = vld [vmem:[%s21600_s5 + $0x4] ss:$0 sm:$0xff] }
0x3673   :  { %v8840_v11 = vmul.f32 1.442695, %v8827_v51  ;;  %v20785_v16 = vpop.f32.mrb[154].mxu1  ;;  %v8806_v51 = vmax.f32 %v20770_v4, 0.0 }
0x3674   :  { %v8838_v10 = vmul.f32 1.442695, %v8826_v30  ;;  %v8821_v29 = vand.u32 2147483647, %v20785_v16  ;;  %v20788_v15 = vpop.f32.mrb[155].mxu1 }
0x3675   :  { %17514 = vpow2.f32 %v8840_v11  ;;  %v8820_v20 = vand.u32 2147483647, %v20788_v15 }
0x3676   :  { %v17507_v12 = vpop.eup %17506  ;;  %17516 = vpow2.f32 %v8838_v10  ;;  %v8829_v46 = vsub.f32 0.0, %v8821_v29 }
0x3677   :  { %v17509_v1 = vpop.eup %17508  ;;  %v8847_v17 = vadd.f32 1.0, %v17507_v12  ;;  %v8828_v8 = vsub.f32 0.0, %v8820_v20  ;;  %v20797_v20 = vld [vmem:[%s21601_s9 + $0x4] ss:$0 sm:$0xff] }
0x3678   :  { %v8846_v26 = vadd.f32 1.0, %v17509_v1  ;;  %v8844_v22 = vmul.f32 1.442695, %v8829_v46 }
0x3679   :  { %17518 = vlog2.f32 %v8847_v17  ;;  %v8842_v31 = vmul.f32 1.442695, %v8828_v8 }
0x367a   :  { %17520 = vlog2.f32 %v8846_v26  ;;  %v8809_v26 = vmax.f32 %v20773_v56, 0.0  ;;  %v8811_v56 = vmax.f32 %v20779_v9, 0.0 }
0x367b   :  { %v17511_v52 = vpop.eup %17510  ;;  %17522 = vpow2.f32 %v8844_v22 }
0x367c   :  { %v17513_v7 = vpop.eup %17512  ;;  %v8849_v14 = vadd.f32 1.0, %v17511_v52  ;;  %17524 = vpow2.f32 %v8842_v31  ;;  %v8808_v31 = vmax.f32 %v20776_v59, 0.0 }
0x367d   :  { %v8848_v54 = vadd.f32 1.0, %v17513_v7 }
0x367e   :  { %17526 = vlog2.f32 %v8849_v14 }
0x367f   :  { %v17515_v38 = vpop.eup %17514  ;;  %17528 = vlog2.f32 %v8848_v54 }
0x3680   :  { %v17517_v24 = vpop.eup %17516  ;;  %v8851_v41 = vadd.f32 1.0, %v17515_v38 }
0x3681   :  { %v8850_v2 = vadd.f32 1.0, %v17517_v24 }
0x3682   :  { %17530 = vlog2.f32 %v8851_v41 }
0x3683   :  { %v17519_v44 = vpop.eup %17518  ;;  %17532 = vlog2.f32 %v8850_v2 }
0x3684   :  { %v17521_v18 = vpop.eup %17520  ;;  %v8857_v28 = vmul.f32 0.6931472, %v17519_v44 }
0x3685   :  { %v17523_v21 = vpop.eup %17522  ;;  %v8855_v30 = vmul.f32 0.6931472, %v17521_v18 }
0x3686   :  { %v17525_v11 = vpop.eup %17524  ;;  %v8871_v10 = vadd.f32 %v8857_v28, %v8807_v33  ;;  %v8853_v29 = vadd.f32 1.0, %v17523_v21  ;;  %v8810_v28 = vmax.f32 %v20782_v42, 0.0 }
0x3687   :  { %v8870_v12 = vadd.f32 %v8855_v30, %v8806_v51  ;;  %v8852_v46 = vadd.f32 1.0, %v17525_v11 }
0x3688   :  { %v17527_v1 = vpop.eup %17526  ;;  %v8887_v17 = vmul.f32 %v20793_v23, %v8871_v10  ;;  %17534 = vlog2.f32 %v8853_v29 }
0x3689   :  { %v17529_v8 = vpop.eup %17528  ;;  %v8886_v32 = vmul.f32 %v20793_v23, %v8870_v12  ;;  %v8861_v22 = vmul.f32 0.6931472, %v17527_v1  ;;  %17536 = vlog2.f32 %v8852_v46 }
0x368a   :  { %v20803_v4 = vadd.f32 %v20797_v20, %v8887_v17  ;;  %v8859_v52 = vmul.f32 0.6931472, %v17529_v8 }
0x368b   :  { %v8873_v7 = vadd.f32 %v8861_v22, %v8809_v26  ;;  %v20807_v14 = vadd.f32 %v20797_v20, %v8886_v32  ;;  %v8813_v32 = vmax.f32 %v20785_v16, 0.0 }
0x368c   :  { %v17531_v54 = vpop.eup %17530  ;;  %v8919_v38 = vand.u32 2147483647, %v20803_v4  ;;  %v8872_v24 = vadd.f32 %v8859_v52, %v8808_v31 }
0x368d   :  { %v17533_v41 = vpop.eup %17532  ;;  %v8889_v2 = vmul.f32 %v20793_v23, %v8873_v7  ;;  %v8865_v44 = vmul.f32 0.6931472, %v17531_v54  ;;  %v8918_v18 = vand.u32 2147483647, %v20807_v14 }
0x368e   :  { %v8927_v33 = vsub.f32 0.0, %v8919_v38  ;;  %v8888_v59 = vmul.f32 %v20793_v23, %v8872_v24  ;;  %v8863_v21 = vmul.f32 0.6931472, %v17533_v41  ;;  %v8812_v38 = vmax.f32 %v20788_v15, 0.0 }
0x368f   :  { %v20816_v51 = vadd.f32 %v20797_v20, %v8889_v2  ;;  %v8875_v30 = vadd.f32 %v8865_v44, %v8811_v56  ;;  %v8926_v11 = vsub.f32 0.0, %v8918_v18 }
0x3690   :  { %v8936_v10 = vmul.f32 1.442695, %v8927_v33  ;;  %v20819_v29 = vadd.f32 %v20797_v20, %v8888_v59  ;;  %v8874_v12 = vadd.f32 %v8863_v21, %v8810_v28 }
0x3691   :  { %v8921_v9 = vand.u32 2147483647, %v20816_v51  ;;  %v8891_v46 = vmul.f32 %v20793_v23, %v8875_v30  ;;  %v8934_v1 = vmul.f32 1.442695, %v8926_v11 }
0x3692   :  { %v17535_v17 = vpop.eup %17534  ;;  %17538 = vpow2.f32 %v8936_v10  ;;  %v8920_v42 = vand.u32 2147483647, %v20819_v29  ;;  %v8890_v8 = vmul.f32 %v20793_v23, %v8874_v12 }
0x3693   :  { %v17537_v26 = vpop.eup %17536  ;;  %v8929_v22 = vsub.f32 0.0, %v8921_v9  ;;  %v20827_v31 = vadd.f32 %v20797_v20, %v8891_v46  ;;  %v8869_v52 = vmul.f32 0.6931472, %v17535_v17  ;;  %17540 = vpow2.f32 %v8934_v1 }
0x3694   :  { %v8928_v7 = vsub.f32 0.0, %v8920_v42  ;;  %v20830_v54 = vadd.f32 %v20797_v20, %v8890_v8  ;;  %v8867_v24 = vmul.f32 0.6931472, %v17537_v26 }
0x3695   :  { %v8940_v41 = vmul.f32 1.442695, %v8929_v22  ;;  %v8923_v2 = vand.u32 2147483647, %v20827_v31  ;;  %v8877_v56 = vadd.f32 %v8869_v52, %v8813_v32 }
0x3696   :  { %v8938_v44 = vmul.f32 1.442695, %v8928_v7  ;;  %v8922_v16 = vand.u32 2147483647, %v20830_v54  ;;  %v8876_v18 = vadd.f32 %v8867_v24, %v8812_v38 }
0x3697   :  { %17542 = vpow2.f32 %v8940_v41  ;;  %v8931_v33 = vsub.f32 0.0, %v8923_v2  ;;  %v8893_v59 = vmul.f32 %v20793_v23, %v8877_v56 }
0x3698   :  { %17544 = vpow2.f32 %v8938_v44  ;;  %v8930_v28 = vsub.f32 0.0, %v8922_v16  ;;  %v8892_v21 = vmul.f32 %v20793_v23, %v8876_v18  ;;  %v8910_v44 = vmax.f32 %v20807_v14, 0.0 }
0x3699   :  { %v20838_v30 = vadd.f32 %v20797_v20, %v8893_v59  ;;  %v8944_v15 = vmul.f32 1.442695, %v8931_v33  ;;  %v8912_v14 = vmax.f32 %v20819_v29, 0.0 }
0x369a   :  { %v8942_v11 = vmul.f32 1.442695, %v8930_v28  ;;  %v20841_v10 = vadd.f32 %v20797_v20, %v8892_v21 }
0x369b   :  { %v8925_v12 = vand.u32 2147483647, %v20838_v30 }
0x369c   :  { %v17539_v9 = vpop.eup %17538  ;;  %17546 = vpow2.f32 %v8942_v11  ;;  %v8924_v46 = vand.u32 2147483647, %v20841_v10 }
0x369d   :  { %v17541_v1 = vpop.eup %17540  ;;  %v8951_v17 = vadd.f32 1.0, %v17539_v9  ;;  %17548 = vpow2.f32 %v8944_v15  ;;  %v8933_v23 = vsub.f32 0.0, %v8925_v12  ;;  %v8911_v15 = vmax.f32 %v20803_v4, 0.0 }
0x369e   :  { %v8932_v42 = vsub.f32 0.0, %v8924_v46  ;;  %v8950_v8 = vadd.f32 1.0, %v17541_v1  ;;  %v8913_v4 = vmax.f32 %v20816_v51, 0.0 }
0x369f   :  { %17550 = vlog2.f32 %v8951_v17  ;;  %v8948_v52 = vmul.f32 1.442695, %v8933_v23 }
0x36a0   :  { %v8946_v32 = vmul.f32 1.442695, %v8932_v42  ;;  %17552 = vlog2.f32 %v8950_v8 }
0x36a1   :  { %v17543_v26 = vpop.eup %17542 }
0x36a2   :  { %v17545_v22 = vpop.eup %17544  ;;  %17554 = vpow2.f32 %v8946_v32  ;;  %v8953_v7 = vadd.f32 1.0, %v17543_v26 }
0x36a3   :  { %v8952_v20 = vadd.f32 1.0, %v17545_v22 }
0x36a5   :  { %17556 = vlog2.f32 %v8952_v20 }
0x36a6   :  { %v17547_v38 = vpop.eup %17546  ;;  %17558 = vpow2.f32 %v8948_v52  ;;  %v8914_v52 = vmax.f32 %v20830_v54, 0.0  ;;  %v8917_v54 = vmax.f32 %v20838_v30, 0.0 }
0x36a7   :  { %v17549_v24 = vpop.eup %17548  ;;  %17560 = vlog2.f32 %v8953_v7  ;;  %v8954_v41 = vadd.f32 1.0, %v17547_v38  ;;  %v8915_v38 = vmax.f32 %v20827_v31, 0.0 }
0x36a8   :  { %v8955_v18 = vadd.f32 1.0, %v17549_v24 }
0x36a9   :  { %v17551_v2 = vpop.eup %17550  ;;  %17562 = vlog2.f32 %v8954_v41 }
0x36aa   :  { %v17553_v56 = vpop.eup %17552  ;;  %v8961_v28 = vmul.f32 0.6931472, %v17551_v2  ;;  %17564 = vlog2.f32 %v8955_v18  ;;  %v8916_v2 = vmax.f32 %v20841_v10, 0.0 }
0x36ab   :  { %v8959_v16 = vmul.f32 0.6931472, %v17553_v56 }
0x36ac   :  { %v17555_v33 = vpop.eup %17554  ;;  %v20850_v9 = vadd.f32 %v8961_v28, %v8911_v15 }
0x36ad   :  { %v20846_v59 = vadd.f32 %v8959_v16, %v8910_v44  ;;  %v8956_v11 = vadd.f32 1.0, %v17555_v33 }
0x36af   :  { %v17557_v21 = vpop.eup %17556  ;;  %8982 = vxpose.xlu0.b32.start [1/8] (short) (narrow) %v20846_v59, 8  ;;  %17566 = vlog2.f32 %v8956_v11 }
0x36b0   :  { %v17559_v12 = vpop.eup %17558  ;;  %v8963_v46 = vmul.f32 0.6931472, %v17557_v21 }
0x36b1   :  { %v17561_v1 = vpop.eup %17560  ;;  %v8957_v17 = vadd.f32 1.0, %v17559_v12 }
0x36b2   :  { %v20854_v42 = vadd.f32 %v8963_v46, %v8912_v14  ;;  %v8965_v8 = vmul.f32 0.6931472, %v17561_v1 }
0x36b3   :  { %8983 = vxpose.xlu0.b32.cont [2/8] (short) (narrow) %v20850_v9, 8  ;;  %v17563_v23 = vpop.eup %17562  ;;  %17568 = vlog2.f32 %v8957_v17 }
0x36b4   :  { %v20858_v32 = vadd.f32 %v8965_v8, %v8913_v4  ;;  %v8967_v26 = vmul.f32 0.6931472, %v17563_v23  ;;  %v17565_v22 = vpop.eup %17564 }
0x36b5   :  { %v8969_v20 = vmul.f32 0.6931472, %v17565_v22 }
0x36b6   :  { %v20862_v29 = vadd.f32 %v8967_v26, %v8914_v52 }
0x36b7   :  { %8984 = vxpose.xlu0.b32.cont [3/8] (short) (narrow) %v20854_v42, 8  ;;  %v20866_v24 = vadd.f32 %v8969_v20, %v8915_v38 }
0x36b9   :  { %v17567_v7 = vpop.eup %17566 }
0x36ba   :  { %v8971_v51 = vmul.f32 0.6931472, %v17567_v7 }
0x36bb   :  { %8985 = vxpose.xlu0.b32.cont [4/8] (short) (narrow) %v20858_v32, 8 }
0x36bc   :  { %v20870_v56 = vadd.f32 %v8971_v51, %v8916_v2 }
0x36bd   :  { %v17569_v41 = vpop.eup %17568 }
0x36be   :  { %v8973_v44 = vmul.f32 0.6931472, %v17569_v41 }
0x36bf   :  { %8986 = vxpose.xlu0.b32.cont [5/8] (short) (narrow) %v20862_v29, 8 }
0x36c0   :  { %v20874_v16 = vadd.f32 %v8973_v44, %v8917_v54 }
0x36c3   :  { %8987 = vxpose.xlu0.b32.cont [6/8] (short) (narrow) %v20866_v24, 8 }
0x36c7   :  { %8988 = vxpose.xlu0.b32.cont [7/8] (short) (narrow) %v20870_v56, 8 }
0x36cb   :  { %8989 = vxpose.xlu0.b32.end [8/8] (short) (narrow) %v20874_v16, 8 }
0x372f   :  { %v8998_v31 = vpop.trf.xlu0 }
0x3730   :  { %v9021_v18 = vrot.slane %v8998_v31, %v18619_v58 }
0x3732   :  { %v9022_v33 = vcombine.high %v9021_v18, %v9021_v18  ;;  %v9029_v28 = vrot.slane %v9021_v18, %v18619_v58 }
0x3734   :  { %v9036_v21 = vrot.slane %v9022_v33, %v18619_v58  ;;  %v9042_v10 = vrot.slane %v9029_v28, %v18626_v60  ;;  %v9037_v46 = vcombine.high %v9029_v28, %v9029_v28 }
0x3736   :  { %v9059_v15 = vadd.f32 %v9042_v10, %v18631_v13  ;;  %v9060_v30 = vadd.f32 %v9042_v10, %v18635_v61  ;;  %v9046_v12 = vrot.slane %v9036_v21, %v18626_v60  ;;  %v9050_v8 = vrot.slane %v9037_v46, %v18626_v60 }
0x3737   :  { %v9038_v26 = vcombine.high %v9036_v21, %v9036_v21 }
0x3738   :  { %v9067_v11 = vsel %vm1627_vm5, %v9059_v15, -inf  ;;  %v9070_v1 = vsel %vm1631_vm6, %v9060_v30, -inf  ;;  %v9061_v14 = vadd.f32 %v9046_v12, %v18631_v13  ;;  %v9062_v58 = vadd.f32 %v9046_v12, %v18635_v61 }
0x3739   :  { %9068 = vmax.xlane.f32.xlu1 %v9067_v11  ;;  %v9063_v4 = vadd.f32 %v9050_v8, %v18631_v13  ;;  %v9064_v52 = vadd.f32 %v9050_v8, %v18635_v61  ;;  %v9054_v20 = vrot.slane %v9038_v26, %v18626_v60 }
0x373a   :  { %v9073_v17 = vsel %vm1627_vm5, %v9061_v14, -inf  ;;  %v9076_v23 = vsel %vm1631_vm6, %v9062_v58, -inf }
0x373b   :  { %v9079_v22 = vsel %vm1627_vm5, %v9063_v4, -inf  ;;  %v9082_v7 = vsel %vm1631_vm6, %v9064_v52, -inf  ;;  %v9065_v38 = vadd.f32 %v9054_v20, %v18631_v13  ;;  %v9066_v41 = vadd.f32 %v9054_v20, %v18635_v61  ;;  %v20928_v52 = vld [vmem:[%s17979_s29 + $0x18] sm:$0xff]  ;;  %v20933_v20 = vld [vmem:[%s17979_s29 + $0x20] sm:$0xff] }
0x373d   :  { %9071 = vmax.xlane.f32.xlu1 %v9070_v1  ;;  %v9085_v51 = vsel %vm1627_vm5, %v9065_v38, -inf  ;;  %v9088_v2 = vsel %vm1631_vm6, %v9066_v41, -inf  ;;  %vm21695_vm6 = vcmask 1043459   ;;  %v20943_v38 = vld [vmem:[%s17979_s29 + $0x30] sm:$0xff]  ;;  %v20953_v41 = vld [vmem:[%s21602_s17] sm:$0xff] }
0x3741   :  { %9074 = vmax.xlane.f32.xlu1 %v9073_v17 }
0x3745   :  { %9077 = vmax.xlane.f32.xlu1 %v9076_v23 }
0x3749   :  { %9080 = vmax.xlane.f32.xlu1 %v9079_v22  ;;  %v20918_v22 = vld [vmem:[%s17979_s29 + $0x8] sm:$0xff] }
0x374d   :  { %9083 = vmax.xlane.f32.xlu1 %v9082_v7  ;;  %v20938_v7 = vld [vmem:[%s17979_s29 + $0x28] sm:$0xff] }
0x3751   :  { %9086 = vmax.xlane.f32.xlu1 %v9085_v51  ;;  %v20948_v51 = vld [vmem:[%s17979_s29 + $0x38] sm:$0xf] }
0x3755   :  { %9089 = vmax.xlane.f32.xlu1 %v9088_v2 }
0x37c6   :  { %v9069_v44 = vpop.xlane.xlu1 %9068 }
0x37c7   :  { %v9102_v30 = vrot.slane %v9069_v44, %v18512_v40 }
0x37ca   :  { %v9072_v54 = vpop.xlane.xlu1 %9071 }
0x37cb   :  { %v9106_v15 = vrot.slane %v9072_v54, %v18515_v47 }
0x37cd   :  { %v9107_v14 = vsel %vm1672_vm8, %v9106_v15, %v9102_v30 }
0x37ce   :  { %v9075_v31 = vpop.xlane.xlu1 %9074 }
0x37cf   :  { %v9111_v61 = vrot.slane %v9075_v31, %v18512_v40 }
0x37d2   :  { %v9078_v18 = vpop.xlane.xlu1 %9077 }
0x37d3   :  { %v9115_v21 = vrot.slane %v9078_v18, %v18515_v47 }
0x37d5   :  { %v9116_v12 = vsel %vm1672_vm8, %v9115_v21, %v9111_v61 }
0x37d6   :  { %v9081_v33 = vpop.xlane.xlu1 %9080  ;;  %v9135_v8 = vsel %vm1701_vm9, %v9116_v12, %v9107_v14 }
0x37d7   :  { %v9120_v11 = vrot.slane %v9081_v33, %v18512_v40 }
0x37da   :  { %v9084_v28 = vpop.xlane.xlu1 %9083 }
0x37db   :  { %v9124_v10 = vrot.slane %v9084_v28, %v18515_v47 }
0x37dd   :  { %v9125_v46 = vsel %vm1672_vm8, %v9124_v10, %v9120_v11 }
0x37de   :  { %v9087_v13 = vpop.xlane.xlu1 %9086  ;;  %v9136_v4 = vsel %vm1703_vm10, %v9125_v46, %v9135_v8  ;;  %vm21698_vm10 = vmmov %vm21645_vm1 }
0x37df   :  { %v9129_v17 = vrot.slane %v9087_v13, %v18512_v40 }
0x37e2   :  { %v9090_v1 = vpop.xlane.xlu1 %9089 }
0x37e3   :  { %v9133_v58 = vrot.slane %v9090_v1, %v18515_v47  ;;  %v20923_v47 = vld [vmem:[%s17979_s29 + $0x10] sm:$0xff]  ;;  %s21705_s29 = sld [smem:[#allocation28_spill]] }
0x37e5   :  { %v9134_v23 = vsel %vm1672_vm8, %v9133_v58, %v9129_v17  ;;  %vm21696_vm8 = vcmask 1043456  }
0x37e6   :  { %v9137_v26 = vsel %vm21695_vm6, %v9134_v23, %v9136_v4  ;;  %vm21697_vm9 = vmmov %vm21696_vm8 }
0x37e7   :  { %15363 = vmatprep.subr.msk.mxu0 %vm818_vm0, %v9137_v26  ;;  %vm21702_vm6 = vmmov %vm21645_vm1 }
0x37e8   :  { %15364 = vmatpush3.xpose.msk.msra.mxu0 %vm818_vm0, %v9137_v26 }
0x37eb   :  { %15366 = vmatmul.mubr.msk.f32.vlgmr.msra.gmra.mrb[160].mxu0 %vm818_vm0, %v20918_v22 }
0x37ec   :  { %15368 = vmatprep.mubr.msk.f32.mxu0 %vm818_vm0, %v20923_v47 }
0x37ef   :  { %15369 = vmatmul.mubr.msk.f32.gmra.mrb[162].mxu0 %vm818_vm0, %v20928_v52 }
0x37f0   :  { %15371 = vmatprep.mubr.msk.f32.mxu0 %vm818_vm0, %v20933_v20 }
0x37f3   :  { %15372 = vmatmul.mubr.msk.f32.gmra.mrb[164].mxu0 %vm818_vm0, %v20938_v7 }
0x37f4   :  { %15374 = vmatprep.mubr.msk.f32.mxu0 %vm818_vm0, %v20943_v38 }
0x37f7   :  { %15375 = vmatmul.mubr.msk.f32.gmra.mrb[166].mxu0 %vm818_vm0, %v20948_v51 }
0x37f8   :  { %15393 = vmatprep.mubr.msk.f32.mxu0 %vm1627_vm5, %v20953_v41 }
0x38be   :  { %v15367_v2 = vpop.f32.mrb[160].mxu0 }
0x38bf   :  { %v9246_v44 = vsub.f32 %v20850_v9, %v15367_v2  ;;  %v9206_v54 = vpop.f32.mrb[161].mxu0 }
0x38c0   :  { %v9245_v31 = vsub.f32 %v20846_v59, %v9206_v54 }
0x38c1   :  { %v9255_v18 = vmul.f32 1.442695, %v9246_v44 }
0x38c2   :  { %v9253_v33 = vmul.f32 1.442695, %v9245_v31  ;;  %v15370_v28 = vpop.f32.mrb[162].mxu0 }
0x38c3   :  { %17570 = vpow2.f32 %v9255_v18  ;;  %v9248_v21 = vsub.f32 %v20858_v32, %v15370_v28  ;;  %v9216_v10 = vpop.f32.mrb[163].mxu0  ;;  %v17785_v18 = vld [vmem:[%s21603_s21] sm:$0xf] }
0x38c4   :  { %17572 = vpow2.f32 %v9253_v33  ;;  %v9247_v13 = vsub.f32 %v20854_v42, %v9216_v10  ;;  %v20990_v33 = vld [vmem:[%s21602_s17 + $0x8] sm:$0xf] }
0x38c5   :  { %v9259_v15 = vmul.f32 1.442695, %v9248_v21 }
0x38c6   :  { %v9257_v61 = vmul.f32 1.442695, %v9247_v13  ;;  %v15373_v11 = vpop.f32.mrb[164].mxu0 }
0x38c7   :  { %17574 = vpow2.f32 %v9259_v15  ;;  %v9250_v30 = vsub.f32 %v20866_v24, %v15373_v11  ;;  %v9226_v9 = vpop.f32.mrb[165].mxu0 }
0x38c8   :  { %17576 = vpow2.f32 %v9257_v61  ;;  %v9249_v59 = vsub.f32 %v20862_v29, %v9226_v9 }
0x38c9   :  { %v9263_v12 = vmul.f32 1.442695, %v9250_v30 }
0x38ca   :  { %v9261_v46 = vmul.f32 1.442695, %v9249_v59  ;;  %v15376_v1 = vpop.f32.mrb[166].mxu0 }
0x38cb   :  { %17578 = vpow2.f32 %v9263_v12  ;;  %v9252_v32 = vsub.f32 %v20874_v16, %v15376_v1  ;;  %v9236_v14 = vpop.f32.mrb[167].mxu0 }
0x38cc   :  { %17580 = vpow2.f32 %v9261_v46  ;;  %v9251_v42 = vsub.f32 %v20870_v56, %v9236_v14 }
0x38cd   :  { %v20965_v17 = vpop.eup %17570  ;;  %v9267_v58 = vmul.f32 1.442695, %v9252_v32 }
0x38ce   :  { %v17573_v8 = vpop.eup %17572  ;;  %v9265_v23 = vmul.f32 1.442695, %v9251_v42 }
0x38cf   :  { %17582 = vpow2.f32 %v9267_v58  ;;  %v16450_v24 = vpack.c.bf16 %v20965_v17, %v17573_v8 }
0x38d0   :  { %17584 = vpow2.f32 %v9265_v23 }
0x38d1   :  { %v20968_v29 = vpop.eup %17574  ;;  %16451 = vmatprep.subr.bf16.mxu0 %v16450_v24 }
0x38d2   :  { %v17577_v4 = vpop.eup %17576  ;;  %16453 = vmatpush3.bf16.msra.mxu0 %v16450_v24 }
0x38d3   :  { %v16454_v16 = vpack.c.bf16 %v20968_v29, %v17577_v4 }
0x38d5   :  { %v20971_v26 = vpop.eup %17578  ;;  %16455 = vmatprep.subr.bf16.mxu0 %v16454_v16 }
0x38d6   :  { %v20973_v56 = vpop.eup %17580  ;;  %16457 = vmatpush3.bf16.msra.mxu0 %v16454_v16 }
0x38d7   :  { %v16458_v2 = vpack.c.bf16 %v20971_v26, %v20973_v56 }
0x38d9   :  { %v20977_v44 = vpop.eup %17582  ;;  %16459 = vmatprep.subr.bf16.mxu0 %v16458_v2 }
0x38da   :  { %v20979_v54 = vpop.eup %17584  ;;  %16461 = vmatpush3.bf16.msra.mxu0 %v16458_v2 }
0x38db   :  { %v16462_v31 = vpack.c.bf16 %v20977_v44, %v20979_v54 }
0x38dd   :  { %16464 = vmatprep.subr.msk.bf16.mxu0 %vm18283_vm4, %v16462_v31 }
0x38de   :  { %16467 = vmatpush3.bf16.msk.msra.mxu0 %vm18283_vm4, %v16462_v31 }
0x38df   :  { %15412 = vmatprep.subr.msk.mxu0 %vm21696_vm8, %v17785_v18  ;;  %vm21703_vm8 = vmmov %vm21645_vm1 }
0x38e1   :  { %15394 = vmatmul.mubr.msk.f32.vlgmr.msra.gmra.mrb[168].mxu0 %vm1627_vm5, %v20990_v33 }
0x38e2   :  { %15413 = vmatpush3.msk.msra.mxu0 %vm21697_vm9, %v17785_v18  ;;  %vm21704_vm9 = vmmov %vm21645_vm1 }
0x38e3   :  { %16493 = vmatprep.subr.bf16.mxu0 %v18766_v43 }
0x39b4   :  { %v15395_v28 = vpop.f32.mrb[168].mxu0 }
0x39b5   :  { %v9344_v21 = vadd.f32 1e-16, %v15395_v28  ;;  %v9338_v10 = vpop.f32.mrb[169].mxu0 }
0x39b6   :  { %v9339_v13 = vadd.f32 1e-16, %v9338_v10 }
0x39b8   :  { %v16468_v15 = vpack.c.bf16 %v9344_v21, %v9339_v13 }
0x39ba   :  { %16470 = vmatprep.subr.msk.bf16.mxu1 %vm18283_vm4, %v16468_v15 }
0x39bb   :  { %16473 = vmatpush3.bf16.msk.msra.mxu1 %vm18283_vm4, %v16468_v15 }
0x39be   :  { %15401 = vmatmul.mubr.msk.f32.vlgmr.msra.gmra.mrb[156].mxu1 %vm818_vm0, %v20918_v22 }
0x39bf   :  { %15403 = vmatprep.mubr.msk.f32.mxu1 %vm818_vm0, %v20923_v47 }
0x39c2   :  { %15404 = vmatmul.mubr.msk.f32.gmra.mrb[158].mxu1 %vm818_vm0, %v20928_v52 }
0x39c3   :  { %15406 = vmatprep.mubr.msk.f32.mxu1 %vm818_vm0, %v20933_v20 }
0x39c6   :  { %15407 = vmatmul.mubr.msk.f32.gmra.mrb[160].mxu1 %vm818_vm0, %v20938_v7 }
0x39c7   :  { %15409 = vmatprep.mubr.msk.f32.mxu1 %vm818_vm0, %v20943_v38 }
0x39ca   :  { %15410 = vmatmul.mubr.msk.f32.gmra.mrb[162].mxu1 %vm818_vm0, %v20948_v51 }
0x39cb   :  { %15442 = vmatprep.mubr.msk.f32.mxu1 %vm1627_vm5, %v20953_v41 }
0x3a91   :  { %v15402_v22 = vpop.f32.mrb[156].mxu1 }
0x3a92   :  { %17586 = vrcp.f32 %v15402_v22  ;;  %v9416_v47 = vpop.f32.mrb[157].mxu1 }
0x3a93   :  { %17588 = vrcp.f32 %v9416_v47 }
0x3a95   :  { %v15405_v52 = vpop.f32.mrb[158].mxu1 }
0x3a96   :  { %17590 = vrcp.f32 %v15405_v52  ;;  %v9426_v61 = vpop.f32.mrb[159].mxu1 }
0x3a97   :  { %17592 = vrcp.f32 %v9426_v61 }
0x3a99   :  { %v15408_v20 = vpop.f32.mrb[160].mxu1 }
0x3a9a   :  { %17594 = vrcp.f32 %v15408_v20  ;;  %v9436_v7 = vpop.f32.mrb[161].mxu1 }
0x3a9b   :  { %17596 = vrcp.f32 %v9436_v7 }
0x3a9c   :  { %v17587_v11 = vpop.eup %17586 }
0x3a9d   :  { %v17589_v38 = vpop.eup %17588  ;;  %v15411_v30 = vpop.f32.mrb[162].mxu1  ;;  %v9464_v41 = vmul.f32 %v17587_v11, %v20965_v17 }
0x3a9e   :  { %17598 = vrcp.f32 %v15411_v30  ;;  %v9446_v51 = vpop.f32.mrb[163].mxu1  ;;  %v9463_v9 = vmul.f32 %v17589_v38, %v17573_v8  ;;  %v9965_v30 = vld [vmem:[%s21705_s29] sm:$0xff] }
0x3a9f   :  { %17600 = vrcp.f32 %v9446_v51  ;;  %v9966_v51 = vld [vmem:[%s21705_s29 + $0x8] sm:$0xff] }
0x3aa0   :  { %v17591_v59 = vpop.eup %17590  ;;  %15414 = vmatprep.mubr.msk.f32.mxu0 %vm21698_vm10, %v9463_v9  ;;  %v16538_v9 = vpack.c.bf16 %v9966_v51, %v9965_v30  ;;  %vm17936_vm10 = vmmov 0  }
0x3aa1   :  { %v17593_v12 = vpop.eup %17592  ;;  %15415 = vmatmul.mubr.msk.f32.vlgmr.msra.gmra.mrb[170].mxu0 %vm21645_vm1, %v9464_v41  ;;  %v9466_v1 = vmul.f32 %v17591_v59, %v20968_v29  ;;  %vm21721_vm1 = vcmask 1041408  }
0x3aa2   :  { %v9465_v46 = vmul.f32 %v17593_v12, %v17577_v4  ;;  %16495 = vmatpush3.bf16.msra.mxu0 %v18766_v43 }
0x3aa3   :  { %16497 = vmatprep.subr.bf16.mxu0 %v18769_v55 }
0x3aa4   :  { %v17595_v32 = vpop.eup %17594  ;;  %15417 = vmatprep.mubr.msk.f32.mxu0 %vm21699_vm11, %v9465_v46  ;;  %vm21722_vm11 = vmmov %vm21721_vm1 }
0x3aa5   :  { %v17597_v14 = vpop.eup %17596  ;;  %15418 = vmatmul.mubr.msk.f32.gmra.mrb[172].mxu0 %vm21700_vm15, %v9466_v1  ;;  %v9468_v17 = vmul.f32 %v17595_v32, %v20971_v26  ;;  %v9967_v1 = vld [vmem:[%s21705_s29 + $0x10] sm:$0xff]  ;;  %v9968_v32 = vld [vmem:[%s21705_s29 + $0x18] sm:$0xff]  ;;  %vm21724_vm15 = vmmov %vm21721_vm1 }
0x3aa6   :  { %v9467_v42 = vmul.f32 %v17597_v14, %v20973_v56  ;;  %16499 = vmatpush3.bf16.msra.mxu0 %v18769_v55 }
0x3aa7   :  { %16501 = vmatprep.subr.bf16.mxu0 %v18776_v35 }
0x3aa8   :  { %v17599_v58 = vpop.eup %17598  ;;  %15420 = vmatprep.mubr.msk.f32.mxu0 %vm21701_vm2, %v9467_v42  ;;  %vm21725_vm2 = vmmov %vm21721_vm1 }
0x3aa9   :  { %v17601_v43 = vpop.eup %17600  ;;  %15421 = vmatmul.mubr.msk.f32.gmra.mrb[174].mxu0 %vm21702_vm6, %v9468_v17  ;;  %v9470_v23 = vmul.f32 %v17599_v58, %v20977_v44  ;;  %v16542_v17 = vpack.c.bf16 %v9968_v32, %v9967_v1  ;;  %v9969_v58 = vld [vmem:[%s21705_s29 + $0x20] sm:$0xff]  ;;  %vm21726_vm6 = vmmov %vm21721_vm1 }
0x3aaa   :  { %v9469_v8 = vmul.f32 %v17601_v43, %v20979_v54  ;;  %16503 = vmatpush3.bf16.msra.mxu0 %v18776_v35  ;;  %v9970_v43 = vld [vmem:[%s21705_s29 + $0x28] sm:$0xff] }
0x3aab   :  { %16505 = vmatprep.subr.bf16.mxu0 %v18782_v45 }
0x3aac   :  { %15423 = vmatprep.mubr.msk.f32.mxu0 %vm21703_vm8, %v9469_v8  ;;  %v16546_v8 = vpack.c.bf16 %v9970_v43, %v9969_v58  ;;  %vm21727_vm8 = vmmov %vm21721_vm1 }
0x3aad   :  { %15424 = vmatmul.mubr.msk.f32.gmra.mrb[176].mxu0 %vm21704_vm9, %v9470_v23  ;;  %v9971_v23 = vld [vmem:[%s21705_s29 + $0x30] sm:$0xff]  ;;  %vm21728_vm9 = vmmov %vm21721_vm1 }
0x3aae   :  { %16507 = vmatpush3.bf16.msra.mxu0 %v18782_v45 }
0x3aaf   :  { %16509 = vmatprep.subr.bf16.mxu0 %v18788_v37 }
0x3ab2   :  { %16511 = vmatpush3.bf16.msra.mxu0 %v18788_v37 }
0x3ab3   :  { %16513 = vmatprep.subr.bf16.mxu0 %v18794_v5 }
0x3ab6   :  { %16515 = vmatpush3.bf16.msra.mxu0 %v18794_v5 }
0x3ab7   :  { %16517 = vmatprep.subr.bf16.mxu0 %v18800_v19 }
0x3aba   :  { %16519 = vmatpush3.bf16.msra.mxu0 %v18800_v19 }
0x3abb   :  { %16521 = vmatprep.subr.bf16.mxu0 %v18806_v36 }
0x3abe   :  { %16523 = vmatpush3.bf16.msra.mxu0 %v18806_v36 }
0x3b74   :  { %v15416_v55 = vpop.f32.mrb[170].mxu0 }
0x3b75   :  { %v9601_v35 = vmul.f32 %v15416_v55, %v20706_v25  ;;  %v9561_v45 = vpop.f32.mrb[171].mxu0  ;;  %v9972_v55 = vld [vmem:[%s21705_s29 + $0x38] sm:$0xff] }
0x3b76   :  { %v9600_v24 = vmul.f32 %v9561_v45, %v20718_v50  ;;  %v9973_v45 = vld [vmem:[%s21705_s29 + $0x40] sm:$0xff] }
0x3b78   :  { %v16474_v29 = vpack.c.bf16 %v9601_v35, %v9600_v24  ;;  %v15419_v37 = vpop.f32.mrb[172].mxu0  ;;  %v16550_v35 = vpack.c.bf16 %v9972_v55, %v9971_v23  ;;  %v9974_v24 = vld [vmem:[%s21705_s29 + $0x48] sm:$0xff]  ;;  %v10282_v55 = vld [vmem:[%s21712_s12] sm:$0xff] }
0x3b79   :  { %v9603_v4 = vmul.f32 %v15419_v37, %v20729_v62  ;;  %v9571_v16 = vpop.f32.mrb[173].mxu0  ;;  %v9975_v37 = vld [vmem:[%s21705_s29 + $0x50] sm:$0xff] }
0x3b7a   :  { %v9602_v5 = vmul.f32 %v9571_v16, %v20731_v49  ;;  %16475 = vmatprep.subr.bf16.mxu1 %v16474_v29 }
0x3b7b   :  { %16477 = vmatpush3.bf16.msra.mxu1 %v16474_v29  ;;  %v16554_v29 = vpack.c.bf16 %v9974_v24, %v9973_v45  ;;  %v10284_v24 = vld [vmem:[%s21712_s12 + $0x10] sm:$0xff] }
0x3b7c   :  { %v16478_v19 = vpack.c.bf16 %v9603_v4, %v9602_v5  ;;  %v15422_v26 = vpop.f32.mrb[174].mxu0  ;;  %v9976_v4 = vld [vmem:[%s21705_s29 + $0x58] sm:$0xff]  ;;  %v9977_v5 = vld [vmem:[%s21705_s29 + $0x60] sm:$0xff] }
0x3b7d   :  { %v9605_v56 = vmul.f32 %v15422_v26, %v20738_v34  ;;  %v9581_v36 = vpop.f32.mrb[175].mxu0  ;;  %v16558_v16 = vpack.c.bf16 %v9976_v4, %v9975_v37  ;;  %v13364_v4 = vld [vmem:[%s21713_s16] ss:$0 sm:$0xff] }
0x3b7e   :  { %v9604_v2 = vmul.f32 %v9581_v36, %v20743_v63  ;;  %16479 = vmatprep.subr.bf16.mxu1 %v16478_v19  ;;  %v9959_v36 = vld [vmem:[%s21706_s3] sm:$0xff] }
0x3b7f   :  { %16481 = vmatpush3.bf16.msra.mxu1 %v16478_v19  ;;  %v9978_v19 = vld [vmem:[%s21705_s29 + $0x68] sm:$0x7] }
0x3b80   :  { %v16482_v25 = vpack.c.bf16 %v9605_v56, %v9604_v2  ;;  %v15425_v50 = vpop.f32.mrb[176].mxu0  ;;  %v16562_v26 = vpack.c.bf16 %v9978_v19, %v9977_v5  ;;  %v9960_v2 = vld [vmem:[%s21706_s3 + $0x8] sm:$0xff] }
0x3b81   :  { %v9607_v44 = vmul.f32 %v15425_v50, %v20753_v57  ;;  %v9591_v54 = vpop.f32.mrb[177].mxu0  ;;  %v13352_v57 = vld [vmem:[%s21606_s23 + $0x4] ss:$0 sm:$0xff]  ;;  %v16568_v50 = vpack.c.bf16 %v9960_v2, %v9959_v36 }
0x3b82   :  { %v9606_v62 = vmul.f32 %v9591_v54, %v20757_v39  ;;  %16483 = vmatprep.subr.bf16.mxu1 %v16482_v25  ;;  %v9961_v54 = vld [vmem:[%s21706_s3 + $0x10] sm:$0xff] }
0x3b83   :  { %16485 = vmatpush3.bf16.msra.mxu1 %v16482_v25  ;;  %v9963_v25 = vld [vmem:[%s21707_s24] sm:$0xff] }
0x3b84   :  { %v16486_v49 = vpack.c.bf16 %v9607_v44, %v9606_v62  ;;  %v9964_v44 = vld [vmem:[%s21707_s24 + $0x8] sm:$0xf]  ;;  %v9962_v62 = vld [vmem:[%s21706_s3 + $0x18] sm:$0xff] }
0x3b86   :  { %16488 = vmatprep.subr.msk.bf16.mxu1 %vm18283_vm4, %v16486_v49 }
0x3b87   :  { %16491 = vmatpush3.bf16.msk.msra.mxu1 %vm18283_vm4, %v16486_v49  ;;  %v16572_v49 = vpack.c.bf16 %v9962_v62, %v9961_v54 }
0x3b88   :  { %16525 = vmatprep.subr.bf16.mxu1 %v18829_v53 }
0x3b8a   :  { %15443 = vmatmul.mubr.msk.f32.vlgmr.msra.gmra.mrb[164].mxu1 %vm1627_vm5, %v20990_v33  ;;  %vm9979_vm5 = vcmask 875520  }
0x3b8b   :  { %16527 = vmatpush3.bf16.msra.mxu1 %v18829_v53 }
0x3b8c   :  { %16529 = vmatprep.subr.bf16.mxu1 %v18869_v48 }
0x3b8f   :  { %16531 = vmatpush3.bf16.msra.mxu1 %v18869_v48  ;;  %v17787_v48 = vld [vmem:[%s21607_s28] ss:$0 sm:$0xff] }
0x3b90   :  { %16534 = vmatprep.subr.msk.bf16.mxu1 %vm18905_vm12, %v18911_v3 }
0x3c5d   :  { %v15444_v34 = vpop.f32.mrb[164].mxu1 }
0x3c5e   :  { %v9677_v63 = vpop.f32.mrb[165].mxu1 }
0x3c5f   :  { %15477 = vmatprep.mubr.f32.mxu0 %v9677_v63 }
0x3c60   :  { %15478 = vmatmul.mubr.f32.vlgmr.msra.gmra.mrb[178].mxu0 %v15444_v34 }
0x3d33   :  { %v15479_v39 = vpop.f32.mrb[178].mxu0 }
0x3d34   :  { %v9760_v31 = vpop.f32.mrb[179].mxu0  ;;  %v21069_v33 = vadd.f32 %v15479_v39, %v13352_v57 }
0x3d35   :  { %v21067_v18 = vadd.f32 %v13352_v57, %v9760_v31 }
0x3d37   :  { %15488 = vmatprep.mubr.msk.f32.mxu1 %vm603_vm7, %v21067_v18 }
0x3d38   :  { %15489 = vmatmul.mubr.msk.f32.vlgmr.msra.gmra.mrb[166].mxu1 %vm603_vm7, %v21069_v33 }
0x3d39   :  { %16537 = vmatpush3.bf16.msk.msra.mxu1 %vm18905_vm12, %v18911_v3  ;;  %vm10454_vm12 = vcmask 91136  }
0x3d3a   :  { %16539 = vmatprep.subr.bf16.mxu1 %v16538_v9 }
0x3e0b   :  { %v15490_v53 = vpop.f32.mrb[166].mxu1 }
0x3e0c   :  { %v9847_v28 = vadd.f32 %v17787_v48, %v15490_v53  ;;  %v9841_v21 = vpop.f32.mrb[167].mxu1 }
0x3e0d   :  { %v9842_v10 = vadd.f32 %v17787_v48, %v9841_v21  ;;  %v17788_v48 = vld [vmem:[%s21611_s0] ss:$0 sm:$0xff] }
0x3e0e   :  { %v9853_v13 = vsel %vm2438_vm13, %v9847_v28, -inf }
0x3e0f   :  { %9854 = vmax.xlane.f32.xlu1 %v9853_v13  ;;  %v9850_v15 = vsel %vm2434_vm14, %v9842_v10, -inf  ;;  %v21711_v13 = vld [vmem:[#allocation50_spill] sm:$0xff] }
0x3e10   :  { %9851 = vmax.xlane.f32.xlu0 %v9850_v15 }
0x3e9c   :  { %v9855_v22 = vpop.xlane.xlu1 %9854 }
0x3e9d   :  { %v9857_v47 = vsub.f32 %v9847_v28, %v9855_v22  ;;  %v9852_v52 = vpop.xlane.xlu0 %9851  ;;  %v10172_v22 = vld [vmem:[%s21709_s30] sm:$0xff] }
0x3e9e   :  { %v9856_v61 = vsub.f32 %v9842_v10, %v9852_v52  ;;  %v10175_v52 = vld [vmem:[%s21709_s30 + $0x18] sm:$0xff] }
0x3e9f   :  { %v9860_v20 = vmul.f32 1.442695, %v9857_v47 }
0x3ea0   :  { %v9858_v0 = vmul.f32 1.442695, %v9856_v61 }
0x3ea2   :  { %17602 = vpow2.f32 %v9858_v0 }
0x3ea3   :  { %17604 = vpow2.f32 %v9860_v20 }
0x3eac   :  { %v17603_v3 = vpop.eup %17602 }
0x3ead   :  { %v9862_v7 = vsel %vm2434_vm14, %v17603_v3, 0.0  ;;  %v17605_v11 = vpop.eup %17604 }
0x3eae   :  { %9863 = vadd.xlane.f32.xlu1 %v9862_v7  ;;  %v9865_v38 = vsel %vm2438_vm13, %v17605_v11, 0.0  ;;  %vm10477_vm13 = vcmask 15360  }
0x3eb2   :  { %9866 = vadd.xlane.f32.xlu1 %v9865_v38 }
0x3f3b   :  { %v9864_v41 = vpop.xlane.xlu1 %9863 }
0x3f3c   :  { %17606 = vrcp.f32 %v9864_v41 }
0x3f3f   :  { %v9867_v59 = vpop.xlane.xlu1 %9866 }
0x3f40   :  { %17608 = vrcp.f32 %v9867_v59 }
0x3f46   :  { %v17607_v12 = vpop.eup %17606 }
0x3f47   :  { %v9870_v46 = vmul.f32 %v17607_v12, %v17603_v3 }
0x3f49   :  { %15495 = vmatprep.mubr.msk.f32.mxu1 %vm2434_vm14, %v9870_v46 }
0x3f4a   :  { %v17609_v14 = vpop.eup %17608 }
0x3f4b   :  { %v9871_v42 = vmul.f32 %v17609_v14, %v17605_v11 }
0x3f4d   :  { %15496 = vmatmul.mubr.msk.f32.vlgmr.msra.gmra.mrb[168].mxu1 %vm2434_vm14, %v9871_v42  ;;  %vm10481_vm14 = vcmask 11264  }
0x3f4e   :  { %16541 = vmatpush3.bf16.msra.mxu1 %v16538_v9  ;;  %15526 = vmatprep.mubr.msk.f32.mxu1 %vm9979_vm5, %v9963_v25 }
0x3f4f   :  { %16543 = vmatprep.subr.bf16.mxu1 %v16542_v17 }
0x3f52   :  { %16545 = vmatpush3.bf16.msra.mxu1 %v16542_v17 }
0x3f53   :  { %16547 = vmatprep.subr.bf16.mxu1 %v16546_v8 }
0x3f56   :  { %16549 = vmatpush3.bf16.msra.mxu1 %v16546_v8 }
0x3f57   :  { %16551 = vmatprep.subr.bf16.mxu1 %v16550_v35 }
0x3f5a   :  { %16553 = vmatpush3.bf16.msra.mxu1 %v16550_v35  ;;  %v10283_v35 = vld [vmem:[%s21712_s12 + $0x8] sm:$0xff] }
0x3f5b   :  { %16555 = vmatprep.subr.bf16.mxu1 %v16554_v29  ;;  %v16584_v45 = vpack.c.bf16 %v10283_v35, %v10282_v55 }
0x3f5e   :  { %16557 = vmatpush3.bf16.msra.mxu1 %v16554_v29  ;;  %v10285_v29 = vld [vmem:[%s21712_s12 + $0x18] sm:$0xff] }
0x3f5f   :  { %16559 = vmatprep.subr.bf16.mxu1 %v16558_v16  ;;  %v16588_v37 = vpack.c.bf16 %v10285_v29, %v10284_v24  ;;  %v21141_v24 = vld [vmem:[%s21716_s1] sm:$0x3] }
0x3f60   :  { %v12948_v29 = vadd.f32 -1.0, %v21141_v24 }
0x3f62   :  { %16561 = vmatpush3.bf16.msra.mxu1 %v16558_v16 }
0x3f63   :  { %16564 = vmatprep.subr.msk.bf16.mxu1 %vm18194_vm3, %v16562_v26 }
0x3f66   :  { %16567 = vmatpush3.bf16.msk.msra.mxu1 %vm18194_vm3, %v16562_v26  ;;  %vm10404_vm3 = vcmask 257024  }
0x3f67   :  { %16569 = vmatprep.subr.bf16.mxu1 %v16568_v50 }
0x3f69   :  { %15527 = vmatmul.mubr.msk.f32.vlgmr.msra.gmra.mrb[170].mxu1 %vm9979_vm5, %v9964_v44  ;;  %vm21729_vm5 = vmmov %vm21721_vm1 }
0x3f6a   :  { %16571 = vmatpush3.bf16.msra.mxu1 %v16568_v50 }
0x3f6b   :  { %16573 = vmatprep.subr.bf16.mxu1 %v16572_v49 }
0x3f6e   :  { %16575 = vmatpush3.bf16.msra.mxu1 %v16572_v49 }
0x4020   :  { %v15497_v34 = vpop.f32.mrb[168].mxu1 }
0x4021   :  { %v9950_v63 = vadd.f32 1.0, %v15497_v34  ;;  %v9944_v57 = vpop.f32.mrb[169].mxu1 }
0x4022   :  { %v9945_v39 = vadd.f32 1.0, %v9944_v57 }
0x4023   :  { %v9954_v31 = vmul.f32 %v9950_v63, %v21069_v33  ;;  %v10173_v33 = vld [vmem:[%s21709_s30 + $0x8] sm:$0xff] }
0x4024   :  { %v9953_v53 = vmul.f32 %v9945_v39, %v21067_v18  ;;  %v16576_v47 = vpack.c.bf16 %v10173_v33, %v10172_v22  ;;  %v10174_v18 = vld [vmem:[%s21709_s30 + $0x10] sm:$0xff] }
0x4025   :  { %v9956_v28 = vadd.f32 %v17788_v48, %v9954_v31  ;;  %v16580_v61 = vpack.c.bf16 %v10175_v52, %v10174_v18 }
0x4026   :  { %v9955_v21 = vadd.f32 %v17788_v48, %v9953_v53  ;;  %16577 = vmatprep.subr.bf16.mxu0 %v16576_v47 }
0x4027   :  { %v21116_v15 = vadd.f32 %v9956_v28, %v21711_v13  ;;  %16579 = vmatpush3.bf16.msra.mxu0 %v16576_v47  ;;  %v13367_v13 = vld [vmem:[%s21714_s22] ss:$0 sm:$0xff] }
0x4028   :  { %v21113_v10 = vadd.f32 %v9955_v21, %v20585_v6  ;;  %16581 = vmatprep.subr.bf16.mxu0 %v16580_v61  ;;  %v13363_v6 = vld [vmem:[%s21710_s6] ss:$0 sm:$0xff] }
0x402a   :  { %15537 = vmatprep.mubr.msk.f32.mxu1 %vm603_vm7, %v21113_v10 }
0x402b   :  { %15538 = vmatmul.mubr.msk.f32.vlgmr.msra.gmra.mrb[170].mxu1 %vm603_vm7, %v21116_v15  ;;  %16583 = vmatpush3.bf16.msra.mxu0 %v16580_v61 }
0x402c   :  { %16585 = vmatprep.subr.bf16.mxu0 %v16584_v45 }
0x40fe   :  { %v15539_v20 = vpop.f32.mrb[170].mxu1 }
0x40ff   :  { %v10153_v0 = vadd.f32 %v15539_v20, %v13363_v6  ;;  %v10136_v3 = vpop.f32.mrb[171].mxu1 }
0x4100   :  { %v10152_v7 = vadd.f32 %v13363_v6, %v10136_v3 }
0x4101   :  { %v10157_v11 = vand.u32 2147483647, %v10153_v0  ;;  %v10155_v43 = vmax.f32 %v10153_v0, 0.0 }
0x4102   :  { %v10156_v38 = vand.u32 2147483647, %v10152_v7  ;;  %v10154_v17 = vmax.f32 %v10152_v7, 0.0 }
0x4103   :  { %v10159_v30 = vsub.f32 0.0, %v10157_v11 }
0x4104   :  { %v10158_v51 = vsub.f32 0.0, %v10156_v38 }
0x4105   :  { %v10162_v9 = vmul.f32 1.442695, %v10159_v30 }
0x4106   :  { %v10160_v41 = vmul.f32 1.442695, %v10158_v51 }
0x4107   :  { %17610 = vpow2.f32 %v10162_v9 }
0x4108   :  { %17612 = vpow2.f32 %v10160_v41 }
0x4111   :  { %v17611_v59 = vpop.eup %17610 }
0x4112   :  { %v17613_v12 = vpop.eup %17612  ;;  %v10165_v46 = vadd.f32 1.0, %v17611_v59 }
0x4113   :  { %v10164_v1 = vadd.f32 1.0, %v17613_v12 }
0x4114   :  { %17614 = vlog2.f32 %v10165_v46 }
0x4115   :  { %17616 = vlog2.f32 %v10164_v1  ;;  %v13370_v1 = vld [vmem:[%s21715_s26] ss:$0 sm:$0xff] }
0x411e   :  { %v17615_v32 = vpop.eup %17614 }
0x411f   :  { %v17617_v14 = vpop.eup %17616  ;;  %v10169_v42 = vmul.f32 0.6931472, %v17615_v32 }
0x4120   :  { %v10167_v58 = vmul.f32 0.6931472, %v17617_v14 }
0x4121   :  { %v10171_v23 = vadd.f32 %v10169_v42, %v10155_v43 }
0x4122   :  { %v10170_v8 = vadd.f32 %v10167_v58, %v10154_v17 }
0x4124   :  { %15548 = vmatprep.mubr.msk.f32.mxu0 %vm603_vm7, %v10170_v8  ;;  %v13371_v8 = vld [vmem:[#allocation2] ss:$0 sm:$0xff] }
0x4125   :  { %15549 = vmatmul.mubr.msk.f32.vlgmr.msra.gmra.mrb[180].mxu0 %vm603_vm7, %v10171_v23 }
0x4126   :  { %16587 = vmatpush3.bf16.msra.mxu0 %v16584_v45 }
0x4127   :  { %16589 = vmatprep.subr.bf16.mxu0 %v16588_v37 }
0x412a   :  { %16591 = vmatpush3.bf16.msra.mxu0 %v16588_v37  ;;  %v21144_v37 = vmul.f32 1e+30, %v12948_v29 }
0x41f8   :  { %v15550_v16 = vpop.f32.mrb[180].mxu0 }
0x41f9   :  { %v10261_v5 = vadd.f32 %v15550_v16, %v13364_v4  ;;  %v10255_v19 = vpop.f32.mrb[181].mxu0 }
0x41fa   :  { %v10256_v26 = vadd.f32 %v13364_v4, %v10255_v19 }
0x41fb   :  { %v10267_v56 = vand.u32 2147483647, %v10261_v5  ;;  %v10265_v48 = vmax.f32 %v10261_v5, 0.0 }
0x41fc   :  { %v10266_v36 = vand.u32 2147483647, %v10256_v26  ;;  %v10264_v31 = vmax.f32 %v10256_v26, 0.0 }
0x41fd   :  { %v10269_v2 = vsub.f32 0.0, %v10267_v56  ;;  %v21150_v56 = vld [vmem:[%s21717_s2] sm:$0xff] }
0x41fe   :  { %v10268_v25 = vsub.f32 0.0, %v10266_v36 }
0x41ff   :  { %v10272_v50 = vmul.f32 1.442695, %v10269_v2  ;;  %v21154_v2 = vld [vmem:[%s21717_s2 + $0x8] sm:$0xf] }
0x4200   :  { %v10270_v44 = vmul.f32 1.442695, %v10268_v25 }
0x4201   :  { %17618 = vpow2.f32 %v10272_v50 }
0x4202   :  { %17620 = vpow2.f32 %v10270_v44 }
0x420b   :  { %v17619_v54 = vpop.eup %17618 }
0x420c   :  { %v17621_v62 = vpop.eup %17620  ;;  %v10275_v49 = vadd.f32 1.0, %v17619_v54 }
0x420d   :  { %v10274_v34 = vadd.f32 1.0, %v17621_v62  ;;  %v17935_v62 = vmov 0.0|0.0  }
0x420e   :  { %17622 = vlog2.f32 %v10275_v49  ;;  %16592 = vmatprep.subr.bf16.mxu0 %v17935_v62  ;;  %16602 = vmatprep.subr.bf16.mxu1 %v17935_v62  ;;  %v17937_v49 = vmov 0.0  }
0x420f   :  { %17624 = vlog2.f32 %v10274_v34  ;;  %15593 = vmatprep.mubr.msk.f32.mxu1 %vm17936_vm10, %v17937_v49 }
0x4218   :  { %v17623_v63 = vpop.eup %17622 }
0x4219   :  { %v17625_v57 = vpop.eup %17624  ;;  %v10279_v39 = vmul.f32 0.6931472, %v17623_v63 }
0x421a   :  { %v10277_v53 = vmul.f32 0.6931472, %v17625_v57 }
0x421b   :  { %v10281_v21 = vadd.f32 %v10279_v39, %v10265_v48 }
0x421c   :  { %v10280_v28 = vadd.f32 %v10277_v53, %v10264_v31 }
0x421e   :  { %15559 = vmatprep.mubr.msk.f32.mxu0 %vm603_vm7, %v10280_v28 }
0x421f   :  { %15560 = vmatmul.mubr.msk.f32.vlgmr.msra.gmra.mrb[182].mxu0 %vm603_vm7, %v10281_v21 }
0x4220   :  { %15566 = vmatprep.mubr.msk.f32.mxu0 %vm17936_vm10, %v17937_v49 }
0x42f2   :  { %v15561_v22 = vpop.f32.mrb[182].mxu0 }
0x42f3   :  { %v10371_v33 = vadd.f32 %v15561_v22, %v13367_v13  ;;  %v10365_v47 = vpop.f32.mrb[183].mxu0  ;;  %v10668_v22 = vld [vmem:[%s21718_s7 + $0x8] sm:$0xff] }
0x42f4   :  { %v10366_v18 = vadd.f32 %v13367_v13, %v10365_v47  ;;  %v10667_v13 = vld [vmem:[%s21718_s7] sm:$0xff]  ;;  %v10669_v47 = vld [vmem:[%s21718_s7 + $0x10] sm:$0xff] }
0x42f5   :  { %v10377_v52 = vand.u32 2147483647, %v10371_v33  ;;  %v10375_v59 = vmax.f32 %v10371_v33, 0.0  ;;  %v21180_v33 = vpack.c.bf16 %v10668_v22, %v10667_v13 }
0x42f6   :  { %v10376_v61 = vand.u32 2147483647, %v10366_v18  ;;  %v10374_v12 = vmax.f32 %v10366_v18, 0.0  ;;  %v10670_v18 = vld [vmem:[%s21718_s7 + $0x18] sm:$0xff] }
0x42f7   :  { %v10379_v6 = vsub.f32 0.0, %v10377_v52  ;;  %16604 = vmatpush3.bf16.msra.mxu1 %v21180_v33  ;;  %v21186_v52 = vpack.c.bf16 %v10670_v18, %v10669_v47 }
0x42f8   :  { %v10378_v20 = vsub.f32 0.0, %v10376_v61  ;;  %16605 = vmatprep.subr.bf16.mxu1 %v17935_v62  ;;  %v10671_v61 = vld [vmem:[%s21719_s20] sm:$0xff] }
0x42f9   :  { %v10382_v0 = vmul.f32 1.442695, %v10379_v6  ;;  %v10672_v6 = vld [vmem:[%s21719_s20 + $0x8] sm:$0xff] }
0x42fa   :  { %v10380_v3 = vmul.f32 1.442695, %v10378_v20 }
0x42fb   :  { %17626 = vpow2.f32 %v10382_v0  ;;  %16607 = vmatpush3.bf16.msra.mxu1 %v21186_v52 }
0x42fc   :  { %17628 = vpow2.f32 %v10380_v3 }
0x42fe   :  { %15594 = vmatmul.mubr.f32.vlgmr.msra.gmra.mrb[172].mxu1 %v17937_v49 }
0x42ff   :  { %15609 = vmatprep.mubr.msk.f32.mxu1 %vm10477_vm13, %v21150_v56 }
0x4305   :  { %v17627_v7 = vpop.eup %17626 }
0x4306   :  { %v17629_v11 = vpop.eup %17628  ;;  %v10385_v38 = vadd.f32 1.0, %v17627_v7  ;;  %v21194_v7 = vpack.c.bf16 %v10672_v6, %v10671_v61 }
0x4307   :  { %v10384_v30 = vadd.f32 1.0, %v17629_v11  ;;  %v10673_v11 = vld [vmem:[%s21719_s20 + $0x10] sm:$0xff] }
0x4308   :  { %17630 = vlog2.f32 %v10385_v38  ;;  %v10674_v38 = vld [vmem:[%s21719_s20 + $0x18] sm:$0xff] }
0x4309   :  { %17632 = vlog2.f32 %v10384_v30  ;;  %v21204_v30 = vpack.c.bf16 %v10674_v38, %v10673_v11 }
0x4312   :  { %v17631_v51 = vpop.eup %17630 }
0x4313   :  { %v17633_v9 = vpop.eup %17632  ;;  %v10389_v41 = vmul.f32 0.6931472, %v17631_v51  ;;  %v10675_v51 = vld [vmem:[%s21720_s10] sm:$0xff] }
0x4314   :  { %v10387_v46 = vmul.f32 0.6931472, %v17633_v9  ;;  %v10676_v9 = vld [vmem:[%s21720_s10 + $0x8] sm:$0xff] }
0x4315   :  { %v10391_v14 = vadd.f32 %v10389_v41, %v10375_v59  ;;  %v21212_v41 = vpack.c.bf16 %v10676_v9, %v10675_v51  ;;  %v10677_v59 = vld [vmem:[%s21720_s10 + $0x10] sm:$0xff] }
0x4316   :  { %v10390_v32 = vadd.f32 %v10387_v46, %v10374_v12  ;;  %v10678_v12 = vld [vmem:[%s21720_s10 + $0x18] sm:$0xff] }
0x4317   :  { %v10400_v58 = vmul.f32 %v13370_v1, %v10391_v14  ;;  %v21219_v46 = vpack.c.bf16 %v10678_v12, %v10677_v59 }
0x4318   :  { %v10399_v42 = vmul.f32 %v13370_v1, %v10390_v32 }
0x4319   :  { %v10405_v43 = vsel %vm10404_vm3, %v10400_v58, 0.0 }
0x431a   :  { %v10401_v17 = vsel %vm603_vm7, %v10399_v42, 0.0 }
0x431b   :  { %10402 = vadd.xlane.f32.xlu1 %v10401_v17 }
0x431f   :  { %10406 = vadd.xlane.f32.xlu1 %v10405_v43 }
0x43a8   :  { %v10403_v23 = vpop.xlane.xlu1 %10402 }
0x43a9   :  { %v10415_v55 = vadd.f32 %v13371_v8, %v10403_v23 }
0x43ab   :  { %10417 = vxpose.xlu1.b32.start [1/2] (short) (narrow) %v10415_v55, 8 }
0x43ac   :  { %v10407_v35 = vpop.xlane.xlu1 %10406 }
0x43ad   :  { %v10416_v45 = vadd.f32 %v13371_v8, %v10407_v35  ;;  %v21230_v8 = vld [vmem:[%s21723_s11] ss:$0 sm:$0xff] }
0x43af   :  { %10418 = vxpose.xlu1.b32.end [2/2] (short) (narrow) %v10416_v45, 8 }
0x43d1   :  { %v10819_v1 = vpop.f32.mrb[172].mxu1 }
0x43d2   :  { %v15595_v32 = vpop.f32.mrb[173].mxu1 }
0x442b   :  { %v10433_v4 = vpop.trf.xlu1 }
0x442c   :  { %v10452_v16 = vrot.slane %v10433_v4, %v18626_v60 }
0x442e   :  { %v10453_v5 = vadd.f32 %v10452_v16, %v21144_v37 }
0x4430   :  { %v10455_v19 = vsel %vm10454_vm12, %v10453_v5, -inf }
0x4431   :  { %10456 = vmax.xlane.f32.xlu0 %v10455_v19 }
0x44be   :  { %v10457_v26 = vpop.xlane.xlu0 %10456 }
0x44bf   :  { %v10462_v36 = vrot.slane %v10457_v26, %v18512_v40 }
0x44c1   :  { %v10475_v25 = vmul.f32 %v10462_v36, %v21150_v56  ;;  %v10476_v44 = vmul.f32 %v10462_v36, %v21154_v2 }
0x44c3   :  { %v10478_v50 = vsel %vm10477_vm13, %v10475_v25, 0.0  ;;  %v10482_v54 = vsel %vm10481_vm14, %v10476_v44, 0.0 }
0x44c4   :  { %10479 = vadd.xlane.f32.xlu0 %v10478_v50 }
0x44c8   :  { %10483 = vadd.xlane.f32.xlu0 %v10482_v54 }
0x4551   :  { %v10480_v34 = vpop.xlane.xlu0 %10479 }
0x4552   :  { %v10485_v63 = vsub.f32 %v10415_v55, %v10480_v34  ;;  %v17940_v34 = vmov 0  }
0x4553   :  { %16760 = vset.pattern.permute.xlu0 %v17940_v34  ;;  %16761 = vset.pattern.permute.xlu1 %v17940_v34 }
0x4554   :  { %v10487_v57 = vmul.f32 1.442695, %v10485_v63 }
0x4555   :  { %v10484_v39 = vpop.xlane.xlu0 %10483 }
0x4556   :  { %v10486_v31 = vsub.f32 %v10416_v45, %v10484_v39  ;;  %17634 = vpow2.f32 %v10487_v57 }
0x4558   :  { %v10489_v53 = vmul.f32 1.442695, %v10486_v31 }
0x455a   :  { %17636 = vpow2.f32 %v10489_v53 }
0x4560   :  { %v21166_v48 = vpop.eup %17634 }
0x4564   :  { %v21168_v28 = vpop.eup %17636 }
0x4565   :  { %v16593_v21 = vpack.c.bf16 %v21168_v28, %v21166_v48 }
0x4567   :  { %16595 = vmatpush3.bf16.msk.msra.mxu0 %vm18283_vm4, %v16593_v21 }
0x456a   :  { %15567 = vmatmul.mubr.msk.f32.vlgmr.msra.gmra.mrb[184].mxu0 %vm818_vm0, %v21141_v24 }
0x456b   :  { %15571 = vmatprep.mubr.msk.f32.mxu0 %vm10477_vm13, %v21150_v56 }
0x463d   :  { %v10563_v20 = vpop.f32.mrb[184].mxu0 }
0x463e   :  { %v10564_v0 = vadd.f32 1e-16, %v10563_v20  ;;  %v15568_v3 = vpop.f32.mrb[185].mxu0 }
0x4640   :  { %15569 = vmatprep.subr.msk.mxu0 %vm21721_vm1, %v10564_v0 }
0x4641   :  { %15570 = vmatpush3.msk.msra.mxu0 %vm21722_vm11, %v10564_v0  ;;  %vm21730_vm11 = vmmov %vm21721_vm1 }
0x4642   :  { %15572 = vmatmul.mubr.msk.f32.vlgmr.msra.gmra.mrb[186].mxu0 %vm10477_vm13, %v21154_v2  ;;  %16596 = vmatprep.subr.bf16.mxu0 %v17935_v62 }
0x4643   :  { %16598 = vmatpush3.bf16.msra.mxu0 %v21194_v7  ;;  %15582 = vmatprep.mubr.msk.f32.mxu0 %vm17936_vm10, %v17937_v49 }
0x4644   :  { %16599 = vmatprep.subr.bf16.mxu0 %v17935_v62 }
0x4647   :  { %16601 = vmatpush3.bf16.msra.mxu0 %v21204_v30 }
0x4648   :  { %16608 = vmatprep.subr.bf16.mxu0 %v17935_v62 }
0x464a   :  { %15583 = vmatmul.mubr.f32.vlgmr.msra.gmra.mrb[188].mxu0 %v17937_v49 }
0x464b   :  { %16610 = vmatpush3.bf16.msra.mxu0 %v21212_v41  ;;  %15604 = vmatprep.mubr.msk.f32.mxu0 %vm17936_vm10, %v17937_v49 }
0x464c   :  { %16611 = vmatprep.subr.bf16.mxu0 %v17935_v62 }
0x464f   :  { %16613 = vmatpush3.bf16.msra.mxu0 %v21219_v46 }
0x4650   :  { %16614 = vmatprep.subr.bf16.mxu0 %v17935_v62 }
0x4652   :  { %15605 = vmatmul.mubr.f32.vlgmr.msra.gmra.mrb[190].mxu0 %v17937_v49 }
0x4653   :  { %15616 = vmatprep.mubr.msk.f32.mxu0 %vm17936_vm10, %v17937_v49 }
0x4715   :  { %v15573_v14 = vpop.f32.mrb[186].mxu0 }
0x4716   :  { %v10642_v42 = vpop.f32.mrb[187].mxu0 }
0x471d   :  { %v10749_v17 = vpop.f32.mrb[188].mxu0 }
0x471e   :  { %v10820_v58 = vadd.f32 %v10819_v1, %v10749_v17  ;;  %v15584_v43 = vpop.f32.mrb[189].mxu0 }
0x4725   :  { %v10889_v23 = vpop.f32.mrb[190].mxu0 }
0x4726   :  { %v10893_v55 = vadd.f32 %v10889_v23, %v10820_v58  ;;  %v15606_v35 = vpop.f32.mrb[191].mxu0 }
0x4728   :  { %v10900_v45 = vadd.f32 %v21230_v8, %v10893_v55 }
0x472a   :  { %17638 = vtanh.f32 %v10900_v45  ;;  %v10901_v4 = vsub.f32 0.0, %v10900_v45 }
0x472c   :  { %v10902_v16 = vmul.f32 1.442695, %v10901_v4 }
0x472e   :  { %17640 = vpow2.f32 %v10902_v16 }
0x4734   :  { %v17639_v29 = vpop.eup %17638 }
0x4735   :  { %10909 = vrot.lane.b32.xlu0 %v17639_v29, %s17938_s19 }
0x4738   :  { %v17641_v5 = vpop.eup %17640 }
0x4739   :  { %v10904_v19 = vadd.f32 1.0, %v17641_v5 }
0x473b   :  { %17642 = vrcp.f32 %v10904_v19 }
0x4745   :  { %v17643_v26 = vpop.eup %17642 }
0x4746   :  { %v10907_v50 = vmul.f32 0.0, %v17643_v26 }
0x47a7   :  { %v10910_v36 = vpop.permute.xlu0 %10909 }
0x47a8   :  { %v10912_v25 = vmul.f32 %v17643_v26, %v10910_v36 }
0x47aa   :  { %10914 = vrot.lane.b32.xlu1 %v10912_v25, %s17939_s15 }
0x481c   :  { %v10915_v44 = vpop.permute.xlu1 %10914 }
0x481d   :  { %v21235_v54 = vadd.f32 %v10915_v44, %v10907_v50 }
0x481f   :  { %17644 = vtanh.f32 %v21235_v54 }
0x4820   :  { %17646 = vrcp.f32 %v10642_v42 }
0x4821   :  { %17648 = vrcp.f32 %v15573_v14 }
0x4829   :  { %v17645_v63 = vpop.eup %17644 }
0x482a   :  { %10920 = vrot.lane.b32.xlu0 %v17645_v63, %s17938_s19  ;;  %v17647_v31 = vpop.eup %17646 }
0x482b   :  { %v10653_v53 = vmul.f32 %v17647_v31, %v21166_v48  ;;  %v17649_v21 = vpop.eup %17648 }
0x482c   :  { %v10654_v13 = vmul.f32 %v17649_v21, %v21168_v28 }
0x489c   :  { %v10921_v57 = vpop.permute.xlu0 %10920 }
0x489d   :  { %v10923_v39 = vmul.f32 %v17643_v26, %v10921_v57 }
0x489f   :  { %10925 = vrot.lane.b32.xlu0 %v10923_v39, %s17939_s15 }
0x48a3   :  { %10657 = vperm.xlu0 %16760, %v10653_v53  }
0x48a7   :  { %10662 = vperm.xlu0 %16760, %v10654_v13  }
0x4911   :  { %v21242_v22 = vpop.permute.xlu0 %10925 }
0x4912   :  { %15607 = vmatprep.subr.msk.mxu1 %vm21724_vm15, %v21242_v22  ;;  %vm21731_vm15 = vmmov %vm21721_vm1 }
0x4913   :  { %15608 = vmatpush3.msk.msra.mxu1 %vm21725_vm2, %v21242_v22  ;;  %vm21732_vm2 = vmmov %vm21721_vm1 }
0x4914   :  { %15610 = vmatmul.mubr.msk.f32.vlgmr.msra.gmra.mrb[174].mxu1 %vm10477_vm13, %v21154_v2 }
0x4915   :  { %15621 = vmatprep.mubr.msk.f32.mxu1 %vm10477_vm13, %v21150_v56 }
0x4922   :  { %v10658_v48 = vpop.permute.xlu0 %10657 }
0x4923   :  { %v21256_v28 = vmul.f32 %v10658_v48, %v21113_v10 }
0x4926   :  { %v10663_v47 = vpop.permute.xlu0 %10662 }
0x4927   :  { %v21253_v18 = vmul.f32 %v10663_v47, %v21116_v15 }
0x49e7   :  { %v15611_v61 = vpop.f32.mrb[174].mxu1 }
0x49e8   :  { %v11005_v6 = vmul.f32 %v15611_v61, %v21253_v18  ;;  %v10995_v20 = vpop.f32.mrb[175].mxu1 }
0x49e9   :  { %v11004_v0 = vmul.f32 %v10995_v20, %v21256_v28 }
0x49ea   :  { %v11009_v3 = vsel %vm10404_vm3, %v11005_v6, 0.0 }
0x49eb   :  { %11010 = vadd.xlane.f32.xlu1 %v11009_v3  ;;  %v11006_v11 = vsel %vm603_vm7, %v11004_v0, 0.0 }
0x49ec   :  { %11007 = vadd.xlane.f32.xlu0 %v11006_v11 }
0x4a78   :  { %v11011_v51 = vpop.xlane.xlu1 %11010 }
0x4a79   :  { %v11008_v38 = vpop.xlane.xlu0 %11007 }
0x4a7a   :  { %11012 = vxpose.xlu0.b32.start [1/2] (short) (narrow) %v11008_v38, 8 }
0x4a7e   :  { %11013 = vxpose.xlu0.b32.end [2/2] (short) (narrow) %v11011_v51, 8 }
0x4afa   :  { %v11028_v15 = vpop.trf.xlu0 }
0x4afb   :  { %v11047_v10 = vrot.slane %v11028_v15, %v18626_v60 }
0x4afd   :  { %v11048_v9 = vadd.f32 %v11047_v10, %v21144_v37 }
0x4aff   :  { %v11049_v59 = vsel %vm10454_vm12, %v11048_v9, -inf }
0x4b00   :  { %11050 = vmax.xlane.f32.xlu1 %v11049_v59 }
0x4b8d   :  { %v11051_v12 = vpop.xlane.xlu1 %11050 }
0x4b8e   :  { %v11056_v1 = vrot.slane %v11051_v12, %v18512_v40 }
0x4b90   :  { %v11065_v32 = vmul.f32 %v11056_v1, %v21150_v56  ;;  %v11066_v42 = vmul.f32 %v11056_v1, %v21154_v2 }
0x4b92   :  { %v11067_v14 = vsel %vm10477_vm13, %v11065_v32, 0.0  ;;  %v11070_v17 = vsel %vm10481_vm14, %v11066_v42, 0.0 }
0x4b93   :  { %11068 = vadd.xlane.f32.xlu1 %v11067_v14 }
0x4b97   :  { %11071 = vadd.xlane.f32.xlu1 %v11070_v17 }
0x4c20   :  { %v11069_v58 = vpop.xlane.xlu1 %11068 }
0x4c21   :  { %v11073_v43 = vsub.f32 %v11008_v38, %v11069_v58 }
0x4c23   :  { %v11075_v23 = vmul.f32 1.442695, %v11073_v43 }
0x4c24   :  { %v11072_v55 = vpop.xlane.xlu1 %11071 }
0x4c25   :  { %v11074_v35 = vsub.f32 %v11011_v51, %v11072_v55  ;;  %17650 = vpow2.f32 %v11075_v23 }
0x4c27   :  { %v11077_v45 = vmul.f32 1.442695, %v11074_v35 }
0x4c29   :  { %17652 = vpow2.f32 %v11077_v45 }
0x4c2f   :  { %v17651_v29 = vpop.eup %17650 }
0x4c33   :  { %v17653_v4 = vpop.eup %17652 }
0x4c34   :  { %v16615_v16 = vpack.c.bf16 %v17653_v4, %v17651_v29 }
0x4c36   :  { %16617 = vmatpush3.bf16.msk.msra.mxu0 %vm18283_vm4, %v16615_v16 }
0x4c37   :  { %16618 = vmatprep.subr.bf16.mxu0 %v17935_v62 }
0x4c39   :  { %15617 = vmatmul.mubr.msk.f32.vlgmr.msra.gmra.mrb[192].mxu0 %vm818_vm0, %v21141_v24 }
0x4c3a   :  { %15628 = vmatprep.mubr.msk.f32.mxu0 %vm17936_vm10, %v17937_v49 }
0x4d0c   :  { %v11148_v5 = vpop.f32.mrb[192].mxu0 }
0x4d0d   :  { %v11149_v19 = vadd.f32 1e-16, %v11148_v5  ;;  %v15618_v26 = vpop.f32.mrb[193].mxu0 }
0x4d0f   :  { %15619 = vmatprep.subr.msk.mxu1 %vm21726_vm6, %v11149_v19 }
0x4d10   :  { %15620 = vmatpush3.msk.msra.mxu1 %vm21727_vm8, %v11149_v19 }
0x4d11   :  { %15622 = vmatmul.mubr.msk.f32.vlgmr.msra.gmra.mrb[176].mxu1 %vm10477_vm13, %v21154_v2  ;;  %16622 = vmatprep.subr.bf16.mxu1 %v17935_v62 }
0x4d12   :  { %16624 = vmatpush3.bf16.msra.mxu1 %v21194_v7  ;;  %15639 = vmatprep.mubr.msk.f32.mxu1 %vm17936_vm10, %v17937_v49 }
0x4d13   :  { %16625 = vmatprep.subr.bf16.mxu1 %v17935_v62 }
0x4d16   :  { %16627 = vmatpush3.bf16.msra.mxu1 %v21204_v30 }
0x4d17   :  { %16634 = vmatprep.subr.bf16.mxu1 %v17935_v62 }
0x4de4   :  { %v15623_v36 = vpop.f32.mrb[176].mxu1 }
0x4de5   :  { %v11221_v25 = vpop.f32.mrb[177].mxu1 }
0x4de6   :  { %17654 = vrcp.f32 %v11221_v25 }
0x4de7   :  { %17656 = vrcp.f32 %v15623_v36 }
0x4df0   :  { %v17655_v50 = vpop.eup %17654 }
0x4df1   :  { %v11232_v44 = vmul.f32 %v17655_v50, %v17651_v29  ;;  %v17657_v34 = vpop.eup %17656 }
0x4df2   :  { %v11233_v63 = vmul.f32 %v17657_v34, %v17653_v4 }
0x4df3   :  { %11236 = vperm.xlu1 %16761, %v11232_v44  }
0x4df7   :  { %11241 = vperm.xlu1 %16761, %v11233_v63  }
0x4e72   :  { %v11237_v57 = vpop.permute.xlu1 %11236 }
0x4e73   :  { %v11244_v31 = vmul.f32 %v11237_v57, %v21256_v28 }
0x4e76   :  { %v11242_v39 = vpop.permute.xlu1 %11241 }
0x4e77   :  { %v11245_v53 = vmul.f32 %v11242_v39, %v21253_v18 }
0x4e79   :  { %v16619_v21 = vpack.c.bf16 %v11245_v53, %v11244_v31 }
0x4e7b   :  { %16621 = vmatpush3.bf16.msk.msra.mxu0 %vm18283_vm4, %v16619_v21 }
0x4e7c   :  { %16628 = vmatprep.subr.bf16.mxu0 %v17935_v62 }
0x4e7e   :  { %15629 = vmatmul.mubr.msk.f32.vlgmr.msra.gmra.mrb[194].mxu0 %vm818_vm0, %v21141_v24 }
0x4e7f   :  { %16630 = vmatpush3.bf16.msra.mxu0 %v21180_v33  ;;  %15650 = vmatprep.mubr.msk.f32.mxu0 %vm17936_vm10, %v17937_v49 }
0x4e80   :  { %16631 = vmatprep.subr.bf16.mxu0 %v17935_v62 }
0x4e83   :  { %16633 = vmatpush3.bf16.msra.mxu0 %v21186_v52 }
0x4e86   :  { %15651 = vmatmul.mubr.msk.f32.vlgmr.msra.gmra.mrb[196].mxu0 %vm603_vm7, %v21242_v22 }
0x4e87   :  { %15666 = vmatprep.mubr.msk.f32.mxu0 %vm10477_vm13, %v21150_v56 }
0x4f51   :  { %v11315_v13 = vpop.f32.mrb[194].mxu0 }
0x4f52   :  { %15640 = vmatmul.mubr.msk.f32.vlgmr.msra.gmra.mrb[178].mxu1 %vm603_vm7, %v11315_v13  ;;  %v15630_v48 = vpop.f32.mrb[195].mxu0 }
0x4f53   :  { %16636 = vmatpush3.bf16.msra.mxu1 %v21212_v41  ;;  %15661 = vmatprep.mubr.msk.f32.mxu1 %vm17936_vm10, %v17937_v49 }
0x4f54   :  { %16637 = vmatprep.subr.bf16.mxu1 %v17935_v62 }
0x4f57   :  { %16639 = vmatpush3.bf16.msra.mxu1 %v21219_v46 }
0x4f59   :  { %v11460_v47 = vpop.f32.mrb[196].mxu0 }
0x4f5a   :  { %15662 = vmatmul.mubr.msk.f32.vlgmr.msra.gmra.mrb[180].mxu1 %vm603_vm7, %v21242_v22  ;;  %v15652_v61 = vpop.f32.mrb[197].mxu0 }
0x4f5b   :  { %15678 = vmatprep.mubr.msk.f32.mxu1 %vm10477_vm13, %v21150_v56 }
0x5025   :  { %v11388_v6 = vpop.f32.mrb[178].mxu1 }
0x5026   :  { %v11461_v20 = vadd.f32 %v11460_v47, %v11388_v6  ;;  %v15641_v0 = vpop.f32.mrb[179].mxu1 }
0x502d   :  { %v11530_v3 = vpop.f32.mrb[180].mxu1 }
0x502e   :  { %v11534_v11 = vadd.f32 %v11530_v3, %v11461_v20  ;;  %v15663_v38 = vpop.f32.mrb[181].mxu1 }
0x5030   :  { %v11535_v51 = vadd.f32 %v21230_v8, %v11534_v11 }
0x5032   :  { %17658 = vtanh.f32 %v11535_v51  ;;  %v11536_v10 = vsub.f32 0.0, %v11535_v51 }
0x5034   :  { %v11537_v9 = vmul.f32 1.442695, %v11536_v10 }
0x5036   :  { %17660 = vpow2.f32 %v11537_v9 }
0x503c   :  { %v17659_v15 = vpop.eup %17658 }
0x503d   :  { %11544 = vrot.lane.b32.xlu1 %v17659_v15, %s17938_s19 }
0x5040   :  { %v17661_v22 = vpop.eup %17660 }
0x5041   :  { %v11539_v59 = vadd.f32 1.0, %v17661_v22 }
0x5043   :  { %17662 = vrcp.f32 %v11539_v59 }
0x504d   :  { %v17663_v12 = vpop.eup %17662 }
0x504e   :  { %v11542_v14 = vmul.f32 %v17663_v12, %v21235_v54 }
0x50af   :  { %v11545_v1 = vpop.permute.xlu1 %11544 }
0x50b0   :  { %v11547_v32 = vmul.f32 %v17663_v12, %v11545_v1 }
0x50b2   :  { %11549 = vrot.lane.b32.xlu1 %v11547_v32, %s17939_s15 }
0x5124   :  { %v11550_v42 = vpop.permute.xlu1 %11549 }
0x5125   :  { %v21318_v17 = vadd.f32 %v11550_v42, %v11542_v14 }
0x5127   :  { %17664 = vtanh.f32 %v21318_v17 }
0x5131   :  { %v17665_v58 = vpop.eup %17664 }
0x5132   :  { %11555 = vrot.lane.b32.xlu0 %v17665_v58, %s17938_s19 }
0x51a4   :  { %v11556_v43 = vpop.permute.xlu0 %11555 }
0x51a5   :  { %v11558_v23 = vmul.f32 %v17663_v12, %v11556_v43 }
0x51a7   :  { %11560 = vrot.lane.b32.xlu1 %v11558_v23, %s17939_s15 }
0x5219   :  { %v21323_v55 = vpop.permute.xlu1 %11560 }
0x521a   :  { %15664 = vmatprep.subr.msk.mxu0 %vm21728_vm9, %v21323_v55 }
0x521b   :  { %15665 = vmatpush3.msk.msra.mxu0 %vm21729_vm5, %v21323_v55 }
0x521c   :  { %15667 = vmatmul.mubr.msk.f32.vlgmr.msra.gmra.mrb[198].mxu0 %vm10477_vm13, %v21154_v2  ;;  %16640 = vmatprep.subr.bf16.mxu0 %v17935_v62 }
0x521d   :  { %15673 = vmatprep.mubr.msk.f32.mxu0 %vm17936_vm10, %v17937_v49 }
0x52ef   :  { %v15668_v54 = vpop.f32.mrb[198].mxu0 }
0x52f0   :  { %v11640_v35 = vmul.f32 %v15668_v54, %v21253_v18  ;;  %v11630_v45 = vpop.f32.mrb[199].mxu0 }
0x52f1   :  { %v11639_v29 = vmul.f32 %v11630_v45, %v21256_v28 }
0x52f2   :  { %v11644_v4 = vsel %vm10404_vm3, %v11640_v35, 0.0 }
0x52f3   :  { %11645 = vadd.xlane.f32.xlu0 %v11644_v4  ;;  %v11641_v16 = vsel %vm603_vm7, %v11639_v29, 0.0 }
0x52f4   :  { %11642 = vadd.xlane.f32.xlu1 %v11641_v16 }
0x5380   :  { %v11646_v19 = vpop.xlane.xlu0 %11645 }
0x5381   :  { %v11643_v5 = vpop.xlane.xlu1 %11642 }
0x5382   :  { %11647 = vxpose.xlu1.b32.start [1/2] (short) (narrow) %v11643_v5, 8 }
0x5386   :  { %11648 = vxpose.xlu1.b32.end [2/2] (short) (narrow) %v11646_v19, 8 }
0x5402   :  { %v11663_v26 = vpop.trf.xlu1 }
0x5403   :  { %v11682_v36 = vrot.slane %v11663_v26, %v18626_v60 }
0x5405   :  { %v11683_v25 = vadd.f32 %v11682_v36, %v21144_v37 }
0x5407   :  { %v11684_v50 = vsel %vm10454_vm12, %v11683_v25, -inf }
0x5408   :  { %11685 = vmax.xlane.f32.xlu0 %v11684_v50 }
0x5495   :  { %v11686_v44 = vpop.xlane.xlu0 %11685 }
0x5496   :  { %v11691_v34 = vrot.slane %v11686_v44, %v18512_v40 }
0x5498   :  { %v11700_v63 = vmul.f32 %v11691_v34, %v21150_v56  ;;  %v11701_v39 = vmul.f32 %v11691_v34, %v21154_v2 }
0x549a   :  { %v11702_v57 = vsel %vm10477_vm13, %v11700_v63, 0.0  ;;  %v11705_v31 = vsel %vm10481_vm14, %v11701_v39, 0.0 }
0x549b   :  { %11703 = vadd.xlane.f32.xlu0 %v11702_v57 }
0x549f   :  { %11706 = vadd.xlane.f32.xlu0 %v11705_v31 }
0x5528   :  { %v11704_v53 = vpop.xlane.xlu0 %11703 }
0x5529   :  { %v11708_v21 = vsub.f32 %v11643_v5, %v11704_v53 }
0x552b   :  { %v11710_v13 = vmul.f32 1.442695, %v11708_v21 }
0x552c   :  { %v11707_v48 = vpop.xlane.xlu0 %11706 }
0x552d   :  { %v11709_v47 = vsub.f32 %v11646_v19, %v11707_v48  ;;  %17666 = vpow2.f32 %v11710_v13 }
0x552f   :  { %v11712_v61 = vmul.f32 1.442695, %v11709_v47 }
0x5531   :  { %17668 = vpow2.f32 %v11712_v61 }
0x5537   :  { %v17667_v6 = vpop.eup %17666 }
0x553b   :  { %v17669_v20 = vpop.eup %17668 }
0x553c   :  { %v16641_v0 = vpack.c.bf16 %v17669_v20, %v17667_v6 }
0x553e   :  { %16643 = vmatpush3.bf16.msk.msra.mxu0 %vm18283_vm4, %v16641_v0 }
0x553f   :  { %16644 = vmatprep.subr.bf16.mxu0 %v17935_v62 }
0x5541   :  { %15674 = vmatmul.mubr.msk.f32.vlgmr.msra.gmra.mrb[200].mxu0 %vm818_vm0, %v21141_v24 }
0x5542   :  { %15685 = vmatprep.mubr.msk.f32.mxu0 %vm17936_vm10, %v17937_v49 }
0x5614   :  { %v11783_v3 = vpop.f32.mrb[200].mxu0 }
0x5615   :  { %v11784_v11 = vadd.f32 1e-16, %v11783_v3  ;;  %v15675_v38 = vpop.f32.mrb[201].mxu0 }
0x5617   :  { %15676 = vmatprep.subr.msk.mxu1 %vm21721_vm1, %v11784_v11 }
0x5618   :  { %15677 = vmatpush3.msk.msra.mxu1 %vm21730_vm11, %v11784_v11 }
0x5619   :  { %15679 = vmatmul.mubr.msk.f32.vlgmr.msra.gmra.mrb[182].mxu1 %vm10477_vm13, %v21154_v2  ;;  %16648 = vmatprep.subr.bf16.mxu1 %v17935_v62 }
0x561a   :  { %16650 = vmatpush3.bf16.msra.mxu1 %v21194_v7  ;;  %15696 = vmatprep.mubr.msk.f32.mxu1 %vm17936_vm10, %v17937_v49 }
0x561b   :  { %16651 = vmatprep.subr.bf16.mxu1 %v17935_v62 }
0x561e   :  { %16653 = vmatpush3.bf16.msra.mxu1 %v21204_v30 }
0x561f   :  { %16660 = vmatprep.subr.bf16.mxu1 %v17935_v62 }
0x56ec   :  { %v15680_v51 = vpop.f32.mrb[182].mxu1 }
0x56ed   :  { %17670 = vrcp.f32 %v15680_v51  ;;  %v11856_v15 = vpop.f32.mrb[183].mxu1 }
0x56ee   :  { %17672 = vrcp.f32 %v11856_v15 }
0x56f7   :  { %v17671_v10 = vpop.eup %17670 }
0x56f8   :  { %v17673_v9 = vpop.eup %17672  ;;  %v11868_v22 = vmul.f32 %v17671_v10, %v17669_v20 }
0x56f9   :  { %v11867_v59 = vmul.f32 %v17673_v9, %v17667_v6 }
0x56fa   :  { %11876 = vperm.xlu1 %16761, %v11868_v22  }
0x56fb   :  { %11871 = vperm.xlu0 %16760, %v11867_v59  }
0x5779   :  { %v11877_v7 = vpop.permute.xlu1 %11876 }
0x577a   :  { %v11880_v12 = vmul.f32 %v11877_v7, %v21253_v18  ;;  %v11872_v1 = vpop.permute.xlu0 %11871 }
0x577b   :  { %v11879_v32 = vmul.f32 %v11872_v1, %v21256_v28 }
0x577d   :  { %v16645_v14 = vpack.c.bf16 %v11880_v12, %v11879_v32 }
0x577f   :  { %16647 = vmatpush3.bf16.msk.msra.mxu0 %vm18283_vm4, %v16645_v14 }
0x5780   :  { %16654 = vmatprep.subr.bf16.mxu0 %v17935_v62 }
0x5782   :  { %15686 = vmatmul.mubr.msk.f32.vlgmr.msra.gmra.mrb[202].mxu0 %vm818_vm0, %v21141_v24 }
0x5783   :  { %16656 = vmatpush3.bf16.msra.mxu0 %v21180_v33  ;;  %15707 = vmatprep.mubr.msk.f32.mxu0 %vm17936_vm10, %v17937_v49 }
0x5784   :  { %16657 = vmatprep.subr.bf16.mxu0 %v17935_v62 }
0x5787   :  { %16659 = vmatpush3.bf16.msra.mxu0 %v21186_v52 }
0x578a   :  { %15708 = vmatmul.mubr.msk.f32.vlgmr.msra.gmra.mrb[204].mxu0 %vm603_vm7, %v21323_v55 }
0x578b   :  { %15723 = vmatprep.mubr.msk.f32.mxu0 %vm10477_vm13, %v21150_v56 }
0x5855   :  { %v11950_v30 = vpop.f32.mrb[202].mxu0 }
0x5856   :  { %15697 = vmatmul.mubr.msk.f32.vlgmr.msra.gmra.mrb[184].mxu1 %vm603_vm7, %v11950_v30  ;;  %v15687_v42 = vpop.f32.mrb[203].mxu0 }
0x5857   :  { %16662 = vmatpush3.bf16.msra.mxu1 %v21212_v41  ;;  %15718 = vmatprep.mubr.msk.f32.mxu1 %vm17936_vm10, %v17937_v49 }
0x5858   :  { %16663 = vmatprep.subr.bf16.mxu1 %v17935_v62 }
0x585b   :  { %16665 = vmatpush3.bf16.msra.mxu1 %v21219_v46 }
0x585d   :  { %v12095_v33 = vpop.f32.mrb[204].mxu0 }
0x585e   :  { %15719 = vmatmul.mubr.msk.f32.vlgmr.msra.gmra.mrb[186].mxu1 %vm603_vm7, %v21323_v55  ;;  %v15709_v52 = vpop.f32.mrb[205].mxu0 }
0x585f   :  { %15735 = vmatprep.mubr.msk.f32.mxu1 %vm10477_vm13, %v21150_v56 }
0x5929   :  { %v12023_v58 = vpop.f32.mrb[184].mxu1 }
0x592a   :  { %v12096_v43 = vadd.f32 %v12095_v33, %v12023_v58  ;;  %v15698_v23 = vpop.f32.mrb[185].mxu1 }
0x592b   :  { %v12595_v23 = vld [vmem:[%s21734_s13 + $0x10] sm:$0xff] }
0x5931   :  { %v12165_v54 = vpop.f32.mrb[186].mxu1 }
0x5932   :  { %v12169_v41 = vadd.f32 %v12165_v54, %v12096_v43  ;;  %v15720_v35 = vpop.f32.mrb[187].mxu1  ;;  %v12593_v43 = vld [vmem:[%s21734_s13] sm:$0xff] }
0x5934   :  { %v12170_v45 = vadd.f32 %v21230_v8, %v12169_v41  ;;  %v12596_v41 = vld [vmem:[%s21734_s13 + $0x18] sm:$0xff] }
0x5935   :  { %v16678_v35 = vpack.c.bf16 %v12596_v41, %v12595_v23 }
0x5936   :  { %17674 = vtanh.f32 %v12170_v45  ;;  %v12171_v46 = vsub.f32 0.0, %v12170_v45 }
0x5938   :  { %v12172_v4 = vmul.f32 1.442695, %v12171_v46 }
0x593a   :  { %17676 = vpow2.f32 %v12172_v4 }
0x5940   :  { %v17675_v29 = vpop.eup %17674 }
0x5941   :  { %12179 = vrot.lane.b32.xlu0 %v17675_v29, %s17938_s19 }
0x5944   :  { %v17677_v55 = vpop.eup %17676 }
0x5945   :  { %v12174_v16 = vadd.f32 1.0, %v17677_v55  ;;  %v12589_v55 = vld [vmem:[%s21736_s18] sm:$0xff] }
0x5947   :  { %17678 = vrcp.f32 %v12174_v16  ;;  %v12590_v16 = vld [vmem:[%s21736_s18 + $0x8] sm:$0xff] }
0x5951   :  { %v17679_v5 = vpop.eup %17678 }
0x5952   :  { %v12177_v36 = vmul.f32 %v17679_v5, %v21318_v17 }
0x59b3   :  { %v12180_v19 = vpop.permute.xlu0 %12179 }
0x59b4   :  { %v12182_v26 = vmul.f32 %v17679_v5, %v12180_v19  ;;  %v16681_v19 = vpack.c.bf16 %v12590_v16, %v12589_v55 }
0x59b6   :  { %12184 = vrot.lane.b32.xlu0 %v12182_v26, %s17939_s15  ;;  %v12591_v26 = vld [vmem:[%s21736_s18 + $0x10] sm:$0xff] }
0x5a28   :  { %v12185_v25 = vpop.permute.xlu0 %12184 }
0x5a29   :  { %v12187_v50 = vadd.f32 %v12185_v25, %v12177_v36  ;;  %v12592_v36 = vld [vmem:[%s21736_s18 + $0x18] sm:$0xff] }
0x5a2b   :  { %17680 = vtanh.f32 %v12187_v50  ;;  %v12759_v50 = vld [vmem:[%s21737_s14] sm:$0xff] }
0x5a35   :  { %v17681_v8 = vpop.eup %17680 }
0x5a36   :  { %12190 = vrot.lane.b32.xlu0 %v17681_v8, %s17938_s19  ;;  %v12760_v8 = vld [vmem:[%s21737_s14 + $0x8] sm:$0xff] }
0x5aa8   :  { %v12191_v44 = vpop.permute.xlu0 %12190 }
0x5aa9   :  { %v12193_v34 = vmul.f32 %v17679_v5, %v12191_v44  ;;  %v16687_v44 = vpack.c.bf16 %v12760_v8, %v12759_v50 }
0x5aab   :  { %12195 = vrot.lane.b32.xlu0 %v12193_v34, %s17939_s15  ;;  %v12761_v34 = vld [vmem:[%s21737_s14 + $0x10] sm:$0xff] }
0x5b1d   :  { %v21396_v63 = vpop.permute.xlu0 %12195 }
0x5b1e   :  { %15721 = vmatprep.subr.msk.mxu0 %vm21731_vm15, %v21396_v63 }
0x5b1f   :  { %15722 = vmatpush3.msk.msra.mxu0 %vm21732_vm2, %v21396_v63 }
0x5b20   :  { %15724 = vmatmul.mubr.msk.f32.vlgmr.msra.gmra.mrb[206].mxu0 %vm10477_vm13, %v21154_v2  ;;  %16666 = vmatprep.subr.bf16.mxu0 %v17935_v62 }
0x5b21   :  { %15730 = vmatprep.mubr.msk.f32.mxu0 %vm17936_vm10, %v17937_v49 }
0x5bf3   :  { %v15725_v17 = vpop.f32.mrb[206].mxu0 }
0x5bf4   :  { %v12275_v57 = vmul.f32 %v15725_v17, %v21253_v18  ;;  %v12265_v39 = vpop.f32.mrb[207].mxu0 }
0x5bf5   :  { %v12274_v31 = vmul.f32 %v12265_v39, %v21256_v28  ;;  %v12764_v39 = vld [vmem:[%s21737_s14 + $0x28] sm:$0xff] }
0x5bf6   :  { %v12279_v53 = vsel %vm10404_vm3, %v12275_v57, 0.0  ;;  %vm21733_vm3 = vmmov %vm21721_vm1  ;;  %v12763_v57 = vld [vmem:[%s21737_s14 + $0x20] sm:$0xff] }
0x5bf7   :  { %12280 = vadd.xlane.f32.xlu1 %v12279_v53  ;;  %v12276_v21 = vsel %vm603_vm7, %v12274_v31, 0.0  ;;  %v16693_v31 = vpack.c.bf16 %v12764_v39, %v12763_v57  ;;  %v12766_v53 = vld [vmem:[%s21737_s14 + $0x38] sm:$0xff] }
0x5bf8   :  { %12277 = vadd.xlane.f32.xlu0 %v12276_v21 }
0x5c84   :  { %v12281_v48 = vpop.xlane.xlu1 %12280 }
0x5c85   :  { %v12278_v13 = vpop.xlane.xlu0 %12277 }
0x5c86   :  { %12282 = vxpose.xlu0.b32.start [1/2] (short) (narrow) %v12278_v13, 8 }
0x5c8a   :  { %12283 = vxpose.xlu0.b32.end [2/2] (short) (narrow) %v12281_v48, 8 }
0x5d06   :  { %v12298_v47 = vpop.trf.xlu0 }
0x5d07   :  { %v12317_v61 = vrot.slane %v12298_v47, %v18626_v60 }
0x5d09   :  { %v12318_v6 = vadd.f32 %v12317_v61, %v21144_v37 }
0x5d0b   :  { %v12319_v20 = vsel %vm10454_vm12, %v12318_v6, -inf  ;;  %vm21735_vm12 = vmmov %vm21721_vm1 }
0x5d0c   :  { %12320 = vmax.xlane.f32.xlu1 %v12319_v20 }
0x5d99   :  { %v12321_v0 = vpop.xlane.xlu1 %12320 }
0x5d9a   :  { %v12326_v3 = vrot.slane %v12321_v0, %v18512_v40 }
0x5d9c   :  { %v12335_v11 = vmul.f32 %v12326_v3, %v21150_v56  ;;  %v12336_v38 = vmul.f32 %v12326_v3, %v21154_v2 }
0x5d9e   :  { %v12337_v51 = vsel %vm10477_vm13, %v12335_v11, 0.0  ;;  %v12340_v15 = vsel %vm10481_vm14, %v12336_v38, 0.0 }
0x5d9f   :  { %12338 = vadd.xlane.f32.xlu1 %v12337_v51 }
0x5da3   :  { %12341 = vadd.xlane.f32.xlu1 %v12340_v15 }
0x5e2c   :  { %v12339_v10 = vpop.xlane.xlu1 %12338 }
0x5e2d   :  { %v12343_v60 = vsub.f32 %v12278_v13, %v12339_v10 }
0x5e2f   :  { %v12345_v9 = vmul.f32 1.442695, %v12343_v60  ;;  %v13417_v60 = vld [vmem:[#allocation8] ss:$0 sm:$0xff] }
0x5e30   :  { %v12342_v37 = vpop.xlane.xlu1 %12341 }
0x5e31   :  { %v12344_v22 = vsub.f32 %v12281_v48, %v12342_v37  ;;  %17682 = vpow2.f32 %v12345_v9  ;;  %v13416_v48 = vld [vmem:[#allocation6] ss:$0 sm:$0xff] }
0x5e33   :  { %v12347_v59 = vmul.f32 1.442695, %v12344_v22 }
0x5e35   :  { %17684 = vpow2.f32 %v12347_v59 }
0x5e3b   :  { %v17683_v7 = vpop.eup %17682 }
0x5e3f   :  { %v17685_v40 = vpop.eup %17684 }
0x5e40   :  { %v16667_v12 = vpack.c.bf16 %v17685_v40, %v17683_v7 }
0x5e42   :  { %16669 = vmatpush3.bf16.msk.msra.mxu0 %vm18283_vm4, %v16667_v12 }
0x5e43   :  { %16670 = vmatprep.subr.bf16.mxu0 %v17935_v62 }
0x5e45   :  { %15731 = vmatmul.mubr.msk.f32.vlgmr.msra.gmra.mrb[208].mxu0 %vm818_vm0, %v21141_v24 }
0x5e46   :  { %15742 = vmatprep.mubr.msk.f32.mxu0 %vm17936_vm10, %v17937_v49 }
0x5f18   :  { %v12418_v56 = vpop.f32.mrb[208].mxu0 }
0x5f19   :  { %v12419_v1 = vadd.f32 1e-16, %v12418_v56  ;;  %v15732_v32 = vpop.f32.mrb[209].mxu0 }
0x5f1b   :  { %15733 = vmatprep.subr.msk.mxu1 %vm21733_vm3, %v12419_v1 }
0x5f1c   :  { %15734 = vmatpush3.msk.msra.mxu1 %vm21735_vm12, %v12419_v1 }
0x5f1d   :  { %15736 = vmatmul.mubr.msk.f32.vlgmr.msra.gmra.mrb[188].mxu1 %vm10477_vm13, %v21154_v2  ;;  %16674 = vmatprep.subr.bf16.mxu1 %v17935_v62  ;;  %v12594_v2 = vld [vmem:[%s21734_s13 + $0x8] sm:$0xff] }
0x5f1e   :  { %15753 = vmatprep.mubr.msk.f32.mxu1 %vm17936_vm10, %v17937_v49  ;;  %v16675_v54 = vpack.c.bf16 %v12594_v2, %v12593_v43 }
0x5f20   :  { %16676 = vmatpush3.bf16.msra.mxu1 %v16675_v54 }
0x5f21   :  { %16677 = vmatprep.subr.bf16.mxu1 %v17935_v62 }
0x5f24   :  { %16679 = vmatpush3.bf16.msra.mxu1 %v16678_v35 }
0x5f25   :  { %16686 = vmatprep.subr.bf16.mxu1 %v17935_v62 }
0x5ff0   :  { %v15737_v14 = vpop.f32.mrb[188].mxu1 }
0x5ff1   :  { %v12491_v30 = vpop.f32.mrb[189].mxu1 }
0x5ff2   :  { %17686 = vrcp.f32 %v12491_v30  ;;  %v13419_v30 = vld [vmem:[#allocation9] ss:$0 sm:$0xff] }
0x5ff3   :  { %17688 = vrcp.f32 %v15737_v14 }
0x5ffc   :  { %v17687_v42 = vpop.eup %17686 }
0x5ffd   :  { %v12502_v33 = vmul.f32 %v17687_v42, %v17683_v7  ;;  %v17689_v52 = vpop.eup %17688 }
0x5ffe   :  { %v12503_v58 = vmul.f32 %v17689_v52, %v17685_v40 }
0x5fff   :  { %12506 = vperm.xlu1 %16761, %v12502_v33  }
0x6003   :  { %12511 = vperm.xlu1 %16761, %v12503_v58   ;;  %v13420_v58 = vld [vmem:[#allocation3] ss:$0 sm:$0xff] }
0x607e   :  { %v12507_v45 = vpop.permute.xlu1 %12506 }
0x607f   :  { %v12514_v46 = vmul.f32 %v12507_v45, %v21256_v28  ;;  %v16684_v28 = vpack.c.bf16 %v12592_v36, %v12591_v26 }
0x6082   :  { %v12512_v29 = vpop.permute.xlu1 %12511 }
0x6083   :  { %v12515_v4 = vmul.f32 %v12512_v29, %v21253_v18 }
0x6085   :  { %v16671_v5 = vpack.c.bf16 %v12515_v4, %v12514_v46 }
0x6087   :  { %16673 = vmatpush3.bf16.msk.msra.mxu0 %vm18283_vm4, %v16671_v5  ;;  %vm12877_vm4 = vcmask 1024  }
0x6088   :  { %16680 = vmatprep.subr.bf16.mxu0 %v17935_v62 }
0x608a   :  { %15743 = vmatmul.mubr.msk.f32.vlgmr.msra.gmra.mrb[210].mxu0 %vm818_vm0, %v21141_v24  ;;  %vm12865_vm0 = vcmask 254976  }
0x608b   :  { %16682 = vmatpush3.bf16.msra.mxu0 %v16681_v19  ;;  %15764 = vmatprep.mubr.msk.f32.mxu0 %vm17936_vm10, %v17937_v49 }
0x608c   :  { %16683 = vmatprep.subr.bf16.mxu0 %v17935_v62 }
0x608f   :  { %16685 = vmatpush3.bf16.msra.mxu0 %v16684_v28 }
0x6092   :  { %15765 = vmatmul.mubr.msk.f32.vlgmr.msra.gmra.mrb[212].mxu0 %vm603_vm7, %v21396_v63  ;;  %v12762_v63 = vld [vmem:[%s21737_s14 + $0x18] sm:$0xff] }
0x6093   :  { %v16690_v17 = vpack.c.bf16 %v12762_v63, %v12761_v34 }
0x615d   :  { %v12585_v27 = vpop.f32.mrb[210].mxu0 }
0x615e   :  { %15754 = vmatmul.mubr.msk.f32.vlgmr.msra.gmra.mrb[190].mxu1 %vm603_vm7, %v12585_v27  ;;  %v15744_v18 = vpop.f32.mrb[211].mxu0  ;;  %vm12774_vm7 = vcmask 523264  }
0x615f   :  { %15783 = vmatprep.mubr.msk.f32.mxu1 %vm17936_vm10, %v17937_v49  ;;  %16688 = vmatpush3.bf16.msra.mxu1 %v16687_v44  ;;  %v12765_v49 = vld [vmem:[%s21737_s14 + $0x30] sm:$0xff] }
0x6160   :  { %16689 = vmatprep.subr.bf16.mxu1 %v17935_v62  ;;  %v16696_v21 = vpack.c.bf16 %v12766_v53, %v12765_v49 }
0x6163   :  { %16691 = vmatpush3.bf16.msra.mxu1 %v16690_v17 }
0x6164   :  { %16692 = vmatprep.subr.bf16.mxu1 %v17935_v62 }
0x6165   :  { %v12738_v24 = vpop.f32.mrb[212].mxu0 }
0x6166   :  { %v15766_v25 = vpop.f32.mrb[213].mxu0 }
0x6167   :  { %16694 = vmatpush3.bf16.msra.mxu1 %v16693_v31 }
0x6168   :  { %16695 = vmatprep.subr.bf16.mxu1 %v17935_v62 }
0x616b   :  { %16697 = vmatpush3.bf16.msra.mxu1 %v16696_v21 }
0x6231   :  { %v12666_v13 = vpop.f32.mrb[190].mxu1 }
0x6232   :  { %v12739_v47 = vadd.f32 %v12738_v24, %v12666_v13  ;;  %v15755_v61 = vpop.f32.mrb[191].mxu1 }
0x6234   :  { %v12749_v6 = vadd.f32 %v13416_v48, %v12739_v47 }
0x6236   :  { %v12751_v20 = vand.u32 2147483647, %v12749_v6  ;;  %v12750_v15 = vmax.f32 %v12749_v6, 0.0 }
0x6238   :  { %v12752_v0 = vsub.f32 0.0, %v12751_v20 }
0x623a   :  { %v12753_v3 = vmul.f32 1.442695, %v12752_v0 }
0x623c   :  { %17690 = vpow2.f32 %v12753_v3 }
0x6246   :  { %v17691_v11 = vpop.eup %17690 }
0x6247   :  { %v12755_v38 = vadd.f32 1.0, %v17691_v11 }
0x6249   :  { %17692 = vlog2.f32 %v12755_v38 }
0x6253   :  { %v17693_v51 = vpop.eup %17692 }
0x6254   :  { %v12757_v10 = vmul.f32 0.6931472, %v17693_v51 }
0x6256   :  { %v12758_v62 = vadd.f32 %v12757_v10, %v12750_v15 }
0x6258   :  { %15784 = vmatmul.mubr.msk.f32.vlgmr.msra.gmra.mrb[192].mxu1 %vm12774_vm7, %v12758_v62 }
0x632b   :  { %v12844_v9 = vpop.f32.mrb[192].mxu1 }
0x632c   :  { %v12845_v37 = vadd.f32 %v13417_v60, %v12844_v9  ;;  %v15785_v22 = vpop.f32.mrb[193].mxu1 }
0x632e   :  { %v12849_v59 = vand.u32 2147483647, %v12845_v37  ;;  %v12848_v32 = vmax.f32 %v12845_v37, 0.0 }
0x6330   :  { %v12850_v7 = vsub.f32 0.0, %v12849_v59 }
0x6332   :  { %v12851_v40 = vmul.f32 1.442695, %v12850_v7 }
0x6334   :  { %17694 = vpow2.f32 %v12851_v40 }
0x633e   :  { %v17695_v12 = vpop.eup %17694 }
0x633f   :  { %v12853_v56 = vadd.f32 1.0, %v17695_v12 }
0x6341   :  { %17696 = vlog2.f32 %v12853_v56 }
0x634b   :  { %v17697_v1 = vpop.eup %17696 }
0x634c   :  { %v12855_v14 = vmul.f32 0.6931472, %v17697_v1 }
0x634e   :  { %v12856_v42 = vadd.f32 %v12855_v14, %v12848_v32 }
0x6350   :  { %v12864_v33 = vmul.f32 %v13419_v30, %v12856_v42 }
0x6352   :  { %v12866_v52 = vsel %vm12865_vm0, %v12864_v33, 0.0 }
0x6353   :  { %12867 = vadd.xlane.f32.xlu1 %v12866_v52 }
0x63e0   :  { %v12868_v43 = vpop.xlane.xlu1 %12867 }
0x63e1   :  { %v12876_v2 = vadd.f32 %v13420_v58, %v12868_v43 }
0x63e3   :  { %12878 = vst.msk [vmem:[%s18172_s4] sm:$0x3] %vm12877_vm4, %v12876_v2 }
0x63e4   :  { %12883 = vsyncpa [#allocation5], 1 }
0x63e5   :  { %12884 = vsyncpa [#allocation7], 1 }
0x63e6   :  { %12885 = vsyncpa [#allocation10], 1 }

</bundles_post_ra>
